<compile_context>
chip_gen: v5e
topology: v5e:2x2
jax: 0.10.0
libtpu: 0.0.40
codegen_flags: <defaults>
</compile_context>

<pallas_src>
import math

import jax
import jax.numpy as jnp
from jax import lax
from jax.experimental import pallas as pl
from jax.experimental.pallas import tpu as pltpu


# ----------------------------------------------------------------------------
# In-kernel exact GELU (erf form, matching nn.GELU()) built from ops with
# guaranteed Mosaic lowerings (exp / abs / select / arithmetic).
# Abramowitz & Stegun 7.1.26, |error| <= 1.5e-7.
# ----------------------------------------------------------------------------
def _erf(x):
    p = 0.3275911
    a1, a2, a3, a4, a5 = (0.254829592, -0.284496736, 1.421413741,
                          -1.453152027, 1.061405429)
    ax = jnp.abs(x)
    t = 1.0 / (1.0 + p * ax)
    poly = ((((a5 * t + a4) * t + a3) * t + a2) * t + a1) * t
    y = 1.0 - poly * jnp.exp(-ax * ax)
    return jnp.where(x < 0, -y, y)


def _gelu_exact(x):
    return 0.5 * x * (1.0 + _erf(x * 0.7071067811865475))


# ----------------------------------------------------------------------------
# Pallas kernel factory: one block of Bb batch elements per grid step.
# use_xlu_roll selects pltpu.roll (XLU) vs slice+concat for the sublane shift.
# ----------------------------------------------------------------------------
def _make_s2attention_kernel(use_xlu_roll):
    def kernel(x_ref, w1_ref, b1_ref, wa1_ref, wa2_ref, w2_ref, b2_ref, o_ref):
        Bb, H, W, C = x_ref.shape
        M = Bb * H * W
        q = C // 4
        f32, bf16 = jnp.float32, jnp.bfloat16

        # ---- masks: built once per grid step, reused by both shifts -------
        c_idx = lax.broadcasted_iota(jnp.int32, (1, 1, W, C), 3)
        m_q0 = c_idx < q
        m_q1 = c_idx < 2 * q
        m_q2 = c_idx < 3 * q
        if use_xlu_roll:
            w_idx = lax.broadcasted_iota(jnp.int32, (1, 1, W, C), 2)
            w_first = w_idx == 0
            w_last = w_idx == (W - 1)

        # ---- spatial shifts (functional: sources are ORIGINAL values,
        #      boundary row/col of each channel group keeps its value) ------
        def shift_h(t, direction):
            # H is a major (non-tiled) axis: plain row-offset slices.
            if direction > 0:                  # dest[:,1:] = src[:,:H-1]
                return jnp.concatenate([t[:, :1], t[:, :H - 1]], axis=1)
            return jnp.concatenate([t[:, 1:], t[:, H - 1:]], axis=1)

        if use_xlu_roll:
            def shift_w(t, direction):
                # W is the sublane axis: roll the flat (M, C) view on the XLU
                # and fix the boundary rows with one masked select.  Rows that
                # wrap across image / H boundaries are exactly the masked
                # boundary rows, so the flat roll is safe.
                tf = t.reshape(M, C)
                if direction > 0:              # dest[:,:,1:] = src[:,:,:W-1]
                    r = pltpu.roll(tf, shift=1, axis=0).reshape(Bb, H, W, C)
                    return jnp.where(w_first, t, r)
                r = pltpu.roll(tf, shift=M - 1, axis=0).reshape(Bb, H, W, C)
                return jnp.where(w_last, t, r)
        else:
            def shift_w(t, direction):
                if direction > 0:
                    return jnp.concatenate([t[:, :, :1], t[:, :, :W - 1]],
                                           axis=2)
                return jnp.concatenate([t[:, :, 1:], t[:, :, W - 1:]], axis=2)

        def blend(v0, v1, v2, v3):
            # quarter-channel group select; masks hoisted above, pure VPU.
            return jnp.where(m_q0, v0,
                   jnp.where(m_q1, v1,
                   jnp.where(m_q2, v2, v3)))

        def sshift1(t):
            return blend(shift_h(t, +1), shift_h(t, -1),
                         shift_w(t, +1), shift_w(t, -1))

        def sshift2(t):
            return blend(shift_w(t, +1), shift_w(t, -1),
                         shift_h(t, +1), shift_h(t, -1))

        # ---- mlp1: ONE fused (M,C)x(C,3C) matmul, bf16 operands, f32 acc --
        xf = x_ref[...].reshape(M, C).astype(bf16)
        y = jnp.dot(xf, w1_ref[...], preferred_element_type=f32)
        y = (y + b1_ref[...]).reshape(Bb, H, W, 3 * C)

        x1 = sshift1(y[..., :C])               # 128-aligned lane slices: free
        x2 = sshift2(y[..., C:2 * C])
        x3 = y[..., 2 * C:]

        # ---- SplitAttention: global spatial sum per batch element ----------
        a = (jnp.sum(x1, axis=(1, 2)) + jnp.sum(x2, axis=(1, 2))
             + jnp.sum(x3, axis=(1, 2)))                       # (Bb, C) f32

        h = jnp.dot(a.astype(bf16), wa1_ref[...], preferred_element_type=f32)
        h = _gelu_exact(h)
        # ONE fused (Bb,C)x(C,3C) matmul, sliced at 128-lane boundaries.
        hat = jnp.dot(h.astype(bf16), wa2_ref[...], preferred_element_type=f32)
        h0, h1, h2 = hat[:, :C], hat[:, C:2 * C], hat[:, 2 * C:]

        # softmax over the k=3 branches (per batch element / channel)
        m = jnp.maximum(jnp.maximum(h0, h1), h2)
        e0 = jnp.exp(h0 - m)
        e1 = jnp.exp(h1 - m)
        e2 = jnp.exp(h2 - m)
        inv = pl.reciprocal(e0 + e1 + e2, approx=True)
        a0 = (e0 * inv).reshape(Bb, 1, 1, C)
        a1 = (e1 * inv).reshape(Bb, 1, 1, C)
        a2 = (e2 * inv).reshape(Bb, 1, 1, C)

        out = a0 * x1 + a1 * x2 + a2 * x3                      # (Bb, H, W, C)

        # ---- mlp2 (C -> C) --------------------------------------------------
        z = jnp.dot(out.reshape(M, C).astype(bf16), w2_ref[...],
                    preferred_element_type=f32) + b2_ref[...]
        o_ref[...] = z.reshape(Bb, H, W, C).astype(o_ref.dtype)

    return kernel


# ----------------------------------------------------------------------------
# Wrapper
# ----------------------------------------------------------------------------
def _num_tensorcores():
    """Best-effort TensorCores-per-chip count (v7x: 2, v5e/v6e: 1)."""
    try:
        info = pltpu.get_tpu_info()
    except Exception:
        return 1
    for attr in ("num_cores", "tensorcore_count", "num_tensorcores",
                 "cores_per_chip", "core_count"):
        v = getattr(info, attr, None)
        if isinstance(v, int) and 1 <= v <= 16:
            return v
    return 1


def _pick_batch_block(B, H, W, C, n_cores, vmem_budget_bytes=16 * 1024 * 1024):
    """Largest batch block bb such that (a) ~10 live (bb,H,W,C) f32 tensors fit
    the VMEM budget, (b) on multi-TC chips every core gets >= 2 grid steps
    (single-TC v5e/v6e take one big step: the grid is a serial loop there),
    and (c) bb divides B so no padded blocks are needed."""
    per_image = H * W * C * 4            # one (1, H, W, C) f32 tensor
    live = 10                            # x, y slices, shift temps, out, ...
    bb_max = max(1, vmem_budget_bytes // (per_image * live))
    if n_cores >= 2:
        bb_max = min(bb_max, max(1, B // (2 * n_cores)))
    bb = 1
    for d in range(1, min(B, bb_max) + 1):
        if B % d == 0:
            bb = d
    return bb


def s2attention(x, params, use_xlu_roll=None):
    """S2Attention forward (mlp1 -> shifts -> SplitAttention -> mlp2), BHWC."""
    w1t, b1, wa1t, wa2t, w2t, b2 = params
    B, H, W, C = x.shape
    assert C % 128 == 0, "lane-dense layout requires C % 128 == 0"
    assert W % 8 == 0, "free (B,H,W,C)<->(B*H*W,C) relayout requires W % 8 == 0"
    assert w1t.shape == (C, 3 * C) and wa1t.shape == (C, C)
    assert wa2t.shape == (C, 3 * C) and w2t.shape == (C, C)

    # bf16 weights (halves weight DMA bytes, runs the MXU at its bf16 rate);
    # biases stay f32, matmuls accumulate in f32 via preferred_element_type.
    bf16 = jnp.bfloat16
    weights = (w1t.astype(bf16), b1.astype(jnp.float32),
               wa1t.astype(bf16), wa2t.astype(bf16),
               w2t.astype(bf16), b2.astype(jnp.float32))

    bb = _pick_batch_block(B, H, W, C, _num_tensorcores())
    grid = (B // bb,)

    def const_spec(a):
        zeros = (0,) * a.ndim
        return pl.BlockSpec(a.shape, lambda i, _z=zeros: _z)

    def build(roll_flag):
        # NOTE: input_output_aliases={0:0} and pl.Buffered(1) on the constant
        # weights would shave a little HBM/VMEM but are intentionally left out
        # (keeps x alive for verification; conservative pipeline config).
        return pl.pallas_call(
            _make_s2attention_kernel(roll_flag),
            out_shape=jax.ShapeDtypeStruct((B, H, W, C), x.dtype),
            grid_spec=pltpu.PrefetchScalarGridSpec(
                num_scalar_prefetch=0,
                grid=grid,
                in_specs=[pl.BlockSpec((bb, H, W, C), lambda i: (i, 0, 0, 0))]
                         + [const_spec(w) for w in weights],
                out_specs=pl.BlockSpec((bb, H, W, C), lambda i: (i, 0, 0, 0)),
            ),
            compiler_params=pltpu.CompilerParams(
                # batch blocks are independent -> megacore-shardable
                dimension_semantics=("parallel",),
                # well above the few-MiB per-step working set, and well below
                # v7x's 64 MiB physical VMEM (don't request the whole core).
                vmem_limit_bytes=32 * 1024 * 1024,
            ),
        )

    if use_xlu_roll is None:
        try:
            return build(True)(x, *weights)
        except Exception:
            # pltpu.roll variant failed to lower on this backend; fall back to
            # sublane slice+concat shifts (identical numerics).
            return build(False)(x, *weights)
    return build(use_xlu_roll)(x, *weights)


# ----------------------------------------------------------------------------
# Pure-JAX reference (mirrors the PyTorch module exactly) for verification.
# ----------------------------------------------------------------------------
def _shift_ref(t, axis, direction):
    n = t.shape[axis]
    if direction > 0:                      # dest[1:] = src[:-1]
        head = lax.slice_in_dim(t, 0, 1, axis=axis)
        body = lax.slice_in_dim(t, 0, n - 1, axis=axis)
        return jnp.concatenate([head, body], axis=axis)
    body = lax.slice_in_dim(t, 1, n, axis=axis)   # dest[:-1] = src[1:]
    tail = lax.slice_in_dim(t, n - 1, n, axis=axis)
    return jnp.concatenate([body, tail], axis=axis)


def _blend_ref(t, variants):
    c = t.shape[-1]
    q = c // 4
    c_idx = lax.broadcasted_iota(jnp.int32, t.shape, t.ndim - 1)
    v0, v1, v2, v3 = variants
    return jnp.where(c_idx < q, v0,
           jnp.where(c_idx < 2 * q, v1,
           jnp.where(c_idx < 3 * q, v2, v3)))


def spatial_shift1_ref(t):
    a1, a2 = t.ndim - 3, t.ndim - 2
    return _blend_ref(t, (_shift_ref(t, a1, +1), _shift_ref(t, a1, -1),
                          _shift_ref(t, a2, +1), _shift_ref(t, a2, -1)))


def spatial_shift2_ref(t):
    a1, a2 = t.ndim - 3, t.ndim - 2
    return _blend_ref(t, (_shift_ref(t, a2, +1), _shift_ref(t, a2, -1),
                          _shift_ref(t, a1, +1), _shift_ref(t, a1, -1)))


def ref_forward(x, params):
    w1t, b1, wa1t, wa2t, w2t, b2 = params
    B, H, W, C = x.shape
    y = x @ w1t + b1.reshape(-1)
    x1 = spatial_shift1_ref(y[..., 0:C])
    x2 = spatial_shift2_ref(y[..., C:2 * C])
    x3 = y[..., 2 * C:]
    a = jnp.sum(x1 + x2 + x3, axis=(1, 2))                     # (B, C)
    hat = jax.nn.gelu(a @ wa1t, approximate=False) @ wa2t      # (B, 3C)
    hat = hat.reshape(B, 3, C)
    bar = jax.nn.softmax(hat, axis=1)
    out = (bar[:, 0][:, None, None, :] * x1 +
           bar[:, 1][:, None, None, :] * x2 +
           bar[:, 2][:, None, None, :] * x3)
    return out @ w2t + b2.reshape(-1)


if __name__ == "__main__":
    key = jax.random.PRNGKey(0)
    # Shapes consistent with GPT: S2Block channels = 2 * d_model (d_model=64),
    # spatial = (vert_anchors, horz_anchors) = (8, 8).  C=128 keeps the lane
    # (last) dim dense; W=8 keeps the in-kernel flatten a free relayout.
    B, H, W, C = 8, 8, 8, 128
    ks = jax.random.split(key, 7)

    x = jax.random.normal(ks[0], (B, H, W, C), jnp.float32)

    # Deterministic synthetic parameters (pre-transposed to (in, out)):
    #   S2Attention.mlp1:      Linear(C, 3C)  with bias
    #   SplitAttention.mlp1:   Linear(C, C)   no bias
    #   SplitAttention.mlp2:   Linear(C, 3C)  no bias
    #   S2Attention.mlp2:      Linear(C, C)   with bias
    w1t = jax.random.normal(ks[1], (C, 3 * C), jnp.float32) / math.sqrt(C)
    b1 = jax.random.normal(ks[2], (1, 3 * C), jnp.float32) * 0.02
    wa1t = jax.random.normal(ks[3], (C, C), jnp.float32) * 0.02
    wa2t = jax.random.normal(ks[4], (C, 3 * C), jnp.float32) * 0.02
    w2t = jax.random.normal(ks[5], (C, C), jnp.float32) * 0.02
    b2 = jax.random.normal(ks[6], (1, C), jnp.float32) * 0.02
    params = (w1t, b1, wa1t, wa2t, w2t, b2)

    out = jax.block_until_ready(s2attention(x, params))

    ref = ref_forward(x, params)
    err = float(jnp.max(jnp.abs(out - ref)))
    # bf16 matmul operands (f32 accumulation) -> looser tolerance vs f32 ref.
    assert jnp.allclose(out, ref, atol=3e-2, rtol=3e-2), f"max abs err {err}"
    print("KERNEL_OK")
</pallas_src>

<mosaic_0001>
module attributes {stable_mosaic.version = 11 : i64} {
  func.func @kernel(%arg0: i32, %arg1: memref<8x8x8x128xf32, #tpu.memory_space<vmem>>, %arg2: memref<128x384xbf16, #tpu.memory_space<vmem>>, %arg3: memref<1x384xf32, #tpu.memory_space<vmem>>, %arg4: memref<128x128xbf16, #tpu.memory_space<vmem>>, %arg5: memref<128x384xbf16, #tpu.memory_space<vmem>>, %arg6: memref<128x128xbf16, #tpu.memory_space<vmem>>, %arg7: memref<1x128xf32, #tpu.memory_space<vmem>>, %arg8: memref<8x8x8x128xf32, #tpu.memory_space<vmem>>) attributes {dimension_semantics = [#tpu.dimension_semantics<parallel>], iteration_bounds = array<i64: 1>, scalar_prefetch = 0 : i64, scratch_operands = 0 : i64, tpu.core_type = #tpu.core_type<tc>, window_params = [{transform_indices = @transform_0, window_bounds = array<i64: 8, 8, 8, 128>}, {pipeline_mode = #tpu.pipeline_mode<synchronous>, transform_indices = @transform_1, window_bounds = array<i64: 128, 384>}, {pipeline_mode = #tpu.pipeline_mode<synchronous>, transform_indices = @transform_2, window_bounds = array<i64: 1, 384>}, {pipeline_mode = #tpu.pipeline_mode<synchronous>, transform_indices = @transform_3, window_bounds = array<i64: 128, 128>}, {pipeline_mode = #tpu.pipeline_mode<synchronous>, transform_indices = @transform_4, window_bounds = array<i64: 128, 384>}, {pipeline_mode = #tpu.pipeline_mode<synchronous>, transform_indices = @transform_5, window_bounds = array<i64: 128, 128>}, {pipeline_mode = #tpu.pipeline_mode<synchronous>, transform_indices = @transform_6, window_bounds = array<i64: 1, 128>}, {transform_indices = @transform_7, window_bounds = array<i64: 8, 8, 8, 128>}]} {
    %0 = tpu.iota {dimensions = array<i32: 3>} : vector<1x1x8x128xi32>
    %c32_i32 = arith.constant 32 : i32
    %1 = vector.broadcast %c32_i32 : i32 to vector<1x1x8x128xi32>
    %2 = arith.cmpi slt, %0, %1 : vector<1x1x8x128xi32>
    %c64_i32 = arith.constant 64 : i32
    %3 = vector.broadcast %c64_i32 : i32 to vector<1x1x8x128xi32>
    %4 = arith.cmpi slt, %0, %3 : vector<1x1x8x128xi32>
    %c96_i32 = arith.constant 96 : i32
    %5 = vector.broadcast %c96_i32 : i32 to vector<1x1x8x128xi32>
    %6 = arith.cmpi slt, %0, %5 : vector<1x1x8x128xi32>
    %7 = tpu.iota {dimensions = array<i32: 2>} : vector<1x1x8x128xi32>
    %c0_i32 = arith.constant 0 : i32
    %8 = vector.broadcast %c0_i32 : i32 to vector<1x1x8x128xi32>
    %9 = arith.cmpi eq, %7, %8 : vector<1x1x8x128xi32>
    %c7_i32 = arith.constant 7 : i32
    %10 = vector.broadcast %c7_i32 : i32 to vector<1x1x8x128xi32>
    %11 = arith.cmpi eq, %7, %10 : vector<1x1x8x128xi32>
    %c0 = arith.constant 0 : index
    %c0_0 = arith.constant 0 : index
    %c0_1 = arith.constant 0 : index
    %c0_2 = arith.constant 0 : index
    %12 = vector.load %arg1[%c0, %c0_0, %c0_1, %c0_2] : memref<8x8x8x128xf32, #tpu.memory_space<vmem>>, vector<8x8x8x128xf32>
    %13 = vector.shape_cast %12 : vector<8x8x8x128xf32> to vector<512x128xf32>
    %14 = arith.truncf %13 : vector<512x128xf32> to vector<512x128xbf16>
    %c0_3 = arith.constant 0 : index
    %c0_4 = arith.constant 0 : index
    %15 = vector.load %arg2[%c0_3, %c0_4] : memref<128x384xbf16, #tpu.memory_space<vmem>>, vector<128x384xbf16>
    %cst = arith.constant dense<0.000000e+00> : vector<512x384xf32>
    %16 = tpu.matmul %14, %15, %cst {dimension_numbers = #tpu.dot_dimension_numbers<[1], [0], [0], [1], [0, 0, 1, 1], [], []>} : vector<512x128xbf16>, vector<128x384xbf16>, vector<512x384xf32> -> vector<512x384xf32>
    %c0_5 = arith.constant 0 : index
    %c0_6 = arith.constant 0 : index
    %17 = vector.load %arg3[%c0_5, %c0_6] : memref<1x384xf32, #tpu.memory_space<vmem>>, vector<1x384xf32>
    %18 = vector.broadcast %17 : vector<1x384xf32> to vector<512x384xf32>
    %19 = arith.addf %16, %18 : vector<512x384xf32>
    %20 = vector.shape_cast %19 : vector<512x384xf32> to vector<8x8x8x384xf32>
    %21 = vector.extract_strided_slice %20 {offsets = [0, 0, 0, 0], sizes = [8, 8, 8, 128], strides = [1, 1, 1, 1]} : vector<8x8x8x384xf32> to vector<8x8x8x128xf32>
    %22 = vector.extract_strided_slice %21 {offsets = [0, 0, 0, 0], sizes = [8, 1, 8, 128], strides = [1, 1, 1, 1]} : vector<8x8x8x128xf32> to vector<8x1x8x128xf32>
    %23 = vector.extract_strided_slice %21 {offsets = [0, 0, 0, 0], sizes = [8, 7, 8, 128], strides = [1, 1, 1, 1]} : vector<8x8x8x128xf32> to vector<8x7x8x128xf32>
    %24 = tpu.concatenate %22, %23 in 1 : vector<8x1x8x128xf32>, vector<8x7x8x128xf32> -> vector<8x8x8x128xf32>
    %25 = vector.extract_strided_slice %21 {offsets = [0, 1, 0, 0], sizes = [8, 7, 8, 128], strides = [1, 1, 1, 1]} : vector<8x8x8x128xf32> to vector<8x7x8x128xf32>
    %26 = vector.extract_strided_slice %21 {offsets = [0, 7, 0, 0], sizes = [8, 1, 8, 128], strides = [1, 1, 1, 1]} : vector<8x8x8x128xf32> to vector<8x1x8x128xf32>
    %27 = tpu.concatenate %25, %26 in 1 : vector<8x7x8x128xf32>, vector<8x1x8x128xf32> -> vector<8x8x8x128xf32>
    %28 = vector.shape_cast %21 : vector<8x8x8x128xf32> to vector<512x128xf32>
    %c1_i32 = arith.constant 1 : i32
    %29 = tpu.dynamic_rotate %28 by %c1_i32 dim 0 : vector<512x128xf32>, i32 -> vector<512x128xf32>
    %30 = vector.shape_cast %29 : vector<512x128xf32> to vector<8x8x8x128xf32>
    %31 = vector.shape_cast %9 : vector<1x1x8x128xi1> to vector<1x1x8x128xi1>
    %32 = vector.broadcast %31 : vector<1x1x8x128xi1> to vector<8x8x8x128xi1>
    %33 = arith.select %32, %21, %30 : vector<8x8x8x128xi1>, vector<8x8x8x128xf32>
    %34 = vector.shape_cast %21 : vector<8x8x8x128xf32> to vector<512x128xf32>
    %c511_i32 = arith.constant 511 : i32
    %35 = tpu.dynamic_rotate %34 by %c511_i32 dim 0 : vector<512x128xf32>, i32 -> vector<512x128xf32>
    %36 = vector.shape_cast %35 : vector<512x128xf32> to vector<8x8x8x128xf32>
    %37 = vector.shape_cast %11 : vector<1x1x8x128xi1> to vector<1x1x8x128xi1>
    %38 = vector.broadcast %37 : vector<1x1x8x128xi1> to vector<8x8x8x128xi1>
    %39 = arith.select %38, %21, %36 : vector<8x8x8x128xi1>, vector<8x8x8x128xf32>
    %40 = vector.shape_cast %6 : vector<1x1x8x128xi1> to vector<1x1x8x128xi1>
    %41 = vector.broadcast %40 : vector<1x1x8x128xi1> to vector<8x8x8x128xi1>
    %42 = arith.select %41, %33, %39 : vector<8x8x8x128xi1>, vector<8x8x8x128xf32>
    %43 = vector.shape_cast %4 : vector<1x1x8x128xi1> to vector<1x1x8x128xi1>
    %44 = vector.broadcast %43 : vector<1x1x8x128xi1> to vector<8x8x8x128xi1>
    %45 = arith.select %44, %27, %42 : vector<8x8x8x128xi1>, vector<8x8x8x128xf32>
    %46 = vector.shape_cast %2 : vector<1x1x8x128xi1> to vector<1x1x8x128xi1>
    %47 = vector.broadcast %46 : vector<1x1x8x128xi1> to vector<8x8x8x128xi1>
    %48 = arith.select %47, %24, %45 : vector<8x8x8x128xi1>, vector<8x8x8x128xf32>
    %49 = vector.extract_strided_slice %20 {offsets = [0, 0, 0, 128], sizes = [8, 8, 8, 128], strides = [1, 1, 1, 1]} : vector<8x8x8x384xf32> to vector<8x8x8x128xf32>
    %50 = vector.shape_cast %49 : vector<8x8x8x128xf32> to vector<512x128xf32>
    %c1_i32_7 = arith.constant 1 : i32
    %51 = tpu.dynamic_rotate %50 by %c1_i32_7 dim 0 : vector<512x128xf32>, i32 -> vector<512x128xf32>
    %52 = vector.shape_cast %51 : vector<512x128xf32> to vector<8x8x8x128xf32>
    %53 = vector.shape_cast %9 : vector<1x1x8x128xi1> to vector<1x1x8x128xi1>
    %54 = vector.broadcast %53 : vector<1x1x8x128xi1> to vector<8x8x8x128xi1>
    %55 = arith.select %54, %49, %52 : vector<8x8x8x128xi1>, vector<8x8x8x128xf32>
    %56 = vector.shape_cast %49 : vector<8x8x8x128xf32> to vector<512x128xf32>
    %c511_i32_8 = arith.constant 511 : i32
    %57 = tpu.dynamic_rotate %56 by %c511_i32_8 dim 0 : vector<512x128xf32>, i32 -> vector<512x128xf32>
    %58 = vector.shape_cast %57 : vector<512x128xf32> to vector<8x8x8x128xf32>
    %59 = vector.shape_cast %11 : vector<1x1x8x128xi1> to vector<1x1x8x128xi1>
    %60 = vector.broadcast %59 : vector<1x1x8x128xi1> to vector<8x8x8x128xi1>
    %61 = arith.select %60, %49, %58 : vector<8x8x8x128xi1>, vector<8x8x8x128xf32>
    %62 = vector.extract_strided_slice %49 {offsets = [0, 0, 0, 0], sizes = [8, 1, 8, 128], strides = [1, 1, 1, 1]} : vector<8x8x8x128xf32> to vector<8x1x8x128xf32>
    %63 = vector.extract_strided_slice %49 {offsets = [0, 0, 0, 0], sizes = [8, 7, 8, 128], strides = [1, 1, 1, 1]} : vector<8x8x8x128xf32> to vector<8x7x8x128xf32>
    %64 = tpu.concatenate %62, %63 in 1 : vector<8x1x8x128xf32>, vector<8x7x8x128xf32> -> vector<8x8x8x128xf32>
    %65 = vector.extract_strided_slice %49 {offsets = [0, 1, 0, 0], sizes = [8, 7, 8, 128], strides = [1, 1, 1, 1]} : vector<8x8x8x128xf32> to vector<8x7x8x128xf32>
    %66 = vector.extract_strided_slice %49 {offsets = [0, 7, 0, 0], sizes = [8, 1, 8, 128], strides = [1, 1, 1, 1]} : vector<8x8x8x128xf32> to vector<8x1x8x128xf32>
    %67 = tpu.concatenate %65, %66 in 1 : vector<8x7x8x128xf32>, vector<8x1x8x128xf32> -> vector<8x8x8x128xf32>
    %68 = vector.shape_cast %6 : vector<1x1x8x128xi1> to vector<1x1x8x128xi1>
    %69 = vector.broadcast %68 : vector<1x1x8x128xi1> to vector<8x8x8x128xi1>
    %70 = arith.select %69, %64, %67 : vector<8x8x8x128xi1>, vector<8x8x8x128xf32>
    %71 = vector.shape_cast %4 : vector<1x1x8x128xi1> to vector<1x1x8x128xi1>
    %72 = vector.broadcast %71 : vector<1x1x8x128xi1> to vector<8x8x8x128xi1>
    %73 = arith.select %72, %61, %70 : vector<8x8x8x128xi1>, vector<8x8x8x128xf32>
    %74 = vector.shape_cast %2 : vector<1x1x8x128xi1> to vector<1x1x8x128xi1>
    %75 = vector.broadcast %74 : vector<1x1x8x128xi1> to vector<8x8x8x128xi1>
    %76 = arith.select %75, %55, %73 : vector<8x8x8x128xi1>, vector<8x8x8x128xf32>
    %77 = vector.extract_strided_slice %20 {offsets = [0, 0, 0, 256], sizes = [8, 8, 8, 128], strides = [1, 1, 1, 1]} : vector<8x8x8x384xf32> to vector<8x8x8x128xf32>
    %cst_9 = arith.constant dense<0.000000e+00> : vector<8x128xf32>
    %78 = vector.multi_reduction <add>, %48, %cst_9 [1, 2] : vector<8x8x8x128xf32> to vector<8x128xf32>
    %cst_10 = arith.constant dense<0.000000e+00> : vector<8x128xf32>
    %79 = vector.multi_reduction <add>, %76, %cst_10 [1, 2] : vector<8x8x8x128xf32> to vector<8x128xf32>
    %80 = arith.addf %78, %79 : vector<8x128xf32>
    %cst_11 = arith.constant dense<0.000000e+00> : vector<8x128xf32>
    %81 = vector.multi_reduction <add>, %77, %cst_11 [1, 2] : vector<8x8x8x128xf32> to vector<8x128xf32>
    %82 = arith.addf %80, %81 : vector<8x128xf32>
    %83 = arith.truncf %82 : vector<8x128xf32> to vector<8x128xbf16>
    %c0_12 = arith.constant 0 : index
    %c0_13 = arith.constant 0 : index
    %84 = vector.load %arg4[%c0_12, %c0_13] : memref<128x128xbf16, #tpu.memory_space<vmem>>, vector<128x128xbf16>
    %cst_14 = arith.constant dense<0.000000e+00> : vector<8x128xf32>
    %85 = tpu.matmul %83, %84, %cst_14 {dimension_numbers = #tpu.dot_dimension_numbers<[1], [0], [0], [1], [0, 0, 1, 1], [], []>} : vector<8x128xbf16>, vector<128x128xbf16>, vector<8x128xf32> -> vector<8x128xf32>
    %cst_15 = arith.constant 5.000000e-01 : f32
    %86 = vector.broadcast %cst_15 : f32 to vector<8x128xf32>
    %87 = arith.mulf %86, %85 : vector<8x128xf32>
    %cst_16 = arith.constant 0.707106769 : f32
    %88 = vector.broadcast %cst_16 : f32 to vector<8x128xf32>
    %89 = arith.mulf %85, %88 : vector<8x128xf32>
    %90 = math.absf %89 : vector<8x128xf32>
    %cst_17 = arith.constant 0.327591091 : f32
    %91 = vector.broadcast %cst_17 : f32 to vector<8x128xf32>
    %92 = arith.mulf %91, %90 : vector<8x128xf32>
    %cst_18 = arith.constant 1.000000e+00 : f32
    %93 = vector.broadcast %cst_18 : f32 to vector<8x128xf32>
    %94 = arith.addf %93, %92 : vector<8x128xf32>
    %cst_19 = arith.constant 1.000000e+00 : f32
    %95 = vector.broadcast %cst_19 : f32 to vector<8x128xf32>
    %96 = arith.divf %95, %94 : vector<8x128xf32>
    %cst_20 = arith.constant 1.06140542 : f32
    %97 = vector.broadcast %cst_20 : f32 to vector<8x128xf32>
    %98 = arith.mulf %97, %96 : vector<8x128xf32>
    %cst_21 = arith.constant -1.45315206 : f32
    %99 = vector.broadcast %cst_21 : f32 to vector<8x128xf32>
    %100 = arith.addf %98, %99 : vector<8x128xf32>
    %101 = arith.mulf %100, %96 : vector<8x128xf32>
    %cst_22 = arith.constant 1.42141378 : f32
    %102 = vector.broadcast %cst_22 : f32 to vector<8x128xf32>
    %103 = arith.addf %101, %102 : vector<8x128xf32>
    %104 = arith.mulf %103, %96 : vector<8x128xf32>
    %cst_23 = arith.constant -0.284496725 : f32
    %105 = vector.broadcast %cst_23 : f32 to vector<8x128xf32>
    %106 = arith.addf %104, %105 : vector<8x128xf32>
    %107 = arith.mulf %106, %96 : vector<8x128xf32>
    %cst_24 = arith.constant 0.254829586 : f32
    %108 = vector.broadcast %cst_24 : f32 to vector<8x128xf32>
    %109 = arith.addf %107, %108 : vector<8x128xf32>
    %110 = arith.mulf %109, %96 : vector<8x128xf32>
    %cst_25 = arith.constant 0.000000e+00 : f32
    %111 = vector.broadcast %cst_25 : f32 to vector<8x128xf32>
    %112 = arith.subf %111, %90 : vector<8x128xf32>
    %113 = arith.mulf %112, %90 : vector<8x128xf32>
    %114 = math.exp %113 : vector<8x128xf32>
    %115 = arith.mulf %110, %114 : vector<8x128xf32>
    %cst_26 = arith.constant 1.000000e+00 : f32
    %116 = vector.broadcast %cst_26 : f32 to vector<8x128xf32>
    %117 = arith.subf %116, %115 : vector<8x128xf32>
    %cst_27 = arith.constant 0.000000e+00 : f32
    %118 = vector.broadcast %cst_27 : f32 to vector<8x128xf32>
    %119 = arith.cmpf olt, %89, %118 : vector<8x128xf32>
    %cst_28 = arith.constant 0.000000e+00 : f32
    %120 = vector.broadcast %cst_28 : f32 to vector<8x128xf32>
    %121 = arith.subf %120, %117 : vector<8x128xf32>
    %122 = arith.select %119, %121, %117 : vector<8x128xi1>, vector<8x128xf32>
    %cst_29 = arith.constant 1.000000e+00 : f32
    %123 = vector.broadcast %cst_29 : f32 to vector<8x128xf32>
    %124 = arith.addf %123, %122 : vector<8x128xf32>
    %125 = arith.mulf %87, %124 : vector<8x128xf32>
    %126 = arith.truncf %125 : vector<8x128xf32> to vector<8x128xbf16>
    %c0_30 = arith.constant 0 : index
    %c0_31 = arith.constant 0 : index
    %127 = vector.load %arg5[%c0_30, %c0_31] : memref<128x384xbf16, #tpu.memory_space<vmem>>, vector<128x384xbf16>
    %cst_32 = arith.constant dense<0.000000e+00> : vector<8x384xf32>
    %128 = tpu.matmul %126, %127, %cst_32 {dimension_numbers = #tpu.dot_dimension_numbers<[1], [0], [0], [1], [0, 0, 1, 1], [], []>} : vector<8x128xbf16>, vector<128x384xbf16>, vector<8x384xf32> -> vector<8x384xf32>
    %129 = vector.extract_strided_slice %128 {offsets = [0, 0], sizes = [8, 128], strides = [1, 1]} : vector<8x384xf32> to vector<8x128xf32>
    %130 = vector.extract_strided_slice %128 {offsets = [0, 128], sizes = [8, 128], strides = [1, 1]} : vector<8x384xf32> to vector<8x128xf32>
    %131 = vector.extract_strided_slice %128 {offsets = [0, 256], sizes = [8, 128], strides = [1, 1]} : vector<8x384xf32> to vector<8x128xf32>
    %132 = arith.maximumf %129, %130 : vector<8x128xf32>
    %133 = arith.maximumf %132, %131 : vector<8x128xf32>
    %134 = arith.subf %129, %133 : vector<8x128xf32>
    %135 = math.exp %134 : vector<8x128xf32>
    %136 = arith.subf %130, %133 : vector<8x128xf32>
    %137 = math.exp %136 : vector<8x128xf32>
    %138 = arith.subf %131, %133 : vector<8x128xf32>
    %139 = math.exp %138 : vector<8x128xf32>
    %140 = arith.addf %135, %137 : vector<8x128xf32>
    %141 = arith.addf %140, %139 : vector<8x128xf32>
    %142 = tpu.reciprocal %141 {approx = true} : vector<8x128xf32> -> vector<8x128xf32>
    %143 = arith.mulf %135, %142 : vector<8x128xf32>
    %144 = vector.shape_cast %143 : vector<8x128xf32> to vector<8x1x1x128xf32>
    %145 = arith.mulf %137, %142 : vector<8x128xf32>
    %146 = vector.shape_cast %145 : vector<8x128xf32> to vector<8x1x1x128xf32>
    %147 = arith.mulf %139, %142 : vector<8x128xf32>
    %148 = vector.shape_cast %147 : vector<8x128xf32> to vector<8x1x1x128xf32>
    %149 = vector.broadcast %144 : vector<8x1x1x128xf32> to vector<8x8x8x128xf32>
    %150 = arith.mulf %149, %48 : vector<8x8x8x128xf32>
    %151 = vector.broadcast %146 : vector<8x1x1x128xf32> to vector<8x8x8x128xf32>
    %152 = arith.mulf %151, %76 : vector<8x8x8x128xf32>
    %153 = arith.addf %150, %152 : vector<8x8x8x128xf32>
    %154 = vector.broadcast %148 : vector<8x1x1x128xf32> to vector<8x8x8x128xf32>
    %155 = arith.mulf %154, %77 : vector<8x8x8x128xf32>
    %156 = arith.addf %153, %155 : vector<8x8x8x128xf32>
    %157 = vector.shape_cast %156 : vector<8x8x8x128xf32> to vector<512x128xf32>
    %158 = arith.truncf %157 : vector<512x128xf32> to vector<512x128xbf16>
    %c0_33 = arith.constant 0 : index
    %c0_34 = arith.constant 0 : index
    %159 = vector.load %arg6[%c0_33, %c0_34] : memref<128x128xbf16, #tpu.memory_space<vmem>>, vector<128x128xbf16>
    %cst_35 = arith.constant dense<0.000000e+00> : vector<512x128xf32>
    %160 = tpu.matmul %158, %159, %cst_35 {dimension_numbers = #tpu.dot_dimension_numbers<[1], [0], [0], [1], [0, 0, 1, 1], [], []>} : vector<512x128xbf16>, vector<128x128xbf16>, vector<512x128xf32> -> vector<512x128xf32>
    %c0_36 = arith.constant 0 : index
    %c0_37 = arith.constant 0 : index
    %161 = vector.load %arg7[%c0_36, %c0_37] : memref<1x128xf32, #tpu.memory_space<vmem>>, vector<1x128xf32>
    %162 = vector.broadcast %161 : vector<1x128xf32> to vector<512x128xf32>
    %163 = arith.addf %160, %162 : vector<512x128xf32>
    %164 = vector.shape_cast %163 : vector<512x128xf32> to vector<8x8x8x128xf32>
    %c0_38 = arith.constant 0 : index
    %c0_39 = arith.constant 0 : index
    %c0_40 = arith.constant 0 : index
    %c0_41 = arith.constant 0 : index
    %165 = vector.load %arg8[%c0_38, %c0_39, %c0_40, %c0_41] : memref<8x8x8x128xf32, #tpu.memory_space<vmem>>, vector<8x8x8x128xf32>
    tpu.vector_store %arg8[%c0_38, %c0_39, %c0_40, %c0_41], %164 {strides = array<i32>} : memref<8x8x8x128xf32, #tpu.memory_space<vmem>>, vector<8x8x8x128xf32>,
    return
  }
  func.func @transform_0(%arg0: i32) -> (i32, i32, i32, i32) {
    %c0_i32 = arith.constant 0 : i32
    %c0_i32_0 = arith.constant 0 : i32
    %c0_i32_1 = arith.constant 0 : i32
    %c0_i32_2 = arith.constant 0 : i32
    return %arg0, %c0_i32, %c0_i32_0, %c0_i32_1 : i32, i32, i32, i32
  }
  func.func @transform_1(%arg0: i32) -> (i32, i32) {
    %c0_i32 = arith.constant 0 : i32
    %c0_i32_0 = arith.constant 0 : i32
    %c0_i32_1 = arith.constant 0 : i32
    return %c0_i32, %c0_i32_0 : i32, i32
  }
  func.func @transform_2(%arg0: i32) -> (i32, i32) {
    %c0_i32 = arith.constant 0 : i32
    %c0_i32_0 = arith.constant 0 : i32
    %c0_i32_1 = arith.constant 0 : i32
    return %c0_i32, %c0_i32_0 : i32, i32
  }
  func.func @transform_3(%arg0: i32) -> (i32, i32) {
    %c0_i32 = arith.constant 0 : i32
    %c0_i32_0 = arith.constant 0 : i32
    %c0_i32_1 = arith.constant 0 : i32
    return %c0_i32, %c0_i32_0 : i32, i32
  }
  func.func @transform_4(%arg0: i32) -> (i32, i32) {
    %c0_i32 = arith.constant 0 : i32
    %c0_i32_0 = arith.constant 0 : i32
    %c0_i32_1 = arith.constant 0 : i32
    return %c0_i32, %c0_i32_0 : i32, i32
  }
  func.func @transform_5(%arg0: i32) -> (i32, i32) {
    %c0_i32 = arith.constant 0 : i32
    %c0_i32_0 = arith.constant 0 : i32
    %c0_i32_1 = arith.constant 0 : i32
    return %c0_i32, %c0_i32_0 : i32, i32
  }
  func.func @transform_6(%arg0: i32) -> (i32, i32) {
    %c0_i32 = arith.constant 0 : i32
    %c0_i32_0 = arith.constant 0 : i32
    %c0_i32_1 = arith.constant 0 : i32
    return %c0_i32, %c0_i32_0 : i32, i32
  }
  func.func @transform_7(%arg0: i32) -> (i32, i32, i32, i32) {
    %c0_i32 = arith.constant 0 : i32
    %c0_i32_0 = arith.constant 0 : i32
    %c0_i32_1 = arith.constant 0 : i32
    %c0_i32_2 = arith.constant 0 : i32
    return %arg0, %c0_i32, %c0_i32_0, %c0_i32_1 : i32, i32, i32, i32
  }
}

module attributes {stable_mosaic.version = 11 : i64} {
  func.func @kernel(%arg0: i32, %arg1: memref<8x8x8x128xf32, #tpu.memory_space<vmem>>, %arg2: memref<128x384xbf16, #tpu.memory_space<vmem>>, %arg3: memref<1x384xf32, #tpu.memory_space<vmem>>, %arg4: memref<128x128xbf16, #tpu.memory_space<vmem>>, %arg5: memref<128x384xbf16, #tpu.memory_space<vmem>>, %arg6: memref<128x128xbf16, #tpu.memory_space<vmem>>, %arg7: memref<1x128xf32, #tpu.memory_space<vmem>>, %arg8: memref<8x8x8x128xf32, #tpu.memory_space<vmem>>) attributes {dimension_semantics = [#tpu.dimension_semantics<parallel>], iteration_bounds = array<i64: 1>, scalar_prefetch = 0 : i64, scratch_operands = 0 : i64, tpu.core_type = #tpu.core_type<tc>, window_params = [{transform_indices = @transform_0, window_bounds = array<i64: 8, 8, 8, 128>}, {pipeline_mode = #tpu.pipeline_mode<synchronous>, transform_indices = @transform_1, window_bounds = array<i64: 128, 384>}, {pipeline_mode = #tpu.pipeline_mode<synchronous>, transform_indices = @transform_2, window_bounds = array<i64: 1, 384>}, {pipeline_mode = #tpu.pipeline_mode<synchronous>, transform_indices = @transform_3, window_bounds = array<i64: 128, 128>}, {pipeline_mode = #tpu.pipeline_mode<synchronous>, transform_indices = @transform_4, window_bounds = array<i64: 128, 384>}, {pipeline_mode = #tpu.pipeline_mode<synchronous>, transform_indices = @transform_5, window_bounds = array<i64: 128, 128>}, {pipeline_mode = #tpu.pipeline_mode<synchronous>, transform_indices = @transform_6, window_bounds = array<i64: 1, 128>}, {transform_indices = @transform_7, window_bounds = array<i64: 8, 8, 8, 128>}]} {
    %0 = tpu.iota {dimensions = array<i32: 3>} : vector<1x1x8x128xi32>
    %c32_i32 = arith.constant 32 : i32
    %1 = vector.broadcast %c32_i32 : i32 to vector<1x1x8x128xi32>
    %2 = arith.cmpi slt, %0, %1 : vector<1x1x8x128xi32>
    %c64_i32 = arith.constant 64 : i32
    %3 = vector.broadcast %c64_i32 : i32 to vector<1x1x8x128xi32>
    %4 = arith.cmpi slt, %0, %3 : vector<1x1x8x128xi32>
    %c96_i32 = arith.constant 96 : i32
    %5 = vector.broadcast %c96_i32 : i32 to vector<1x1x8x128xi32>
    %6 = arith.cmpi slt, %0, %5 : vector<1x1x8x128xi32>
    %c0 = arith.constant 0 : index
    %c0_0 = arith.constant 0 : index
    %c0_1 = arith.constant 0 : index
    %c0_2 = arith.constant 0 : index
    %7 = vector.load %arg1[%c0, %c0_0, %c0_1, %c0_2] : memref<8x8x8x128xf32, #tpu.memory_space<vmem>>, vector<8x8x8x128xf32>
    %8 = vector.shape_cast %7 : vector<8x8x8x128xf32> to vector<512x128xf32>
    %9 = arith.truncf %8 : vector<512x128xf32> to vector<512x128xbf16>
    %c0_3 = arith.constant 0 : index
    %c0_4 = arith.constant 0 : index
    %10 = vector.load %arg2[%c0_3, %c0_4] : memref<128x384xbf16, #tpu.memory_space<vmem>>, vector<128x384xbf16>
    %cst = arith.constant dense<0.000000e+00> : vector<512x384xf32>
    %11 = tpu.matmul %9, %10, %cst {dimension_numbers = #tpu.dot_dimension_numbers<[1], [0], [0], [1], [0, 0, 1, 1], [], []>} : vector<512x128xbf16>, vector<128x384xbf16>, vector<512x384xf32> -> vector<512x384xf32>
    %c0_5 = arith.constant 0 : index
    %c0_6 = arith.constant 0 : index
    %12 = vector.load %arg3[%c0_5, %c0_6] : memref<1x384xf32, #tpu.memory_space<vmem>>, vector<1x384xf32>
    %13 = vector.broadcast %12 : vector<1x384xf32> to vector<512x384xf32>
    %14 = arith.addf %11, %13 : vector<512x384xf32>
    %15 = vector.shape_cast %14 : vector<512x384xf32> to vector<8x8x8x384xf32>
    %16 = vector.extract_strided_slice %15 {offsets = [0, 0, 0, 0], sizes = [8, 8, 8, 128], strides = [1, 1, 1, 1]} : vector<8x8x8x384xf32> to vector<8x8x8x128xf32>
    %17 = vector.extract_strided_slice %16 {offsets = [0, 0, 0, 0], sizes = [8, 1, 8, 128], strides = [1, 1, 1, 1]} : vector<8x8x8x128xf32> to vector<8x1x8x128xf32>
    %18 = vector.extract_strided_slice %16 {offsets = [0, 0, 0, 0], sizes = [8, 7, 8, 128], strides = [1, 1, 1, 1]} : vector<8x8x8x128xf32> to vector<8x7x8x128xf32>
    %19 = tpu.concatenate %17, %18 in 1 : vector<8x1x8x128xf32>, vector<8x7x8x128xf32> -> vector<8x8x8x128xf32>
    %20 = vector.extract_strided_slice %16 {offsets = [0, 1, 0, 0], sizes = [8, 7, 8, 128], strides = [1, 1, 1, 1]} : vector<8x8x8x128xf32> to vector<8x7x8x128xf32>
    %21 = vector.extract_strided_slice %16 {offsets = [0, 7, 0, 0], sizes = [8, 1, 8, 128], strides = [1, 1, 1, 1]} : vector<8x8x8x128xf32> to vector<8x1x8x128xf32>
    %22 = tpu.concatenate %20, %21 in 1 : vector<8x7x8x128xf32>, vector<8x1x8x128xf32> -> vector<8x8x8x128xf32>
    %23 = vector.extract_strided_slice %16 {offsets = [0, 0, 0, 0], sizes = [8, 8, 1, 128], strides = [1, 1, 1, 1]} : vector<8x8x8x128xf32> to vector<8x8x1x128xf32>
    %24 = vector.extract_strided_slice %16 {offsets = [0, 0, 0, 0], sizes = [8, 8, 7, 128], strides = [1, 1, 1, 1]} : vector<8x8x8x128xf32> to vector<8x8x7x128xf32>
    %25 = tpu.concatenate %23, %24 in 2 : vector<8x8x1x128xf32>, vector<8x8x7x128xf32> -> vector<8x8x8x128xf32>
    %26 = vector.extract_strided_slice %16 {offsets = [0, 0, 1, 0], sizes = [8, 8, 7, 128], strides = [1, 1, 1, 1]} : vector<8x8x8x128xf32> to vector<8x8x7x128xf32>
    %27 = vector.extract_strided_slice %16 {offsets = [0, 0, 7, 0], sizes = [8, 8, 1, 128], strides = [1, 1, 1, 1]} : vector<8x8x8x128xf32> to vector<8x8x1x128xf32>
    %28 = tpu.concatenate %26, %27 in 2 : vector<8x8x7x128xf32>, vector<8x8x1x128xf32> -> vector<8x8x8x128xf32>
    %29 = vector.shape_cast %6 : vector<1x1x8x128xi1> to vector<1x1x8x128xi1>
    %30 = vector.broadcast %29 : vector<1x1x8x128xi1> to vector<8x8x8x128xi1>
    %31 = arith.select %30, %25, %28 : vector<8x8x8x128xi1>, vector<8x8x8x128xf32>
    %32 = vector.shape_cast %4 : vector<1x1x8x128xi1> to vector<1x1x8x128xi1>
    %33 = vector.broadcast %32 : vector<1x1x8x128xi1> to vector<8x8x8x128xi1>
    %34 = arith.select %33, %22, %31 : vector<8x8x8x128xi1>, vector<8x8x8x128xf32>
    %35 = vector.shape_cast %2 : vector<1x1x8x128xi1> to vector<1x1x8x128xi1>
    %36 = vector.broadcast %35 : vector<1x1x8x128xi1> to vector<8x8x8x128xi1>
    %37 = arith.select %36, %19, %34 : vector<8x8x8x128xi1>, vector<8x8x8x128xf32>
    %38 = vector.extract_strided_slice %15 {offsets = [0, 0, 0, 128], sizes = [8, 8, 8, 128], strides = [1, 1, 1, 1]} : vector<8x8x8x384xf32> to vector<8x8x8x128xf32>
    %39 = vector.extract_strided_slice %38 {offsets = [0, 0, 0, 0], sizes = [8, 8, 1, 128], strides = [1, 1, 1, 1]} : vector<8x8x8x128xf32> to vector<8x8x1x128xf32>
    %40 = vector.extract_strided_slice %38 {offsets = [0, 0, 0, 0], sizes = [8, 8, 7, 128], strides = [1, 1, 1, 1]} : vector<8x8x8x128xf32> to vector<8x8x7x128xf32>
    %41 = tpu.concatenate %39, %40 in 2 : vector<8x8x1x128xf32>, vector<8x8x7x128xf32> -> vector<8x8x8x128xf32>
    %42 = vector.extract_strided_slice %38 {offsets = [0, 0, 1, 0], sizes = [8, 8, 7, 128], strides = [1, 1, 1, 1]} : vector<8x8x8x128xf32> to vector<8x8x7x128xf32>
    %43 = vector.extract_strided_slice %38 {offsets = [0, 0, 7, 0], sizes = [8, 8, 1, 128], strides = [1, 1, 1, 1]} : vector<8x8x8x128xf32> to vector<8x8x1x128xf32>
    %44 = tpu.concatenate %42, %43 in 2 : vector<8x8x7x128xf32>, vector<8x8x1x128xf32> -> vector<8x8x8x128xf32>
    %45 = vector.extract_strided_slice %38 {offsets = [0, 0, 0, 0], sizes = [8, 1, 8, 128], strides = [1, 1, 1, 1]} : vector<8x8x8x128xf32> to vector<8x1x8x128xf32>
    %46 = vector.extract_strided_slice %38 {offsets = [0, 0, 0, 0], sizes = [8, 7, 8, 128], strides = [1, 1, 1, 1]} : vector<8x8x8x128xf32> to vector<8x7x8x128xf32>
    %47 = tpu.concatenate %45, %46 in 1 : vector<8x1x8x128xf32>, vector<8x7x8x128xf32> -> vector<8x8x8x128xf32>
    %48 = vector.extract_strided_slice %38 {offsets = [0, 1, 0, 0], sizes = [8, 7, 8, 128], strides = [1, 1, 1, 1]} : vector<8x8x8x128xf32> to vector<8x7x8x128xf32>
    %49 = vector.extract_strided_slice %38 {offsets = [0, 7, 0, 0], sizes = [8, 1, 8, 128], strides = [1, 1, 1, 1]} : vector<8x8x8x128xf32> to vector<8x1x8x128xf32>
    %50 = tpu.concatenate %48, %49 in 1 : vector<8x7x8x128xf32>, vector<8x1x8x128xf32> -> vector<8x8x8x128xf32>
    %51 = vector.shape_cast %6 : vector<1x1x8x128xi1> to vector<1x1x8x128xi1>
    %52 = vector.broadcast %51 : vector<1x1x8x128xi1> to vector<8x8x8x128xi1>
    %53 = arith.select %52, %47, %50 : vector<8x8x8x128xi1>, vector<8x8x8x128xf32>
    %54 = vector.shape_cast %4 : vector<1x1x8x128xi1> to vector<1x1x8x128xi1>
    %55 = vector.broadcast %54 : vector<1x1x8x128xi1> to vector<8x8x8x128xi1>
    %56 = arith.select %55, %44, %53 : vector<8x8x8x128xi1>, vector<8x8x8x128xf32>
    %57 = vector.shape_cast %2 : vector<1x1x8x128xi1> to vector<1x1x8x128xi1>
    %58 = vector.broadcast %57 : vector<1x1x8x128xi1> to vector<8x8x8x128xi1>
    %59 = arith.select %58, %41, %56 : vector<8x8x8x128xi1>, vector<8x8x8x128xf32>
    %60 = vector.extract_strided_slice %15 {offsets = [0, 0, 0, 256], sizes = [8, 8, 8, 128], strides = [1, 1, 1, 1]} : vector<8x8x8x384xf32> to vector<8x8x8x128xf32>
    %cst_7 = arith.constant dense<0.000000e+00> : vector<8x128xf32>
    %61 = vector.multi_reduction <add>, %37, %cst_7 [1, 2] : vector<8x8x8x128xf32> to vector<8x128xf32>
    %cst_8 = arith.constant dense<0.000000e+00> : vector<8x128xf32>
    %62 = vector.multi_reduction <add>, %59, %cst_8 [1, 2] : vector<8x8x8x128xf32> to vector<8x128xf32>
    %63 = arith.addf %61, %62 : vector<8x128xf32>
    %cst_9 = arith.constant dense<0.000000e+00> : vector<8x128xf32>
    %64 = vector.multi_reduction <add>, %60, %cst_9 [1, 2] : vector<8x8x8x128xf32> to vector<8x128xf32>
    %65 = arith.addf %63, %64 : vector<8x128xf32>
    %66 = arith.truncf %65 : vector<8x128xf32> to vector<8x128xbf16>
    %c0_10 = arith.constant 0 : index
    %c0_11 = arith.constant 0 : index
    %67 = vector.load %arg4[%c0_10, %c0_11] : memref<128x128xbf16, #tpu.memory_space<vmem>>, vector<128x128xbf16>
    %cst_12 = arith.constant dense<0.000000e+00> : vector<8x128xf32>
    %68 = tpu.matmul %66, %67, %cst_12 {dimension_numbers = #tpu.dot_dimension_numbers<[1], [0], [0], [1], [0, 0, 1, 1], [], []>} : vector<8x128xbf16>, vector<128x128xbf16>, vector<8x128xf32> -> vector<8x128xf32>
    %cst_13 = arith.constant 5.000000e-01 : f32
    %69 = vector.broadcast %cst_13 : f32 to vector<8x128xf32>
    %70 = arith.mulf %69, %68 : vector<8x128xf32>
    %cst_14 = arith.constant 0.707106769 : f32
    %71 = vector.broadcast %cst_14 : f32 to vector<8x128xf32>
    %72 = arith.mulf %68, %71 : vector<8x128xf32>
    %73 = math.absf %72 : vector<8x128xf32>
    %cst_15 = arith.constant 0.327591091 : f32
    %74 = vector.broadcast %cst_15 : f32 to vector<8x128xf32>
    %75 = arith.mulf %74, %73 : vector<8x128xf32>
    %cst_16 = arith.constant 1.000000e+00 : f32
    %76 = vector.broadcast %cst_16 : f32 to vector<8x128xf32>
    %77 = arith.addf %76, %75 : vector<8x128xf32>
    %cst_17 = arith.constant 1.000000e+00 : f32
    %78 = vector.broadcast %cst_17 : f32 to vector<8x128xf32>
    %79 = arith.divf %78, %77 : vector<8x128xf32>
    %cst_18 = arith.constant 1.06140542 : f32
    %80 = vector.broadcast %cst_18 : f32 to vector<8x128xf32>
    %81 = arith.mulf %80, %79 : vector<8x128xf32>
    %cst_19 = arith.constant -1.45315206 : f32
    %82 = vector.broadcast %cst_19 : f32 to vector<8x128xf32>
    %83 = arith.addf %81, %82 : vector<8x128xf32>
    %84 = arith.mulf %83, %79 : vector<8x128xf32>
    %cst_20 = arith.constant 1.42141378 : f32
    %85 = vector.broadcast %cst_20 : f32 to vector<8x128xf32>
    %86 = arith.addf %84, %85 : vector<8x128xf32>
    %87 = arith.mulf %86, %79 : vector<8x128xf32>
    %cst_21 = arith.constant -0.284496725 : f32
    %88 = vector.broadcast %cst_21 : f32 to vector<8x128xf32>
    %89 = arith.addf %87, %88 : vector<8x128xf32>
    %90 = arith.mulf %89, %79 : vector<8x128xf32>
    %cst_22 = arith.constant 0.254829586 : f32
    %91 = vector.broadcast %cst_22 : f32 to vector<8x128xf32>
    %92 = arith.addf %90, %91 : vector<8x128xf32>
    %93 = arith.mulf %92, %79 : vector<8x128xf32>
    %cst_23 = arith.constant 0.000000e+00 : f32
    %94 = vector.broadcast %cst_23 : f32 to vector<8x128xf32>
    %95 = arith.subf %94, %73 : vector<8x128xf32>
    %96 = arith.mulf %95, %73 : vector<8x128xf32>
    %97 = math.exp %96 : vector<8x128xf32>
    %98 = arith.mulf %93, %97 : vector<8x128xf32>
    %cst_24 = arith.constant 1.000000e+00 : f32
    %99 = vector.broadcast %cst_24 : f32 to vector<8x128xf32>
    %100 = arith.subf %99, %98 : vector<8x128xf32>
    %cst_25 = arith.constant 0.000000e+00 : f32
    %101 = vector.broadcast %cst_25 : f32 to vector<8x128xf32>
    %102 = arith.cmpf olt, %72, %101 : vector<8x128xf32>
    %cst_26 = arith.constant 0.000000e+00 : f32
    %103 = vector.broadcast %cst_26 : f32 to vector<8x128xf32>
    %104 = arith.subf %103, %100 : vector<8x128xf32>
    %105 = arith.select %102, %104, %100 : vector<8x128xi1>, vector<8x128xf32>
    %cst_27 = arith.constant 1.000000e+00 : f32
    %106 = vector.broadcast %cst_27 : f32 to vector<8x128xf32>
    %107 = arith.addf %106, %105 : vector<8x128xf32>
    %108 = arith.mulf %70, %107 : vector<8x128xf32>
    %109 = arith.truncf %108 : vector<8x128xf32> to vector<8x128xbf16>
    %c0_28 = arith.constant 0 : index
    %c0_29 = arith.constant 0 : index
    %110 = vector.load %arg5[%c0_28, %c0_29] : memref<128x384xbf16, #tpu.memory_space<vmem>>, vector<128x384xbf16>
    %cst_30 = arith.constant dense<0.000000e+00> : vector<8x384xf32>
    %111 = tpu.matmul %109, %110, %cst_30 {dimension_numbers = #tpu.dot_dimension_numbers<[1], [0], [0], [1], [0, 0, 1, 1], [], []>} : vector<8x128xbf16>, vector<128x384xbf16>, vector<8x384xf32> -> vector<8x384xf32>
    %112 = vector.extract_strided_slice %111 {offsets = [0, 0], sizes = [8, 128], strides = [1, 1]} : vector<8x384xf32> to vector<8x128xf32>
    %113 = vector.extract_strided_slice %111 {offsets = [0, 128], sizes = [8, 128], strides = [1, 1]} : vector<8x384xf32> to vector<8x128xf32>
    %114 = vector.extract_strided_slice %111 {offsets = [0, 256], sizes = [8, 128], strides = [1, 1]} : vector<8x384xf32> to vector<8x128xf32>
    %115 = arith.maximumf %112, %113 : vector<8x128xf32>
    %116 = arith.maximumf %115, %114 : vector<8x128xf32>
    %117 = arith.subf %112, %116 : vector<8x128xf32>
    %118 = math.exp %117 : vector<8x128xf32>
    %119 = arith.subf %113, %116 : vector<8x128xf32>
    %120 = math.exp %119 : vector<8x128xf32>
    %121 = arith.subf %114, %116 : vector<8x128xf32>
    %122 = math.exp %121 : vector<8x128xf32>
    %123 = arith.addf %118, %120 : vector<8x128xf32>
    %124 = arith.addf %123, %122 : vector<8x128xf32>
    %125 = tpu.reciprocal %124 {approx = true} : vector<8x128xf32> -> vector<8x128xf32>
    %126 = arith.mulf %118, %125 : vector<8x128xf32>
    %127 = vector.shape_cast %126 : vector<8x128xf32> to vector<8x1x1x128xf32>
    %128 = arith.mulf %120, %125 : vector<8x128xf32>
    %129 = vector.shape_cast %128 : vector<8x128xf32> to vector<8x1x1x128xf32>
    %130 = arith.mulf %122, %125 : vector<8x128xf32>
    %131 = vector.shape_cast %130 : vector<8x128xf32> to vector<8x1x1x128xf32>
    %132 = vector.broadcast %127 : vector<8x1x1x128xf32> to vector<8x8x8x128xf32>
    %133 = arith.mulf %132, %37 : vector<8x8x8x128xf32>
    %134 = vector.broadcast %129 : vector<8x1x1x128xf32> to vector<8x8x8x128xf32>
    %135 = arith.mulf %134, %59 : vector<8x8x8x128xf32>
    %136 = arith.addf %133, %135 : vector<8x8x8x128xf32>
    %137 = vector.broadcast %131 : vector<8x1x1x128xf32> to vector<8x8x8x128xf32>
    %138 = arith.mulf %137, %60 : vector<8x8x8x128xf32>
    %139 = arith.addf %136, %138 : vector<8x8x8x128xf32>
    %140 = vector.shape_cast %139 : vector<8x8x8x128xf32> to vector<512x128xf32>
    %141 = arith.truncf %140 : vector<512x128xf32> to vector<512x128xbf16>
    %c0_31 = arith.constant 0 : index
    %c0_32 = arith.constant 0 : index
    %142 = vector.load %arg6[%c0_31, %c0_32] : memref<128x128xbf16, #tpu.memory_space<vmem>>, vector<128x128xbf16>
    %cst_33 = arith.constant dense<0.000000e+00> : vector<512x128xf32>
    %143 = tpu.matmul %141, %142, %cst_33 {dimension_numbers = #tpu.dot_dimension_numbers<[1], [0], [0], [1], [0, 0, 1, 1], [], []>} : vector<512x128xbf16>, vector<128x128xbf16>, vector<512x128xf32> -> vector<512x128xf32>
    %c0_34 = arith.constant 0 : index
    %c0_35 = arith.constant 0 : index
    %144 = vector.load %arg7[%c0_34, %c0_35] : memref<1x128xf32, #tpu.memory_space<vmem>>, vector<1x128xf32>
    %145 = vector.broadcast %144 : vector<1x128xf32> to vector<512x128xf32>
    %146 = arith.addf %143, %145 : vector<512x128xf32>
    %147 = vector.shape_cast %146 : vector<512x128xf32> to vector<8x8x8x128xf32>
    %c0_36 = arith.constant 0 : index
    %c0_37 = arith.constant 0 : index
    %c0_38 = arith.constant 0 : index
    %c0_39 = arith.constant 0 : index
    %148 = vector.load %arg8[%c0_36, %c0_37, %c0_38, %c0_39] : memref<8x8x8x128xf32, #tpu.memory_space<vmem>>, vector<8x8x8x128xf32>
    tpu.vector_store %arg8[%c0_36, %c0_37, %c0_38, %c0_39], %147 {strides = array<i32>} : memref<8x8x8x128xf32, #tpu.memory_space<vmem>>, vector<8x8x8x128xf32>,
    return
  }
  func.func @transform_0(%arg0: i32) -> (i32, i32, i32, i32) {
    %c0_i32 = arith.constant 0 : i32
    %c0_i32_0 = arith.constant 0 : i32
    %c0_i32_1 = arith.constant 0 : i32
    %c0_i32_2 = arith.constant 0 : i32
    return %arg0, %c0_i32, %c0_i32_0, %c0_i32_1 : i32, i32, i32, i32
  }
  func.func @transform_1(%arg0: i32) -> (i32, i32) {
    %c0_i32 = arith.constant 0 : i32
    %c0_i32_0 = arith.constant 0 : i32
    %c0_i32_1 = arith.constant 0 : i32
    return %c0_i32, %c0_i32_0 : i32, i32
  }
  func.func @transform_2(%arg0: i32) -> (i32, i32) {
    %c0_i32 = arith.constant 0 : i32
    %c0_i32_0 = arith.constant 0 : i32
    %c0_i32_1 = arith.constant 0 : i32
    return %c0_i32, %c0_i32_0 : i32, i32
  }
  func.func @transform_3(%arg0: i32) -> (i32, i32) {
    %c0_i32 = arith.constant 0 : i32
    %c0_i32_0 = arith.constant 0 : i32
    %c0_i32_1 = arith.constant 0 : i32
    return %c0_i32, %c0_i32_0 : i32, i32
  }
  func.func @transform_4(%arg0: i32) -> (i32, i32) {
    %c0_i32 = arith.constant 0 : i32
    %c0_i32_0 = arith.constant 0 : i32
    %c0_i32_1 = arith.constant 0 : i32
    return %c0_i32, %c0_i32_0 : i32, i32
  }
  func.func @transform_5(%arg0: i32) -> (i32, i32) {
    %c0_i32 = arith.constant 0 : i32
    %c0_i32_0 = arith.constant 0 : i32
    %c0_i32_1 = arith.constant 0 : i32
    return %c0_i32, %c0_i32_0 : i32, i32
  }
  func.func @transform_6(%arg0: i32) -> (i32, i32) {
    %c0_i32 = arith.constant 0 : i32
    %c0_i32_0 = arith.constant 0 : i32
    %c0_i32_1 = arith.constant 0 : i32
    return %c0_i32, %c0_i32_0 : i32, i32
  }
  func.func @transform_7(%arg0: i32) -> (i32, i32, i32, i32) {
    %c0_i32 = arith.constant 0 : i32
    %c0_i32_0 = arith.constant 0 : i32
    %c0_i32_1 = arith.constant 0 : i32
    %c0_i32_2 = arith.constant 0 : i32
    return %arg0, %c0_i32, %c0_i32_0, %c0_i32_1 : i32, i32, i32, i32
  }
}

</mosaic_0001>

<bundles_post_ra>
// kernel: tpu_custom_call.1
= control target key start
LH: loop header
LB: loop body
LE: loop exit
PB: predicated region body
PF: predicated region fallthrough
CT: control target
= control target key end

     0   :  { %12 = vsyncpa [#allocation3], 0  ;;  %s8084_s0 = inlined_call_operand.hbm [shape: f32[8,8,8,128], index: 0, kind: input, shape index: {}]   ;;  %s8085_s1 = inlined_call_operand.hbm [shape: bf16[128,384], index: 1, kind: input, shape index: {}]   ;;  %s8086_s2 = inlined_call_operand.hbm [shape: f32[1,384], index: 2, kind: input, shape index: {}]   ;;  %s8087_s3 = inlined_call_operand.hbm [shape: bf16[128,128], index: 3, kind: input, shape index: {}]   ;;  %s8088_s4 = inlined_call_operand.hbm [shape: bf16[128,384], index: 4, kind: input, shape index: {}]   ;;  %s8089_s5 = inlined_call_operand.hbm [shape: bf16[128,128], index: 5, kind: input, shape index: {}]   ;;  %s8090_s6 = inlined_call_operand.vmem [shape: f32[1,128], index: 6, kind: input, shape index: {}]   ;;  %s8091_s7 = inlined_call_operand.hbm [shape: f32[8,8,8,128], index: 7, kind: output, shape index: {}]  }
   0x1   :  { %13 = vsyncpa [#allocation6], 0 }
   0x2   :  { %14 = vsyncpa [#allocation9], 0 }
   0x3   :  { %15 = vsyncpa [#allocation12], 0  ;;  %s34_s26 = sshll.u32 %s8085_s1, 4  ;;  %s35_s26 = int_to_ptr.hbm [resolvable:$true] %s34_s26 }
   0x4   :  { %16 = vsyncpa [#allocation4], 0  ;;  %s4037_s27 = smov [#allocation5]   ;;  %s58_s8 = sshll.u32 %s8087_s3, 4  ;;  %s59_s8 = int_to_ptr.hbm [resolvable:$true] %s58_s8 }
   0x5   :  { %s36_s28 = sshll.u32 %s4037_s27, 4  ;;  %s4038_s9 = smov 192   ;;  %s37_s28 = int_to_ptr.vmem [resolvable:$true] %s36_s28 }
   0x6   :  { %s4039_s10 = smov 12   ;;  %s4040_s11 = smov [#allocation8]  }
   0x7   :  { %42 = dma.hbm_to_vmem [thread:$0]  %s35_s26, 3072, %s37_s28, [#allocation6], %s4038_s9, %s4038_s9, %s4039_s10  }
   0x8   :  { %s60_s12 = sshll.u32 %s4040_s11, 4  ;;  %s4041_s1 = smov 64   ;;  %s61_s12 = int_to_ptr.vmem [resolvable:$true] %s60_s12 }
   0x9   :  { %s4042_s13 = smov 4   ;;  %s21_s3 = sshll.u32 %s8084_s0, 4  ;;  %s22_s3 = int_to_ptr.hbm [resolvable:$true] %s21_s3 }
   0xa   :  { %66 = dma.hbm_to_vmem [thread:$0]  %s59_s8, 1024, %s61_s12, [#allocation9], %s4041_s1, %s4041_s1, %s4042_s13  }
   0xb   :  { %s4043_s16 = smov [#allocation2]   ;;  %s48_s20 = sshll.u32 %s8086_s2, 4  ;;  %s49_s20 = int_to_ptr.hbm [resolvable:$true] %s48_s20 }
   0xc   :  { %s23_s17 = sshll.u32 %s4043_s16, 4  ;;  %s4044_s21 = smov 128   ;;  %s24_s17 = int_to_ptr.vmem [resolvable:$true] %s23_s17 }
   0xd   :  { %s4045_s22 = smov 8   ;;  %s4046_s23 = smov [#allocation7]  }
   0xe   :  { %29 = dma.hbm_to_vmem [thread:$0]  %s22_s3, 8192, %s24_s17, [#allocation3], %s4044_s21, %s4044_s21, %s4045_s22  }
   0xf   :  { %s50_s24 = sshll.u32 %s4046_s23, 4  ;;  %s71_s0 = sshll.u32 %s8088_s4, 4  ;;  %s51_s24 = int_to_ptr.vmem [resolvable:$true] %s50_s24  ;;  %s72_s0 = int_to_ptr.hbm [resolvable:$true] %s71_s0 }
  0x10   :  { %53 = dma.hbm_to_vmem [thread:$0]  %s49_s20, 48, %s51_s24, [#allocation6]  }
  0x11   :  { %s84_s2 = sshll.u32 %s8089_s5, 4  ;;  %s4047_s29 = smov [#allocation10]   ;;  %s85_s2 = int_to_ptr.hbm [resolvable:$true] %s84_s2 }
  0x12   :  { %s73_s30 = sshll.u32 %s4047_s29, 4  ;;  %s4048_s8 = smov [#allocation11]   ;;  %s74_s30 = int_to_ptr.vmem [resolvable:$true] %s73_s30 }
  0x13   :  { %79 = dma.hbm_to_vmem [thread:$0]  %s72_s0, 3072, %s74_s30, [#allocation9], %s4038_s9, %s4038_s9, %s4039_s10  }
  0x14   :  { %s86_s11 = sshll.u32 %s4048_s8, 4  ;;  %s87_s11 = int_to_ptr.vmem [resolvable:$true] %s86_s11 }
  0x15   :  { %92 = dma.hbm_to_vmem [thread:$0]  %s85_s2, 1024, %s87_s11, [#allocation12], %s4041_s1, %s4041_s1, %s4042_s13  }
  0x16   :  { %4027 = dma.done.wait [#allocation3], 8192  }
  0x17   :  { %4028 = vsyncadd [#allocation3], 4294959104 }
  0x18   :  { %4029 = dma.done.wait [#allocation6], 3120  }
  0x19   :  { %4030 = vsyncadd [#allocation6], 4294964176 }
  0x1a   :  { %4031 = dma.done.wait [#allocation9], 4096  }
  0x1b   :  { %4032 = vsyncadd [#allocation9], 4294963200 }
  0x1c   :  { %4033 = dma.done.wait [#allocation12], 1024  }
  0x1d   :  { %4034 = vsyncadd [#allocation12], 4294966272  ;;  %v3598_v0 = vld [vmem:[#allocation5 + $0xa8] sm:$0xf]  ;;  %v3790_v1 = vld [vmem:[#allocation5 + $0xb0] sm:$0xf0] }
  0x1e   :  { %v3789_v2 = vld [vmem:[#allocation5 + $0xac] sm:$0xf]  ;;  %v3599_v3 = vor.u32 %v3790_v1, %v3598_v0  ;;  %v3600_v4 = vld [vmem:[#allocation5 + $0xb4] sm:$0xf0]  ;;  %v3606_v5 = vld [vmem:[#allocation5 + $0xb0] sm:$0xf] }
  0x1f   :  { %v3791_v6 = vld [vmem:[#allocation5 + $0xb8] sm:$0xf0]  ;;  %v3603_v7 = vor.u32 %v3789_v2, %v3600_v4  ;;  %v3586_v9 = vld [vmem:[#allocation5 + $0x90] sm:$0xf]  ;;  %v3786_v11 = vld [vmem:[#allocation5 + $0x94] sm:$0xf] }
  0x20   :  { %v3607_v8 = vor.u32 %v3791_v6, %v3606_v5  ;;  %v3787_v10 = vld [vmem:[#allocation5 + $0x98] sm:$0xf0]  ;;  %392 = vmatpush.bf16.msra.mxu0 %v3599_v3  ;;  %v3588_v13 = vld [vmem:[#allocation5 + $0x9c] sm:$0xf0]  ;;  %v3594_v14 = vld [vmem:[#allocation5 + $0x98] sm:$0xf] }
  0x21   :  { %v3587_v12 = vor.u32 %v3787_v10, %v3586_v9  ;;  %v3788_v15 = vld [vmem:[#allocation5 + $0xa0] sm:$0xf0]  ;;  %561 = vmatpush.bf16.msra.mxu1 %v3603_v7  ;;  %v3591_v16 = vor.u32 %v3786_v11, %v3588_v13  ;;  %v3574_v18 = vld [vmem:[#allocation5 + $0x78] sm:$0xf]  ;;  %v3783_v20 = vld [vmem:[#allocation5 + $0x7c] sm:$0xf] }
  0x22   :  { %730 = vmatpush.bf16.msra.mxu2 %v3607_v8  ;;  %v3595_v17 = vor.u32 %v3788_v15, %v3594_v14  ;;  %v3784_v19 = vld [vmem:[#allocation5 + $0x80] sm:$0xf0]  ;;  %v3576_v21 = vld [vmem:[#allocation5 + $0x84] sm:$0xf0]  ;;  %v3582_v22 = vld [vmem:[#allocation5 + $0x80] sm:$0xf] }
  0x23   :  { %v3785_v23 = vld [vmem:[#allocation5 + $0x88] sm:$0xf0]  ;;  %v3575_v24 = vor.u32 %v3784_v19, %v3574_v18  ;;  %v3579_v25 = vor.u32 %v3783_v20, %v3576_v21  ;;  %v3562_v27 = vld [vmem:[#allocation5 + $0x60] sm:$0xf]  ;;  %v3780_v29 = vld [vmem:[#allocation5 + $0x64] sm:$0xf] }
  0x24   :  { %393 = vmatpush.bf16.msra.mxu0 %v3587_v12  ;;  %v3583_v26 = vor.u32 %v3785_v23, %v3582_v22  ;;  %v3781_v28 = vld [vmem:[#allocation5 + $0x68] sm:$0xf0]  ;;  %v3564_v30 = vld [vmem:[#allocation5 + $0x6c] sm:$0xf0]  ;;  %v3570_v31 = vld [vmem:[#allocation5 + $0x68] sm:$0xf] }
  0x25   :  { %562 = vmatpush.bf16.msra.mxu1 %v3591_v16  ;;  %v3782_v32 = vld [vmem:[#allocation5 + $0x70] sm:$0xf0]  ;;  %v3563_v33 = vor.u32 %v3781_v28, %v3562_v27  ;;  %v3567_v34 = vor.u32 %v3780_v29, %v3564_v30  ;;  %v3550_v36 = vld [vmem:[#allocation5 + $0x48] sm:$0xf]  ;;  %v3777_v38 = vld [vmem:[#allocation5 + $0x4c] sm:$0xf] }
  0x26   :  { %731 = vmatpush.bf16.msra.mxu2 %v3595_v17  ;;  %v3571_v35 = vor.u32 %v3782_v32, %v3570_v31  ;;  %v3778_v37 = vld [vmem:[#allocation5 + $0x50] sm:$0xf0]  ;;  %v3552_v39 = vld [vmem:[#allocation5 + $0x54] sm:$0xf0]  ;;  %v3558_v40 = vld [vmem:[#allocation5 + $0x50] sm:$0xf] }
  0x27   :  { %v3779_v41 = vld [vmem:[#allocation5 + $0x58] sm:$0xf0]  ;;  %v3551_v42 = vor.u32 %v3778_v37, %v3550_v36  ;;  %v3538_v43 = vld [vmem:[#allocation5 + $0x30] sm:$0xf]  ;;  %v3555_v44 = vor.u32 %v3777_v38, %v3552_v39  ;;  %v3774_v47 = vld [vmem:[#allocation5 + $0x34] sm:$0xf]  ;;  %v119_v38 = vlaneseq }
  0x28   :  { %394 = vmatpush.bf16.msra.mxu0 %v3575_v24  ;;  %v3559_v45 = vor.u32 %v3779_v41, %v3558_v40  ;;  %v3775_v46 = vld [vmem:[#allocation5 + $0x38] sm:$0xf0]  ;;  %v3540_v48 = vld [vmem:[#allocation5 + $0x3c] sm:$0xf0]  ;;  %v3546_v49 = vld [vmem:[#allocation5 + $0x38] sm:$0xf] }
  0x29   :  { %563 = vmatpush.bf16.msra.mxu1 %v3579_v25  ;;  %v3776_v50 = vld [vmem:[#allocation5 + $0x40] sm:$0xf0]  ;;  %v3539_v51 = vor.u32 %v3775_v46, %v3538_v43  ;;  %v3543_v52 = vor.u32 %v3774_v47, %v3540_v48  ;;  %v3526_v54 = vld [vmem:[#allocation5 + $0x18] sm:$0xf]  ;;  %v3771_v56 = vld [vmem:[#allocation5 + $0x1c] sm:$0xf] }
  0x2a   :  { %732 = vmatpush.bf16.msra.mxu2 %v3583_v26  ;;  %v3547_v53 = vor.u32 %v3776_v50, %v3546_v49  ;;  %v3772_v55 = vld [vmem:[#allocation5 + $0x20] sm:$0xf0]  ;;  %v3528_v57 = vld [vmem:[#allocation5 + $0x24] sm:$0xf0]  ;;  %v3534_v58 = vld [vmem:[#allocation5 + $0x20] sm:$0xf] }
  0x2b   :  { %v3773_v59 = vld [vmem:[#allocation5 + $0x28] sm:$0xf0]  ;;  %v3527_v60 = vor.u32 %v3772_v55, %v3526_v54  ;;  %v3531_v61 = vor.u32 %v3771_v56, %v3528_v57  ;;  %v3514_v63 = vld [vmem:[#allocation5] sm:$0xf]  ;;  %v3768_v1 = vld [vmem:[#allocation5 + $0x4] sm:$0xf] }
  0x2c   :  { %395 = vmatpush.bf16.msra.mxu0 %v3563_v33  ;;  %v3535_v62 = vor.u32 %v3773_v59, %v3534_v58  ;;  %v3769_v0 = vld [vmem:[#allocation5 + $0x8] sm:$0xf0]  ;;  %v3516_v2 = vld [vmem:[#allocation5 + $0xc] sm:$0xf0]  ;;  %v3522_v3 = vld [vmem:[#allocation5 + $0x8] sm:$0xf] }
  0x2d   :  { %564 = vmatpush.bf16.msra.mxu1 %v3567_v34  ;;  %v3770_v4 = vld [vmem:[#allocation5 + $0x10] sm:$0xf0]  ;;  %v3515_v5 = vor.u32 %v3769_v0, %v3514_v63  ;;  %v128_v6 = vld [vmem:[#allocation2] sm:$0xff]  ;;  %v129_v7 = vld [vmem:[#allocation2 + $0x8] sm:$0xff]  ;;  %v3519_v8 = vor.u32 %v3768_v1, %v3516_v2  ;;  %v4127_v41 = vshrl.u32 %v119_v38, 7  ;;  %vm2431_vm7 = vcmask 1041409  }
  0x2e   :  { %733 = vmatpush.bf16.msra.mxu2 %v3571_v35  ;;  %v3523_v9 = vor.u32 %v3770_v4, %v3522_v3  ;;  %v192_v10 = vpack.c.bf16 %v129_v7, %v128_v6  ;;  %v130_v11 = vld [vmem:[#allocation2 + $0x10] sm:$0xff]  ;;  %v131_v12 = vld [vmem:[#allocation2 + $0x18] sm:$0xff]  ;;  %v132_v14 = vld [vmem:[#allocation2 + $0x20] sm:$0xff]  ;;  %vm2433_vm8 = vcmask 1042434   ;;  %vm2435_vm9 = vcmask 1043459   ;;  %s3496_s1 = sshll.u32 %s8091_s7, 4  ;;  %s3497_s1 = int_to_ptr.hbm [resolvable:$true] %s3496_s1 }
  0x2f   :  { %v193_v13 = vpack.c.bf16 %v131_v12, %v130_v11  ;;  %v133_v15 = vld [vmem:[#allocation2 + $0x28] sm:$0xff]  ;;  %v134_v17 = vld [vmem:[#allocation2 + $0x30] sm:$0xff]  ;;  %v135_v18 = vld [vmem:[#allocation2 + $0x38] sm:$0xff]  ;;  %vm126_vm0 = vcmp.eq.s32.totalorder %v4127_v41, 0  ;;  %vm127_vm1 = vcmp.eq.s32.totalorder %v4127_v41, 7  ;;  %vm963_vm3 = vcmp.lt.s32.totalorder %v4127_v41, 1 }
  0x30   :  { %396 = vmatpush.bf16.msra.mxu0 %v3551_v42  ;;  %v194_v16 = vpack.c.bf16 %v133_v15, %v132_v14  ;;  %v195_v19 = vpack.c.bf16 %v135_v18, %v134_v17  ;;  %v136_v20 = vld [vmem:[#allocation2 + $0x40] sm:$0xff]  ;;  %v137_v21 = vld [vmem:[#allocation2 + $0x48] sm:$0xff]  ;;  %v138_v23 = vld [vmem:[#allocation2 + $0x50] sm:$0xff]  ;;  %v4129_v42 = vand.u32 127, %v119_v38  ;;  %vm1158_vm4 = vcmp.lt.s32.totalorder %v4127_v41, 7 }
  0x31   :  { %565 = vmatpush.bf16.msra.mxu1 %v3555_v44  ;;  %v196_v22 = vpack.c.bf16 %v137_v21, %v136_v20  ;;  %v139_v24 = vld [vmem:[#allocation2 + $0x58] sm:$0xff]  ;;  %v140_v26 = vld [vmem:[#allocation2 + $0x60] sm:$0xff]  ;;  %v141_v27 = vld [vmem:[#allocation2 + $0x68] sm:$0xff]  ;;  %vm2437_vm10 = vcmask 1044484   ;;  %vm2439_vm11 = vcmask 1045509   ;;  %vm2441_vm12 = vcmask 1046534  }
  0x32   :  { %734 = vmatpush.bf16.msra.mxu2 %v3559_v45  ;;  %v197_v25 = vpack.c.bf16 %v139_v24, %v138_v23  ;;  %v198_v28 = vpack.c.bf16 %v141_v27, %v140_v26  ;;  %v142_v29 = vld [vmem:[#allocation2 + $0x70] sm:$0xff]  ;;  %v143_v30 = vld [vmem:[#allocation2 + $0x78] sm:$0xff]  ;;  %v144_v32 = vld [vmem:[#allocation2 + $0x80] sm:$0xff]  ;;  %vm123_vm2 = vcmp.lt.s32.totalorder %v4129_v42, 96  ;;  %vm122_vm5 = vcmp.lt.s32.totalorder %v4129_v42, 64 }
  0x33   :  { %v199_v31 = vpack.c.bf16 %v143_v30, %v142_v29  ;;  %v145_v33 = vld [vmem:[#allocation2 + $0x88] sm:$0xff]  ;;  %v256_v34 = vld [vmem:[#allocation7] sm:$0x7]  ;;  %v146_v59 = vld [vmem:[#allocation2 + $0x90] sm:$0xff]  ;;  %vm121_vm6 = vcmp.lt.s32.totalorder %v4129_v42, 32  ;;  %vm2443_vm13 = vcmask 1047559  }
  0x34   :  { %397 = vmatpush.bf16.msra.mxu0 %v3539_v51  ;;  %v200_v35 = vpack.c.bf16 %v145_v33, %v144_v32  ;;  %v4123_v39 = vperm.slane %v256_v34, 0  ;;  %v4125_v40 = vperm.slane %v256_v34, 1  ;;  %v3799_v11 = vld [vmem:[#allocation8 + $0x38] sm:$0xff] }
  0x35   :  { %566 = vmatpush.bf16.msra.mxu1 %v3543_v52 }
  0x36   :  { %735 = vmatpush.bf16.msra.mxu2 %v3547_v53 }
  0x38   :  { %398 = vmatpush.bf16.msra.mxu0 %v3527_v60  ;;  %v147_v60 = vld [vmem:[#allocation2 + $0x98] sm:$0xff] }
  0x39   :  { %567 = vmatpush.bf16.msra.mxu1 %v3531_v61  ;;  %v201_v6 = vpack.c.bf16 %v147_v60, %v146_v59 }
  0x3a   :  { %736 = vmatpush.bf16.msra.mxu2 %v3535_v62 }
  0x3c   :  { %399 = vmatpush.bf16.msra.mxu0 %v3515_v5 }
  0x3d   :  { %568 = vmatpush.bf16.msra.mxu1 %v3519_v8 }
  0x3e   :  { %737 = vmatpush.bf16.msra.mxu2 %v3523_v9 }
  0x3f   :  { %400 = vmatmul.bf16.vlgmr.msra.gmra.mxu0 %v192_v10 }
  0x40   :  { %569 = vmatmul.bf16.vlgmr.msra.gmra.mxu1 %v192_v10  ;;  %2495 = vmatpush.bf16.msrb.mxu0 %v3799_v11 }
  0x41   :  { %738 = vmatmul.bf16.vlgmr.msra.gmra.mxu2 %v192_v10 }
  0x4f   :  { %405 = vmatmul.bf16.gmra.mxu0 %v193_v13 }
  0x50   :  { %574 = vmatmul.bf16.gmra.mxu1 %v193_v13 }
  0x51   :  { %743 = vmatmul.bf16.gmra.mxu2 %v193_v13 }
  0x5f   :  { %410 = vmatmul.bf16.gmra.mxu0 %v194_v16 }
  0x60   :  { %579 = vmatmul.bf16.gmra.mxu1 %v194_v16 }
  0x61   :  { %748 = vmatmul.bf16.gmra.mxu2 %v194_v16 }
  0x6f   :  { %415 = vmatmul.bf16.gmra.mxu0 %v195_v19 }
  0x70   :  { %584 = vmatmul.bf16.gmra.mxu1 %v195_v19 }
  0x71   :  { %753 = vmatmul.bf16.gmra.mxu2 %v195_v19 }
  0x7f   :  { %420 = vmatmul.bf16.gmra.mxu0 %v196_v22 }
  0x80   :  { %589 = vmatmul.bf16.gmra.mxu1 %v196_v22 }
  0x81   :  { %758 = vmatmul.bf16.gmra.mxu2 %v196_v22 }
  0x8f   :  { %425 = vmatmul.bf16.gmra.mxu0 %v197_v25 }
  0x90   :  { %594 = vmatmul.bf16.gmra.mxu1 %v197_v25 }
  0x91   :  { %763 = vmatmul.bf16.gmra.mxu2 %v197_v25 }
  0x9f   :  { %430 = vmatmul.bf16.gmra.mxu0 %v198_v28 }
  0xa0   :  { %599 = vmatmul.bf16.gmra.mxu1 %v198_v28 }
  0xa1   :  { %768 = vmatmul.bf16.gmra.mxu2 %v198_v28 }
  0xaf   :  { %435 = vmatmul.bf16.gmra.mxu0 %v199_v31 }
  0xb0   :  { %604 = vmatmul.bf16.gmra.mxu1 %v199_v31 }
  0xb1   :  { %773 = vmatmul.bf16.gmra.mxu2 %v199_v31 }
  0xbc   :  { %v401_v36 = vpop.f32.mrf.mxu0 }
  0xbd   :  { %v570_v37 = vpop.f32.mrf.mxu1  ;;  %v4132_v43 = vadd.f32 %v401_v36, %v4123_v39 }
  0xbe   :  { %v4135_v44 = vadd.f32 %v570_v37, %v4125_v40 }
  0xbf   :  { %440 = vmatmul.bf16.gmra.mxu0 %v200_v35  ;;  %8298 = vst [vmem:[#allocation19_spill] sm:$0xff] %v4132_v43  ;;  %v8095_v49 = vrot.slane %v4132_v43, 7  ;;  %v8094_v51 = vrot.slane %v4132_v43, 1 }
  0xc0   :  { %609 = vmatmul.bf16.gmra.mxu1 %v200_v35  ;;  %8299 = vst [vmem:[#allocation20_spill] sm:$0xff] %v4135_v44  ;;  %v8093_v52 = vrot.slane %v4135_v44, 7  ;;  %v8092_v55 = vrot.slane %v4135_v44, 1 }
  0xc1   :  { %778 = vmatmul.bf16.gmra.mxu2 %v200_v35 }
  0xc4   :  { %v4137_v45 = vpop.f32.mrf.mxu2  ;;  %v403_v46 = vpop.f32.mrf.mxu0 }
  0xc5   :  { %v4142_v47 = vadd.f32 %v403_v46, %v4123_v39  ;;  %v572_v48 = vpop.f32.mrf.mxu1 }
  0xc6   :  { %v573_v50 = vadd.f32 %v572_v48, %v4125_v40 }
  0xc7   :  { %8300 = vst [vmem:[#allocation21_spill] sm:$0xff] %v4142_v47  ;;  %v900_v53 = vrot.slane %v4142_v47, 7  ;;  %v1095_v54 = vrot.slane %v4142_v47, 1 }
  0xc8   :  { %v1488_v56 = vrot.slane %v573_v50, 7  ;;  %v1680_v57 = vrot.slane %v573_v50, 1  ;;  %v1871_v58 = vsel %vm123_vm2, %v4135_v44, %v573_v50 }
  0xc9   :  { %v1026_v61 = vsel %vm963_vm3, %v8095_v49, %v900_v53  ;;  %v1221_v62 = vsel %vm1158_vm4, %v8094_v51, %v1095_v54 }
  0xca   :  { %v1031_v63 = vsel %vm126_vm0, %v4142_v47, %v1026_v61  ;;  %v4172_v0 = vsel %vm127_vm1, %v4132_v43, %v1221_v62  ;;  %v1613_v1 = vsel %vm963_vm3, %v8093_v52, %v1488_v56  ;;  %v1805_v2 = vsel %vm1158_vm4, %v8092_v55, %v1680_v57  ;;  %v157_v55 = vld [vmem:[#allocation2 + $0xe8] sm:$0xff] }
  0xcb   :  { %8301 = vst [vmem:[#allocation22_spill] sm:$0xff] %v4172_v0  ;;  %v1616_v3 = vsel %vm126_vm0, %v573_v50, %v1613_v1  ;;  %v1807_v4 = vsel %vm127_vm1, %v4135_v44, %v1805_v2 }
  0xcc   :  { %v4187_v5 = vpop.f32.mrf.mxu2  ;;  %v4191_v7 = vsel %vm122_vm5, %v1807_v4, %v1871_v58  ;;  %v406_v8 = vpop.f32.mrf.mxu0 }
  0xcd   :  { %8302 = vst [vmem:[#allocation23_spill] sm:$0xff] %v4191_v7  ;;  %v4194_v9 = vadd.f32 %v406_v8, %v4123_v39  ;;  %v575_v10 = vpop.f32.mrf.mxu1 }
  0xce   :  { %v576_v12 = vadd.f32 %v575_v10, %v4125_v40 }
  0xcf   :  { %v901_v13 = vrot.slane %v4194_v9, 7  ;;  %v1096_v14 = vrot.slane %v4194_v9, 1  ;;  %445 = vmatmul.bf16.gmra.mxu0 %v201_v6 }
  0xd0   :  { %v1489_v15 = vrot.slane %v576_v12, 7  ;;  %v1681_v16 = vrot.slane %v576_v12, 1  ;;  %v1872_v17 = vsel %vm123_vm2, %v4135_v44, %v576_v12  ;;  %614 = vmatmul.bf16.gmra.mxu1 %v201_v6 }
  0xd1   :  { %783 = vmatmul.bf16.gmra.mxu2 %v201_v6  ;;  %v1025_v18 = vsel %vm963_vm3, %v900_v53, %v901_v13  ;;  %v1220_v19 = vsel %vm1158_vm4, %v1095_v54, %v1096_v14  ;;  %v148_v53 = vld [vmem:[#allocation2 + $0xa0] sm:$0xff]  ;;  %v149_v54 = vld [vmem:[#allocation2 + $0xa8] sm:$0xff] }
  0xd2   :  { %v1032_v20 = vsel %vm126_vm0, %v4194_v9, %v1025_v18  ;;  %v1226_v21 = vsel %vm127_vm1, %v4142_v47, %v1220_v19  ;;  %v1612_v22 = vsel %vm963_vm3, %v1488_v56, %v1489_v15  ;;  %v1804_v23 = vsel %vm1158_vm4, %v1680_v57, %v1681_v16 }
  0xd3   :  { %v1292_v24 = vsel %vm123_vm2, %v1031_v63, %v1226_v21  ;;  %v1617_v25 = vsel %vm126_vm0, %v576_v12, %v1612_v22  ;;  %v1808_v26 = vsel %vm127_vm1, %v573_v50, %v1804_v23  ;;  %v202_v2 = vpack.c.bf16 %v149_v54, %v148_v53 }
  0xd4   :  { %v4223_v27 = vpop.f32.mrf.mxu2  ;;  %v1358_v28 = vsel %vm122_vm5, %v4194_v9, %v1292_v24  ;;  %v1936_v29 = vsel %vm122_vm5, %v1808_v26, %v1872_v17  ;;  %v408_v30 = vpop.f32.mrf.mxu0 }
  0xd5   :  { %v4233_v31 = vsel %vm121_vm6, %v4132_v43, %v1358_v28  ;;  %v4237_v32 = vsel %vm121_vm6, %v1616_v3, %v1936_v29  ;;  %v4240_v33 = vadd.f32 %v408_v30, %v4123_v39  ;;  %v577_v34 = vpop.f32.mrf.mxu1 }
  0xd6   :  { %8303 = vst [vmem:[#allocation24_spill] sm:$0xff] %v4233_v31  ;;  %v578_v35 = vadd.f32 %v577_v34, %v4125_v40 }
  0xd7   :  { %8304 = vst [vmem:[#allocation25_spill] sm:$0xff] %v4237_v32  ;;  %v902_v36 = vrot.slane %v4240_v33, 7  ;;  %v1097_v37 = vrot.slane %v4240_v33, 1 }
  0xd8   :  { %v1490_v38 = vrot.slane %v578_v35, 7  ;;  %v1682_v46 = vrot.slane %v578_v35, 1  ;;  %v1873_v48 = vsel %vm123_vm2, %v573_v50, %v578_v35 }
  0xd9   :  { %v1024_v56 = vsel %vm963_vm3, %v901_v13, %v902_v36  ;;  %v1219_v57 = vsel %vm1158_vm4, %v1096_v14, %v1097_v37 }
  0xda   :  { %v1033_v58 = vsel %vm126_vm0, %v4240_v33, %v1024_v56  ;;  %v1227_v59 = vsel %vm127_vm1, %v4194_v9, %v1219_v57  ;;  %v1611_v60 = vsel %vm963_vm3, %v1489_v15, %v1490_v38  ;;  %v1803_v50 = vsel %vm1158_vm4, %v1681_v16, %v1682_v46 }
  0xdb   :  { %v1293_v61 = vsel %vm123_vm2, %v1032_v20, %v1227_v59  ;;  %v1618_v62 = vsel %vm126_vm0, %v578_v35, %v1611_v60  ;;  %v1809_v63 = vsel %vm127_vm1, %v576_v12, %v1803_v50  ;;  %v150_v59 = vld [vmem:[#allocation2 + $0xb0] sm:$0xff]  ;;  %v151_v60 = vld [vmem:[#allocation2 + $0xb8] sm:$0xff] }
  0xdc   :  { %v4267_v1 = vpop.f32.mrf.mxu2  ;;  %v1359_v3 = vsel %vm122_vm5, %v4240_v33, %v1293_v61  ;;  %v1937_v4 = vsel %vm122_vm5, %v1809_v63, %v1873_v48  ;;  %v411_v6 = vpop.f32.mrf.mxu0 }
  0xdd   :  { %v4277_v8 = vsel %vm121_vm6, %v4142_v47, %v1359_v3  ;;  %v4281_v10 = vsel %vm121_vm6, %v1617_v25, %v1937_v4  ;;  %v4284_v11 = vadd.f32 %v411_v6, %v4123_v39  ;;  %v580_v13 = vpop.f32.mrf.mxu1 }
  0xde   :  { %8305 = vst [vmem:[#allocation26_spill] sm:$0xff] %v4277_v8  ;;  %v581_v14 = vadd.f32 %v580_v13, %v4125_v40 }
  0xdf   :  { %8306 = vst [vmem:[#allocation27_spill] sm:$0xff] %v4281_v10  ;;  %v903_v15 = vrot.slane %v4284_v11, 7  ;;  %v1098_v16 = vrot.slane %v4284_v11, 1  ;;  %450 = vmatmul.bf16.gmra.mxu0 %v202_v2 }
  0xe0   :  { %v1491_v17 = vrot.slane %v581_v14, 7  ;;  %v1683_v18 = vrot.slane %v581_v14, 1  ;;  %v1874_v19 = vsel %vm123_vm2, %v576_v12, %v581_v14  ;;  %619 = vmatmul.bf16.gmra.mxu1 %v202_v2 }
  0xe1   :  { %788 = vmatmul.bf16.gmra.mxu2 %v202_v2  ;;  %v1023_v20 = vsel %vm963_vm3, %v902_v36, %v903_v15  ;;  %v1218_v21 = vsel %vm1158_vm4, %v1097_v37, %v1098_v16 }
  0xe2   :  { %v1034_v22 = vsel %vm126_vm0, %v4284_v11, %v1023_v20  ;;  %v1228_v23 = vsel %vm127_vm1, %v4240_v33, %v1218_v21  ;;  %v1610_v24 = vsel %vm963_vm3, %v1490_v38, %v1491_v17  ;;  %v1802_v12 = vsel %vm1158_vm4, %v1682_v46, %v1683_v18 }
  0xe3   :  { %v1294_v25 = vsel %vm123_vm2, %v1033_v58, %v1228_v23  ;;  %v1619_v26 = vsel %vm126_vm0, %v581_v14, %v1610_v24  ;;  %v1810_v28 = vsel %vm127_vm1, %v578_v35, %v1802_v12 }
  0xe4   :  { %v4311_v29 = vpop.f32.mrf.mxu2  ;;  %v1360_v30 = vsel %vm122_vm5, %v4284_v11, %v1294_v25  ;;  %v1938_v34 = vsel %vm122_vm5, %v1810_v28, %v1874_v19  ;;  %v413_v36 = vpop.f32.mrf.mxu0 }
  0xe5   :  { %v4321_v37 = vsel %vm121_vm6, %v4194_v9, %v1360_v30  ;;  %v4325_v38 = vsel %vm121_vm6, %v1618_v62, %v1938_v34  ;;  %v4328_v46 = vadd.f32 %v413_v36, %v4123_v39  ;;  %v582_v48 = vpop.f32.mrf.mxu1 }
  0xe6   :  { %8307 = vst [vmem:[#allocation28_spill] sm:$0xff] %v4321_v37  ;;  %v583_v53 = vadd.f32 %v582_v48, %v4125_v40 }
  0xe7   :  { %8308 = vst [vmem:[#allocation29_spill] sm:$0xff] %v4325_v38  ;;  %v904_v54 = vrot.slane %v4328_v46, 7  ;;  %v1099_v56 = vrot.slane %v4328_v46, 1 }
  0xe8   :  { %v1492_v57 = vrot.slane %v583_v53, 7  ;;  %v1684_v58 = vrot.slane %v583_v53, 1  ;;  %v1875_v9 = vsel %vm123_vm2, %v578_v35, %v583_v53 }
  0xe9   :  { %v1022_v50 = vsel %vm963_vm3, %v903_v15, %v904_v54  ;;  %v1217_v61 = vsel %vm1158_vm4, %v1098_v16, %v1099_v56  ;;  %v203_v15 = vpack.c.bf16 %v151_v60, %v150_v59 }
  0xea   :  { %v1035_v62 = vsel %vm126_vm0, %v4328_v46, %v1022_v50  ;;  %v1229_v63 = vsel %vm127_vm1, %v4284_v11, %v1217_v61  ;;  %v1609_v2 = vsel %vm963_vm3, %v1491_v17, %v1492_v57  ;;  %v1801_v35 = vsel %vm1158_vm4, %v1683_v18, %v1684_v58 }
  0xeb   :  { %v1295_v3 = vsel %vm123_vm2, %v1034_v22, %v1229_v63  ;;  %v1620_v4 = vsel %vm126_vm0, %v583_v53, %v1609_v2  ;;  %v1811_v6 = vsel %vm127_vm1, %v581_v14, %v1801_v35 }
  0xec   :  { %v4355_v13 = vpop.f32.mrf.mxu2  ;;  %v1361_v16 = vsel %vm122_vm5, %v4328_v46, %v1295_v3  ;;  %v1939_v17 = vsel %vm122_vm5, %v1811_v6, %v1875_v9  ;;  %v416_v18 = vpop.f32.mrf.mxu0 }
  0xed   :  { %v4365_v19 = vsel %vm121_vm6, %v4240_v33, %v1361_v16  ;;  %v4369_v20 = vsel %vm121_vm6, %v1619_v26, %v1939_v17  ;;  %v4372_v21 = vadd.f32 %v416_v18, %v4123_v39  ;;  %v585_v22 = vpop.f32.mrf.mxu1  ;;  %v152_v17 = vld [vmem:[#allocation2 + $0xc0] sm:$0xff]  ;;  %v153_v18 = vld [vmem:[#allocation2 + $0xc8] sm:$0xff] }
  0xee   :  { %8309 = vst [vmem:[#allocation30_spill] sm:$0xff] %v4365_v19  ;;  %v586_v23 = vadd.f32 %v585_v22, %v4125_v40 }
  0xef   :  { %8310 = vst [vmem:[#allocation31_spill] sm:$0xff] %v4369_v20  ;;  %v905_v24 = vrot.slane %v4372_v21, 7  ;;  %v1100_v12 = vrot.slane %v4372_v21, 1  ;;  %455 = vmatmul.bf16.gmra.mxu0 %v203_v15 }
  0xf0   :  { %v1493_v25 = vrot.slane %v586_v23, 7  ;;  %v1685_v28 = vrot.slane %v586_v23, 1  ;;  %v1876_v33 = vsel %vm123_vm2, %v581_v14, %v586_v23  ;;  %624 = vmatmul.bf16.gmra.mxu1 %v203_v15 }
  0xf1   :  { %793 = vmatmul.bf16.gmra.mxu2 %v203_v15  ;;  %v1021_v26 = vsel %vm963_vm3, %v904_v54, %v905_v24  ;;  %v1216_v30 = vsel %vm1158_vm4, %v1099_v56, %v1100_v12 }
  0xf2   :  { %v1036_v34 = vsel %vm126_vm0, %v4372_v21, %v1021_v26  ;;  %v1230_v36 = vsel %vm127_vm1, %v4328_v46, %v1216_v30  ;;  %v1608_v48 = vsel %vm963_vm3, %v1492_v57, %v1493_v25  ;;  %v1800_v14 = vsel %vm1158_vm4, %v1684_v58, %v1685_v28 }
  0xf3   :  { %v1296_v54 = vsel %vm123_vm2, %v1035_v62, %v1230_v36  ;;  %v1621_v56 = vsel %vm126_vm0, %v586_v23, %v1608_v48  ;;  %v1812_v9 = vsel %vm127_vm1, %v583_v53, %v1800_v14  ;;  %v204_v14 = vpack.c.bf16 %v153_v18, %v152_v17 }
  0xf4   :  { %v4399_v59 = vpop.f32.mrf.mxu2  ;;  %v1362_v60 = vsel %vm122_vm5, %v4372_v21, %v1296_v54  ;;  %v1940_v57 = vsel %vm122_vm5, %v1812_v9, %v1876_v33  ;;  %v418_v50 = vpop.f32.mrf.mxu0 }
  0xf5   :  { %v4409_v58 = vsel %vm121_vm6, %v4284_v11, %v1362_v60  ;;  %v4413_v61 = vsel %vm121_vm6, %v1620_v4, %v1940_v57  ;;  %v419_v62 = vadd.f32 %v418_v50, %v4123_v39  ;;  %v587_v63 = vpop.f32.mrf.mxu1 }
  0xf6   :  { %8311 = vst [vmem:[#allocation32_spill] sm:$0xff] %v4409_v58  ;;  %v588_v2 = vadd.f32 %v587_v63, %v4125_v40 }
  0xf7   :  { %8312 = vst [vmem:[#allocation33_spill] sm:$0xff] %v4413_v61  ;;  %v906_v35 = vrot.slane %v419_v62, 7  ;;  %v1101_v3 = vrot.slane %v419_v62, 1 }
  0xf8   :  { %v1494_v6 = vrot.slane %v588_v2, 7  ;;  %v1686_v15 = vrot.slane %v588_v2, 1  ;;  %v1877_v16 = vsel %vm123_vm2, %v583_v53, %v588_v2  ;;  %v1878_v11 = vsel %vm123_vm2, %v586_v23, %v588_v2 }
  0xf9   :  { %v1020_v4 = vsel %vm963_vm3, %v905_v24, %v906_v35  ;;  %v1215_v22 = vsel %vm1158_vm4, %v1100_v12, %v1101_v3 }
  0xfa   :  { %v1037_v33 = vsel %vm126_vm0, %v419_v62, %v1020_v4  ;;  %v1231_v26 = vsel %vm127_vm1, %v4372_v21, %v1215_v22  ;;  %v1607_v53 = vsel %vm963_vm3, %v1493_v25, %v1494_v6  ;;  %v1799_v30 = vsel %vm1158_vm4, %v1685_v28, %v1686_v15 }
  0xfb   :  { %v1297_v36 = vsel %vm123_vm2, %v1036_v34, %v1231_v26  ;;  %v1622_v24 = vsel %vm126_vm0, %v588_v2, %v1607_v53  ;;  %v1813_v12 = vsel %vm127_vm1, %v586_v23, %v1799_v30 }
  0xfc   :  { %v4440_v48 = vpop.f32.mrf.mxu2  ;;  %v1363_v54 = vsel %vm122_vm5, %v419_v62, %v1297_v36  ;;  %v1941_v25 = vsel %vm122_vm5, %v1813_v12, %v1877_v16  ;;  %v421_v9 = vpop.f32.mrf.mxu0 }
  0xfd   :  { %v4449_v28 = vsel %vm121_vm6, %v4328_v46, %v1363_v54  ;;  %v4453_v34 = vsel %vm121_vm6, %v1621_v56, %v1941_v25  ;;  %v4456_v23 = vadd.f32 %v421_v9, %v4123_v39  ;;  %v590_v60 = vpop.f32.mrf.mxu1 }
  0xfe   :  { %8313 = vst [vmem:[#allocation34_spill] sm:$0xff] %v4449_v28  ;;  %v591_v57 = vadd.f32 %v590_v60, %v4125_v40 }
  0xff   :  { %8314 = vst [vmem:[#allocation35_spill] sm:$0xff] %v4453_v34  ;;  %v907_v50 = vrot.slane %v4456_v23, 7  ;;  %v1102_v63 = vrot.slane %v4456_v23, 1  ;;  %460 = vmatmul.bf16.gmra.mxu0 %v204_v14  ;;  %v159_v34 = vld [vmem:[#allocation2 + $0xf8] sm:$0xff] }
 0x100   :  { %v1495_v16 = vrot.slane %v591_v57, 7  ;;  %v1687_v17 = vrot.slane %v591_v57, 1  ;;  %629 = vmatmul.bf16.gmra.mxu1 %v204_v14 }
 0x101   :  { %798 = vmatmul.bf16.gmra.mxu2 %v204_v14  ;;  %v1019_v46 = vsel %vm963_vm3, %v906_v35, %v907_v50  ;;  %v1214_v56 = vsel %vm1158_vm4, %v1101_v3, %v1102_v63 }
 0x102   :  { %v1038_v18 = vsel %vm126_vm0, %v4456_v23, %v1019_v46  ;;  %v1232_v4 = vsel %vm127_vm1, %v419_v62, %v1214_v56  ;;  %v1606_v22 = vsel %vm963_vm3, %v1494_v6, %v1495_v16  ;;  %v1798_v35 = vsel %vm1158_vm4, %v1686_v15, %v1687_v17  ;;  %v155_v46 = vld [vmem:[#allocation2 + $0xd8] sm:$0xff] }
 0x103   :  { %v1298_v26 = vsel %vm123_vm2, %v1037_v33, %v1232_v4  ;;  %v1623_v53 = vsel %vm126_vm0, %v591_v57, %v1606_v22  ;;  %v1814_v36 = vsel %vm127_vm1, %v588_v2, %v1798_v35 }
 0x104   :  { %v4478_v3 = vpop.f32.mrf.mxu2  ;;  %v1364_v30 = vsel %vm122_vm5, %v419_v62, %v1298_v26  ;;  %v423_v12 = vpop.f32.mrf.mxu0  ;;  %v1942_v33 = vsel %vm122_vm5, %v1814_v36, %v1878_v11  ;;  %v154_v11 = vld [vmem:[#allocation2 + $0xd0] sm:$0xff] }
 0x105   :  { %v4487_v6 = vsel %vm121_vm6, %v4372_v21, %v1364_v30  ;;  %v4492_v14 = vadd.f32 %v423_v12, %v4123_v39  ;;  %v592_v15 = vpop.f32.mrf.mxu1  ;;  %v4496_v54 = vsel %vm121_vm6, %v1622_v24, %v1942_v33  ;;  %v205_v36 = vpack.c.bf16 %v155_v46, %v154_v11 }
 0x106   :  { %8315 = vst [vmem:[#allocation36_spill] sm:$0xff] %v4487_v6  ;;  %v593_v62 = vadd.f32 %v592_v15, %v4125_v40 }
 0x107   :  { %8316 = vst [vmem:[#allocation37_spill] sm:$0xff] %v4496_v54  ;;  %v908_v2 = vrot.slane %v4492_v14, 7  ;;  %v1103_v25 = vrot.slane %v4492_v14, 1 }
 0x108   :  { %v1496_v9 = vrot.slane %v593_v62, 7  ;;  %v1688_v21 = vrot.slane %v593_v62, 1  ;;  %v1879_v60 = vsel %vm123_vm2, %v591_v57, %v593_v62 }
 0x109   :  { %v1018_v56 = vsel %vm963_vm3, %v907_v50, %v908_v2  ;;  %v1213_v24 = vsel %vm1158_vm4, %v1102_v63, %v1103_v25 }
 0x10a   :  { %v1039_v4 = vsel %vm126_vm0, %v4492_v14, %v1018_v56  ;;  %v1233_v22 = vsel %vm127_vm1, %v4456_v23, %v1213_v24  ;;  %v1605_v26 = vsel %vm963_vm3, %v1495_v16, %v1496_v9  ;;  %v1797_v63 = vsel %vm1158_vm4, %v1687_v17, %v1688_v21  ;;  %v3798_v24 = vld [vmem:[#allocation8 + $0x30] sm:$0xff] }
 0x10b   :  { %v1299_v35 = vsel %vm123_vm2, %v1038_v18, %v1233_v22  ;;  %v1624_v50 = vsel %vm126_vm0, %v593_v62, %v1605_v26  ;;  %v1815_v33 = vsel %vm127_vm1, %v591_v57, %v1797_v63  ;;  %2496 = vmatpush.bf16.msrb.mxu0 %v3798_v24 }
 0x10c   :  { %v4521_v30 = vpop.f32.mrf.mxu2  ;;  %v1365_v12 = vsel %vm122_vm5, %v4492_v14, %v1299_v35  ;;  %v426_v16 = vpop.f32.mrf.mxu0  ;;  %v1943_v15 = vsel %vm122_vm5, %v1815_v33, %v1879_v60 }
 0x10d   :  { %v4531_v18 = vsel %vm121_vm6, %v4456_v23, %v1365_v12  ;;  %v4536_v17 = vadd.f32 %v426_v16, %v4123_v39  ;;  %v595_v11 = vpop.f32.mrf.mxu1  ;;  %v4540_v46 = vsel %vm121_vm6, %v1623_v53, %v1943_v15 }
 0x10e   :  { %8317 = vst [vmem:[#allocation38_spill] sm:$0xff] %v4531_v18  ;;  %v596_v56 = vadd.f32 %v595_v11, %v4125_v40 }
 0x10f   :  { %8318 = vst [vmem:[#allocation39_spill] sm:$0xff] %v4540_v46  ;;  %v909_v22 = vrot.slane %v4536_v17, 7  ;;  %v1104_v26 = vrot.slane %v4536_v17, 1  ;;  %465 = vmatmul.bf16.gmra.mxu0 %v205_v36 }
 0x110   :  { %v1497_v35 = vrot.slane %v596_v56, 7  ;;  %v1689_v63 = vrot.slane %v596_v56, 1  ;;  %v1880_v60 = vsel %vm123_vm2, %v591_v57, %v596_v56  ;;  %634 = vmatmul.bf16.gmra.mxu1 %v205_v36 }
 0x111   :  { %803 = vmatmul.bf16.gmra.mxu2 %v205_v36  ;;  %v1017_v12 = vsel %vm963_vm3, %v908_v2, %v909_v22  ;;  %v1212_v53 = vsel %vm1158_vm4, %v1103_v25, %v1104_v26 }
 0x112   :  { %v1040_v33 = vsel %vm126_vm0, %v4536_v17, %v1017_v12  ;;  %v1234_v16 = vsel %vm127_vm1, %v4492_v14, %v1212_v53  ;;  %v1604_v57 = vsel %vm963_vm3, %v1496_v9, %v1497_v35  ;;  %v1796_v36 = vsel %vm1158_vm4, %v1688_v21, %v1689_v63 }
 0x113   :  { %v1300_v2 = vsel %vm123_vm2, %v1039_v4, %v1234_v16  ;;  %v1625_v25 = vsel %vm126_vm0, %v596_v56, %v1604_v57  ;;  %v1816_v15 = vsel %vm127_vm1, %v593_v62, %v1796_v36 }
 0x114   :  { %v4567_v11 = vpop.f32.mrf.mxu2  ;;  %v1366_v24 = vsel %vm122_vm5, %v4536_v17, %v1300_v2  ;;  %v1944_v9 = vsel %vm122_vm5, %v1816_v15, %v1880_v60  ;;  %v428_v12 = vpop.f32.mrf.mxu0 }
 0x115   :  { %v4577_v21 = vsel %vm121_vm6, %v4456_v23, %v1366_v24  ;;  %v4581_v4 = vsel %vm121_vm6, %v1624_v50, %v1944_v9  ;;  %v4584_v53 = vadd.f32 %v428_v12, %v4123_v39  ;;  %v597_v16 = vpop.f32.mrf.mxu1  ;;  %v156_v24 = vld [vmem:[#allocation2 + $0xe0] sm:$0xff] }
 0x116   :  { %8319 = vst [vmem:[#allocation40_spill] sm:$0xff] %v4577_v21  ;;  %v598_v57 = vadd.f32 %v597_v16, %v4125_v40  ;;  %v206_v49 = vpack.c.bf16 %v157_v55, %v156_v24 }
 0x117   :  { %8320 = vst [vmem:[#allocation41_spill] sm:$0xff] %v4581_v4  ;;  %v910_v36 = vrot.slane %v4584_v53, 7  ;;  %v1105_v60 = vrot.slane %v4584_v53, 1 }
 0x118   :  { %v1498_v2 = vrot.slane %v598_v57, 7  ;;  %v1690_v15 = vrot.slane %v598_v57, 1  ;;  %v1881_v23 = vsel %vm123_vm2, %v593_v62, %v598_v57 }
 0x119   :  { %v1016_v50 = vsel %vm963_vm3, %v909_v22, %v910_v36  ;;  %v1211_v9 = vsel %vm1158_vm4, %v1104_v26, %v1105_v60 }
 0x11a   :  { %v1041_v12 = vsel %vm126_vm0, %v4584_v53, %v1016_v50  ;;  %v1235_v16 = vsel %vm127_vm1, %v4536_v17, %v1211_v9  ;;  %v1603_v52 = vsel %vm963_vm3, %v1497_v35, %v1498_v2  ;;  %v1795_v62 = vsel %vm1158_vm4, %v1689_v63, %v1690_v15 }
 0x11b   :  { %v1301_v22 = vsel %vm123_vm2, %v1040_v33, %v1235_v16  ;;  %v1626_v26 = vsel %vm126_vm0, %v598_v57, %v1603_v52  ;;  %v1817_v51 = vsel %vm127_vm1, %v596_v56, %v1795_v62 }
 0x11c   :  { %v4611_v50 = vpop.f32.mrf.mxu2  ;;  %v1367_v9 = vsel %vm122_vm5, %v4584_v53, %v1301_v22  ;;  %v1945_v35 = vsel %vm122_vm5, %v1817_v51, %v1881_v23  ;;  %v431_v63 = vpop.f32.mrf.mxu0 }
 0x11d   :  { %v4621_v33 = vsel %vm121_vm6, %v4492_v14, %v1367_v9  ;;  %v4625_v52 = vsel %vm121_vm6, %v1625_v25, %v1945_v35  ;;  %v4628_v16 = vadd.f32 %v431_v63, %v4123_v39  ;;  %v600_v55 = vpop.f32.mrf.mxu1 }
 0x11e   :  { %8321 = vst [vmem:[#allocation42_spill] sm:$0xff] %v4621_v33  ;;  %v601_v24 = vadd.f32 %v600_v55, %v4125_v40 }
 0x11f   :  { %8322 = vst [vmem:[#allocation43_spill] sm:$0xff] %v4625_v52  ;;  %v911_v62 = vrot.slane %v4628_v16, 7  ;;  %v1106_v51 = vrot.slane %v4628_v16, 1  ;;  %470 = vmatmul.bf16.gmra.mxu0 %v206_v49 }
 0x120   :  { %v1499_v23 = vrot.slane %v601_v24, 7  ;;  %v1691_v22 = vrot.slane %v601_v24, 1  ;;  %v1882_v14 = vsel %vm123_vm2, %v596_v56, %v601_v24  ;;  %639 = vmatmul.bf16.gmra.mxu1 %v206_v49 }
 0x121   :  { %808 = vmatmul.bf16.gmra.mxu2 %v206_v49  ;;  %v1015_v25 = vsel %vm963_vm3, %v910_v36, %v911_v62  ;;  %v1210_v9 = vsel %vm1158_vm4, %v1105_v60, %v1106_v51 }
 0x122   :  { %v1042_v35 = vsel %vm126_vm0, %v4628_v16, %v1015_v25  ;;  %v1236_v63 = vsel %vm127_vm1, %v4584_v53, %v1210_v9  ;;  %v1602_v55 = vsel %vm963_vm3, %v1498_v2, %v1499_v23  ;;  %v1794_v49 = vsel %vm1158_vm4, %v1690_v15, %v1691_v22 }
 0x123   :  { %v1302_v56 = vsel %vm123_vm2, %v1041_v12, %v1236_v63  ;;  %v1627_v36 = vsel %vm126_vm0, %v601_v24, %v1602_v55  ;;  %v1818_v60 = vsel %vm127_vm1, %v598_v57, %v1794_v49 }
 0x124   :  { %v4655_v25 = vpop.f32.mrf.mxu2  ;;  %v1368_v9 = vsel %vm122_vm5, %v4628_v16, %v1302_v56  ;;  %v1946_v2 = vsel %vm122_vm5, %v1818_v60, %v1882_v14  ;;  %v433_v54 = vpop.f32.mrf.mxu0 }
 0x125   :  { %v4665_v15 = vsel %vm121_vm6, %v4536_v17, %v1368_v9  ;;  %v4669_v12 = vsel %vm121_vm6, %v1626_v26, %v1946_v2  ;;  %v4672_v63 = vadd.f32 %v433_v54, %v4123_v39  ;;  %v602_v55 = vpop.f32.mrf.mxu1  ;;  %v158_v9 = vld [vmem:[#allocation2 + $0xf0] sm:$0xff] }
 0x126   :  { %8323 = vst [vmem:[#allocation44_spill] sm:$0xff] %v4665_v15  ;;  %v603_v49 = vadd.f32 %v602_v55, %v4125_v40  ;;  %v207_v58 = vpack.c.bf16 %v159_v34, %v158_v9 }
 0x127   :  { %8324 = vst [vmem:[#allocation45_spill] sm:$0xff] %v4669_v12  ;;  %v912_v56 = vrot.slane %v4672_v63, 7  ;;  %v1107_v14 = vrot.slane %v4672_v63, 1 }
 0x128   :  { %v1500_v60 = vrot.slane %v603_v49, 7  ;;  %v1692_v6 = vrot.slane %v603_v49, 1  ;;  %v1883_v17 = vsel %vm123_vm2, %v598_v57, %v603_v49 }
 0x129   :  { %v1014_v26 = vsel %vm963_vm3, %v911_v62, %v912_v56  ;;  %v1209_v54 = vsel %vm1158_vm4, %v1106_v51, %v1107_v14 }
 0x12a   :  { %v1043_v2 = vsel %vm126_vm0, %v4672_v63, %v1014_v26  ;;  %v1237_v55 = vsel %vm127_vm1, %v4628_v16, %v1209_v54  ;;  %v1601_v28 = vsel %vm963_vm3, %v1499_v23, %v1500_v60  ;;  %v1793_v57 = vsel %vm1158_vm4, %v1691_v22, %v1692_v6 }
 0x12b   :  { %v1303_v62 = vsel %vm123_vm2, %v1042_v35, %v1237_v55  ;;  %v1628_v51 = vsel %vm126_vm0, %v603_v49, %v1601_v28  ;;  %v1819_v61 = vsel %vm127_vm1, %v601_v24, %v1793_v57 }
 0x12c   :  { %v4699_v26 = vpop.f32.mrf.mxu2  ;;  %v1369_v54 = vsel %vm122_vm5, %v4672_v63, %v1303_v62  ;;  %v1947_v23 = vsel %vm122_vm5, %v1819_v61, %v1883_v17  ;;  %v436_v22 = vpop.f32.mrf.mxu0 }
 0x12d   :  { %v4709_v35 = vsel %vm121_vm6, %v4584_v53, %v1369_v54  ;;  %v4713_v28 = vsel %vm121_vm6, %v1627_v36, %v1947_v23  ;;  %v4716_v55 = vadd.f32 %v436_v22, %v4123_v39  ;;  %v605_v34 = vpop.f32.mrf.mxu1 }
 0x12e   :  { %8325 = vst [vmem:[#allocation46_spill] sm:$0xff] %v4709_v35  ;;  %v606_v9 = vadd.f32 %v605_v34, %v4125_v40 }
 0x12f   :  { %8326 = vst [vmem:[#allocation47_spill] sm:$0xff] %v4713_v28  ;;  %v913_v57 = vrot.slane %v4716_v55, 7  ;;  %v1108_v61 = vrot.slane %v4716_v55, 1  ;;  %475 = vmatmul.bf16.gmra.mxu0 %v207_v58 }
 0x130   :  { %v1501_v17 = vrot.slane %v606_v9, 7  ;;  %v1693_v62 = vrot.slane %v606_v9, 1  ;;  %v1884_v53 = vsel %vm123_vm2, %v601_v24, %v606_v9  ;;  %644 = vmatmul.bf16.gmra.mxu1 %v207_v58 }
 0x131   :  { %813 = vmatmul.bf16.gmra.mxu2 %v207_v58  ;;  %v1013_v36 = vsel %vm963_vm3, %v912_v56, %v913_v57  ;;  %v1208_v54 = vsel %vm1158_vm4, %v1107_v14, %v1108_v61 }
 0x132   :  { %v1044_v23 = vsel %vm126_vm0, %v4716_v55, %v1013_v36  ;;  %v1238_v22 = vsel %vm127_vm1, %v4672_v63, %v1208_v54  ;;  %v1600_v34 = vsel %vm963_vm3, %v1500_v60, %v1501_v17  ;;  %v1792_v58 = vsel %vm1158_vm4, %v1692_v6, %v1693_v62 }
 0x133   :  { %v1304_v24 = vsel %vm123_vm2, %v1043_v2, %v1238_v22  ;;  %v1629_v56 = vsel %vm126_vm0, %v606_v9, %v1600_v34  ;;  %v1820_v14 = vsel %vm127_vm1, %v603_v49, %v1792_v58 }
 0x134   :  { %v4743_v36 = vpop.f32.mrf.mxu2  ;;  %v1370_v54 = vsel %vm122_vm5, %v4716_v55, %v1304_v24  ;;  %v1948_v60 = vsel %vm122_vm5, %v1820_v14, %v1884_v53  ;;  %v438_v20 = vpop.f32.mrf.mxu0  ;;  %v160_v14 = vld [vmem:[#allocation2 + $0x100] sm:$0xff] }
 0x135   :  { %v4753_v6 = vsel %vm121_vm6, %v4628_v16, %v1370_v54  ;;  %v4757_v2 = vsel %vm121_vm6, %v1628_v51, %v1948_v60  ;;  %v439_v22 = vadd.f32 %v438_v20, %v4123_v39  ;;  %v607_v34 = vpop.f32.mrf.mxu1  ;;  %v161_v54 = vld [vmem:[#allocation2 + $0x108] sm:$0xff] }
 0x136   :  { %8327 = vst [vmem:[#allocation48_spill] sm:$0xff] %v4753_v6  ;;  %v608_v58 = vadd.f32 %v607_v34, %v4125_v40  ;;  %v208_v8 = vpack.c.bf16 %v161_v54, %v160_v14 }
 0x137   :  { %8328 = vst [vmem:[#allocation49_spill] sm:$0xff] %v4757_v2  ;;  %v914_v38 = vrot.slane %v439_v22, 7  ;;  %v1109_v24 = vrot.slane %v439_v22, 1 }
 0x138   :  { %v1502_v19 = vrot.slane %v608_v58, 7  ;;  %v1694_v10 = vrot.slane %v608_v58, 1  ;;  %v1885_v53 = vsel %vm123_vm2, %v603_v49, %v608_v58  ;;  %v1886_v16 = vsel %vm123_vm2, %v606_v9, %v608_v58 }
 0x139   :  { %v1012_v51 = vsel %vm963_vm3, %v913_v57, %v914_v38  ;;  %v1207_v20 = vsel %vm1158_vm4, %v1108_v61, %v1109_v24 }
 0x13a   :  { %v1045_v60 = vsel %vm126_vm0, %v439_v22, %v1012_v51  ;;  %v1239_v34 = vsel %vm127_vm1, %v4716_v55, %v1207_v20  ;;  %v1599_v49 = vsel %vm963_vm3, %v1501_v17, %v1502_v19  ;;  %v1791_v37 = vsel %vm1158_vm4, %v1693_v62, %v1694_v10 }
 0x13b   :  { %v1305_v32 = vsel %vm123_vm2, %v1044_v23, %v1239_v34  ;;  %v1630_v57 = vsel %vm126_vm0, %v608_v58, %v1599_v49  ;;  %v1821_v61 = vsel %vm127_vm1, %v606_v9, %v1791_v37 }
 0x13c   :  { %v4784_v51 = vpop.f32.mrf.mxu2  ;;  %v1371_v20 = vsel %vm122_vm5, %v439_v22, %v1305_v32  ;;  %v1949_v17 = vsel %vm122_vm5, %v1821_v61, %v1885_v53  ;;  %v441_v7 = vpop.f32.mrf.mxu0 }
 0x13d   :  { %v4793_v62 = vsel %vm121_vm6, %v4672_v63, %v1371_v20  ;;  %v4797_v23 = vsel %vm121_vm6, %v1629_v56, %v1949_v17  ;;  %v4800_v37 = vadd.f32 %v441_v7, %v4123_v39  ;;  %v610_v9 = vpop.f32.mrf.mxu1 }
 0x13e   :  { %8329 = vst [vmem:[#allocation50_spill] sm:$0xff] %v4793_v62  ;;  %v611_v14 = vadd.f32 %v610_v9, %v4125_v40 }
 0x13f   :  { %8330 = vst [vmem:[#allocation51_spill] sm:$0xff] %v4797_v23  ;;  %v915_v32 = vrot.slane %v4800_v37, 7  ;;  %v1110_v53 = vrot.slane %v4800_v37, 1  ;;  %480 = vmatmul.bf16.gmra.mxu0 %v208_v8 }
 0x140   :  { %v1503_v54 = vrot.slane %v611_v14, 7  ;;  %v1695_v34 = vrot.slane %v611_v14, 1  ;;  %649 = vmatmul.bf16.gmra.mxu1 %v208_v8 }
 0x141   :  { %818 = vmatmul.bf16.gmra.mxu2 %v208_v8  ;;  %v1011_v63 = vsel %vm963_vm3, %v914_v38, %v915_v32  ;;  %v1206_v56 = vsel %vm1158_vm4, %v1109_v24, %v1110_v53 }
 0x142   :  { %v1046_v7 = vsel %vm126_vm0, %v4800_v37, %v1011_v63  ;;  %v1240_v49 = vsel %vm127_vm1, %v439_v22, %v1206_v56  ;;  %v1598_v61 = vsel %vm963_vm3, %v1502_v19, %v1503_v54  ;;  %v1790_v38 = vsel %vm1158_vm4, %v1694_v10, %v1695_v34 }
 0x143   :  { %v1306_v20 = vsel %vm123_vm2, %v1045_v60, %v1240_v49  ;;  %v1631_v8 = vsel %vm126_vm0, %v611_v14, %v1598_v61  ;;  %v1822_v9 = vsel %vm127_vm1, %v608_v58, %v1790_v38  ;;  %v162_v38 = vld [vmem:[#allocation2 + $0x110] sm:$0xff] }
 0x144   :  { %v4822_v24 = vpop.f32.mrf.mxu2  ;;  %v1372_v17 = vsel %vm122_vm5, %v439_v22, %v1306_v20  ;;  %v443_v63 = vpop.f32.mrf.mxu0  ;;  %v1950_v60 = vsel %vm122_vm5, %v1822_v9, %v1886_v16 }
 0x145   :  { %8331 = vst [vmem:[#allocation52_spill] sm:$0xff] %v4822_v24  ;;  %v4831_v19 = vsel %vm121_vm6, %v4716_v55, %v1372_v17  ;;  %v4836_v56 = vadd.f32 %v443_v63, %v4123_v39  ;;  %v612_v10 = vpop.f32.mrf.mxu1  ;;  %v4840_v49 = vsel %vm121_vm6, %v1630_v57, %v1950_v60  ;;  %v163_v17 = vld [vmem:[#allocation2 + $0x118] sm:$0xff] }
 0x146   :  { %8332 = vst [vmem:[#allocation53_spill] sm:$0xff] %v4831_v19  ;;  %v613_v22 = vadd.f32 %v612_v10, %v4125_v40  ;;  %v209_v47 = vpack.c.bf16 %v163_v17, %v162_v38 }
 0x147   :  { %8333 = vst [vmem:[#allocation54_spill] sm:$0xff] %v4840_v49  ;;  %v916_v58 = vrot.slane %v4836_v56, 7  ;;  %v1111_v61 = vrot.slane %v4836_v56, 1 }
 0x148   :  { %v1504_v20 = vrot.slane %v613_v22, 7  ;;  %v1696_v55 = vrot.slane %v613_v22, 1  ;;  %v1887_v57 = vsel %vm123_vm2, %v611_v14, %v613_v22 }
 0x149   :  { %v1010_v16 = vsel %vm963_vm3, %v915_v32, %v916_v58  ;;  %v1205_v9 = vsel %vm1158_vm4, %v1110_v53, %v1111_v61 }
 0x14a   :  { %v1047_v63 = vsel %vm126_vm0, %v4836_v56, %v1010_v16  ;;  %v1241_v60 = vsel %vm127_vm1, %v4800_v37, %v1205_v9  ;;  %v1597_v10 = vsel %vm963_vm3, %v1503_v54, %v1504_v20  ;;  %v1789_v31 = vsel %vm1158_vm4, %v1695_v34, %v1696_v55 }
 0x14b   :  { %v1307_v32 = vsel %vm123_vm2, %v1046_v7, %v1241_v60  ;;  %v1632_v53 = vsel %vm126_vm0, %v613_v22, %v1597_v10  ;;  %v1823_v9 = vsel %vm127_vm1, %v611_v14, %v1789_v31  ;;  %v3797_v31 = vld [vmem:[#allocation8 + $0x28] sm:$0xff] }
 0x14c   :  { %v4865_v44 = vpop.f32.mrf.mxu2  ;;  %v1373_v16 = vsel %vm122_vm5, %v4836_v56, %v1307_v32  ;;  %v446_v54 = vpop.f32.mrf.mxu0  ;;  %v1951_v60 = vsel %vm122_vm5, %v1823_v9, %v1887_v57  ;;  %2497 = vmatpush.bf16.msrb.mxu0 %v3797_v31 }
 0x14d   :  { %8334 = vst [vmem:[#allocation55_spill] sm:$0xff] %v4865_v44  ;;  %v4875_v7 = vsel %vm121_vm6, %v4800_v37, %v1373_v16  ;;  %v4880_v34 = vadd.f32 %v446_v54, %v4123_v39  ;;  %v615_v38 = vpop.f32.mrf.mxu1  ;;  %v4884_v17 = vsel %vm121_vm6, %v1631_v8, %v1951_v60 }
 0x14e   :  { %8335 = vst [vmem:[#allocation56_spill] sm:$0xff] %v4875_v7  ;;  %v616_v10 = vadd.f32 %v615_v38, %v4125_v40 }
 0x14f   :  { %8336 = vst [vmem:[#allocation57_spill] sm:$0xff] %v4884_v17  ;;  %v917_v32 = vrot.slane %v4880_v34, 7  ;;  %v1112_v0 = vrot.slane %v4880_v34, 1  ;;  %485 = vmatmul.bf16.gmra.mxu0 %v209_v47 }
 0x150   :  { %v1505_v16 = vrot.slane %v616_v10, 7  ;;  %v1697_v43 = vrot.slane %v616_v10, 1  ;;  %v1888_v57 = vsel %vm123_vm2, %v611_v14, %v616_v10  ;;  %654 = vmatmul.bf16.gmra.mxu1 %v209_v47 }
 0x151   :  { %823 = vmatmul.bf16.gmra.mxu2 %v209_v47  ;;  %v1009_v9 = vsel %vm963_vm3, %v916_v58, %v917_v32  ;;  %v1204_v8 = vsel %vm1158_vm4, %v1111_v61, %v1112_v0 }
 0x152   :  { %v1048_v54 = vsel %vm126_vm0, %v4880_v34, %v1009_v9  ;;  %v1242_v60 = vsel %vm127_vm1, %v4836_v56, %v1204_v8  ;;  %v1596_v14 = vsel %vm963_vm3, %v1504_v20, %v1505_v16  ;;  %v1788_v47 = vsel %vm1158_vm4, %v1696_v55, %v1697_v43 }
 0x153   :  { %v1308_v58 = vsel %vm123_vm2, %v1047_v63, %v1242_v60  ;;  %v1633_v61 = vsel %vm126_vm0, %v616_v10, %v1596_v14  ;;  %v1824_v38 = vsel %vm127_vm1, %v613_v22, %v1788_v47 }
 0x154   :  { %v4911_v31 = vpop.f32.mrf.mxu2  ;;  %v1374_v9 = vsel %vm122_vm5, %v4880_v34, %v1308_v58  ;;  %v1952_v20 = vsel %vm122_vm5, %v1824_v38, %v1888_v57  ;;  %v448_v8 = vpop.f32.mrf.mxu0 }
 0x155   :  { %8337 = vst [vmem:[#allocation58_spill] sm:$0xff] %v4911_v31  ;;  %v4921_v55 = vsel %vm121_vm6, %v4800_v37, %v1374_v9  ;;  %v4925_v63 = vsel %vm121_vm6, %v1632_v53, %v1952_v20  ;;  %v4928_v60 = vadd.f32 %v448_v8, %v4123_v39  ;;  %v617_v14 = vpop.f32.mrf.mxu1  ;;  %v164_v9 = vld [vmem:[#allocation2 + $0x120] sm:$0xff] }
 0x156   :  { %8338 = vst [vmem:[#allocation59_spill] sm:$0xff] %v4921_v55  ;;  %v618_v47 = vadd.f32 %v617_v14, %v4125_v40  ;;  %v165_v55 = vld [vmem:[#allocation2 + $0x128] sm:$0xff] }
 0x157   :  { %8339 = vst [vmem:[#allocation60_spill] sm:$0xff] %v4925_v63  ;;  %v918_v58 = vrot.slane %v4928_v60, 7  ;;  %v1113_v57 = vrot.slane %v4928_v60, 1  ;;  %v210_v31 = vpack.c.bf16 %v165_v55, %v164_v9 }
 0x158   :  { %v1506_v38 = vrot.slane %v618_v47, 7  ;;  %v1698_v17 = vrot.slane %v618_v47, 1  ;;  %v1889_v37 = vsel %vm123_vm2, %v613_v22, %v618_v47 }
 0x159   :  { %v1008_v53 = vsel %vm963_vm3, %v917_v32, %v918_v58  ;;  %v1203_v20 = vsel %vm1158_vm4, %v1112_v0, %v1113_v57 }
 0x15a   :  { %v1049_v8 = vsel %vm126_vm0, %v4928_v60, %v1008_v53  ;;  %v1243_v14 = vsel %vm127_vm1, %v4880_v34, %v1203_v20  ;;  %v1595_v63 = vsel %vm963_vm3, %v1505_v16, %v1506_v38  ;;  %v1787_v22 = vsel %vm1158_vm4, %v1697_v43, %v1698_v17 }
 0x15b   :  { %v1309_v32 = vsel %vm123_vm2, %v1048_v54, %v1243_v14  ;;  %v1634_v0 = vsel %vm126_vm0, %v618_v47, %v1595_v63  ;;  %v1825_v7 = vsel %vm127_vm1, %v616_v10, %v1787_v22 }
 0x15c   :  { %v4955_v53 = vpop.f32.mrf.mxu2  ;;  %v1375_v20 = vsel %vm122_vm5, %v4928_v60, %v1309_v32  ;;  %v1953_v16 = vsel %vm122_vm5, %v1825_v7, %v1889_v37  ;;  %v451_v43 = vpop.f32.mrf.mxu0 }
 0x15d   :  { %8340 = vst [vmem:[#allocation61_spill] sm:$0xff] %v4955_v53  ;;  %v4965_v54 = vsel %vm121_vm6, %v4836_v56, %v1375_v20  ;;  %v4969_v63 = vsel %vm121_vm6, %v1633_v61, %v1953_v16  ;;  %v4972_v14 = vadd.f32 %v451_v43, %v4123_v39  ;;  %v620_v55 = vpop.f32.mrf.mxu1 }
 0x15e   :  { %8341 = vst [vmem:[#allocation62_spill] sm:$0xff] %v4965_v54  ;;  %v621_v9 = vadd.f32 %v620_v55, %v4125_v40 }
 0x15f   :  { %8342 = vst [vmem:[#allocation63_spill] sm:$0xff] %v4969_v63  ;;  %v919_v22 = vrot.slane %v4972_v14, 7  ;;  %v1114_v7 = vrot.slane %v4972_v14, 1  ;;  %490 = vmatmul.bf16.gmra.mxu0 %v210_v31 }
 0x160   :  { %v1507_v37 = vrot.slane %v621_v9, 7  ;;  %v1699_v32 = vrot.slane %v621_v9, 1  ;;  %v1890_v56 = vsel %vm123_vm2, %v616_v10, %v621_v9  ;;  %659 = vmatmul.bf16.gmra.mxu1 %v210_v31 }
 0x161   :  { %828 = vmatmul.bf16.gmra.mxu2 %v210_v31  ;;  %v1007_v61 = vsel %vm963_vm3, %v918_v58, %v919_v22  ;;  %v1202_v20 = vsel %vm1158_vm4, %v1113_v57, %v1114_v7 }
 0x162   :  { %v1050_v16 = vsel %vm126_vm0, %v4972_v14, %v1007_v61  ;;  %v1244_v43 = vsel %vm127_vm1, %v4928_v60, %v1202_v20  ;;  %v1594_v55 = vsel %vm963_vm3, %v1506_v38, %v1507_v37  ;;  %v1786_v10 = vsel %vm1158_vm4, %v1698_v17, %v1699_v32 }
 0x163   :  { %v1310_v31 = vsel %vm123_vm2, %v1049_v8, %v1244_v43  ;;  %v1635_v58 = vsel %vm126_vm0, %v621_v9, %v1594_v55  ;;  %v1826_v57 = vsel %vm127_vm1, %v618_v47, %v1786_v10 }
 0x164   :  { %v4999_v61 = vpop.f32.mrf.mxu2  ;;  %v1376_v20 = vsel %vm122_vm5, %v4972_v14, %v1310_v31  ;;  %v1954_v38 = vsel %vm122_vm5, %v1826_v57, %v1890_v56  ;;  %v453_v63 = vpop.f32.mrf.mxu0 }
 0x165   :  { %8343 = vst [vmem:[#allocation64_spill] sm:$0xff] %v4999_v61  ;;  %v5009_v17 = vsel %vm121_vm6, %v4880_v34, %v1376_v20  ;;  %v5013_v8 = vsel %vm121_vm6, %v1634_v0, %v1954_v38  ;;  %v5016_v43 = vadd.f32 %v453_v63, %v4123_v39  ;;  %v622_v55 = vpop.f32.mrf.mxu1  ;;  %v166_v20 = vld [vmem:[#allocation2 + $0x130] sm:$0xff] }
 0x166   :  { %8344 = vst [vmem:[#allocation65_spill] sm:$0xff] %v5009_v17  ;;  %v623_v10 = vadd.f32 %v622_v55, %v4125_v40  ;;  %v167_v17 = vld [vmem:[#allocation2 + $0x138] sm:$0xff] }
 0x167   :  { %8345 = vst [vmem:[#allocation66_spill] sm:$0xff] %v5013_v8  ;;  %v920_v31 = vrot.slane %v5016_v43, 7  ;;  %v1115_v56 = vrot.slane %v5016_v43, 1  ;;  %v211_v53 = vpack.c.bf16 %v167_v17, %v166_v20 }
 0x168   :  { %v1508_v57 = vrot.slane %v623_v10, 7  ;;  %v1700_v54 = vrot.slane %v623_v10, 1  ;;  %v1891_v34 = vsel %vm123_vm2, %v618_v47, %v623_v10 }
 0x169   :  { %v1006_v0 = vsel %vm963_vm3, %v919_v22, %v920_v31  ;;  %v1201_v63 = vsel %vm1158_vm4, %v1114_v7, %v1115_v56 }
 0x16a   :  { %v1051_v38 = vsel %vm126_vm0, %v5016_v43, %v1006_v0  ;;  %v1245_v55 = vsel %vm127_vm1, %v4972_v14, %v1201_v63  ;;  %v1593_v8 = vsel %vm963_vm3, %v1507_v37, %v1508_v57  ;;  %v1785_v47 = vsel %vm1158_vm4, %v1699_v32, %v1700_v54 }
 0x16b   :  { %v1311_v22 = vsel %vm123_vm2, %v1050_v16, %v1245_v55  ;;  %v1636_v7 = vsel %vm126_vm0, %v623_v10, %v1593_v8  ;;  %v1827_v61 = vsel %vm127_vm1, %v621_v9, %v1785_v47 }
 0x16c   :  { %v5043_v0 = vpop.f32.mrf.mxu2  ;;  %v1377_v63 = vsel %vm122_vm5, %v5016_v43, %v1311_v22  ;;  %v1955_v37 = vsel %vm122_vm5, %v1827_v61, %v1891_v34  ;;  %v456_v32 = vpop.f32.mrf.mxu0 }
 0x16d   :  { %8346 = vst [vmem:[#allocation67_spill] sm:$0xff] %v5043_v0  ;;  %v5053_v16 = vsel %vm121_vm6, %v4928_v60, %v1377_v63  ;;  %v5057_v8 = vsel %vm121_vm6, %v1635_v58, %v1955_v37  ;;  %v5060_v55 = vadd.f32 %v456_v32, %v4123_v39  ;;  %v625_v17 = vpop.f32.mrf.mxu1 }
 0x16e   :  { %8347 = vst [vmem:[#allocation68_spill] sm:$0xff] %v5053_v16  ;;  %v626_v20 = vadd.f32 %v625_v17, %v4125_v40 }
 0x16f   :  { %8348 = vst [vmem:[#allocation69_spill] sm:$0xff] %v5057_v8  ;;  %v921_v47 = vrot.slane %v5060_v55, 7  ;;  %v1116_v61 = vrot.slane %v5060_v55, 1  ;;  %495 = vmatmul.bf16.gmra.mxu0 %v211_v53 }
 0x170   :  { %v1509_v34 = vrot.slane %v626_v20, 7  ;;  %v1701_v22 = vrot.slane %v626_v20, 1  ;;  %v1892_v60 = vsel %vm123_vm2, %v621_v9, %v626_v20  ;;  %664 = vmatmul.bf16.gmra.mxu1 %v211_v53 }
 0x171   :  { %833 = vmatmul.bf16.gmra.mxu2 %v211_v53  ;;  %v1005_v58 = vsel %vm963_vm3, %v920_v31, %v921_v47  ;;  %v1200_v63 = vsel %vm1158_vm4, %v1115_v56, %v1116_v61 }
 0x172   :  { %v1052_v37 = vsel %vm126_vm0, %v5060_v55, %v1005_v58  ;;  %v1246_v32 = vsel %vm127_vm1, %v5016_v43, %v1200_v63  ;;  %v1592_v17 = vsel %vm963_vm3, %v1508_v57, %v1509_v34  ;;  %v1784_v53 = vsel %vm1158_vm4, %v1700_v54, %v1701_v22 }
 0x173   :  { %v1312_v9 = vsel %vm123_vm2, %v1051_v38, %v1246_v32  ;;  %v1637_v31 = vsel %vm126_vm0, %v626_v20, %v1592_v17  ;;  %v1828_v56 = vsel %vm127_vm1, %v623_v10, %v1784_v53 }
 0x174   :  { %v5087_v58 = vpop.f32.mrf.mxu2  ;;  %v1378_v63 = vsel %vm122_vm5, %v5060_v55, %v1312_v9  ;;  %v1956_v57 = vsel %vm122_vm5, %v1828_v56, %v1892_v60  ;;  %v458_v8 = vpop.f32.mrf.mxu0  ;;  %v168_v56 = vld [vmem:[#allocation2 + $0x140] sm:$0xff] }
 0x175   :  { %8349 = vst [vmem:[#allocation70_spill] sm:$0xff] %v5087_v58  ;;  %v5097_v54 = vsel %vm121_vm6, %v4972_v14, %v1378_v63  ;;  %v5101_v38 = vsel %vm121_vm6, %v1636_v7, %v1956_v57  ;;  %v459_v32 = vadd.f32 %v458_v8, %v4123_v39  ;;  %v627_v17 = vpop.f32.mrf.mxu1  ;;  %v169_v63 = vld [vmem:[#allocation2 + $0x148] sm:$0xff] }
 0x176   :  { %8350 = vst [vmem:[#allocation71_spill] sm:$0xff] %v5097_v54  ;;  %v628_v53 = vadd.f32 %v627_v17, %v4125_v40  ;;  %v212_v44 = vpack.c.bf16 %v169_v63, %v168_v56 }
 0x177   :  { %8351 = vst [vmem:[#allocation72_spill] sm:$0xff] %v5101_v38  ;;  %v922_v58 = vrot.slane %v459_v32, 7  ;;  %v1117_v9 = vrot.slane %v459_v32, 1 }
 0x178   :  { %v1510_v16 = vrot.slane %v628_v53, 7  ;;  %v1702_v0 = vrot.slane %v628_v53, 1  ;;  %v1893_v60 = vsel %vm123_vm2, %v623_v10, %v628_v53  ;;  %v1894_v14 = vsel %vm123_vm2, %v626_v20, %v628_v53 }
 0x179   :  { %v1004_v7 = vsel %vm963_vm3, %v921_v47, %v922_v58  ;;  %v1199_v8 = vsel %vm1158_vm4, %v1116_v61, %v1117_v9 }
 0x17a   :  { %v1053_v57 = vsel %vm126_vm0, %v459_v32, %v1004_v7  ;;  %v1247_v17 = vsel %vm127_vm1, %v5060_v55, %v1199_v8  ;;  %v1591_v10 = vsel %vm963_vm3, %v1509_v34, %v1510_v16  ;;  %v1783_v38 = vsel %vm1158_vm4, %v1701_v22, %v1702_v0 }
 0x17b   :  { %v1313_v54 = vsel %vm123_vm2, %v1052_v37, %v1247_v17  ;;  %v1638_v47 = vsel %vm126_vm0, %v628_v53, %v1591_v10  ;;  %v1829_v61 = vsel %vm127_vm1, %v626_v20, %v1783_v38 }
 0x17c   :  { %v5128_v7 = vpop.f32.mrf.mxu2  ;;  %v1379_v8 = vsel %vm122_vm5, %v459_v32, %v1313_v54  ;;  %v1957_v34 = vsel %vm122_vm5, %v1829_v61, %v1893_v60  ;;  %v461_v24 = vpop.f32.mrf.mxu0 }
 0x17d   :  { %8352 = vst [vmem:[#allocation73_spill] sm:$0xff] %v5128_v7  ;;  %v5137_v22 = vsel %vm121_vm6, %v5016_v43, %v1379_v8  ;;  %v5141_v37 = vsel %vm121_vm6, %v1637_v31, %v1957_v34  ;;  %v5144_v20 = vadd.f32 %v461_v24, %v4123_v39  ;;  %v630_v38 = vpop.f32.mrf.mxu1 }
 0x17e   :  { %8353 = vst [vmem:[#allocation74_spill] sm:$0xff] %v5137_v22  ;;  %v5147_v56 = vadd.f32 %v630_v38, %v4125_v40 }
 0x17f   :  { %8354 = vst [vmem:[#allocation75_spill] sm:$0xff] %v5141_v37  ;;  %v923_v54 = vrot.slane %v5144_v20, 7  ;;  %v1118_v60 = vrot.slane %v5144_v20, 1  ;;  %500 = vmatmul.bf16.gmra.mxu0 %v212_v44 }
 0x180   :  { %v1511_v63 = vrot.slane %v5147_v56, 7  ;;  %v1703_v43 = vrot.slane %v5147_v56, 1  ;;  %669 = vmatmul.bf16.gmra.mxu1 %v212_v44 }
 0x181   :  { %838 = vmatmul.bf16.gmra.mxu2 %v212_v44  ;;  %v1003_v31 = vsel %vm963_vm3, %v922_v58, %v923_v54  ;;  %v1198_v24 = vsel %vm1158_vm4, %v1117_v9, %v1118_v60 }
 0x182   :  { %v1054_v17 = vsel %vm126_vm0, %v5144_v20, %v1003_v31  ;;  %v1248_v10 = vsel %vm127_vm1, %v459_v32, %v1198_v24  ;;  %v1590_v61 = vsel %vm963_vm3, %v1510_v16, %v1511_v63  ;;  %v1782_v58 = vsel %vm1158_vm4, %v1702_v0, %v1703_v43 }
 0x183   :  { %v1314_v8 = vsel %vm123_vm2, %v1053_v57, %v1248_v10  ;;  %v1639_v44 = vsel %vm126_vm0, %v5147_v56, %v1590_v61  ;;  %v1830_v38 = vsel %vm127_vm1, %v628_v53, %v1782_v58  ;;  %v3821_v53 = vld [vmem:[#allocation10 + $0xac] sm:$0xf]  ;;  %v3728_v61 = vld [vmem:[#allocation10 + $0xb4] sm:$0xf0] }
 0x184   :  { %v5171_v9 = vpop.f32.mrf.mxu2  ;;  %v1380_v34 = vsel %vm122_vm5, %v459_v32, %v1314_v8  ;;  %v463_v31 = vpop.f32.mrf.mxu0  ;;  %v1958_v57 = vsel %vm122_vm5, %v1830_v38, %v1894_v14  ;;  %v3731_v58 = vor.u32 %v3821_v53, %v3728_v61  ;;  %v170_v38 = vld [vmem:[#allocation2 + $0x150] sm:$0xff] }
 0x185   :  { %8355 = vst [vmem:[#allocation76_spill] sm:$0xff] %v5171_v9  ;;  %v5180_v16 = vsel %vm121_vm6, %v5060_v55, %v1380_v34  ;;  %v5185_v24 = vadd.f32 %v463_v31, %v4123_v39  ;;  %v632_v0 = vpop.f32.mrf.mxu1  ;;  %v5189_v10 = vsel %vm121_vm6, %v1638_v47, %v1958_v57  ;;  %v171_v31 = vld [vmem:[#allocation2 + $0x158] sm:$0xff] }
 0x186   :  { %8356 = vst [vmem:[#allocation77_spill] sm:$0xff] %v5180_v16  ;;  %v5192_v32 = vadd.f32 %v632_v0, %v4125_v40  ;;  %2722 = vmatpush.bf16.msrb.mxu2 %v3731_v58 }
 0x187   :  { %8357 = vst [vmem:[#allocation78_spill] sm:$0xff] %v5189_v10  ;;  %v924_v8 = vrot.slane %v5185_v24, 7  ;;  %v1119_v55 = vrot.slane %v5185_v24, 1 }
 0x188   :  { %v1512_v14 = vrot.slane %v5192_v32, 7  ;;  %v1704_v34 = vrot.slane %v5192_v32, 1  ;;  %v1895_v47 = vsel %vm123_vm2, %v5147_v56, %v5192_v32 }
 0x189   :  { %v1002_v57 = vsel %vm963_vm3, %v923_v54, %v924_v8  ;;  %v1197_v0 = vsel %vm1158_vm4, %v1118_v60, %v1119_v55 }
 0x18a   :  { %v1055_v53 = vsel %vm126_vm0, %v5185_v24, %v1002_v57  ;;  %v1249_v61 = vsel %vm127_vm1, %v5144_v20, %v1197_v0  ;;  %v1589_v9 = vsel %vm963_vm3, %v1511_v63, %v1512_v14  ;;  %v1781_v60 = vsel %vm1158_vm4, %v1703_v43, %v1704_v34 }
 0x18b   :  { %v1315_v10 = vsel %vm123_vm2, %v1054_v17, %v1249_v61  ;;  %v1640_v54 = vsel %vm126_vm0, %v5192_v32, %v1589_v9  ;;  %v213_v57 = vpack.c.bf16 %v171_v31, %v170_v38  ;;  %v1831_v63 = vsel %vm127_vm1, %v5147_v56, %v1781_v60  ;;  %v3726_v61 = vld [vmem:[#allocation10 + $0xa8] sm:$0xf]  ;;  %v3822_v60 = vld [vmem:[#allocation10 + $0xb0] sm:$0xf0] }
 0x18c   :  { %v5221_v58 = vpop.f32.mrf.mxu2  ;;  %v1381_v0 = vsel %vm122_vm5, %v5185_v24, %v1315_v10  ;;  %v466_v16 = vpop.f32.mrf.mxu0  ;;  %v1959_v43 = vsel %vm122_vm5, %v1831_v63, %v1895_v47  ;;  %v3727_v47 = vor.u32 %v3822_v60, %v3726_v61 }
 0x18d   :  { %8358 = vst [vmem:[#allocation79_spill] sm:$0xff] %v5221_v58  ;;  %v5232_v17 = vsel %vm121_vm6, %v5144_v20, %v1381_v0  ;;  %v5237_v9 = vadd.f32 %v466_v16, %v4123_v39  ;;  %v635_v38 = vpop.f32.mrf.mxu1  ;;  %v5241_v10 = vsel %vm121_vm6, %v1639_v44, %v1959_v43  ;;  %v3796_v58 = vld [vmem:[#allocation8 + $0x20] sm:$0xff] }
 0x18e   :  { %8359 = vst [vmem:[#allocation80_spill] sm:$0xff] %v5232_v17  ;;  %v5244_v31 = vadd.f32 %v635_v38, %v4125_v40  ;;  %2709 = vmatpush.bf16.msrb.mxu1 %v3727_v47  ;;  %2498 = vmatpush.bf16.msrb.mxu0 %v3796_v58 }
 0x18f   :  { %8360 = vst [vmem:[#allocation81_spill] sm:$0xff] %v5241_v10  ;;  %v925_v0 = vrot.slane %v5237_v9, 7  ;;  %v1120_v17 = vrot.slane %v5237_v9, 1  ;;  %505 = vmatmul.bf16.gmra.mxu0 %v213_v57 }
 0x190   :  { %v1513_v16 = vrot.slane %v5244_v31, 7  ;;  %v1705_v63 = vrot.slane %v5244_v31, 1  ;;  %v1896_v44 = vsel %vm123_vm2, %v5147_v56, %v5244_v31  ;;  %674 = vmatmul.bf16.gmra.mxu1 %v213_v57 }
 0x191   :  { %843 = vmatmul.bf16.gmra.mxu2 %v213_v57  ;;  %v1001_v43 = vsel %vm963_vm3, %v924_v8, %v925_v0  ;;  %v1196_v38 = vsel %vm1158_vm4, %v1119_v55, %v1120_v17 }
 0x192   :  { %v1056_v61 = vsel %vm126_vm0, %v5237_v9, %v1001_v43  ;;  %v1250_v60 = vsel %vm127_vm1, %v5185_v24, %v1196_v38  ;;  %v1588_v56 = vsel %vm963_vm3, %v1512_v14, %v1513_v16  ;;  %v1780_v57 = vsel %vm1158_vm4, %v1704_v34, %v1705_v63 }
 0x193   :  { %v1316_v8 = vsel %vm123_vm2, %v1055_v53, %v1250_v60  ;;  %v1641_v55 = vsel %vm126_vm0, %v5244_v31, %v1588_v56  ;;  %v1832_v58 = vsel %vm127_vm1, %v5192_v32, %v1780_v57 }
 0x194   :  { %v5276_v47 = vpop.f32.mrf.mxu2  ;;  %v1382_v14 = vsel %vm122_vm5, %v5237_v9, %v1316_v8  ;;  %v1960_v34 = vsel %vm122_vm5, %v1832_v58, %v1896_v44  ;;  %v468_v43 = vpop.f32.mrf.mxu0 }
 0x195   :  { %8361 = vst [vmem:[#allocation82_spill] sm:$0xff] %v5276_v47  ;;  %v5286_v53 = vsel %vm121_vm6, %v5144_v20, %v1382_v14  ;;  %v5290_v38 = vsel %vm121_vm6, %v1640_v54, %v1960_v34  ;;  %v5293_v60 = vadd.f32 %v468_v43, %v4123_v39  ;;  %v637_v56 = vpop.f32.mrf.mxu1  ;;  %v172_v14 = vld [vmem:[#allocation2 + $0x160] sm:$0xff] }
 0x196   :  { %8362 = vst [vmem:[#allocation83_spill] sm:$0xff] %v5286_v53  ;;  %v638_v57 = vadd.f32 %v637_v56, %v4125_v40  ;;  %v173_v53 = vld [vmem:[#allocation2 + $0x168] sm:$0xff] }
 0x197   :  { %8363 = vst [vmem:[#allocation84_spill] sm:$0xff] %v5290_v38  ;;  %v926_v8 = vrot.slane %v5293_v60, 7  ;;  %v1121_v44 = vrot.slane %v5293_v60, 1  ;;  %v214_v37 = vpack.c.bf16 %v173_v53, %v172_v14 }
 0x198   :  { %v1514_v58 = vrot.slane %v638_v57, 7  ;;  %v1706_v10 = vrot.slane %v638_v57, 1  ;;  %v1897_v20 = vsel %vm123_vm2, %v5192_v32, %v638_v57 }
 0x199   :  { %v1000_v54 = vsel %vm963_vm3, %v925_v0, %v926_v8  ;;  %v1195_v34 = vsel %vm1158_vm4, %v1120_v17, %v1121_v44 }
 0x19a   :  { %v1057_v43 = vsel %vm126_vm0, %v5293_v60, %v1000_v54  ;;  %v1251_v56 = vsel %vm127_vm1, %v5237_v9, %v1195_v34  ;;  %v1587_v38 = vsel %vm963_vm3, %v1513_v16, %v1514_v58  ;;  %v1779_v32 = vsel %vm1158_vm4, %v1705_v63, %v1706_v10 }
 0x19b   :  { %v1317_v0 = vsel %vm123_vm2, %v1056_v61, %v1251_v56  ;;  %v1642_v17 = vsel %vm126_vm0, %v638_v57, %v1587_v38  ;;  %v1833_v54 = vsel %vm127_vm1, %v5244_v31, %v1779_v32 }
 0x19c   :  { %v5322_v47 = vpop.f32.mrf.mxu2  ;;  %v1383_v16 = vsel %vm122_vm5, %v5293_v60, %v1317_v0  ;;  %v1961_v63 = vsel %vm122_vm5, %v1833_v54, %v1897_v20  ;;  %v471_v34 = vpop.f32.mrf.mxu0 }
 0x19d   :  { %8364 = vst [vmem:[#allocation85_spill] sm:$0xff] %v5322_v47  ;;  %v5332_v61 = vsel %vm121_vm6, %v5185_v24, %v1383_v16  ;;  %v5336_v38 = vsel %vm121_vm6, %v1641_v55, %v1961_v63  ;;  %v5339_v56 = vadd.f32 %v471_v34, %v4123_v39  ;;  %v640_v53 = vpop.f32.mrf.mxu1 }
 0x19e   :  { %8365 = vst [vmem:[#allocation86_spill] sm:$0xff] %v5332_v61  ;;  %v641_v14 = vadd.f32 %v640_v53, %v4125_v40 }
 0x19f   :  { %8366 = vst [vmem:[#allocation87_spill] sm:$0xff] %v5336_v38  ;;  %v927_v32 = vrot.slane %v5339_v56, 7  ;;  %v1122_v20 = vrot.slane %v5339_v56, 1  ;;  %510 = vmatmul.bf16.gmra.mxu0 %v214_v37 }
 0x1a0   :  { %v1515_v0 = vrot.slane %v641_v14, 7  ;;  %v1707_v54 = vrot.slane %v641_v14, 1  ;;  %v1898_v24 = vsel %vm123_vm2, %v5244_v31, %v641_v14  ;;  %679 = vmatmul.bf16.gmra.mxu1 %v214_v37 }
 0x1a1   :  { %848 = vmatmul.bf16.gmra.mxu2 %v214_v37  ;;  %v999_v55 = vsel %vm963_vm3, %v926_v8, %v927_v32  ;;  %v1194_v16 = vsel %vm1158_vm4, %v1121_v44, %v1122_v20 }
 0x1a2   :  { %v1058_v63 = vsel %vm126_vm0, %v5339_v56, %v999_v55  ;;  %v1252_v34 = vsel %vm127_vm1, %v5293_v60, %v1194_v16  ;;  %v1586_v53 = vsel %vm963_vm3, %v1514_v58, %v1515_v0  ;;  %v1778_v37 = vsel %vm1158_vm4, %v1706_v10, %v1707_v54 }
 0x1a3   :  { %v1318_v31 = vsel %vm123_vm2, %v1057_v43, %v1252_v34  ;;  %v1643_v8 = vsel %vm126_vm0, %v641_v14, %v1586_v53  ;;  %v1834_v44 = vsel %vm127_vm1, %v638_v57, %v1778_v37 }
 0x1a4   :  { %v5367_v55 = vpop.f32.mrf.mxu2  ;;  %v1384_v16 = vsel %vm122_vm5, %v5339_v56, %v1318_v31  ;;  %v1962_v58 = vsel %vm122_vm5, %v1834_v44, %v1898_v24  ;;  %v473_v38 = vpop.f32.mrf.mxu0 }
 0x1a5   :  { %8367 = vst [vmem:[#allocation88_spill] sm:$0xff] %v5367_v55  ;;  %v5377_v10 = vsel %vm121_vm6, %v5237_v9, %v1384_v16  ;;  %v5381_v43 = vsel %vm121_vm6, %v1642_v17, %v1962_v58  ;;  %v5384_v34 = vadd.f32 %v473_v38, %v4123_v39  ;;  %v642_v53 = vpop.f32.mrf.mxu1  ;;  %v174_v16 = vld [vmem:[#allocation2 + $0x170] sm:$0xff] }
 0x1a6   :  { %8368 = vst [vmem:[#allocation89_spill] sm:$0xff] %v5377_v10  ;;  %v643_v37 = vadd.f32 %v642_v53, %v4125_v40  ;;  %v175_v10 = vld [vmem:[#allocation2 + $0x178] sm:$0xff] }
 0x1a7   :  { %8369 = vst [vmem:[#allocation90_spill] sm:$0xff] %v5381_v43  ;;  %v928_v31 = vrot.slane %v5384_v34, 7  ;;  %v1123_v24 = vrot.slane %v5384_v34, 1  ;;  %v215_v47 = vpack.c.bf16 %v175_v10, %v174_v16 }
 0x1a8   :  { %v1516_v44 = vrot.slane %v643_v37, 7  ;;  %v1708_v55 = vrot.slane %v643_v37, 1  ;;  %v1899_v9 = vsel %vm123_vm2, %v638_v57, %v643_v37 }
 0x1a9   :  { %v998_v17 = vsel %vm963_vm3, %v927_v32, %v928_v31  ;;  %v1193_v38 = vsel %vm1158_vm4, %v1122_v20, %v1123_v24 }
 0x1aa   :  { %v1059_v58 = vsel %vm126_vm0, %v5384_v34, %v998_v17  ;;  %v1253_v53 = vsel %vm127_vm1, %v5339_v56, %v1193_v38  ;;  %v1585_v43 = vsel %vm963_vm3, %v1515_v0, %v1516_v44  ;;  %v1777_v57 = vsel %vm1158_vm4, %v1707_v54, %v1708_v55 }
 0x1ab   :  { %v1319_v32 = vsel %vm123_vm2, %v1058_v63, %v1253_v53  ;;  %v1644_v20 = vsel %vm126_vm0, %v643_v37, %v1585_v43  ;;  %v1835_v61 = vsel %vm127_vm1, %v641_v14, %v1777_v57 }
 0x1ac   :  { %v5411_v17 = vpop.f32.mrf.mxu2  ;;  %v1385_v38 = vsel %vm122_vm5, %v5384_v34, %v1319_v32  ;;  %v1963_v0 = vsel %vm122_vm5, %v1835_v61, %v1899_v9  ;;  %v476_v54 = vpop.f32.mrf.mxu0 }
 0x1ad   :  { %8370 = vst [vmem:[#allocation91_spill] sm:$0xff] %v5411_v17  ;;  %v5421_v63 = vsel %vm121_vm6, %v5293_v60, %v1385_v38  ;;  %v5425_v43 = vsel %vm121_vm6, %v1643_v8, %v1963_v0  ;;  %v5428_v53 = vadd.f32 %v476_v54, %v4123_v39  ;;  %v645_v10 = vpop.f32.mrf.mxu1 }
 0x1ae   :  { %8371 = vst [vmem:[#allocation92_spill] sm:$0xff] %v5421_v63  ;;  %v646_v16 = vadd.f32 %v645_v10, %v4125_v40 }
 0x1af   :  { %8372 = vst [vmem:[#allocation93_spill] sm:$0xff] %v5425_v43  ;;  %v929_v57 = vrot.slane %v5428_v53, 7  ;;  %v1124_v61 = vrot.slane %v5428_v53, 1  ;;  %515 = vmatmul.bf16.gmra.mxu0 %v215_v47 }
 0x1b0   :  { %v1517_v9 = vrot.slane %v646_v16, 7  ;;  %v1709_v32 = vrot.slane %v646_v16, 1  ;;  %v1900_v60 = vsel %vm123_vm2, %v641_v14, %v646_v16  ;;  %684 = vmatmul.bf16.gmra.mxu1 %v215_v47 }
 0x1b1   :  { %853 = vmatmul.bf16.gmra.mxu2 %v215_v47  ;;  %v997_v8 = vsel %vm963_vm3, %v928_v31, %v929_v57  ;;  %v1192_v38 = vsel %vm1158_vm4, %v1123_v24, %v1124_v61 }
 0x1b2   :  { %v1060_v0 = vsel %vm126_vm0, %v5428_v53, %v997_v8  ;;  %v1254_v54 = vsel %vm127_vm1, %v5384_v34, %v1192_v38  ;;  %v1584_v10 = vsel %vm963_vm3, %v1516_v44, %v1517_v9  ;;  %v1776_v47 = vsel %vm1158_vm4, %v1708_v55, %v1709_v32 }
 0x1b3   :  { %v1320_v14 = vsel %vm123_vm2, %v1059_v58, %v1254_v54  ;;  %v1645_v31 = vsel %vm126_vm0, %v646_v16, %v1584_v10  ;;  %v1836_v24 = vsel %vm127_vm1, %v643_v37, %v1776_v47 }
 0x1b4   :  { %v5455_v8 = vpop.f32.mrf.mxu2  ;;  %v1386_v38 = vsel %vm122_vm5, %v5428_v53, %v1320_v14  ;;  %v1964_v44 = vsel %vm122_vm5, %v1836_v24, %v1900_v60  ;;  %v478_v43 = vpop.f32.mrf.mxu0  ;;  %v176_v24 = vld [vmem:[#allocation2 + $0x180] sm:$0xff] }
 0x1b5   :  { %8373 = vst [vmem:[#allocation94_spill] sm:$0xff] %v5455_v8  ;;  %v5465_v55 = vsel %vm121_vm6, %v5339_v56, %v1386_v38  ;;  %v5469_v58 = vsel %vm121_vm6, %v1644_v20, %v1964_v44  ;;  %v479_v54 = vadd.f32 %v478_v43, %v4123_v39  ;;  %v647_v10 = vpop.f32.mrf.mxu1  ;;  %v177_v38 = vld [vmem:[#allocation2 + $0x188] sm:$0xff] }
 0x1b6   :  { %8374 = vst [vmem:[#allocation95_spill] sm:$0xff] %v5465_v55  ;;  %v648_v47 = vadd.f32 %v647_v10, %v4125_v40  ;;  %v216_v22 = vpack.c.bf16 %v177_v38, %v176_v24 }
 0x1b7   :  { %8375 = vst [vmem:[#allocation96_spill] sm:$0xff] %v5469_v58  ;;  %v930_v8 = vrot.slane %v479_v54, 7  ;;  %v1125_v14 = vrot.slane %v479_v54, 1 }
 0x1b8   :  { %v1518_v63 = vrot.slane %v648_v47, 7  ;;  %v1710_v17 = vrot.slane %v648_v47, 1  ;;  %v1901_v60 = vsel %vm123_vm2, %v643_v37, %v648_v47  ;;  %v1902_v56 = vsel %vm123_vm2, %v646_v16, %v648_v47 }
 0x1b9   :  { %v996_v20 = vsel %vm963_vm3, %v929_v57, %v930_v8  ;;  %v1191_v43 = vsel %vm1158_vm4, %v1124_v61, %v1125_v14 }
 0x1ba   :  { %v1061_v44 = vsel %vm126_vm0, %v479_v54, %v996_v20  ;;  %v1255_v10 = vsel %vm127_vm1, %v5428_v53, %v1191_v43  ;;  %v1583_v37 = vsel %vm963_vm3, %v1517_v9, %v1518_v63  ;;  %v1775_v58 = vsel %vm1158_vm4, %v1709_v32, %v1710_v17 }
 0x1bb   :  { %v1321_v55 = vsel %vm123_vm2, %v1060_v0, %v1255_v10  ;;  %v1646_v57 = vsel %vm126_vm0, %v648_v47, %v1583_v37  ;;  %v1837_v61 = vsel %vm127_vm1, %v646_v16, %v1775_v58 }
 0x1bc   :  { %v5496_v20 = vpop.f32.mrf.mxu2  ;;  %v1387_v43 = vsel %vm122_vm5, %v479_v54, %v1321_v55  ;;  %v1965_v9 = vsel %vm122_vm5, %v1837_v61, %v1901_v60  ;;  %v481_v7 = vpop.f32.mrf.mxu0 }
 0x1bd   :  { %v5505_v32 = vsel %vm121_vm6, %v5384_v34, %v1387_v43  ;;  %v5509_v0 = vsel %vm121_vm6, %v1645_v31, %v1965_v9  ;;  %v5512_v16 = vadd.f32 %v481_v7, %v4123_v39  ;;  %v650_v58 = vpop.f32.mrf.mxu1 }
 0x1be   :  { %8376 = vst [vmem:[#allocation97_spill] sm:$0xff] %v5505_v32  ;;  %v5515_v24 = vadd.f32 %v650_v58, %v4125_v40 }
 0x1bf   :  { %8377 = vst [vmem:[#allocation98_spill] sm:$0xff] %v5509_v0  ;;  %v931_v55 = vrot.slane %v5512_v16, 7  ;;  %v1126_v60 = vrot.slane %v5512_v16, 1  ;;  %520 = vmatmul.bf16.gmra.mxu0 %v216_v22 }
 0x1c0   :  { %v1519_v38 = vrot.slane %v5515_v24, 7  ;;  %v1711_v34 = vrot.slane %v5515_v24, 1  ;;  %689 = vmatmul.bf16.gmra.mxu1 %v216_v22 }
 0x1c1   :  { %858 = vmatmul.bf16.gmra.mxu2 %v216_v22  ;;  %v995_v31 = vsel %vm963_vm3, %v930_v8, %v931_v55  ;;  %v1190_v7 = vsel %vm1158_vm4, %v1125_v14, %v1126_v60 }
 0x1c2   :  { %v1062_v10 = vsel %vm126_vm0, %v5512_v16, %v995_v31  ;;  %v1256_v37 = vsel %vm127_vm1, %v479_v54, %v1190_v7  ;;  %v1582_v61 = vsel %vm963_vm3, %v1518_v63, %v1519_v38  ;;  %v1774_v8 = vsel %vm1158_vm4, %v1710_v17, %v1711_v34 }
 0x1c3   :  { %v1322_v43 = vsel %vm123_vm2, %v1061_v44, %v1256_v37  ;;  %v1647_v22 = vsel %vm126_vm0, %v5515_v24, %v1582_v61  ;;  %v1838_v58 = vsel %vm127_vm1, %v648_v47, %v1774_v8  ;;  %v3818_v47 = vld [vmem:[#allocation10 + $0x94] sm:$0xf]  ;;  %v3716_v61 = vld [vmem:[#allocation10 + $0x9c] sm:$0xf0] }
 0x1c4   :  { %v5539_v14 = vpop.f32.mrf.mxu2  ;;  %v1388_v9 = vsel %vm122_vm5, %v479_v54, %v1322_v43  ;;  %v483_v31 = vpop.f32.mrf.mxu0  ;;  %v1966_v44 = vsel %vm122_vm5, %v1838_v58, %v1902_v56  ;;  %v3719_v8 = vor.u32 %v3818_v47, %v3716_v61  ;;  %v178_v58 = vld [vmem:[#allocation2 + $0x190] sm:$0xff] }
 0x1c5   :  { %8378 = vst [vmem:[#allocation99_spill] sm:$0xff] %v5539_v14  ;;  %v5548_v63 = vsel %vm121_vm6, %v5428_v53, %v1388_v9  ;;  %v5553_v7 = vadd.f32 %v483_v31, %v4123_v39  ;;  %v652_v17 = vpop.f32.mrf.mxu1  ;;  %v5557_v37 = vsel %vm121_vm6, %v1646_v57, %v1966_v44  ;;  %v179_v31 = vld [vmem:[#allocation2 + $0x198] sm:$0xff] }
 0x1c6   :  { %8379 = vst [vmem:[#allocation100_spill] sm:$0xff] %v5548_v63  ;;  %v5560_v54 = vadd.f32 %v652_v17, %v4125_v40  ;;  %2723 = vmatpush.bf16.msrb.mxu2 %v3719_v8 }
 0x1c7   :  { %8380 = vst [vmem:[#allocation101_spill] sm:$0xff] %v5557_v37  ;;  %v932_v43 = vrot.slane %v5553_v7, 7  ;;  %v1127_v53 = vrot.slane %v5553_v7, 1 }
 0x1c8   :  { %v1520_v56 = vrot.slane %v5560_v54, 7  ;;  %v1712_v9 = vrot.slane %v5560_v54, 1  ;;  %v1903_v57 = vsel %vm123_vm2, %v5515_v24, %v5560_v54 }
 0x1c9   :  { %v994_v44 = vsel %vm963_vm3, %v931_v55, %v932_v43  ;;  %v1189_v17 = vsel %vm1158_vm4, %v1126_v60, %v1127_v53 }
 0x1ca   :  { %v1063_v47 = vsel %vm126_vm0, %v5553_v7, %v994_v44  ;;  %v1257_v61 = vsel %vm127_vm1, %v5512_v16, %v1189_v17  ;;  %v1581_v14 = vsel %vm963_vm3, %v1519_v38, %v1520_v56  ;;  %v1773_v60 = vsel %vm1158_vm4, %v1711_v34, %v1712_v9 }
 0x1cb   :  { %v1323_v37 = vsel %vm123_vm2, %v1062_v10, %v1257_v61  ;;  %v1648_v55 = vsel %vm126_vm0, %v5560_v54, %v1581_v14  ;;  %v217_v44 = vpack.c.bf16 %v179_v31, %v178_v58  ;;  %v1839_v38 = vsel %vm127_vm1, %v5515_v24, %v1773_v60  ;;  %v3714_v61 = vld [vmem:[#allocation10 + $0x90] sm:$0xf]  ;;  %v3819_v60 = vld [vmem:[#allocation10 + $0x98] sm:$0xf0] }
 0x1cc   :  { %v5589_v8 = vpop.f32.mrf.mxu2  ;;  %v1389_v17 = vsel %vm122_vm5, %v5553_v7, %v1323_v37  ;;  %v486_v63 = vpop.f32.mrf.mxu0  ;;  %v1967_v34 = vsel %vm122_vm5, %v1839_v38, %v1903_v57  ;;  %v3715_v57 = vor.u32 %v3819_v60, %v3714_v61 }
 0x1cd   :  { %8381 = vst [vmem:[#allocation102_spill] sm:$0xff] %v5589_v8  ;;  %v5600_v10 = vsel %vm121_vm6, %v5512_v16, %v1389_v17  ;;  %v5605_v14 = vadd.f32 %v486_v63, %v4123_v39  ;;  %v655_v58 = vpop.f32.mrf.mxu1  ;;  %v5609_v37 = vsel %vm121_vm6, %v1647_v22, %v1967_v34  ;;  %v3795_v8 = vld [vmem:[#allocation8 + $0x18] sm:$0xff] }
 0x1ce   :  { %8382 = vst [vmem:[#allocation103_spill] sm:$0xff] %v5600_v10  ;;  %v5612_v31 = vadd.f32 %v655_v58, %v4125_v40  ;;  %2710 = vmatpush.bf16.msrb.mxu1 %v3715_v57  ;;  %2499 = vmatpush.bf16.msrb.mxu0 %v3795_v8 }
 0x1cf   :  { %8383 = vst [vmem:[#allocation104_spill] sm:$0xff] %v5609_v37  ;;  %v933_v17 = vrot.slane %v5605_v14, 7  ;;  %v1128_v10 = vrot.slane %v5605_v14, 1  ;;  %525 = vmatmul.bf16.gmra.mxu0 %v217_v44 }
 0x1d0   :  { %v1521_v63 = vrot.slane %v5612_v31, 7  ;;  %v1713_v38 = vrot.slane %v5612_v31, 1  ;;  %v1904_v22 = vsel %vm123_vm2, %v5515_v24, %v5612_v31  ;;  %694 = vmatmul.bf16.gmra.mxu1 %v217_v44 }
 0x1d1   :  { %863 = vmatmul.bf16.gmra.mxu2 %v217_v44  ;;  %v993_v34 = vsel %vm963_vm3, %v932_v43, %v933_v17  ;;  %v1188_v58 = vsel %vm1158_vm4, %v1127_v53, %v1128_v10 }
 0x1d2   :  { %v1064_v61 = vsel %vm126_vm0, %v5605_v14, %v993_v34  ;;  %v1258_v60 = vsel %vm127_vm1, %v5553_v7, %v1188_v58  ;;  %v1580_v24 = vsel %vm963_vm3, %v1520_v56, %v1521_v63  ;;  %v1772_v44 = vsel %vm1158_vm4, %v1712_v9, %v1713_v38 }
 0x1d3   :  { %v1324_v43 = vsel %vm123_vm2, %v1063_v47, %v1258_v60  ;;  %v1649_v53 = vsel %vm126_vm0, %v5612_v31, %v1580_v24  ;;  %v1840_v8 = vsel %vm127_vm1, %v5560_v54, %v1772_v44 }
 0x1d4   :  { %v5644_v57 = vpop.f32.mrf.mxu2  ;;  %v1390_v56 = vsel %vm122_vm5, %v5605_v14, %v1324_v43  ;;  %v1968_v9 = vsel %vm122_vm5, %v1840_v8, %v1904_v22  ;;  %v488_v34 = vpop.f32.mrf.mxu0 }
 0x1d5   :  { %8384 = vst [vmem:[#allocation105_spill] sm:$0xff] %v5644_v57  ;;  %v5654_v47 = vsel %vm121_vm6, %v5512_v16, %v1390_v56  ;;  %v5658_v58 = vsel %vm121_vm6, %v1648_v55, %v1968_v9  ;;  %v5661_v60 = vadd.f32 %v488_v34, %v4123_v39  ;;  %v657_v24 = vpop.f32.mrf.mxu1  ;;  %v180_v56 = vld [vmem:[#allocation2 + $0x1a0] sm:$0xff]  ;;  %v181_v9 = vld [vmem:[#allocation2 + $0x1a8] sm:$0xff] }
 0x1d6   :  { %8385 = vst [vmem:[#allocation106_spill] sm:$0xff] %v5654_v47  ;;  %v5664_v44 = vadd.f32 %v657_v24, %v4125_v40  ;;  %v3858_v34 = vld [vmem:[#allocation7] sm:$0x7] }
 0x1d7   :  { %8386 = vst [vmem:[#allocation107_spill] sm:$0xff] %v5658_v58  ;;  %v934_v43 = vrot.slane %v5661_v60, 7  ;;  %v1129_v22 = vrot.slane %v5661_v60, 1  ;;  %v5674_v58 = vperm.slane %v3858_v34, 2 }
 0x1d8   :  { %v1522_v8 = vrot.slane %v5664_v44, 7  ;;  %v1714_v16 = vrot.slane %v5664_v44, 1  ;;  %v1905_v55 = vsel %vm123_vm2, %v5560_v54, %v5664_v44 }
 0x1d9   :  { %v992_v24 = vsel %vm963_vm3, %v933_v17, %v934_v43  ;;  %v1187_v37 = vsel %vm1158_vm4, %v1128_v10, %v1129_v22 }
 0x1da   :  { %v1065_v47 = vsel %vm126_vm0, %v5661_v60, %v992_v24  ;;  %v1259_v57 = vsel %vm127_vm1, %v5605_v14, %v1187_v37  ;;  %v1579_v54 = vsel %vm963_vm3, %v1521_v63, %v1522_v8  ;;  %v1771_v34 = vsel %vm1158_vm4, %v1713_v38, %v1714_v16 }
 0x1db   :  { %v1325_v17 = vsel %vm123_vm2, %v1064_v61, %v1259_v57  ;;  %v1650_v10 = vsel %vm126_vm0, %v5664_v44, %v1579_v54  ;;  %v1841_v24 = vsel %vm127_vm1, %v5612_v31, %v1771_v34  ;;  %v218_v37 = vpack.c.bf16 %v181_v9, %v180_v56 }
 0x1dc   :  { %v5698_v0 = vpop.f32.mrf.mxu2  ;;  %v1391_v63 = vsel %vm122_vm5, %v5661_v60, %v1325_v17  ;;  %v1969_v38 = vsel %vm122_vm5, %v1841_v24, %v1905_v55  ;;  %v491_v32 = vpop.f32.mrf.mxu0  ;;  %v5722_v55 = vadd.f32 %v4137_v45, %v5674_v58 }
 0x1dd   :  { %v5708_v61 = vsel %vm121_vm6, %v5553_v7, %v1391_v63  ;;  %v5712_v57 = vsel %vm121_vm6, %v1649_v53, %v1969_v38  ;;  %v5715_v54 = vadd.f32 %v491_v32, %v4123_v39  ;;  %v660_v56 = vpop.f32.mrf.mxu1  ;;  %v5728_v53 = vadd.f32 %v4187_v5, %v5674_v58 }
 0x1de   :  { %8387 = vst [vmem:[#allocation108_spill] sm:$0xff] %v5708_v61  ;;  %v5718_v9 = vadd.f32 %v660_v56, %v4125_v40 }
 0x1df   :  { %8388 = vst [vmem:[#allocation109_spill] sm:$0xff] %v5712_v57  ;;  %v935_v34 = vrot.slane %v5715_v54, 7  ;;  %v1130_v7 = vrot.slane %v5715_v54, 1  ;;  %530 = vmatmul.bf16.gmra.mxu0 %v218_v37 }
 0x1e0   :  { %8389 = vst [vmem:[#allocation110_spill] sm:$0xff] %v5722_v55  ;;  %v1523_v32 = vrot.slane %v5718_v9, 7  ;;  %v1715_v17 = vrot.slane %v5718_v9, 1  ;;  %v1906_v24 = vsel %vm123_vm2, %v5612_v31, %v5718_v9  ;;  %699 = vmatmul.bf16.gmra.mxu1 %v218_v37 }
 0x1e1   :  { %8390 = vst [vmem:[#allocation111_spill] sm:$0xff] %v5728_v53  ;;  %868 = vmatmul.bf16.gmra.mxu2 %v218_v37  ;;  %v991_v45 = vsel %vm963_vm3, %v934_v43, %v935_v34  ;;  %v1186_v63 = vsel %vm1158_vm4, %v1129_v22, %v1130_v7 }
 0x1e2   :  { %v1066_v5 = vsel %vm126_vm0, %v5715_v54, %v991_v45  ;;  %v1260_v38 = vsel %vm127_vm1, %v5661_v60, %v1186_v63  ;;  %v1578_v56 = vsel %vm963_vm3, %v1522_v8, %v1523_v32  ;;  %v1770_v31 = vsel %vm1158_vm4, %v1714_v16, %v1715_v17 }
 0x1e3   :  { %v1326_v43 = vsel %vm123_vm2, %v1065_v47, %v1260_v38  ;;  %v1651_v22 = vsel %vm126_vm0, %v5718_v9, %v1578_v56  ;;  %v1842_v37 = vsel %vm127_vm1, %v5664_v44, %v1770_v31  ;;  %v2279_v63 = vadd.f32 %v5728_v53, %v5722_v55 }
 0x1e4   :  { %v5758_v45 = vpop.f32.mrf.mxu2  ;;  %v1392_v8 = vsel %vm122_vm5, %v5715_v54, %v1326_v43  ;;  %v1970_v47 = vsel %vm122_vm5, %v1842_v37, %v1906_v24  ;;  %v493_v16 = vpop.f32.mrf.mxu0  ;;  %v5769_v38 = vadd.f32 %v4223_v27, %v5674_v58 }
 0x1e5   :  { %8391 = vst [vmem:[#allocation112_spill] sm:$0xff] %v5758_v45  ;;  %v5774_v56 = vsel %vm121_vm6, %v5605_v14, %v1392_v8  ;;  %v5778_v31 = vsel %vm121_vm6, %v1650_v10, %v1970_v47  ;;  %v5781_v53 = vadd.f32 %v493_v16, %v4123_v39  ;;  %v662_v43 = vpop.f32.mrf.mxu1  ;;  %v182_v8 = vld [vmem:[#allocation2 + $0x1b0] sm:$0xff]  ;;  %v183_v47 = vld [vmem:[#allocation2 + $0x1b8] sm:$0xff] }
 0x1e6   :  { %8392 = vst [vmem:[#allocation113_spill] sm:$0xff] %v5769_v38  ;;  %v5784_v24 = vadd.f32 %v662_v43, %v4125_v40  ;;  %v2280_v16 = vadd.f32 %v2279_v63, %v5769_v38  ;;  %v5797_v43 = vadd.f32 %v4267_v1, %v5674_v58 }
 0x1e7   :  { %8393 = vst [vmem:[#allocation114_spill] sm:$0xff] %v5774_v56  ;;  %v936_v37 = vrot.slane %v5781_v53, 7  ;;  %v1131_v27 = vrot.slane %v5781_v53, 1 }
 0x1e8   :  { %8394 = vst [vmem:[#allocation115_spill] sm:$0xff] %v5778_v31  ;;  %v1524_v55 = vrot.slane %v5784_v24, 7  ;;  %v1716_v14 = vrot.slane %v5784_v24, 1  ;;  %v1907_v10 = vsel %vm123_vm2, %v5664_v44, %v5784_v24 }
 0x1e9   :  { %8395 = vst [vmem:[#allocation116_spill] sm:$0xff] %v5797_v43  ;;  %v990_v31 = vsel %vm963_vm3, %v935_v34, %v936_v37  ;;  %v1185_v56 = vsel %vm1158_vm4, %v1130_v7, %v1131_v27 }
 0x1ea   :  { %v1067_v45 = vsel %vm126_vm0, %v5781_v53, %v990_v31  ;;  %v1261_v44 = vsel %vm127_vm1, %v5715_v54, %v1185_v56  ;;  %v1577_v63 = vsel %vm963_vm3, %v1523_v32, %v1524_v55  ;;  %v1769_v1 = vsel %vm1158_vm4, %v1715_v17, %v1716_v14 }
 0x1eb   :  { %v1327_v34 = vsel %vm123_vm2, %v1066_v5, %v1261_v44  ;;  %v1652_v7 = vsel %vm126_vm0, %v5784_v24, %v1577_v63  ;;  %v1843_v31 = vsel %vm127_vm1, %v5718_v9, %v1769_v1  ;;  %v219_v56 = vpack.c.bf16 %v183_v47, %v182_v8 }
 0x1ec   :  { %v5821_v38 = vpop.f32.mrf.mxu2  ;;  %v5825_v32 = vadd.f32 %v4478_v3, %v5674_v58  ;;  %v1393_v17 = vsel %vm122_vm5, %v5781_v53, %v1327_v34  ;;  %v1971_v5 = vsel %vm122_vm5, %v1843_v31, %v1907_v10  ;;  %v496_v44 = vpop.f32.mrf.mxu0  ;;  %v5834_v63 = vadd.f32 %v4521_v30, %v5674_v58 }
 0x1ed   :  { %v5839_v8 = vsel %vm121_vm6, %v5661_v60, %v1393_v17  ;;  %v5843_v3 = vsel %vm121_vm6, %v1651_v22, %v1971_v5  ;;  %v5846_v47 = vadd.f32 %v496_v44, %v4123_v39  ;;  %v665_v1 = vpop.f32.mrf.mxu1  ;;  %v2281_v34 = vadd.f32 %v2280_v16, %v5797_v43 }
 0x1ee   :  { %8396 = vst [vmem:[#allocation117_spill] sm:$0xff] %v5825_v32  ;;  %v666_v10 = vadd.f32 %v665_v1, %v4125_v40  ;;  %v5854_v60 = vadd.f32 %v4311_v29, %v5674_v58  ;;  %v5861_v16 = vadd.f32 %v4355_v13, %v5674_v58  ;;  %v2292_v44 = vadd.f32 %v5834_v63, %v5825_v32 }
 0x1ef   :  { %8397 = vst [vmem:[#allocation118_spill] sm:$0xff] %v5834_v63  ;;  %v937_v30 = vrot.slane %v5846_v47, 7  ;;  %v1132_v31 = vrot.slane %v5846_v47, 1  ;;  %535 = vmatmul.bf16.gmra.mxu0 %v219_v56 }
 0x1f0   :  { %8398 = vst [vmem:[#allocation119_spill] sm:$0xff] %v5843_v3  ;;  %v1525_v17 = vrot.slane %v666_v10, 7  ;;  %v1717_v22 = vrot.slane %v666_v10, 1  ;;  %v1908_v5 = vsel %vm123_vm2, %v5718_v9, %v666_v10  ;;  %704 = vmatmul.bf16.gmra.mxu1 %v219_v56 }
 0x1f1   :  { %8399 = vst [vmem:[#allocation120_spill] sm:$0xff] %v5854_v60  ;;  %873 = vmatmul.bf16.gmra.mxu2 %v219_v56  ;;  %v989_v1 = vsel %vm963_vm3, %v936_v37, %v937_v30  ;;  %v1184_v29 = vsel %vm1158_vm4, %v1131_v27, %v1132_v31  ;;  %v5881_v37 = vadd.f32 %v4567_v11, %v5674_v58 }
 0x1f2   :  { %8400 = vst [vmem:[#allocation121_spill] sm:$0xff] %v5861_v16  ;;  %v1068_v43 = vsel %vm126_vm0, %v5846_v47, %v989_v1  ;;  %v1262_v9 = vsel %vm127_vm1, %v5781_v53, %v1184_v29  ;;  %v1576_v13 = vsel %vm963_vm3, %v1524_v55, %v1525_v17  ;;  %v1768_v56 = vsel %vm1158_vm4, %v1716_v14, %v1717_v22 }
 0x1f3   :  { %8401 = vst [vmem:[#allocation122_spill] sm:$0xff] %v5881_v37  ;;  %v1328_v27 = vsel %vm123_vm2, %v1067_v45, %v1262_v9  ;;  %v1653_v1 = vsel %vm126_vm0, %v666_v10, %v1576_v13  ;;  %v1844_v29 = vsel %vm127_vm1, %v5784_v24, %v1768_v56  ;;  %v2282_v55 = vadd.f32 %v2281_v34, %v5854_v60 }
 0x1f4   :  { %v5890_v63 = vpop.f32.mrf.mxu2  ;;  %v1394_v14 = vsel %vm122_vm5, %v5846_v47, %v1328_v27  ;;  %v1972_v11 = vsel %vm122_vm5, %v1844_v29, %v1908_v5  ;;  %v498_v32 = vpop.f32.mrf.mxu0  ;;  %v2293_v5 = vadd.f32 %v2292_v44, %v5881_v37  ;;  %v5917_v29 = vadd.f32 %v4611_v50, %v5674_v58  ;;  %v185_v50 = vld [vmem:[#allocation2 + $0x1c8] sm:$0xff] }
 0x1f5   :  { %8402 = vst [vmem:[#allocation123_spill] sm:$0xff] %v5890_v63  ;;  %v5901_v45 = vsel %vm121_vm6, %v5715_v54, %v1394_v14  ;;  %v5905_v9 = vsel %vm121_vm6, %v1652_v7, %v1972_v11  ;;  %v5908_v13 = vadd.f32 %v498_v32, %v4123_v39  ;;  %v667_v34 = vpop.f32.mrf.mxu1  ;;  %v2283_v56 = vadd.f32 %v2282_v55, %v5861_v16  ;;  %v184_v11 = vld [vmem:[#allocation2 + $0x1c0] sm:$0xff] }
 0x1f6   :  { %8403 = vst [vmem:[#allocation124_spill] sm:$0xff] %v5901_v45  ;;  %v5912_v27 = vadd.f32 %v667_v34, %v4125_v40  ;;  %v5932_v34 = vadd.f32 %v4399_v59, %v5674_v58  ;;  %v5936_v37 = vadd.f32 %v4655_v25, %v5674_v58  ;;  %v220_v63 = vpack.c.bf16 %v185_v50, %v184_v11 }
 0x1f7   :  { %8404 = vst [vmem:[#allocation125_spill] sm:$0xff] %v5905_v9  ;;  %v938_v54 = vrot.slane %v5908_v13, 7  ;;  %v1133_v7 = vrot.slane %v5908_v13, 1 }
 0x1f8   :  { %8405 = vst [vmem:[#allocation126_spill] sm:$0xff] %v5917_v29  ;;  %v1526_v14 = vrot.slane %v5912_v27, 7  ;;  %v1718_v32 = vrot.slane %v5912_v27, 1  ;;  %v1909_v55 = vsel %vm123_vm2, %v5784_v24, %v5912_v27  ;;  %v1910_v44 = vsel %vm123_vm2, %v666_v10, %v5912_v27 }
 0x1f9   :  { %8406 = vst [vmem:[#allocation127_spill] sm:$0xff] %v5932_v34  ;;  %v988_v16 = vsel %vm963_vm3, %v937_v30, %v938_v54  ;;  %v1183_v24 = vsel %vm1158_vm4, %v1132_v31, %v1133_v7 }
 0x1fa   :  { %8407 = vst [vmem:[#allocation128_spill] sm:$0xff] %v5936_v37  ;;  %v1069_v60 = vsel %vm126_vm0, %v5908_v13, %v988_v16  ;;  %v1263_v9 = vsel %vm127_vm1, %v5846_v47, %v1183_v24  ;;  %v1575_v59 = vsel %vm963_vm3, %v1525_v17, %v1526_v14  ;;  %v1767_v25 = vsel %vm1158_vm4, %v1717_v22, %v1718_v32 }
 0x1fb   :  { %v1329_v30 = vsel %vm123_vm2, %v1068_v43, %v1263_v9  ;;  %v1654_v31 = vsel %vm126_vm0, %v5912_v27, %v1575_v59  ;;  %v1845_v16 = vsel %vm127_vm1, %v666_v10, %v1767_v25  ;;  %v2294_v24 = vadd.f32 %v2293_v5, %v5917_v29 }
 0x1fc   :  { %v5959_v45 = vpop.f32.mrf.mxu2  ;;  %v5964_v17 = vadd.f32 %v4699_v26, %v5674_v58  ;;  %v1395_v43 = vsel %vm122_vm5, %v5908_v13, %v1329_v30  ;;  %v1973_v22 = vsel %vm122_vm5, %v1845_v16, %v1909_v55  ;;  %v501_v9 = vpop.f32.mrf.mxu0  ;;  %v5973_v10 = vadd.f32 %v4440_v48, %v5674_v58 }
 0x1fd   :  { %v5978_v5 = vsel %vm121_vm6, %v5781_v53, %v1395_v43  ;;  %v5982_v26 = vsel %vm121_vm6, %v1653_v1, %v1973_v22  ;;  %v5985_v11 = vadd.f32 %v501_v9, %v4123_v39  ;;  %v670_v50 = vpop.f32.mrf.mxu1  ;;  %v2295_v55 = vadd.f32 %v2294_v24, %v5936_v37 }
 0x1fe   :  { %8408 = vst [vmem:[#allocation129_spill] sm:$0xff] %v5964_v17  ;;  %v5990_v59 = vadd.f32 %v4743_v36, %v5674_v58  ;;  %v5993_v48 = vadd.f32 %v670_v50, %v4125_v40  ;;  %v2284_v53 = vadd.f32 %v2283_v56, %v5932_v34  ;;  %v6001_v16 = vadd.f32 %v4784_v51, %v5674_v58  ;;  %v8447_v34 = vld [vmem:[#allocation70_spill] sm:$0xff] }
 0x1ff   :  { %8409 = vst [vmem:[#allocation130_spill] sm:$0xff] %v5973_v10  ;;  %v8165_v25 = vrot.slane %v5985_v11, 7  ;;  %v1134_v1 = vrot.slane %v5985_v11, 1  ;;  %540 = vmatmul.bf16.gmra.mxu0 %v220_v63  ;;  %v2296_v30 = vadd.f32 %v2295_v55, %v5964_v17  ;;  %v187_v17 = vld [vmem:[#allocation2 + $0x1d8] sm:$0xff] }
 0x200   :  { %8410 = vst [vmem:[#allocation131_spill] sm:$0xff] %v5978_v5  ;;  %v8164_v24 = vrot.slane %v5993_v48, 7  ;;  %v1719_v36 = vrot.slane %v5993_v48, 1  ;;  %709 = vmatmul.bf16.gmra.mxu1 %v220_v63  ;;  %v2285_v43 = vadd.f32 %v2284_v53, %v5973_v10 }
 0x201   :  { %8411 = vst [vmem:[#allocation132_spill] sm:$0xff] %v5982_v26  ;;  %878 = vmatmul.bf16.gmra.mxu2 %v220_v63  ;;  %v987_v56 = vsel %vm963_vm3, %v938_v54, %v8165_v25  ;;  %v1182_v22 = vsel %vm1158_vm4, %v1133_v7, %v1134_v1  ;;  %v2297_v9 = vadd.f32 %v2296_v30, %v5990_v59 }
 0x202   :  { %8412 = vst [vmem:[#allocation133_spill] sm:$0xff] %v5990_v59  ;;  %v1070_v51 = vsel %vm126_vm0, %v5985_v11, %v987_v56  ;;  %v1264_v63 = vsel %vm127_vm1, %v5908_v13, %v1182_v22  ;;  %v1574_v50 = vsel %vm963_vm3, %v1526_v14, %v8164_v24  ;;  %v2076_v54 = vadd.f32 %v4577_v21, %v4531_v18  ;;  %v8433_v21 = vld [vmem:[#allocation60_spill] sm:$0xff] }
 0x203   :  { %8413 = vst [vmem:[#allocation134_spill] sm:$0xff] %v6001_v16  ;;  %v1330_v7 = vsel %vm123_vm2, %v1069_v60, %v1264_v63  ;;  %v1655_v55 = vsel %vm126_vm0, %v5993_v48, %v1574_v50  ;;  %v1766_v53 = vsel %vm1158_vm4, %v1718_v32, %v1719_v36  ;;  %v2180_v56 = vadd.f32 %v4581_v4, %v4540_v46 }
 0x204   :  { %v6032_v30 = vpop.f32.mrf.mxu2  ;;  %v2298_v14 = vadd.f32 %v2297_v9, %v6001_v16  ;;  %v1396_v22 = vsel %vm122_vm5, %v5908_v13, %v1330_v7  ;;  %v1846_v60 = vsel %vm127_vm1, %v5912_v27, %v1766_v53  ;;  %v503_v63 = vpop.f32.mrf.mxu0  ;;  %v2286_v50 = vrot.slane %v2285_v43, 4 }
 0x205   :  { %v1974_v32 = vsel %vm122_vm5, %v1846_v60, %v1910_v44  ;;  %v6046_v24 = vadd.f32 %v503_v63, %v4123_v39  ;;  %v672_v25 = vpop.f32.mrf.mxu1  ;;  %v6051_v9 = vsel %vm121_vm6, %v5846_v47, %v1396_v22  ;;  %v2077_v13 = vadd.f32 %v2076_v54, %v4621_v33  ;;  %v3815_v44 = vld [vmem:[#allocation10 + $0x7c] sm:$0xf]  ;;  %v3704_v60 = vld [vmem:[#allocation10 + $0x84] sm:$0xf0] }
 0x206   :  { %8414 = vst [vmem:[#allocation135_spill] sm:$0xff] %v6051_v9  ;;  %v2181_v7 = vadd.f32 %v2180_v56, %v4625_v52  ;;  %v6057_v27 = vsel %vm121_vm6, %v1654_v31, %v1974_v32  ;;  %v6060_v53 = vadd.f32 %v672_v25, %v4125_v40  ;;  %v3707_v16 = vor.u32 %v3815_v44, %v3704_v60  ;;  %v186_v56 = vld [vmem:[#allocation2 + $0x1d0] sm:$0xff] }
 0x207   :  { %8415 = vst [vmem:[#allocation136_spill] sm:$0xff] %v6057_v27  ;;  %v1135_v63 = vrot.slane %v6046_v24, 1  ;;  %v2078_v59 = vadd.f32 %v2077_v13, %v4665_v15  ;;  %v2299_v22 = vrot.slane %v2298_v14, 4  ;;  %v2287_v25 = vadd.f32 %v2286_v50, %v2285_v43 }
 0x208   :  { %v2182_v47 = vadd.f32 %v2181_v7, %v4669_v12  ;;  %v1720_v54 = vrot.slane %v6060_v53, 1  ;;  %2724 = vmatpush.bf16.msrb.mxu2 %v3707_v16  ;;  %v940_v7 = vrot.slane %v6046_v24, 7 }
 0x209   :  { %v1181_v31 = vsel %vm1158_vm4, %v1134_v1, %v1135_v63  ;;  %v2079_v32 = vadd.f32 %v2078_v59, %v4709_v35  ;;  %v221_v1 = vpack.c.bf16 %v187_v17, %v186_v56  ;;  %v2300_v16 = vadd.f32 %v2299_v22, %v2298_v14 }
 0x20a   :  { %v2183_v37 = vadd.f32 %v2182_v47, %v4713_v28  ;;  %v1265_v13 = vsel %vm127_vm1, %v5985_v11, %v1181_v31  ;;  %v1765_v60 = vsel %vm1158_vm4, %v1719_v36, %v1720_v54  ;;  %v1528_v17 = vrot.slane %v6060_v53, 7 }
 0x20b   :  { %v1331_v44 = vsel %vm123_vm2, %v1070_v51, %v1265_v13  ;;  %v1847_v43 = vsel %vm127_vm1, %v5993_v48, %v1765_v60  ;;  %v1911_v51 = vsel %vm123_vm2, %v5993_v48, %v6060_v53  ;;  %v2080_v56 = vadd.f32 %v2079_v32, %v4753_v6  ;;  %v3816_v60 = vld [vmem:[#allocation10 + $0x80] sm:$0xf0] }
 0x20c   :  { %v6078_v29 = vpop.f32.mrf.mxu2  ;;  %v1397_v59 = vsel %vm122_vm5, %v6046_v24, %v1331_v44  ;;  %v506_v50 = vpop.f32.mrf.mxu0  ;;  %v1975_v14 = vsel %vm122_vm5, %v1847_v43, %v1911_v51  ;;  %v3702_v44 = vld [vmem:[#allocation10 + $0x78] sm:$0xf]  ;;  %v2184_v28 = vadd.f32 %v2183_v37, %v4757_v2  ;;  %v8418_v43 = vrot.slane %v5985_v11, 7 }
 0x20d   :  { %v6093_v36 = vsel %vm121_vm6, %v5985_v11, %v1397_v59  ;;  %v6099_v47 = vadd.f32 %v506_v50, %v4123_v39  ;;  %v675_v22 = vpop.f32.mrf.mxu1  ;;  %v6104_v31 = vsel %vm121_vm6, %v1655_v55, %v1975_v14  ;;  %v3794_v59 = vld [vmem:[#allocation8 + $0x10] sm:$0xff]  ;;  %v3703_v32 = vor.u32 %v3816_v60, %v3702_v44 }
 0x20e   :  { %8416 = vst [vmem:[#allocation137_spill] sm:$0xff] %v6093_v36  ;;  %v6107_v13 = vadd.f32 %v675_v22, %v4125_v40  ;;  %v986_v51 = vsel %vm963_vm3, %v8418_v43, %v940_v7  ;;  %v2288_v6 = vrot.slane %v2287_v25, 2  ;;  %v2081_v55 = vadd.f32 %v2080_v56, %v4793_v62  ;;  %2500 = vmatpush.bf16.msrb.mxu0 %v3794_v59 }
 0x20f   :  { %8417 = vst [vmem:[#allocation138_spill] sm:$0xff] %v6104_v31  ;;  %v1136_v50 = vrot.slane %v6099_v47, 1  ;;  %545 = vmatmul.bf16.gmra.mxu0 %v221_v1  ;;  %v2185_v37 = vadd.f32 %v2184_v28, %v4797_v23  ;;  %v2301_v2 = vrot.slane %v2300_v16, 2  ;;  %v8419_v43 = vrot.slane %v5993_v48, 7  ;;  %2711 = vmatpush.bf16.msrb.mxu1 %v3703_v32 }
 0x210   :  { %v1721_v14 = vrot.slane %v6107_v13, 1  ;;  %v1912_v22 = vsel %vm123_vm2, %v5993_v48, %v6107_v13  ;;  %714 = vmatmul.bf16.gmra.mxu1 %v221_v1  ;;  %v1071_v60 = vsel %vm126_vm0, %v6046_v24, %v986_v51  ;;  %v941_v62 = vrot.slane %v6099_v47, 7 }
 0x211   :  { %883 = vmatmul.bf16.gmra.mxu2 %v221_v1  ;;  %v1573_v44 = vsel %vm963_vm3, %v8419_v43, %v1528_v17  ;;  %v1180_v56 = vsel %vm1158_vm4, %v1135_v63, %v1136_v50  ;;  %v2082_v1 = vadd.f32 %v2081_v55, %v4831_v19  ;;  %v2186_v43 = vadd.f32 %v2185_v37, %v4840_v49  ;;  %v8425_v19 = vld [vmem:[#allocation55_spill] sm:$0xff] }
 0x212   :  { %v1266_v28 = vsel %vm127_vm1, %v6046_v24, %v1180_v56  ;;  %v1764_v48 = vsel %vm1158_vm4, %v1720_v54, %v1721_v14  ;;  %v6146_v32 = vadd.f32 %v2288_v6, %v2287_v25  ;;  %v1656_v56 = vsel %vm126_vm0, %v6060_v53, %v1573_v44 }
 0x213   :  { %v1332_v63 = vsel %vm123_vm2, %v1071_v60, %v1266_v28  ;;  %v1848_v59 = vsel %vm127_vm1, %v6060_v53, %v1764_v48  ;;  %v1529_v6 = vrot.slane %v6107_v13, 7  ;;  %v188_v48 = vld [vmem:[#allocation2 + $0x1e0] sm:$0xff]  ;;  %v6169_v49 = vadd.f32 %v2301_v2, %v2300_v16 }
 0x214   :  { %v6144_v51 = vpop.f32.mrf.mxu2  ;;  %8420 = vst [vmem:[#allocation139_spill] sm:$0xff] %v6146_v32  ;;  %v1398_v54 = vsel %vm122_vm5, %v6099_v47, %v1332_v63  ;;  %v1976_v55 = vsel %vm122_vm5, %v1848_v59, %v1912_v22  ;;  %v508_v37 = vpop.f32.mrf.mxu0  ;;  %v189_v63 = vld [vmem:[#allocation2 + $0x1e8] sm:$0xff]  ;;  %v6184_v2 = vadd.f32 %v8425_v19, %v5674_v58  ;;  %v6341_v32 = vadd.f32 %v8447_v34, %v5674_v58 }
 0x215   :  { %v6159_v60 = vsel %vm121_vm6, %v5985_v11, %v1398_v54  ;;  %v6164_v25 = vsel %vm121_vm6, %v1656_v56, %v1976_v55  ;;  %v6167_v44 = vadd.f32 %v508_v37, %v4123_v39  ;;  %v677_v28 = vpop.f32.mrf.mxu1  ;;  %v8423_v22 = vld [vmem:[#allocation52_spill] sm:$0xff]  ;;  %v985_v11 = vsel %vm963_vm3, %v940_v7, %v941_v62 }
 0x216   :  { %8421 = vst [vmem:[#allocation140_spill] sm:$0xff] %v6159_v60  ;;  %v6173_v59 = vadd.f32 %v8423_v22, %v5674_v58  ;;  %v6178_v54 = vadd.f32 %v677_v28, %v4125_v40  ;;  %v2083_v56 = vrot.slane %v2082_v1, 4  ;;  %v2187_v55 = vrot.slane %v2186_v43, 4 }
 0x217   :  { %8422 = vst [vmem:[#allocation141_spill] sm:$0xff] %v6164_v25  ;;  %v942_v37 = vrot.slane %v6167_v44, 7  ;;  %v1137_v23 = vrot.slane %v6167_v44, 1  ;;  %v222_v35 = vpack.c.bf16 %v189_v63, %v188_v48  ;;  %v1072_v7 = vsel %vm126_vm0, %v6099_v47, %v985_v11 }
 0x218   :  { %8424 = vst [vmem:[#allocation52_spill] sm:$0xff] %v6173_v59  ;;  %v1530_v16 = vrot.slane %v6178_v54, 7  ;;  %v1722_v22 = vrot.slane %v6178_v54, 1  ;;  %v1572_v28 = vsel %vm963_vm3, %v1528_v17, %v1529_v6 }
 0x219   :  { %8426 = vst [vmem:[#allocation55_spill] sm:$0xff] %v6184_v2  ;;  %v984_v12 = vsel %vm963_vm3, %v941_v62, %v942_v37  ;;  %v1179_v52 = vsel %vm1158_vm4, %v1136_v50, %v1137_v23 }
 0x21a   :  { %v1073_v19 = vsel %vm126_vm0, %v6167_v44, %v984_v12  ;;  %v1267_v48 = vsel %vm127_vm1, %v6099_v47, %v1179_v52  ;;  %v1571_v63 = vsel %vm963_vm3, %v1529_v6, %v1530_v16  ;;  %v1763_v17 = vsel %vm1158_vm4, %v1721_v14, %v1722_v22  ;;  %8448 = vst [vmem:[#allocation70_spill] sm:$0xff] %v6341_v32 }
 0x21b   :  { %v1333_v62 = vsel %vm123_vm2, %v1072_v7, %v1267_v48  ;;  %v1658_v50 = vsel %vm126_vm0, %v6178_v54, %v1571_v63  ;;  %v1849_v12 = vsel %vm127_vm1, %v6107_v13, %v1763_v17  ;;  %v1913_v52 = vsel %vm123_vm2, %v6060_v53, %v6178_v54  ;;  %v8427_v53 = vld [vmem:[#allocation58_spill] sm:$0xff] }
 0x21c   :  { %v6219_v6 = vpop.f32.mrf.mxu2  ;;  %v1657_v14 = vsel %vm126_vm0, %v6107_v13, %v1572_v28  ;;  %v6227_v11 = vsel %vm122_vm5, %v6167_v44, %v1333_v62  ;;  %v1977_v7 = vsel %vm122_vm5, %v1849_v12, %v1913_v52  ;;  %v511_v48 = vpop.f32.mrf.mxu0  ;;  %v2305_v63 = vadd.f32 %v6184_v2, %v6173_v59  ;;  %v8430_v59 = vld [vmem:[#allocation56_spill] sm:$0xff] }
 0x21d   :  { %v6235_v17 = vadd.f32 %v8427_v53, %v5674_v58  ;;  %v6239_v15 = vsel %vm121_vm6, %v1657_v14, %v1977_v7  ;;  %v6242_v28 = vadd.f32 %v511_v48, %v4123_v39  ;;  %v680_v62 = vpop.f32.mrf.mxu1  ;;  %v6246_v52 = vadd.f32 %v2187_v55, %v2186_v43  ;;  %v8431_v53 = vld [vmem:[#allocation59_spill] sm:$0xff]  ;;  %v8432_v48 = vld [vmem:[#allocation57_spill] sm:$0xff] }
 0x21e   :  { %8429 = vst [vmem:[#allocation142_spill] sm:$0xff] %v6239_v15  ;;  %v6249_v2 = vadd.f32 %v680_v62, %v4125_v40  ;;  %v2089_v4 = vadd.f32 %v8431_v53, %v8430_v59  ;;  %v6255_v7 = vadd.f32 %v2083_v56, %v2082_v1  ;;  %v2193_v33 = vadd.f32 %v8433_v21, %v8432_v48  ;;  %v8434_v53 = vld [vmem:[#allocation61_spill] sm:$0xff] }
 0x21f   :  { %8428 = vst [vmem:[#allocation58_spill] sm:$0xff] %v6235_v17  ;;  %v943_v46 = vrot.slane %v6242_v28, 7  ;;  %v1138_v14 = vrot.slane %v6242_v28, 1  ;;  %550 = vmatmul.bf16.gmra.mxu0 %v222_v35  ;;  %v2306_v62 = vadd.f32 %v2305_v63, %v6235_v17  ;;  %v6268_v1 = vadd.f32 %v8434_v53, %v5674_v58  ;;  %v8436_v53 = vld [vmem:[#allocation64_spill] sm:$0xff] }
 0x220   :  { %v1531_v12 = vrot.slane %v6249_v2, 7  ;;  %v1723_v43 = vrot.slane %v6249_v2, 1  ;;  %v1914_v55 = vsel %vm123_vm2, %v6107_v13, %v6249_v2  ;;  %719 = vmatmul.bf16.gmra.mxu1 %v222_v35 }
 0x221   :  { %888 = vmatmul.bf16.gmra.mxu2 %v222_v35  ;;  %8435 = vst [vmem:[#allocation61_spill] sm:$0xff] %v6268_v1  ;;  %v983_v56 = vsel %vm963_vm3, %v942_v37, %v943_v46  ;;  %v1178_v21 = vsel %vm1158_vm4, %v1137_v23, %v1138_v14  ;;  %v6286_v37 = vadd.f32 %v8436_v53, %v5674_v58 }
 0x222   :  { %v1074_v48 = vsel %vm126_vm0, %v6242_v28, %v983_v56  ;;  %v1268_v35 = vsel %vm127_vm1, %v6167_v44, %v1178_v21  ;;  %v1570_v13 = vsel %vm963_vm3, %v1530_v16, %v1531_v12  ;;  %v1762_v63 = vsel %vm1158_vm4, %v1722_v22, %v1723_v43  ;;  %v8438_v16 = vld [vmem:[#allocation62_spill] sm:$0xff]  ;;  %v8439_v22 = vld [vmem:[#allocation63_spill] sm:$0xff] }
 0x223   :  { %8437 = vst [vmem:[#allocation64_spill] sm:$0xff] %v6286_v37  ;;  %v1334_v23 = vsel %vm123_vm2, %v1073_v19, %v1268_v35  ;;  %v1659_v56 = vsel %vm126_vm0, %v6249_v2, %v1570_v13  ;;  %v1850_v21 = vsel %vm127_vm1, %v6178_v54, %v1762_v63  ;;  %v2090_v59 = vadd.f32 %v2089_v4, %v8438_v16 }
 0x224   :  { %v6296_v17 = vpop.f32.mrf.mxu2  ;;  %v2194_v18 = vadd.f32 %v2193_v33, %v8439_v22  ;;  %v1400_v53 = vsel %vm122_vm5, %v6242_v28, %v1334_v23  ;;  %v1978_v19 = vsel %vm122_vm5, %v1850_v21, %v1914_v55  ;;  %v513_v35 = vpop.f32.mrf.mxu0  ;;  %v2307_v13 = vadd.f32 %v2306_v62, %v6268_v1  ;;  %v8442_v23 = vld [vmem:[#allocation65_spill] sm:$0xff]  ;;  %v8443_v1 = vld [vmem:[#allocation66_spill] sm:$0xff] }
 0x225   :  { %v6309_v63 = vsel %vm121_vm6, %v6099_v47, %v1400_v53  ;;  %v6313_v4 = vsel %vm121_vm6, %v1658_v50, %v1978_v19  ;;  %v6316_v33 = vadd.f32 %v513_v35, %v4123_v39  ;;  %v682_v22 = vpop.f32.mrf.mxu1  ;;  %v2091_v16 = vadd.f32 %v2090_v59, %v8442_v23  ;;  %v8444_v35 = vld [vmem:[#allocation67_spill] sm:$0xff] }
 0x226   :  { %8440 = vst [vmem:[#allocation143_spill] sm:$0xff] %v6309_v63  ;;  %v6320_v55 = vadd.f32 %v682_v22, %v4125_v40  ;;  %v2085_v62 = vrot.slane %v6255_v7, 2  ;;  %v2189_v21 = vrot.slane %v6246_v52, 2  ;;  %v2195_v47 = vadd.f32 %v2194_v18, %v8443_v1  ;;  %v190_v18 = vld [vmem:[#allocation2 + $0x1f0] sm:$0xff]  ;;  %v191_v1 = vld [vmem:[#allocation2 + $0x1f8] sm:$0xff] }
 0x227   :  { %8441 = vst [vmem:[#allocation144_spill] sm:$0xff] %v6313_v4  ;;  %v2308_v53 = vadd.f32 %v2307_v13, %v6286_v37  ;;  %v944_v50 = vrot.slane %v6316_v33, 7  ;;  %v1139_v19 = vrot.slane %v6316_v33, 1  ;;  %v6330_v10 = vadd.f32 %v8444_v35, %v5674_v58  ;;  %v8446_v13 = vld [vmem:[#allocation68_spill] sm:$0xff] }
 0x228   :  { %v1532_v59 = vrot.slane %v6320_v55, 7  ;;  %v1724_v22 = vrot.slane %v6320_v55, 1  ;;  %v1915_v23 = vsel %vm123_vm2, %v6178_v54, %v6320_v55  ;;  %v2092_v37 = vadd.f32 %v2091_v16, %v8446_v13 }
 0x229   :  { %8445 = vst [vmem:[#allocation67_spill] sm:$0xff] %v6330_v10  ;;  %v982_v35 = vsel %vm963_vm3, %v943_v46, %v944_v50  ;;  %v1177_v27 = vsel %vm1158_vm4, %v1138_v14, %v1139_v19  ;;  %v2309_v9 = vadd.f32 %v2308_v53, %v6330_v10 }
 0x22a   :  { %v1075_v4 = vsel %vm126_vm0, %v6316_v33, %v982_v35  ;;  %v1269_v54 = vsel %vm127_vm1, %v6242_v28, %v1177_v27  ;;  %v1569_v16 = vsel %vm963_vm3, %v1531_v12, %v1532_v59  ;;  %v1761_v34 = vsel %vm1158_vm4, %v1723_v43, %v1724_v22  ;;  %v8449_v12 = vld [vmem:[#allocation73_spill] sm:$0xff] }
 0x22b   :  { %v1335_v46 = vsel %vm123_vm2, %v1074_v48, %v1269_v54  ;;  %v1660_v14 = vsel %vm126_vm0, %v6320_v55, %v1569_v16  ;;  %v1851_v35 = vsel %vm127_vm1, %v6249_v2, %v1761_v34  ;;  %v223_v27 = vpack.c.bf16 %v191_v1, %v190_v18  ;;  %v8451_v16 = vld [vmem:[#allocation69_spill] sm:$0xff] }
 0x22c   :  { %v6365_v13 = vpop.f32.mrf.mxu2  ;;  %v6370_v63 = vadd.f32 %v8449_v12, %v5674_v58  ;;  %v1401_v48 = vsel %vm122_vm5, %v6316_v33, %v1335_v46  ;;  %v1979_v43 = vsel %vm122_vm5, %v1851_v35, %v1915_v23  ;;  %v516_v54 = vpop.f32.mrf.mxu0  ;;  %v2196_v15 = vadd.f32 %v2195_v47, %v8451_v16 }
 0x22d   :  { %v6381_v1 = vsel %vm121_vm6, %v6167_v44, %v1401_v48  ;;  %v6385_v53 = vsel %vm121_vm6, %v1659_v56, %v1979_v43  ;;  %v6388_v18 = vadd.f32 %v516_v54, %v4123_v39  ;;  %v685_v34 = vpop.f32.mrf.mxu1  ;;  %v2310_v46 = vadd.f32 %v2309_v9, %v6341_v32  ;;  %v8454_v44 = vld [vmem:[#allocation71_spill] sm:$0xff]  ;;  %v8455_v48 = vld [vmem:[#allocation72_spill] sm:$0xff] }
 0x22e   :  { %8450 = vst [vmem:[#allocation73_spill] sm:$0xff] %v6370_v63  ;;  %v686_v23 = vadd.f32 %v685_v34, %v4125_v40  ;;  %v6393_v35 = vadd.f32 %v2085_v62, %v6255_v7  ;;  %v6396_v47 = vadd.f32 %v2189_v21, %v6246_v52  ;;  %v2093_v12 = vadd.f32 %v2092_v37, %v8454_v44  ;;  %v8456_v52 = vld [vmem:[#allocation74_spill] sm:$0xff]  ;;  %v8457_v37 = vld [vmem:[#allocation75_spill] sm:$0xff] }
 0x22f   :  { %8452 = vst [vmem:[#allocation145_spill] sm:$0xff] %v6381_v1  ;;  %v2197_v10 = vadd.f32 %v2196_v15, %v8455_v48  ;;  %v945_v56 = vrot.slane %v6388_v18, 7  ;;  %v1140_v43 = vrot.slane %v6388_v18, 1  ;;  %555 = vmatmul.bf16.gmra.mxu0 %v223_v27  ;;  %v2311_v54 = vadd.f32 %v2310_v46, %v6370_v63 }
 0x230   :  { %8453 = vst [vmem:[#allocation146_spill] sm:$0xff] %v6385_v53  ;;  %v1533_v9 = vrot.slane %v686_v23, 7  ;;  %v1725_v32 = vrot.slane %v686_v23, 1  ;;  %v1916_v7 = vsel %vm123_vm2, %v6249_v2, %v686_v23  ;;  %724 = vmatmul.bf16.gmra.mxu1 %v223_v27  ;;  %v2094_v62 = vadd.f32 %v2093_v12, %v8456_v52  ;;  %v8458_v12 = vld [vmem:[#allocation77_spill] sm:$0xff] }
 0x231   :  { %893 = vmatmul.bf16.gmra.mxu2 %v223_v27  ;;  %v2198_v21 = vadd.f32 %v2197_v10, %v8457_v37  ;;  %v981_v15 = vsel %vm963_vm3, %v944_v50, %v945_v56  ;;  %v1176_v34 = vsel %vm1158_vm4, %v1139_v19, %v1140_v43 }
 0x232   :  { %v1076_v46 = vsel %vm126_vm0, %v6388_v18, %v981_v15  ;;  %v1270_v2 = vsel %vm127_vm1, %v6316_v33, %v1176_v34  ;;  %v1568_v27 = vsel %vm963_vm3, %v1532_v59, %v1533_v9  ;;  %v1760_v10 = vsel %vm1158_vm4, %v1724_v22, %v1725_v32 }
 0x233   :  { %v2095_v63 = vadd.f32 %v2094_v62, %v8458_v12  ;;  %v1336_v50 = vsel %vm123_vm2, %v1075_v4, %v1270_v2  ;;  %v1661_v19 = vsel %vm126_vm0, %v686_v23, %v1568_v27  ;;  %v1852_v15 = vsel %vm127_vm1, %v6320_v55, %v1760_v10  ;;  %v8462_v27 = vld [vmem:[#allocation78_spill] sm:$0xff] }
 0x234   :  { %v6430_v37 = vpop.f32.mrf.mxu2  ;;  %v8460_v59 = vrot.slane %v6169_v49, 1  ;;  %v2312_v22 = vrot.slane %v2311_v54, 4  ;;  %v1402_v62 = vsel %vm122_vm5, %v6388_v18, %v1336_v50  ;;  %v1980_v4 = vsel %vm122_vm5, %v1852_v15, %v1916_v7  ;;  %v518_v2 = vpop.f32.mrf.mxu0  ;;  %v8465_v50 = vld [vmem:[#allocation76_spill] sm:$0xff]  ;;  %v8467_v15 = vld [vmem:[#allocation79_spill] sm:$0xff] }
 0x235   :  { %8459 = vst [vmem:[#allocation147_spill] sm:$0xff] %v6430_v37  ;;  %v2199_v12 = vadd.f32 %v2198_v21, %v8462_v27  ;;  %v6446_v10 = vsel %vm121_vm6, %v6242_v28, %v1402_v62  ;;  %v687_v52 = vpop.f32.mrf.mxu1  ;;  %v6457_v48 = vadd.f32 %v8465_v50, %v5674_v58  ;;  %v2087_v21 = vrot.slane %v6393_v35, 1 }
 0x236   :  { %v6435_v34 = vadd.f32 %v8460_v59, %v6169_v49  ;;  %8463 = vst [vmem:[#allocation149_spill] sm:$0xff] %v6446_v10  ;;  %v6450_v49 = vsel %vm121_vm6, %v1660_v14, %v1980_v4  ;;  %v6453_v59 = vadd.f32 %v518_v2, %v4123_v39  ;;  %v6460_v7 = vadd.f32 %v687_v52, %v4125_v40 }
 0x237   :  { %8464 = vst [vmem:[#allocation150_spill] sm:$0xff] %v6450_v49  ;;  %v2191_v28 = vrot.slane %v6396_v47, 1  ;;  %v6466_v62 = vadd.f32 %v8467_v15, %v5674_v58  ;;  %v2096_v2 = vrot.slane %v2095_v63, 4  ;;  %v6479_v15 = vadd.f32 %v2312_v22, %v2311_v54 }
 0x238   :  { %8461 = vst [vmem:[#allocation148_spill] sm:$0xff] %v6435_v34  ;;  %v946_v14 = vrot.slane %v6453_v59, 7  ;;  %v1141_v4 = vrot.slane %v6453_v59, 1  ;;  %v1534_v27 = vrot.slane %v6460_v7, 7  ;;  %v1726_v50 = vrot.slane %v6460_v7, 1 }
 0x239   :  { %8466 = vst [vmem:[#allocation76_spill] sm:$0xff] %v6457_v48  ;;  %v1917_v52 = vsel %vm123_vm2, %v6320_v55, %v6460_v7  ;;  %v1918_v16 = vsel %vm123_vm2, %v686_v23, %v6460_v7  ;;  %v2200_v44 = vrot.slane %v2199_v12, 4  ;;  %v6504_v53 = vadd.f32 %v2096_v2, %v2095_v63 }
 0x23a   :  { %8468 = vst [vmem:[#allocation79_spill] sm:$0xff] %v6466_v62  ;;  %v980_v34 = vsel %vm963_vm3, %v945_v56, %v946_v14  ;;  %v1175_v49 = vsel %vm1158_vm4, %v1140_v43, %v1141_v4  ;;  %v1567_v37 = vsel %vm963_vm3, %v1533_v9, %v1534_v27  ;;  %v1759_v54 = vsel %vm1158_vm4, %v1725_v32, %v1726_v50 }
 0x23b   :  { %v1077_v10 = vsel %vm126_vm0, %v6453_v59, %v980_v34  ;;  %v1271_v55 = vsel %vm127_vm1, %v6388_v18, %v1175_v49  ;;  %v1662_v43 = vsel %vm126_vm0, %v6460_v7, %v1567_v37  ;;  %v1853_v34 = vsel %vm127_vm1, %v686_v23, %v1759_v54  ;;  %v8470_v49 = vld [vmem:[#allocation82_spill] sm:$0xff] }
 0x23c   :  { %v1337_v56 = vsel %vm123_vm2, %v1076_v46, %v1271_v55  ;;  %v6502_v22 = vpop.f32.mrf.mxu2  ;;  %v2318_v9 = vadd.f32 %v6466_v62, %v6457_v48  ;;  %v6510_v32 = vadd.f32 %v8470_v49, %v5674_v58  ;;  %v1981_v37 = vsel %vm122_vm5, %v1853_v34, %v1917_v52  ;;  %v521_v55 = vpop.f32.mrf.mxu0 }
 0x23d   :  { %8469 = vst [vmem:[#allocation151_spill] sm:$0xff] %v6502_v22  ;;  %v1403_v46 = vsel %vm122_vm5, %v6453_v59, %v1337_v56  ;;  %v6524_v23 = vsel %vm121_vm6, %v1661_v19, %v1981_v37  ;;  %v6527_v2 = vadd.f32 %v521_v55, %v4123_v39  ;;  %v690_v54 = vpop.f32.mrf.mxu1  ;;  %v6529_v49 = vadd.f32 %v2200_v44, %v2199_v12  ;;  %v8475_v19 = vld [vmem:[#allocation83_spill] sm:$0xff]  ;;  %v3692_v22 = vld [vmem:[#allocation10 + $0x6c] sm:$0xf0] }
 0x23e   :  { %8471 = vst [vmem:[#allocation82_spill] sm:$0xff] %v6510_v32  ;;  %v6520_v63 = vsel %vm121_vm6, %v6316_v33, %v1403_v46  ;;  %v6533_v52 = vadd.f32 %v690_v54, %v4125_v40  ;;  %v6536_v34 = vadd.f32 %v2087_v21, %v6393_v35  ;;  %v6539_v33 = vadd.f32 %v2191_v28, %v6396_v47  ;;  %v8474_v46 = vld [vmem:[#allocation80_spill] sm:$0xff]  ;;  %v8476_v54 = vld [vmem:[#allocation85_spill] sm:$0xff] }
 0x23f   :  { %8472 = vst [vmem:[#allocation152_spill] sm:$0xff] %v6520_v63  ;;  %v2102_v37 = vadd.f32 %v8475_v19, %v8474_v46  ;;  %v947_v55 = vrot.slane %v6527_v2, 7  ;;  %v1142_v62 = vrot.slane %v6527_v2, 1  ;;  %v2319_v12 = vadd.f32 %v2318_v9, %v6510_v32  ;;  %v8478_v21 = vld [vmem:[#allocation81_spill] sm:$0xff]  ;;  %v8479_v28 = vld [vmem:[#allocation84_spill] sm:$0xff]  ;;  %v8480_v9 = vld [vmem:[#allocation86_spill] sm:$0xff] }
 0x240   :  { %8473 = vst [vmem:[#allocation153_spill] sm:$0xff] %v6524_v23  ;;  %v6549_v56 = vadd.f32 %v8476_v54, %v5674_v58  ;;  %v1535_v35 = vrot.slane %v6533_v52, 7  ;;  %v1727_v47 = vrot.slane %v6533_v52, 1  ;;  %v2206_v48 = vadd.f32 %v8479_v28, %v8478_v21 }
 0x241   :  { %v979_v19 = vsel %vm963_vm3, %v946_v14, %v947_v55  ;;  %v1174_v46 = vsel %vm1158_vm4, %v1141_v4, %v1142_v62  ;;  %v2103_v32 = vadd.f32 %v2102_v37, %v8480_v9  ;;  %v8481_v14 = vld [vmem:[#allocation88_spill] sm:$0xff] }
 0x242   :  { %8477 = vst [vmem:[#allocation85_spill] sm:$0xff] %v6549_v56  ;;  %v1078_v54 = vsel %vm126_vm0, %v6527_v2, %v979_v19  ;;  %v1272_v23 = vsel %vm127_vm1, %v6453_v59, %v1174_v46  ;;  %v1566_v28 = vsel %vm963_vm3, %v1534_v27, %v1535_v35  ;;  %v6571_v21 = vadd.f32 %v8481_v14, %v5674_v58  ;;  %v8484_v46 = vld [vmem:[#allocation87_spill] sm:$0xff] }
 0x243   :  { %v1338_v4 = vsel %vm123_vm2, %v1077_v10, %v1272_v23  ;;  %v1663_v37 = vsel %vm126_vm0, %v6533_v52, %v1566_v28  ;;  %v1758_v19 = vsel %vm1158_vm4, %v1726_v50, %v1727_v47  ;;  %v2207_v9 = vadd.f32 %v2206_v48, %v8484_v46  ;;  %v8485_v28 = vld [vmem:[#allocation91_spill] sm:$0xff] }
 0x244   :  { %8482 = vst [vmem:[#allocation88_spill] sm:$0xff] %v6571_v21  ;;  %v6580_v44 = vpop.f32.mrf.mxu2  ;;  %v2320_v27 = vadd.f32 %v2319_v12, %v6549_v56  ;;  %v1404_v14 = vsel %vm122_vm5, %v6453_v59, %v1338_v4  ;;  %v1854_v10 = vsel %vm127_vm1, %v6460_v7, %v1758_v19  ;;  %v523_v23 = vpop.f32.mrf.mxu0  ;;  %v6592_v63 = vadd.f32 %v8485_v28, %v5674_v58  ;;  %v8488_v4 = vld [vmem:[#allocation89_spill] sm:$0xff]  ;;  %v8489_v7 = vld [vmem:[#allocation90_spill] sm:$0xff]  ;;  %v3812_v28 = vld [vmem:[#allocation10 + $0x64] sm:$0xf] }
 0x245   :  { %8483 = vst [vmem:[#allocation154_spill] sm:$0xff] %v6580_v44  ;;  %v1982_v50 = vsel %vm122_vm5, %v1854_v10, %v1918_v16  ;;  %v6597_v48 = vadd.f32 %v523_v23, %v4123_v39  ;;  %v692_v12 = vpop.f32.mrf.mxu1  ;;  %v6602_v59 = vsel %vm121_vm6, %v6388_v18, %v1404_v14  ;;  %v2104_v56 = vadd.f32 %v2103_v32, %v8488_v4 }
 0x246   :  { %8486 = vst [vmem:[#allocation91_spill] sm:$0xff] %v6592_v63  ;;  %v2208_v19 = vadd.f32 %v2207_v9, %v8489_v7  ;;  %v6607_v46 = vadd.f32 %v692_v12, %v4125_v40  ;;  %v6611_v16 = vsel %vm121_vm6, %v1662_v43, %v1982_v50  ;;  %v2321_v10 = vadd.f32 %v2320_v27, %v6571_v21  ;;  %v8492_v43 = vld [vmem:[#allocation93_spill] sm:$0xff] }
 0x247   :  { %8487 = vst [vmem:[#allocation155_spill] sm:$0xff] %v6602_v59  ;;  %v948_v23 = vrot.slane %v6597_v48, 7  ;;  %v1143_v18 = vrot.slane %v6597_v48, 1  ;;  %v3695_v14 = vor.u32 %v3812_v28, %v3692_v22  ;;  %v8491_v59 = vld [vmem:[#allocation92_spill] sm:$0xff] }
 0x248   :  { %8490 = vst [vmem:[#allocation156_spill] sm:$0xff] %v6611_v16  ;;  %v2105_v32 = vadd.f32 %v2104_v56, %v8491_v59  ;;  %v1536_v9 = vrot.slane %v6607_v46, 7  ;;  %v1728_v12 = vrot.slane %v6607_v46, 1  ;;  %v1919_v7 = vsel %vm123_vm2, %v6533_v52, %v6607_v46  ;;  %v8493_v56 = vld [vmem:[#allocation94_spill] sm:$0xff] }
 0x249   :  { %v2209_v50 = vadd.f32 %v2208_v19, %v8492_v43  ;;  %v2322_v27 = vadd.f32 %v2321_v10, %v6592_v63  ;;  %v978_v21 = vsel %vm963_vm3, %v947_v55, %v948_v23  ;;  %v1173_v22 = vsel %vm1158_vm4, %v1142_v62, %v1143_v18  ;;  %2725 = vmatpush.bf16.msrb.mxu2 %v3695_v14  ;;  %v8495_v55 = vld [vmem:[#allocation95_spill] sm:$0xff]  ;;  %v8497_v43 = vld [vmem:[#allocation96_spill] sm:$0xff] }
 0x24a   :  { %v6631_v28 = vadd.f32 %v8493_v56, %v5674_v58  ;;  %v1079_v59 = vsel %vm126_vm0, %v6597_v48, %v978_v21  ;;  %v1273_v19 = vsel %vm127_vm1, %v6527_v2, %v1173_v22  ;;  %v1565_v10 = vsel %vm963_vm3, %v1535_v35, %v1536_v9 }
 0x24b   :  { %v2106_v63 = vadd.f32 %v2105_v32, %v8495_v55  ;;  %v1339_v62 = vsel %vm123_vm2, %v1078_v54, %v1273_v19  ;;  %v1664_v14 = vsel %vm126_vm0, %v6607_v46, %v1565_v10  ;;  %v1757_v56 = vsel %vm1158_vm4, %v1727_v47, %v1728_v12  ;;  %v8499_v19 = vld [vmem:[#allocation97_spill] sm:$0xff]  ;;  %v8501_v55 = vld [vmem:[#allocation98_spill] sm:$0xff] }
 0x24c   :  { %8494 = vst [vmem:[#allocation94_spill] sm:$0xff] %v6631_v28  ;;  %v6649_v21 = vpop.f32.mrf.mxu2  ;;  %v2210_v4 = vadd.f32 %v2209_v50, %v8497_v43  ;;  %v6654_v22 = vadd.f32 %v5496_v20, %v5674_v58  ;;  %v1405_v35 = vsel %vm122_vm5, %v6597_v48, %v1339_v62  ;;  %v1855_v54 = vsel %vm127_vm1, %v6533_v52, %v1757_v56  ;;  %v526_v32 = vpop.f32.mrf.mxu0 }
 0x24d   :  { %8496 = vst [vmem:[#allocation157_spill] sm:$0xff] %v6649_v21  ;;  %v2107_v10 = vadd.f32 %v2106_v63, %v8499_v19  ;;  %v6666_v47 = vsel %vm121_vm6, %v6527_v2, %v1405_v35  ;;  %v1983_v20 = vsel %vm122_vm5, %v1855_v54, %v1919_v7  ;;  %v6671_v50 = vadd.f32 %v526_v32, %v4123_v39  ;;  %v695_v43 = vpop.f32.mrf.mxu1  ;;  %v3690_v35 = vld [vmem:[#allocation10 + $0x60] sm:$0xf]  ;;  %v3813_v19 = vld [vmem:[#allocation10 + $0x68] sm:$0xf0] }
 0x24e   :  { %8498 = vst [vmem:[#allocation158_spill] sm:$0xff] %v6654_v22  ;;  %v2323_v62 = vadd.f32 %v2322_v27, %v6631_v28  ;;  %v2211_v16 = vadd.f32 %v2210_v4, %v8501_v55  ;;  %v6677_v56 = vsel %vm121_vm6, %v1663_v37, %v1983_v20  ;;  %v6680_v63 = vadd.f32 %v695_v43, %v4125_v40  ;;  %v8503_v21 = vld [vmem:[#allocation100_spill] sm:$0xff]  ;;  %v8504_v27 = vld [vmem:[#allocation101_spill] sm:$0xff] }
 0x24f   :  { %8500 = vst [vmem:[#allocation159_spill] sm:$0xff] %v6666_v47  ;;  %v3793_v47 = vld [vmem:[#allocation8 + $0x8] sm:$0xff]  ;;  %v949_v7 = vrot.slane %v6671_v50, 7  ;;  %v1144_v54 = vrot.slane %v6671_v50, 1  ;;  %v3691_v32 = vor.u32 %v3813_v19, %v3690_v35  ;;  %v2108_v44 = vadd.f32 %v2107_v10, %v8503_v21 }
 0x250   :  { %8502 = vst [vmem:[#allocation160_spill] sm:$0xff] %v6677_v56  ;;  %v2212_v28 = vadd.f32 %v2211_v16, %v8504_v27  ;;  %v1537_v4 = vrot.slane %v6680_v63, 7  ;;  %v1729_v37 = vrot.slane %v6680_v63, 1  ;;  %v1920_v43 = vsel %vm123_vm2, %v6533_v52, %v6680_v63  ;;  %2501 = vmatpush.bf16.msrb.mxu0 %v3793_v47 }
 0x251   :  { %v2324_v20 = vadd.f32 %v2323_v62, %v6654_v22  ;;  %v977_v55 = vsel %vm963_vm3, %v948_v23, %v949_v7  ;;  %v1172_v19 = vsel %vm1158_vm4, %v1143_v18, %v1144_v54  ;;  %2712 = vmatpush.bf16.msrb.mxu1 %v3691_v32  ;;  %v8505_v16 = vrot.slane %v6504_v53, 2 }
 0x252   :  { %v1080_v35 = vsel %vm126_vm0, %v6671_v50, %v977_v55  ;;  %v1274_v52 = vsel %vm127_vm1, %v6597_v48, %v1172_v19  ;;  %v1564_v47 = vsel %vm963_vm3, %v1536_v9, %v1537_v4  ;;  %v1756_v23 = vsel %vm1158_vm4, %v1728_v12, %v1729_v37 }
 0x253   :  { %v2099_v10 = vadd.f32 %v8505_v16, %v6504_v53  ;;  %v1340_v18 = vsel %vm123_vm2, %v1079_v59, %v1274_v52  ;;  %v1665_v53 = vsel %vm126_vm0, %v6680_v63, %v1564_v47  ;;  %v1856_v55 = vsel %vm127_vm1, %v6607_v46, %v1756_v23 }
 0x254   :  { %v6718_v62 = vpop.f32.mrf.mxu2  ;;  %v2109_v32 = vrot.slane %v2108_v44, 4  ;;  %v1406_v9 = vsel %vm122_vm5, %v6671_v50, %v1340_v18  ;;  %v1984_v12 = vsel %vm122_vm5, %v1856_v55, %v1920_v43  ;;  %v528_v19 = vpop.f32.mrf.mxu0  ;;  %v8507_v59 = vrot.slane %v6529_v49, 2 }
 0x255   :  { %8506 = vst [vmem:[#allocation161_spill] sm:$0xff] %v6718_v62  ;;  %v2213_v52 = vrot.slane %v2212_v28, 4  ;;  %v2325_v47 = vrot.slane %v2324_v20, 4  ;;  %v6731_v23 = vsel %vm121_vm6, %v6527_v2, %v1406_v9  ;;  %v6735_v22 = vsel %vm121_vm6, %v1664_v14, %v1984_v12  ;;  %v697_v43 = vpop.f32.mrf.mxu1  ;;  %v8514_v14 = vld [vmem:[#allocation102_spill] sm:$0xff] }
 0x256   :  { %v2203_v16 = vadd.f32 %v8507_v59, %v6529_v49  ;;  %8508 = vst [vmem:[#allocation162_spill] sm:$0xff] %v6731_v23  ;;  %v6738_v18 = vadd.f32 %v528_v19, %v4123_v39  ;;  %v8510_v55 = vrot.slane %v6479_v15, 2  ;;  %v8512_v49 = vld [vmem:[#allocation99_spill] sm:$0xff]  ;;  %v6750_v2 = vadd.f32 %v697_v43, %v4125_v40 }
 0x257   :  { %8509 = vst [vmem:[#allocation163_spill] sm:$0xff] %v6735_v22  ;;  %v6747_v59 = vadd.f32 %v8512_v49, %v5674_v58  ;;  %v2100_v9 = vrot.slane %v2099_v10, 1  ;;  %v6754_v12 = vadd.f32 %v8514_v14, %v5674_v58  ;;  %v2110_v22 = vadd.f32 %v2109_v32, %v2108_v44 }
 0x258   :  { %v6743_v27 = vadd.f32 %v8510_v55, %v6479_v15  ;;  %v950_v19 = vrot.slane %v6738_v18, 7  ;;  %v1145_v21 = vrot.slane %v6738_v18, 1  ;;  %v1538_v15 = vrot.slane %v6750_v2, 7 }
 0x259   :  { %8513 = vst [vmem:[#allocation99_spill] sm:$0xff] %v6747_v59  ;;  %v1730_v55 = vrot.slane %v6750_v2, 1  ;;  %v1921_v43 = vsel %vm123_vm2, %v6607_v46, %v6750_v2  ;;  %v2214_v49 = vadd.f32 %v2213_v52, %v2212_v28  ;;  %v2326_v56 = vadd.f32 %v2325_v47, %v2324_v20 }
 0x25a   :  { %8511 = vst [vmem:[#allocation164_spill] sm:$0xff] %v6743_v27  ;;  %v976_v14 = vsel %vm963_vm3, %v949_v7, %v950_v19  ;;  %v1171_v23 = vsel %vm1158_vm4, %v1144_v54, %v1145_v21  ;;  %v2204_v62 = vrot.slane %v2203_v16, 1  ;;  %v1563_v46 = vsel %vm963_vm3, %v1537_v4, %v1538_v15 }
 0x25b   :  { %8515 = vst [vmem:[#allocation102_spill] sm:$0xff] %v6754_v12  ;;  %v1081_v44 = vsel %vm126_vm0, %v6738_v18, %v976_v14  ;;  %v1275_v32 = vsel %vm127_vm1, %v6671_v50, %v1171_v23  ;;  %v1755_v28 = vsel %vm1158_vm4, %v1729_v37, %v1730_v55  ;;  %v1666_v54 = vsel %vm126_vm0, %v6750_v2, %v1563_v46 }
 0x25c   :  { %v1341_v7 = vsel %vm123_vm2, %v1080_v35, %v1275_v32  ;;  %v1857_v20 = vsel %vm127_vm1, %v6680_v63, %v1755_v28  ;;  %v6786_v52 = vpop.f32.mrf.mxu2  ;;  %v2111_v47 = vrot.slane %v2110_v22, 2  ;;  %v2331_v4 = vadd.f32 %v6754_v12, %v6747_v59  ;;  %v531_v23 = vpop.f32.mrf.mxu0  ;;  %v8517_v32 = vld [vmem:[#allocation105_spill] sm:$0xff] }
 0x25d   :  { %8516 = vst [vmem:[#allocation165_spill] sm:$0xff] %v6786_v52  ;;  %v1407_v37 = vsel %vm122_vm5, %v6738_v18, %v1341_v7  ;;  %v1985_v35 = vsel %vm122_vm5, %v1857_v20, %v1921_v43  ;;  %v2215_v14 = vrot.slane %v2214_v49, 2  ;;  %v6797_v46 = vadd.f32 %v8517_v32, %v5674_v58  ;;  %v700_v59 = vpop.f32.mrf.mxu1 }
 0x25e   :  { %v6802_v28 = vsel %vm121_vm6, %v6597_v48, %v1407_v37  ;;  %v6806_v12 = vsel %vm121_vm6, %v1665_v53, %v1985_v35  ;;  %v6809_v7 = vadd.f32 %v531_v23, %v4123_v39  ;;  %v6813_v20 = vadd.f32 %v700_v59, %v4125_v40 }
 0x25f   :  { %8518 = vst [vmem:[#allocation105_spill] sm:$0xff] %v6797_v46  ;;  %v6815_v32 = vadd.f32 %v2100_v9, %v2099_v10  ;;  %v6819_v52 = vadd.f32 %v6539_v33, %v6536_v34  ;;  %v2327_v48 = vrot.slane %v2326_v56, 2  ;;  %v6823_v35 = vadd.f32 %v2204_v62, %v2203_v16 }
 0x260   :  { %8519 = vst [vmem:[#allocation166_spill] sm:$0xff] %v6802_v28  ;;  %v951_v37 = vrot.slane %v6809_v7, 7  ;;  %v1146_v53 = vrot.slane %v6809_v7, 1  ;;  %v1539_v23 = vrot.slane %v6813_v20, 7  ;;  %v1731_v43 = vrot.slane %v6813_v20, 1 }
 0x261   :  { %8520 = vst [vmem:[#allocation167_spill] sm:$0xff] %v6806_v12  ;;  %v1922_v10 = vsel %vm123_vm2, %v6680_v63, %v6813_v20  ;;  %v2112_v59 = vadd.f32 %v2111_v47, %v2110_v22  ;;  %v2332_v34 = vadd.f32 %v2331_v4, %v6797_v46  ;;  %v2216_v62 = vadd.f32 %v2215_v14, %v2214_v49  ;;  %v8524_v14 = vld [vmem:[#allocation106_spill] sm:$0xff] }
 0x262   :  { %8521 = vst [vmem:[#allocation168_spill] sm:$0xff] %v6819_v52  ;;  %v975_v33 = vsel %vm963_vm3, %v950_v19, %v951_v37  ;;  %v1170_v9 = vsel %vm1158_vm4, %v1145_v21, %v1146_v53  ;;  %v1562_v22 = vsel %vm963_vm3, %v1538_v15, %v1539_v23  ;;  %v1754_v63 = vsel %vm1158_vm4, %v1730_v55, %v1731_v43  ;;  %v8523_v55 = vld [vmem:[#allocation103_spill] sm:$0xff] }
 0x263   :  { %v1082_v16 = vsel %vm126_vm0, %v6809_v7, %v975_v33  ;;  %v1276_v52 = vsel %vm127_vm1, %v6738_v18, %v1170_v9  ;;  %v6848_v19 = vadd.f32 %v5698_v0, %v5674_v58  ;;  %v1667_v49 = vsel %vm126_vm0, %v6813_v20, %v1562_v22  ;;  %v8525_v9 = vld [vmem:[#allocation104_spill] sm:$0xff]  ;;  %v8526_v22 = vld [vmem:[#allocation107_spill] sm:$0xff] }
 0x264   :  { %v1342_v21 = vsel %vm123_vm2, %v1081_v44, %v1276_v52  ;;  %v1858_v47 = vsel %vm127_vm1, %v6750_v2, %v1754_v63  ;;  %v6858_v4 = vpop.f32.mrf.mxu2  ;;  %v6860_v15 = vadd.f32 %v2327_v48, %v2326_v56  ;;  %v2115_v33 = vadd.f32 %v8524_v14, %v8523_v55  ;;  %v533_v52 = vpop.f32.mrf.mxu0 }
 0x265   :  { %8522 = vst [vmem:[#allocation169_spill] sm:$0xff] %v6848_v19  ;;  %v1408_v0 = vsel %vm122_vm5, %v6809_v7, %v1342_v21  ;;  %v1986_v44 = vsel %vm122_vm5, %v1858_v47, %v1922_v10  ;;  %v2219_v46 = vadd.f32 %v8526_v22, %v8525_v9  ;;  %v6881_v48 = vadd.f32 %v533_v52, %v4123_v39  ;;  %v702_v21 = vpop.f32.mrf.mxu1 }
 0x266   :  { %v6874_v63 = vsel %vm121_vm6, %v6671_v50, %v1408_v0  ;;  %v6878_v56 = vsel %vm121_vm6, %v1666_v54, %v1986_v44  ;;  %v2116_v14 = vadd.f32 %v2115_v33, %v5708_v61  ;;  %v6885_v10 = vadd.f32 %v702_v21, %v4125_v40  ;;  %v8529_v44 = vld [vmem:[#allocation112_spill] sm:$0xff] }
 0x267   :  { %8527 = vst [vmem:[#allocation170_spill] sm:$0xff] %v6874_v63  ;;  %v2113_v47 = vrot.slane %v2112_v59, 1  ;;  %v2217_v22 = vrot.slane %v2216_v62, 1  ;;  %v2220_v9 = vadd.f32 %v2219_v46, %v5712_v57  ;;  %v2333_v50 = vadd.f32 %v2332_v34, %v6848_v19  ;;  %v8531_v46 = vld [vmem:[#allocation114_spill] sm:$0xff]  ;;  %v8532_v34 = vld [vmem:[#allocation115_spill] sm:$0xff] }
 0x268   :  { %8528 = vst [vmem:[#allocation171_spill] sm:$0xff] %v6878_v56  ;;  %v952_v0 = vrot.slane %v6881_v48, 7  ;;  %v1147_v54 = vrot.slane %v6881_v48, 1  ;;  %v6893_v52 = vadd.f32 %v8529_v44, %v5674_v58  ;;  %v1540_v55 = vrot.slane %v6885_v10, 7 }
 0x269   :  { %v1732_v33 = vrot.slane %v6885_v10, 1  ;;  %v1923_v21 = vsel %vm123_vm2, %v6750_v2, %v6885_v10  ;;  %v2117_v57 = vadd.f32 %v2116_v14, %v8531_v46  ;;  %v2221_v19 = vadd.f32 %v2220_v9, %v8532_v34 }
 0x26a   :  { %8530 = vst [vmem:[#allocation112_spill] sm:$0xff] %v6893_v52  ;;  %v974_v61 = vsel %vm963_vm3, %v951_v37, %v952_v0  ;;  %v1169_v44 = vsel %vm1158_vm4, %v1146_v53, %v1147_v54  ;;  %v1561_v2 = vsel %vm963_vm3, %v1539_v23, %v1540_v55  ;;  %v6919_v37 = vadd.f32 %v5821_v38, %v5674_v58 }
 0x26b   :  { %v1083_v27 = vsel %vm126_vm0, %v6881_v48, %v974_v61  ;;  %v1277_v56 = vsel %vm127_vm1, %v6809_v7, %v1169_v44  ;;  %v1753_v14 = vsel %vm1158_vm4, %v1731_v43, %v1732_v33  ;;  %v1668_v61 = vsel %vm126_vm0, %v6885_v10, %v1561_v2 }
 0x26c   :  { %8533 = vst [vmem:[#allocation172_spill] sm:$0xff] %v6919_v37  ;;  %v1343_v53 = vsel %vm123_vm2, %v1082_v16, %v1277_v56  ;;  %v1859_v9 = vsel %vm127_vm1, %v6813_v20, %v1753_v14  ;;  %v6929_v44 = vpop.f32.mrf.mxu2  ;;  %v2334_v23 = vadd.f32 %v2333_v50, %v6893_v52  ;;  %v6934_v43 = vadd.f32 %v6032_v30, %v5674_v58  ;;  %v536_v56 = vpop.f32.mrf.mxu0 }
 0x26d   :  { %v1409_v38 = vsel %vm122_vm5, %v6881_v48, %v1343_v53  ;;  %v1987_v16 = vsel %vm122_vm5, %v1859_v9, %v1923_v21  ;;  %v6943_v2 = vadd.f32 %v6078_v29, %v5674_v58  ;;  %v6955_v14 = vadd.f32 %v536_v56, %v4123_v39  ;;  %v705_v53 = vpop.f32.mrf.mxu1 }
 0x26e   :  { %8534 = vst [vmem:[#allocation173_spill] sm:$0xff] %v6934_v43  ;;  %v6948_v50 = vsel %vm121_vm6, %v6738_v18, %v1409_v38  ;;  %v6952_v30 = vsel %vm121_vm6, %v1667_v49, %v1987_v16  ;;  %v2118_v21 = vadd.f32 %v2117_v57, %v5839_v8  ;;  %v706_v9 = vadd.f32 %v705_v53, %v4125_v40  ;;  %v8538_v16 = vld [vmem:[#allocation123_spill] sm:$0xff] }
 0x26f   :  { %8535 = vst [vmem:[#allocation174_spill] sm:$0xff] %v6943_v2  ;;  %v6959_v52 = vadd.f32 %v2113_v47, %v2112_v59  ;;  %v6961_v29 = vadd.f32 %v2217_v22, %v2216_v62  ;;  %v2222_v34 = vadd.f32 %v2221_v19, %v5843_v3  ;;  %v2335_v18 = vadd.f32 %v2334_v23, %v6919_v37  ;;  %v8540_v62 = vld [vmem:[#allocation124_spill] sm:$0xff]  ;;  %v8579_v37 = vld [vmem:[#allocation165_spill] sm:$0xff] }
 0x270   :  { %8536 = vst [vmem:[#allocation175_spill] sm:$0xff] %v6948_v50  ;;  %v953_v38 = vrot.slane %v6955_v14, 7  ;;  %v1148_v49 = vrot.slane %v6955_v14, 1  ;;  %v6969_v56 = vadd.f32 %v8538_v16, %v5674_v58  ;;  %v1541_v46 = vrot.slane %v706_v9, 7 }
 0x271   :  { %8537 = vst [vmem:[#allocation176_spill] sm:$0xff] %v6952_v30  ;;  %v1733_v57 = vrot.slane %v706_v9, 1  ;;  %v1924_v59 = vsel %vm123_vm2, %v6813_v20, %v706_v9  ;;  %v2119_v22 = vadd.f32 %v2118_v21, %v8540_v62  ;;  %v2344_v19 = vadd.f32 %v6943_v2, %v6934_v43 }
 0x272   :  { %8539 = vst [vmem:[#allocation123_spill] sm:$0xff] %v6969_v56  ;;  %v973_v47 = vsel %vm963_vm3, %v952_v0, %v953_v38  ;;  %v1168_v23 = vsel %vm1158_vm4, %v1147_v54, %v1148_v49  ;;  %v1560_v20 = vsel %vm963_vm3, %v1540_v55, %v1541_v46  ;;  %v6993_v0 = vadd.f32 %v6144_v51, %v5674_v58  ;;  %v8542_v55 = vld [vmem:[#allocation125_spill] sm:$0xff] }
 0x273   :  { %v1084_v53 = vsel %vm126_vm0, %v6955_v14, %v973_v47  ;;  %v1278_v16 = vsel %vm127_vm1, %v6881_v48, %v1168_v23  ;;  %v1752_v21 = vsel %vm1158_vm4, %v1732_v33, %v1733_v57  ;;  %v1669_v47 = vsel %vm126_vm0, %v706_v9, %v1560_v20 }
 0x274   :  { %8541 = vst [vmem:[#allocation177_spill] sm:$0xff] %v6993_v0  ;;  %v1344_v54 = vsel %vm123_vm2, %v1083_v27, %v1278_v16  ;;  %v1860_v23 = vsel %vm127_vm1, %v6885_v10, %v1752_v21  ;;  %v7002_v2 = vpop.f32.mrf.mxu2  ;;  %v2223_v43 = vadd.f32 %v2222_v34, %v8542_v55  ;;  %v2336_v33 = vadd.f32 %v2335_v18, %v6969_v56  ;;  %v538_v16 = vpop.f32.mrf.mxu0 }
 0x275   :  { %v1410_v51 = vsel %vm122_vm5, %v6955_v14, %v1344_v54  ;;  %v1988_v27 = vsel %vm122_vm5, %v1860_v23, %v1924_v59  ;;  %v7013_v20 = vadd.f32 %v5959_v45, %v5674_v58  ;;  %v7025_v18 = vadd.f32 %v538_v16, %v4123_v39  ;;  %v707_v54 = vpop.f32.mrf.mxu1 }
 0x276   :  { %v7018_v21 = vsel %vm121_vm6, %v6809_v7, %v1410_v51  ;;  %v7022_v34 = vsel %vm121_vm6, %v1668_v61, %v1988_v27  ;;  %v2120_v59 = vadd.f32 %v2119_v22, %v5978_v5  ;;  %v2224_v23 = vadd.f32 %v2223_v43, %v5982_v26 }
 0x277   :  { %8543 = vst [vmem:[#allocation178_spill] sm:$0xff] %v7013_v20  ;;  %v2128_v45 = vadd.f32 %v6159_v60, %v6093_v36  ;;  %v7032_v56 = vadd.f32 %v707_v54, %v4125_v40  ;;  %v2232_v7 = vadd.f32 %v6164_v25, %v6104_v31  ;;  %v2345_v61 = vadd.f32 %v2344_v19, %v6993_v0 }
 0x278   :  { %8544 = vst [vmem:[#allocation179_spill] sm:$0xff] %v7018_v21  ;;  %v8239_v51 = vrot.slane %v7025_v18, 7  ;;  %v1149_v27 = vrot.slane %v7025_v18, 1  ;;  %v7052_v19 = vsel %vm121_vm6, %v6046_v24, %v6227_v11  ;;  %v7056_v16 = vadd.f32 %v6219_v6, %v5674_v58 }
 0x279   :  { %8545 = vst [vmem:[#allocation180_spill] sm:$0xff] %v7022_v34  ;;  %v1734_v22 = vrot.slane %v7032_v56, 1  ;;  %v1925_v43 = vsel %vm123_vm2, %v6885_v10, %v7032_v56  ;;  %v1926_v54 = vsel %vm123_vm2, %v706_v9, %v7032_v56  ;;  %v8548_v11 = vrot.slane %v7032_v56, 7 }
 0x27a   :  { %8546 = vst [vmem:[#allocation181_spill] sm:$0xff] %v7052_v19  ;;  %v972_v0 = vsel %vm963_vm3, %v953_v38, %v8239_v51  ;;  %v1167_v10 = vsel %vm1158_vm4, %v1148_v49, %v1149_v27  ;;  %v7078_v38 = vadd.f32 %v6296_v17, %v5674_v58  ;;  %v2346_v60 = vadd.f32 %v2345_v61, %v7056_v16 }
 0x27b   :  { %8547 = vst [vmem:[#allocation182_spill] sm:$0xff] %v7056_v16  ;;  %v1085_v25 = vsel %vm126_vm0, %v7025_v18, %v972_v0  ;;  %v1279_v24 = vsel %vm127_vm1, %v6955_v14, %v1167_v10  ;;  %v1559_v6 = vsel %vm963_vm3, %v1541_v46, %v8548_v11  ;;  %v1751_v31 = vsel %vm1158_vm4, %v1733_v57, %v1734_v22  ;;  %v8550_v11 = vld [vmem:[#allocation142_spill] sm:$0xff]  ;;  %v8556_v16 = vld [vmem:[#allocation144_spill] sm:$0xff] }
 0x27c   :  { %8549 = vst [vmem:[#allocation183_spill] sm:$0xff] %v7078_v38  ;;  %v1345_v49 = vsel %vm123_vm2, %v1084_v53, %v1279_v24  ;;  %v1670_v0 = vsel %vm126_vm0, %v7032_v56, %v1559_v6  ;;  %v1861_v10 = vsel %vm127_vm1, %v706_v9, %v1751_v31  ;;  %v7087_v51 = vpop.f32.mrf.mxu2  ;;  %v2129_v46 = vadd.f32 %v2128_v45, %v7052_v19  ;;  %v541_v24 = vpop.f32.mrf.mxu0  ;;  %v8553_v6 = vld [vmem:[#allocation143_spill] sm:$0xff]  ;;  %v8561_v19 = vld [vmem:[#allocation146_spill] sm:$0xff] }
 0x27d   :  { %v2233_v57 = vadd.f32 %v2232_v7, %v8550_v11  ;;  %v1411_v17 = vsel %vm122_vm5, %v7025_v18, %v1345_v49  ;;  %v1989_v53 = vsel %vm122_vm5, %v1861_v10, %v1925_v43  ;;  %v7107_v45 = vadd.f32 %v541_v24, %v4123_v39  ;;  %v710_v7 = vpop.f32.mrf.mxu1  ;;  %v8555_v10 = vld [vmem:[#allocation135_spill] sm:$0xff] }
 0x27e   :  { %v7100_v31 = vsel %vm121_vm6, %v6881_v48, %v1411_v17  ;;  %v7104_v9 = vsel %vm121_vm6, %v1669_v47, %v1989_v53  ;;  %v2130_v49 = vadd.f32 %v2129_v46, %v8553_v6  ;;  %v7112_v43 = vadd.f32 %v6365_v13, %v5674_v58  ;;  %v8557_v46 = vld [vmem:[#allocation154_spill] sm:$0xff]  ;;  %v8559_v13 = vld [vmem:[#allocation157_spill] sm:$0xff] }
 0x27f   :  { %8551 = vst [vmem:[#allocation184_spill] sm:$0xff] %v7100_v31  ;;  %v7115_v61 = vadd.f32 %v710_v7, %v4125_v40  ;;  %v2121_v48 = vadd.f32 %v2120_v59, %v8555_v10  ;;  %v2337_v17 = vadd.f32 %v2336_v33, %v7013_v20  ;;  %v2234_v47 = vadd.f32 %v2233_v57, %v8556_v16  ;;  %v8562_v57 = vld [vmem:[#allocation147_spill] sm:$0xff] }
 0x280   :  { %8552 = vst [vmem:[#allocation185_spill] sm:$0xff] %v7104_v9  ;;  %v2347_v53 = vadd.f32 %v2346_v60, %v7078_v38  ;;  %v8247_v24 = vrot.slane %v7107_v45, 1  ;;  %v2131_v11 = vadd.f32 %v2130_v49, %v6381_v1  ;;  %v7125_v6 = vadd.f32 %v8557_v46, %v5674_v58  ;;  %v8564_v49 = vld [vmem:[#allocation136_spill] sm:$0xff]  ;;  %v8565_v1 = vld [vmem:[#allocation149_spill] sm:$0xff]  ;;  %v8577_v10 = vld [vmem:[#allocation159_spill] sm:$0xff] }
 0x281   :  { %8554 = vst [vmem:[#allocation186_spill] sm:$0xff] %v7112_v43  ;;  %v7129_v7 = vadd.f32 %v8559_v13, %v5674_v58  ;;  %v2235_v33 = vadd.f32 %v2234_v47, %v8561_v19  ;;  %v7135_v16 = vadd.f32 %v8562_v57, %v5674_v58  ;;  %v2225_v46 = vadd.f32 %v2224_v23, %v8564_v49  ;;  %v8566_v19 = vld [vmem:[#allocation150_spill] sm:$0xff]  ;;  %v8567_v57 = vld [vmem:[#allocation151_spill] sm:$0xff] }
 0x282   :  { %8558 = vst [vmem:[#allocation154_spill] sm:$0xff] %v7125_v6  ;;  %v1166_v60 = vsel %vm1158_vm4, %v1149_v27, %v8247_v24  ;;  %v2348_v38 = vadd.f32 %v2347_v53, %v7112_v43  ;;  %v2132_v13 = vadd.f32 %v2131_v11, %v8565_v1  ;;  %v2122_v47 = vrot.slane %v2121_v48, 4  ;;  %v8570_v24 = vld [vmem:[#allocation161_spill] sm:$0xff]  ;;  %v3680_v1 = vld [vmem:[#allocation10 + $0x54] sm:$0xf0] }
 0x283   :  { %8560 = vst [vmem:[#allocation157_spill] sm:$0xff] %v7129_v7  ;;  %v1280_v59 = vsel %vm127_vm1, %v7025_v18, %v1166_v60  ;;  %v2236_v36 = vadd.f32 %v2235_v33, %v8566_v19  ;;  %v7150_v20 = vadd.f32 %v8567_v57, %v5674_v58  ;;  %v8569_v23 = vrot.slane %v7115_v61, 1 }
 0x284   :  { %8563 = vst [vmem:[#allocation147_spill] sm:$0xff] %v7135_v16  ;;  %v1346_v27 = vsel %vm123_vm2, %v1085_v25, %v1280_v59  ;;  %v7158_v11 = vpop.f32.mrf.mxu2  ;;  %v2357_v60 = vadd.f32 %v7129_v7, %v7125_v6  ;;  %v7164_v33 = vadd.f32 %v8570_v24, %v5674_v58  ;;  %v543_v43 = vpop.f32.mrf.mxu0  ;;  %v8572_v59 = vld [vmem:[#allocation152_spill] sm:$0xff]  ;;  %v2338_v19 = vrot.slane %v2337_v17, 4 }
 0x285   :  { %8568 = vst [vmem:[#allocation151_spill] sm:$0xff] %v7150_v20  ;;  %v1750_v53 = vsel %vm1158_vm4, %v1734_v22, %v8569_v23  ;;  %v1412_v25 = vsel %vm122_vm5, %v7025_v18, %v1346_v27  ;;  %v2349_v22 = vadd.f32 %v2348_v38, %v7135_v16  ;;  %v2133_v23 = vadd.f32 %v2132_v13, %v8572_v59  ;;  %v712_v6 = vpop.f32.mrf.mxu1  ;;  %v8575_v16 = vld [vmem:[#allocation153_spill] sm:$0xff] }
 0x286   :  { %8571 = vst [vmem:[#allocation161_spill] sm:$0xff] %v7164_v33  ;;  %v1862_v57 = vsel %vm127_vm1, %v7032_v56, %v1750_v53  ;;  %v7179_v24 = vsel %vm121_vm6, %v6955_v14, %v1412_v25  ;;  %v3809_v53 = vld [vmem:[#allocation10 + $0x4c] sm:$0xf]  ;;  %v2123_v27 = vadd.f32 %v2122_v47, %v2121_v48  ;;  %v2226_v38 = vrot.slane %v2225_v46, 4  ;;  %v8578_v14 = vld [vmem:[#allocation162_spill] sm:$0xff] }
 0x287   :  { %v1990_v7 = vsel %vm122_vm5, %v1862_v57, %v1926_v54  ;;  %8573 = vst [vmem:[#allocation187_spill] sm:$0xff] %v7179_v24  ;;  %v2237_v13 = vadd.f32 %v2236_v36, %v8575_v16  ;;  %v7187_v59 = vadd.f32 %v2349_v22, %v7150_v20  ;;  %v3683_v54 = vor.u32 %v3809_v53, %v3680_v1  ;;  %v8576_v57 = vld [vmem:[#allocation155_spill] sm:$0xff]  ;;  %v8581_v48 = vld [vmem:[#allocation160_spill] sm:$0xff] }
 0x288   :  { %v7183_v49 = vsel %vm121_vm6, %v1670_v0, %v1990_v7  ;;  %v2134_v26 = vadd.f32 %v2133_v23, %v8576_v57  ;;  %v2141_v25 = vadd.f32 %v8578_v14, %v8577_v10  ;;  %v2358_v5 = vadd.f32 %v2357_v60, %v7164_v33  ;;  %v8582_v7 = vld [vmem:[#allocation163_spill] sm:$0xff]  ;;  %v8583_v1 = vld [vmem:[#allocation156_spill] sm:$0xff]  ;;  %v3644_v57 = vld [vmem:[#allocation10 + $0xc] sm:$0xf0] }
 0x289   :  { %8574 = vst [vmem:[#allocation188_spill] sm:$0xff] %v7183_v49  ;;  %v7195_v55 = vadd.f32 %v8579_v37, %v5674_v58  ;;  %v7198_v0 = vadd.f32 %v543_v43, %v4123_v39  ;;  %v2245_v47 = vadd.f32 %v8582_v7, %v8581_v48  ;;  %2726 = vmatpush.bf16.msrb.mxu2 %v3683_v54  ;;  %v2124_v43 = vrot.slane %v2123_v27, 2  ;;  %v3678_v54 = vld [vmem:[#allocation10 + $0x48] sm:$0xf]  ;;  %v8641_v48 = vld [vmem:[#allocation37_spill] sm:$0xff] }
 0x28a   :  { %v2238_v22 = vadd.f32 %v2237_v13, %v8583_v1  ;;  %v7206_v23 = vadd.f32 %v6823_v35, %v6815_v32  ;;  %v2142_v60 = vadd.f32 %v2141_v25, %v6802_v28  ;;  %v7211_v37 = vadd.f32 %v6858_v4, %v5674_v58  ;;  %v3804_v20 = vld [vmem:[#allocation10 + $0x20] sm:$0xf0] }
 0x28b   :  { %8580 = vst [vmem:[#allocation165_spill] sm:$0xff] %v7195_v55  ;;  %v7215_v53 = vadd.f32 %v6961_v29, %v6959_v52  ;;  %v7217_v36 = vadd.f32 %v2338_v19, %v2337_v17  ;;  %v2246_v13 = vadd.f32 %v2245_v47, %v6806_v12  ;;  %v7223_v32 = vadd.f32 %v2226_v38, %v2225_v46  ;;  %v8585_v52 = vld [vmem:[#allocation171_spill] sm:$0xff] }
 0x28c   :  { %8584 = vst [vmem:[#allocation189_spill] sm:$0xff] %v7211_v37  ;;  %v7221_v33 = vpop.f32.mrf.mxu2  ;;  %v2359_v35 = vadd.f32 %v2358_v5, %v7195_v55  ;;  %v2143_v4 = vadd.f32 %v2142_v60, %v6874_v63  ;;  %v1151_v25 = vrot.slane %v7198_v0, 1  ;;  %v546_v28 = vpop.f32.mrf.mxu0  ;;  %v2135_v7 = vrot.slane %v2134_v26, 4  ;;  %v3810_v55 = vld [vmem:[#allocation10 + $0x50] sm:$0xf0]  ;;  %v3792_v12 = vld [vmem:[#allocation8] sm:$0xff] }
 0x28d   :  { %v2247_v29 = vadd.f32 %v2246_v13, %v8585_v52  ;;  %v7231_v19 = vadd.f32 %v6929_v44, %v5674_v58  ;;  %v7234_v17 = vadd.f32 %v546_v28, %v4123_v39  ;;  %v715_v47 = vpop.f32.mrf.mxu1  ;;  %v2239_v46 = vrot.slane %v2238_v22, 4  ;;  %2502 = vmatpush.bf16.msrb.mxu0 %v3792_v12 }
 0x28e   :  { %v2360_v38 = vadd.f32 %v2359_v35, %v7211_v37  ;;  %v2144_v5 = vadd.f32 %v2143_v4, %v6948_v50  ;;  %v955_v60 = vrot.slane %v7107_v45, 7  ;;  %v7239_v63 = vadd.f32 %v2124_v43, %v2123_v27 }
 0x28f   :  { %8586 = vst [vmem:[#allocation190_spill] sm:$0xff] %v7231_v19  ;;  %v2248_v13 = vadd.f32 %v2247_v29, %v6952_v30  ;;  %v7244_v44 = vadd.f32 %v7002_v2, %v5674_v58  ;;  %v1543_v28 = vrot.slane %v7115_v61, 7  ;;  %v3679_v52 = vor.u32 %v3810_v55, %v3678_v54 }
 0x290   :  { %v8588_v35 = vrot.slane %v7107_v45, 1  ;;  %v7252_v37 = vadd.f32 %v712_v6, %v4125_v40  ;;  %v1152_v27 = vrot.slane %v7234_v17, 1  ;;  %v7256_v43 = vadd.f32 %v715_v47, %v4125_v40 }
 0x291   :  { %8587 = vst [vmem:[#allocation191_spill] sm:$0xff] %v7244_v44  ;;  %v2361_v2 = vadd.f32 %v2360_v38, %v7231_v19  ;;  %v2145_v29 = vadd.f32 %v2144_v5, %v7018_v21  ;;  %v7262_v55 = vadd.f32 %v7087_v51, %v5674_v58  ;;  %2713 = vmatpush.bf16.msrb.mxu1 %v3679_v52  ;;  %v956_v12 = vrot.slane %v7198_v0, 7 }
 0x292   :  { %v1165_v4 = vsel %vm1158_vm4, %v8588_v35, %v1151_v25  ;;  %v7264_v54 = vadd.f32 %v2135_v7, %v2134_v26  ;;  %v2249_v6 = vadd.f32 %v2248_v13, %v7022_v34  ;;  %v8590_v35 = vrot.slane %v7025_v18, 7 }
 0x293   :  { %8589 = vst [vmem:[#allocation192_spill] sm:$0xff] %v7262_v55  ;;  %v7272_v30 = vadd.f32 %v2239_v46, %v2238_v22  ;;  %v2362_v38 = vadd.f32 %v2361_v2, %v7244_v44  ;;  %v2146_v5 = vadd.f32 %v2145_v29, %v7100_v31  ;;  %v8591_v51 = vrot.slane %v7032_v56, 7 }
 0x294   :  { %v971_v47 = vsel %vm963_vm3, %v8590_v35, %v955_v60  ;;  %v1281_v18 = vsel %vm127_vm1, %v7107_v45, %v1165_v4  ;;  %v884_v7 = vpop.f32.mrf.mxu2  ;;  %v2250_v52 = vadd.f32 %v2249_v6, %v7104_v9  ;;  %v1736_v13 = vrot.slane %v7252_v37, 1  ;;  %v548_v2 = vpop.f32.mrf.mxu0 }
 0x295   :  { %v1558_v26 = vsel %vm963_vm3, %v8591_v51, %v1543_v28  ;;  %v1164_v22 = vsel %vm1158_vm4, %v1151_v25, %v1152_v27  ;;  %v1737_v46 = vrot.slane %v7256_v43, 1  ;;  %v7289_v56 = vadd.f32 %v2362_v38, %v7262_v55  ;;  %v717_v6 = vpop.f32.mrf.mxu1 }
 0x296   :  { %v1086_v29 = vsel %vm126_vm0, %v7107_v45, %v971_v47  ;;  %v1544_v4 = vrot.slane %v7252_v37, 7  ;;  %v7296_v35 = vadd.f32 %v548_v2, %v4123_v39  ;;  %v1671_v25 = vsel %vm126_vm0, %v7115_v61, %v1558_v26 }
 0x297   :  { %v970_v51 = vsel %vm963_vm3, %v955_v60, %v956_v12  ;;  %v1347_v38 = vsel %vm123_vm2, %v1086_v29, %v1281_v18  ;;  %v7306_v55 = vadd.f32 %v2146_v5, %v7179_v24  ;;  %v7310_v47 = vadd.f32 %v7158_v11, %v5674_v58 }
 0x298   :  { %v1282_v2 = vsel %vm127_vm1, %v7198_v0, %v1164_v22  ;;  %v1153_v44 = vrot.slane %v7296_v35, 1  ;;  %v7317_v26 = vadd.f32 %v717_v6, %v4125_v40  ;;  %v8593_v60 = vrot.slane %v7115_v61, 1 }
 0x299   :  { %8592 = vst [vmem:[#allocation193_spill] sm:$0xff] %v7310_v47  ;;  %v957_v5 = vrot.slane %v7234_v17, 7  ;;  %v1748_v11 = vsel %vm1158_vm4, %v1736_v13, %v1737_v46  ;;  %v7327_v29 = vadd.f32 %v2250_v52, %v7183_v49  ;;  %v1087_v22 = vsel %vm126_vm0, %v7198_v0, %v970_v51 }
 0x29a   :  { %v1749_v18 = vsel %vm1158_vm4, %v8593_v60, %v1736_v13  ;;  %v1413_v6 = vsel %vm122_vm5, %v7198_v0, %v1347_v38  ;;  %v1557_v9 = vsel %vm963_vm3, %v1543_v28, %v1544_v4  ;;  %v1927_v60 = vsel %vm123_vm2, %v7115_v61, %v7252_v37 }
 0x29b   :  { %v7343_v52 = vadd.f32 %v7221_v33, %v5674_v58  ;;  %v1348_v13 = vsel %vm123_vm2, %v1087_v22, %v1282_v2  ;;  %v1163_v51 = vsel %vm1158_vm4, %v1152_v27, %v1153_v44  ;;  %v1863_v28 = vsel %vm127_vm1, %v7115_v61, %v1749_v18 }
 0x29c   :  { %v1545_v49 = vrot.slane %v7256_v43, 7  ;;  %v1864_v24 = vsel %vm127_vm1, %v7252_v37, %v1748_v11  ;;  %v1738_v33 = vrot.slane %v7317_v26, 1  ;;  %v886_v31 = vpop.f32.mrf.mxu2  ;;  %v7361_v2 = vsel %vm121_vm6, %v7107_v45, %v1413_v6  ;;  %v551_v22 = vpop.f32.mrf.mxu0 }
 0x29d   :  { %8594 = vst [vmem:[#allocation194_spill] sm:$0xff] %v7343_v52  ;;  %v1672_v27 = vsel %vm126_vm0, %v7252_v37, %v1557_v9  ;;  %v969_v18 = vsel %vm963_vm3, %v956_v12, %v957_v5  ;;  %v1928_v11 = vsel %vm123_vm2, %v7115_v61, %v7256_v43  ;;  %v1414_v38 = vsel %vm122_vm5, %v7234_v17, %v1348_v13  ;;  %v720_v12 = vpop.f32.mrf.mxu1 }
 0x29e   :  { %8595 = vst [vmem:[#allocation195_spill] sm:$0xff] %v7361_v2  ;;  %v958_v6 = vrot.slane %v7296_v35, 7  ;;  %v1283_v19 = vsel %vm127_vm1, %v7234_v17, %v1163_v51  ;;  %v7380_v9 = vadd.f32 %v551_v22, %v4123_v39  ;;  %v1991_v34 = vsel %vm122_vm5, %v1863_v28, %v1927_v60 }
 0x29f   :  { %v2370_v61 = vadd.f32 %v7343_v52, %v7310_v47  ;;  %v1992_v21 = vsel %vm122_vm5, %v1864_v24, %v1928_v11  ;;  %v7389_v13 = vadd.f32 %v720_v12, %v4125_v40  ;;  %v1088_v51 = vsel %vm126_vm0, %v7234_v17, %v969_v18 }
 0x2a0   :  { %v1556_v22 = vsel %vm963_vm3, %v1544_v4, %v1545_v49  ;;  %v1747_v50 = vsel %vm1158_vm4, %v1737_v46, %v1738_v33  ;;  %v1154_v60 = vrot.slane %v7380_v9, 1  ;;  %v7402_v28 = vsel %vm121_vm6, %v7107_v45, %v1414_v38 }
 0x2a1   :  { %8596 = vst [vmem:[#allocation196_spill] sm:$0xff] %v7402_v28  ;;  %v1349_v24 = vsel %vm123_vm2, %v1088_v51, %v1283_v19  ;;  %v1546_v11 = vrot.slane %v7317_v26, 7  ;;  %v1739_v18 = vrot.slane %v7389_v13, 1  ;;  %v7410_v4 = vsel %vm121_vm6, %v1672_v27, %v1992_v21 }
 0x2a2   :  { %8597 = vst [vmem:[#allocation197_spill] sm:$0xff] %v7410_v4  ;;  %v7413_v46 = vadd.f32 %v884_v7, %v5674_v58  ;;  %v968_v12 = vsel %vm963_vm3, %v957_v5, %v958_v6  ;;  %v1162_v45 = vsel %vm1158_vm4, %v1153_v44, %v1154_v60  ;;  %v7421_v19 = vsel %vm121_vm6, %v1671_v25, %v1991_v34 }
 0x2a3   :  { %8599 = vst [vmem:[#allocation199_spill] sm:$0xff] %v7421_v19  ;;  %v1673_v38 = vsel %vm126_vm0, %v7256_v43, %v1556_v22  ;;  %v1865_v21 = vsel %vm127_vm1, %v7256_v43, %v1747_v50  ;;  %v1284_v7 = vsel %vm127_vm1, %v7296_v35, %v1162_v45  ;;  %v2154_v5 = vadd.f32 %v7402_v28, %v7361_v2 }
 0x2a4   :  { %8598 = vst [vmem:[#allocation198_spill] sm:$0xff] %v7413_v46  ;;  %v1415_v34 = vsel %vm122_vm5, %v7296_v35, %v1349_v24  ;;  %v959_v44 = vrot.slane %v7380_v9, 7  ;;  %v1746_v25 = vsel %vm1158_vm4, %v1738_v33, %v1739_v18  ;;  %v889_v27 = vpop.f32.mrf.mxu2  ;;  %v2258_v50 = vadd.f32 %v7410_v4, %v7421_v19  ;;  %v553_v45 = vpop.f32.mrf.mxu0 }
 0x2a5   :  { %v1089_v51 = vsel %vm126_vm0, %v7296_v35, %v968_v12  ;;  %v1555_v22 = vsel %vm963_vm3, %v1545_v49, %v1546_v11  ;;  %v1929_v24 = vsel %vm123_vm2, %v7252_v37, %v7317_v26  ;;  %v2371_v52 = vadd.f32 %v2370_v61, %v7413_v46  ;;  %v722_v12 = vpop.f32.mrf.mxu1 }
 0x2a6   :  { %v1993_v33 = vsel %vm122_vm5, %v1865_v21, %v1929_v24  ;;  %v1350_v47 = vsel %vm123_vm2, %v1089_v51, %v1284_v7  ;;  %v7457_v4 = vadd.f32 %v553_v45, %v4123_v39  ;;  %v7462_v49 = vsel %vm121_vm6, %v7198_v0, %v1415_v34 }
 0x2a7   :  { %8600 = vst [vmem:[#allocation200_spill] sm:$0xff] %v7462_v49  ;;  %v1547_v37 = vrot.slane %v7389_v13, 7  ;;  %v1866_v61 = vsel %vm127_vm1, %v7317_v26, %v1746_v25  ;;  %v7469_v21 = vadd.f32 %v722_v12, %v4125_v40  ;;  %v1674_v7 = vsel %vm126_vm0, %v7317_v26, %v1555_v22 }
 0x2a8   :  { %v7475_v51 = vadd.f32 %v886_v31, %v5674_v58  ;;  %v967_v0 = vsel %vm963_vm3, %v958_v6, %v959_v44  ;;  %v1155_v34 = vrot.slane %v7457_v4, 1  ;;  %v7482_v24 = vsel %vm121_vm6, %v1673_v38, %v1993_v33 }
 0x2a9   :  { %8602 = vst [vmem:[#allocation202_spill] sm:$0xff] %v7482_v24  ;;  %v1416_v25 = vsel %vm122_vm5, %v7380_v9, %v1350_v47  ;;  %v1930_v22 = vsel %vm123_vm2, %v7256_v43, %v7389_v13  ;;  %v1740_v31 = vrot.slane %v7469_v21, 1  ;;  %v2155_v45 = vadd.f32 %v2154_v5, %v7462_v49 }
 0x2aa   :  { %8601 = vst [vmem:[#allocation201_spill] sm:$0xff] %v7475_v51  ;;  %v1994_v6 = vsel %vm122_vm5, %v1866_v61, %v1930_v22  ;;  %v960_v12 = vrot.slane %v7457_v4, 7  ;;  %v1161_v38 = vsel %vm1158_vm4, %v1154_v60, %v1155_v34  ;;  %v1090_v47 = vsel %vm126_vm0, %v7380_v9, %v967_v0 }
 0x2ab   :  { %v1554_v33 = vsel %vm963_vm3, %v1546_v11, %v1547_v37  ;;  %v1285_v43 = vsel %vm127_vm1, %v7380_v9, %v1161_v38  ;;  %v1745_v5 = vsel %vm1158_vm4, %v1739_v18, %v1740_v31  ;;  %v7511_v61 = vsel %vm121_vm6, %v7234_v17, %v1416_v25 }
 0x2ac   :  { %8603 = vst [vmem:[#allocation203_spill] sm:$0xff] %v7511_v61  ;;  %v1351_v60 = vsel %vm123_vm2, %v1090_v47, %v1285_v43  ;;  %v1548_v0 = vrot.slane %v7469_v21, 7  ;;  %v1867_v11 = vsel %vm127_vm1, %v7389_v13, %v1745_v5  ;;  %v891_v22 = vpop.f32.mrf.mxu2  ;;  %v2259_v38 = vadd.f32 %v2258_v50, %v7482_v24  ;;  %v556_v25 = vpop.f32.mrf.mxu0 }
 0x2ad   :  { %v2372_v46 = vadd.f32 %v2371_v52, %v7475_v51  ;;  %v7523_v18 = vsel %vm121_vm6, %v1674_v7, %v1994_v6  ;;  %v7526_v17 = vadd.f32 %v889_v27, %v5674_v58  ;;  %v1675_v47 = vsel %vm126_vm0, %v7389_v13, %v1554_v33  ;;  %v725_v7 = vpop.f32.mrf.mxu1 }
 0x2ae   :  { %8604 = vst [vmem:[#allocation204_spill] sm:$0xff] %v7523_v18  ;;  %v966_v43 = vsel %vm963_vm3, %v959_v44, %v960_v12  ;;  %v1931_v52 = vsel %vm123_vm2, %v7317_v26, %v7469_v21  ;;  %v7538_v50 = vadd.f32 %v556_v25, %v4123_v39  ;;  %v2156_v27 = vadd.f32 %v2155_v45, %v7511_v61 }
 0x2af   :  { %8605 = vst [vmem:[#allocation205_spill] sm:$0xff] %v7526_v17  ;;  %v1417_v6 = vsel %vm122_vm5, %v7457_v4, %v1351_v60  ;;  %v1995_v33 = vsel %vm122_vm5, %v1867_v11, %v1931_v52  ;;  %v7547_v44 = vadd.f32 %v725_v7, %v4125_v40  ;;  %v2260_v5 = vadd.f32 %v2259_v38, %v7523_v18 }
 0x2b0   :  { %v1553_v26 = vsel %vm963_vm3, %v1547_v37, %v1548_v0  ;;  %v961_v25 = vrot.slane %v7538_v50, 7  ;;  %v1156_v51 = vrot.slane %v7538_v50, 1  ;;  %v2373_v45 = vadd.f32 %v2372_v46, %v7526_v17 }
 0x2b1   :  { %v1091_v60 = vsel %vm126_vm0, %v7457_v4, %v966_v43  ;;  %v1549_v11 = vrot.slane %v7547_v44, 7  ;;  %v1741_v52 = vrot.slane %v7547_v44, 1  ;;  %v7563_v38 = vsel %vm121_vm6, %v7296_v35, %v1417_v6 }
 0x2b2   :  { %8606 = vst [vmem:[#allocation206_spill] sm:$0xff] %v7563_v38  ;;  %v7567_v37 = vsel %vm121_vm6, %v1675_v47, %v1995_v33  ;;  %v7570_v7 = vadd.f32 %v891_v22, %v5674_v58  ;;  %v1160_v46 = vsel %vm1158_vm4, %v1155_v34, %v1156_v51  ;;  %v1676_v43 = vsel %vm126_vm0, %v7469_v21, %v1553_v26 }
 0x2b3   :  { %8607 = vst [vmem:[#allocation207_spill] sm:$0xff] %v7567_v37  ;;  %v1286_v17 = vsel %vm127_vm1, %v7457_v4, %v1160_v46  ;;  %v1744_v35 = vsel %vm1158_vm4, %v1740_v31, %v1741_v52  ;;  %v1932_v22 = vsel %vm123_vm2, %v7389_v13, %v7547_v44  ;;  %v965_v47 = vsel %vm963_vm3, %v960_v12, %v961_v25 }
 0x2b4   :  { %8608 = vst [vmem:[#allocation208_spill] sm:$0xff] %v7570_v7  ;;  %v1352_v34 = vsel %vm123_vm2, %v1091_v60, %v1286_v17  ;;  %v1552_v6 = vsel %vm963_vm3, %v1548_v0, %v1549_v11  ;;  %v1868_v33 = vsel %vm127_vm1, %v7469_v21, %v1744_v35  ;;  %v894_v26 = vpop.f32.mrf.mxu2  ;;  %v2157_v31 = vadd.f32 %v2156_v27, %v7563_v38  ;;  %v558_v17 = vpop.f32.mrf.mxu0 }
 0x2b5   :  { %v2261_v46 = vadd.f32 %v2260_v5, %v7567_v37  ;;  %v1418_v13 = vsel %vm122_vm5, %v7538_v50, %v1352_v34  ;;  %v1996_v12 = vsel %vm122_vm5, %v1868_v33, %v1932_v22  ;;  %v2374_v60 = vadd.f32 %v2373_v45, %v7570_v7  ;;  %v727_v35 = vpop.f32.mrf.mxu1 }
 0x2b6   :  { %v7606_v0 = vsel %vm121_vm6, %v7380_v9, %v1418_v13  ;;  %v7610_v27 = vsel %vm121_vm6, %v1676_v43, %v1996_v12  ;;  %v559_v5 = vadd.f32 %v558_v17, %v4123_v39  ;;  %v1092_v34 = vsel %vm126_vm0, %v7538_v50, %v965_v47 }
 0x2b7   :  { %8609 = vst [vmem:[#allocation209_spill] sm:$0xff] %v7606_v0  ;;  %v1677_v45 = vsel %vm126_vm0, %v7547_v44, %v1552_v6  ;;  %v7620_v22 = vadd.f32 %v894_v26, %v5674_v58  ;;  %v728_v9 = vadd.f32 %v727_v35, %v4125_v40  ;;  %v2158_v33 = vadd.f32 %v2157_v31, %v7606_v0  ;;  %v8612_v40 = vld [vmem:[#allocation19_spill] sm:$0xff] }
 0x2b8   :  { %8610 = vst [vmem:[#allocation210_spill] sm:$0xff] %v7610_v27  ;;  %v2262_v43 = vadd.f32 %v2261_v46, %v7610_v27  ;;  %v962_v13 = vrot.slane %v559_v5, 7  ;;  %v1157_v39 = vrot.slane %v559_v5, 1  ;;  %v8613_v35 = vrot.slane %v8612_v40, 7 }
 0x2b9   :  { %8611 = vst [vmem:[#allocation211_spill] sm:$0xff] %v7620_v22  ;;  %v1550_v12 = vrot.slane %v728_v9, 7  ;;  %v1742_v17 = vrot.slane %v728_v9, 1  ;;  %v1933_v47 = vsel %vm123_vm2, %v7469_v21, %v728_v9  ;;  %v1934_v6 = vsel %vm123_vm2, %v7547_v44, %v728_v9 }
 0x2ba   :  { %v964_v26 = vsel %vm963_vm3, %v961_v25, %v962_v13  ;;  %v1027_v31 = vsel %vm963_vm3, %v962_v13, %v8613_v35  ;;  %v1159_v46 = vsel %vm1158_vm4, %v1156_v51, %v1157_v39  ;;  %v8614_v7 = vrot.slane %v8612_v40, 1  ;;  %v8615_v51 = vld [vmem:[#allocation22_spill] sm:$0xff] }
 0x2bb   :  { %v1030_v27 = vsel %vm126_vm0, %v8612_v40, %v1027_v31  ;;  %v1093_v25 = vsel %vm126_vm0, %v559_v5, %v964_v26  ;;  %v1287_v37 = vsel %vm127_vm1, %v7538_v50, %v1159_v46  ;;  %v1551_v26 = vsel %vm963_vm3, %v1549_v11, %v1550_v12  ;;  %v8616_v31 = vld [vmem:[#allocation21_spill] sm:$0xff] }
 0x2bc   :  { %v1222_v21 = vsel %vm1158_vm4, %v1157_v39, %v8614_v7  ;;  %v1291_v35 = vsel %vm123_vm2, %v1030_v27, %v8615_v51  ;;  %v1353_v7 = vsel %vm123_vm2, %v1092_v34, %v1287_v37  ;;  %v8617_v27 = vld [vmem:[#allocation20_spill] sm:$0xff]  ;;  %v896_v34 = vpop.f32.mrf.mxu2  ;;  %v2252_v41 = vrot.slane %v7327_v29, 4 }
 0x2bd   :  { %v1288_v13 = vsel %vm127_vm1, %v559_v5, %v1222_v21  ;;  %v1357_v46 = vsel %vm122_vm5, %v8616_v31, %v1291_v35  ;;  %v1419_v21 = vsel %vm122_vm5, %v559_v5, %v1353_v7  ;;  %v8618_v51 = vrot.slane %v8617_v27, 7  ;;  %v8623_v31 = vld [vmem:[#allocation23_spill] sm:$0xff] }
 0x2be   :  { %v1354_v39 = vsel %vm123_vm2, %v1093_v25, %v1288_v13  ;;  %v7676_v11 = vsel %vm121_vm6, %v8612_v40, %v1357_v46  ;;  %v7681_v25 = vsel %vm121_vm6, %v7457_v4, %v1419_v21  ;;  %v8621_v13 = vld [vmem:[#allocation24_spill] sm:$0xff]  ;;  %v1678_v7 = vsel %vm126_vm0, %v728_v9, %v1551_v26  ;;  %v3806_v26 = vld [vmem:[#allocation10 + $0x34] sm:$0xf]  ;;  %v8625_v21 = vld [vmem:[#allocation26_spill] sm:$0xff] }
 0x2bf   :  { %v1420_v0 = vsel %vm122_vm5, %v559_v5, %v1354_v39  ;;  %v1614_v37 = vsel %vm963_vm3, %v1550_v12, %v8618_v51  ;;  %8619 = vst [vmem:[#allocation19_spill] sm:$0xff] %v7681_v25  ;;  %v2063_v35 = vadd.f32 %v8621_v13, %v7676_v11  ;;  %v2159_v40 = vadd.f32 %v2158_v33, %v7681_v25  ;;  %v8626_v51 = vld [vmem:[#allocation25_spill] sm:$0xff] }
 0x2c0   :  { %v7686_v5 = vsel %vm121_vm6, %v7538_v50, %v1420_v0  ;;  %v1615_v12 = vsel %vm126_vm0, %v8617_v27, %v1614_v37  ;;  %v1743_v4 = vsel %vm1158_vm4, %v1741_v52, %v1742_v17  ;;  %v8622_v39 = vrot.slane %v8617_v27, 1  ;;  %v3668_v37 = vld [vmem:[#allocation10 + $0x3c] sm:$0xf0] }
 0x2c1   :  { %8620 = vst [vmem:[#allocation22_spill] sm:$0xff] %v7686_v5  ;;  %v1869_v0 = vsel %vm127_vm1, %v7547_v44, %v1743_v4  ;;  %v7708_v46 = vsel %vm121_vm6, %v1615_v12, %v8623_v31  ;;  %v7711_v33 = vadd.f32 %v896_v34, %v5674_v58  ;;  %v2064_v52 = vadd.f32 %v2063_v35, %v8625_v21  ;;  %v3666_v4 = vld [vmem:[#allocation10 + $0x30] sm:$0xf] }
 0x2c2   :  { %v1806_v50 = vsel %vm1158_vm4, %v1742_v17, %v8622_v39  ;;  %v1997_v17 = vsel %vm122_vm5, %v1869_v0, %v1933_v47  ;;  %v2167_v44 = vadd.f32 %v8626_v51, %v7708_v46  ;;  %v3807_v39 = vld [vmem:[#allocation10 + $0x38] sm:$0xf0]  ;;  %v2160_v34 = vadd.f32 %v2159_v40, %v7686_v5  ;;  %v8628_v47 = vld [vmem:[#allocation28_spill] sm:$0xff]  ;;  %v8632_v40 = vld [vmem:[#allocation29_spill] sm:$0xff] }
 0x2c3   :  { %8624 = vst [vmem:[#allocation21_spill] sm:$0xff] %v7711_v33  ;;  %v1870_v27 = vsel %vm127_vm1, %v728_v9, %v1806_v50  ;;  %v7724_v58 = vsel %vm121_vm6, %v1677_v45, %v1997_v17  ;;  %v2375_v9 = vadd.f32 %v2374_v60, %v7620_v22  ;;  %v2065_v35 = vadd.f32 %v2064_v52, %v8628_v47  ;;  %v8629_v50 = vld [vmem:[#allocation27_spill] sm:$0xff]  ;;  %v8631_v17 = vld [vmem:[#allocation30_spill] sm:$0xff] }
 0x2c4   :  { %v1998_v12 = vsel %vm122_vm5, %v1870_v27, %v1934_v6  ;;  %8627 = vst [vmem:[#allocation20_spill] sm:$0xff] %v7724_v58  ;;  %v2168_v0 = vadd.f32 %v2167_v44, %v8629_v50  ;;  %v2263_v31 = vadd.f32 %v2262_v43, %v7724_v58  ;;  %v2161_v6 = vrot.slane %v2160_v34, 4 }
 0x2c5   :  { %v7734_v25 = vsel %vm121_vm6, %v1678_v7, %v1998_v12  ;;  %v3671_v27 = vor.u32 %v3806_v26, %v3668_v37  ;;  %v3667_v45 = vor.u32 %v3807_v39, %v3666_v4  ;;  %v2066_v38 = vadd.f32 %v2065_v35, %v8631_v17  ;;  %v8634_v26 = vld [vmem:[#allocation31_spill] sm:$0xff]  ;;  %v8635_v39 = vld [vmem:[#allocation32_spill] sm:$0xff] }
 0x2c6   :  { %8630 = vst [vmem:[#allocation24_spill] sm:$0xff] %v7734_v25  ;;  %v2169_v5 = vadd.f32 %v2168_v0, %v8632_v40  ;;  %v2264_v18 = vadd.f32 %v2263_v31, %v7734_v25  ;;  %v2376_v60 = vadd.f32 %v2375_v9, %v7711_v33  ;;  %v2340_v52 = vrot.slane %v7217_v36, 2  ;;  %v8639_v25 = vld [vmem:[#allocation35_spill] sm:$0xff] }
 0x2c7   :  { %v2162_v44 = vadd.f32 %v2161_v6, %v2160_v34  ;;  %2727 = vmatpush.bf16.msrb.mxu2 %v3671_v27  ;;  %2714 = vmatpush.bf16.msrb.mxu1 %v3667_v45  ;;  %v8633_v42 = vrot.slane %v7306_v55, 4  ;;  %v2253_v7 = vadd.f32 %v2252_v41, %v7327_v29  ;;  %v2067_v12 = vadd.f32 %v2066_v38, %v8635_v39 }
 0x2c8   :  { %v2170_v37 = vadd.f32 %v2169_v5, %v8634_v26  ;;  %v2265_v4 = vrot.slane %v2264_v18, 4  ;;  %v2228_v35 = vrot.slane %v7223_v32, 2  ;;  %v8636_v9 = vrot.slane %v7187_v59, 4  ;;  %v8638_v5 = vld [vmem:[#allocation34_spill] sm:$0xff] }
 0x2c9   :  { %v2149_v43 = vadd.f32 %v8633_v42, %v7306_v55  ;;  %v2364_v34 = vrot.slane %v7289_v56, 4  ;;  %v2137_v31 = vrot.slane %v7264_v54, 2  ;;  %v2241_v6 = vrot.slane %v7272_v30, 2  ;;  %v8637_v55 = vld [vmem:[#allocation33_spill] sm:$0xff] }
 0x2ca   :  { %v2352_v0 = vadd.f32 %v8636_v9, %v7187_v59  ;;  %v2171_v27 = vadd.f32 %v2170_v37, %v8637_v55  ;;  %v2266_v29 = vadd.f32 %v2265_v4, %v2264_v18  ;;  %v2377_v41 = vrot.slane %v2376_v60, 4  ;;  %v8640_v9 = vld [vmem:[#allocation36_spill] sm:$0xff]  ;;  %v3803_v4 = vld [vmem:[#allocation10 + $0x1c] sm:$0xf] }
 0x2cb   :  { %v2068_v45 = vadd.f32 %v2067_v12, %v8638_v5  ;;  %v2163_v42 = vrot.slane %v2162_v44, 2  ;;  %v2126_v38 = vrot.slane %v7239_v63, 1  ;;  %v2150_v33 = vrot.slane %v2149_v43, 2  ;;  %v3656_v12 = vld [vmem:[#allocation10 + $0x24] sm:$0xf0] }
 0x2cc   :  { %v2254_v22 = vrot.slane %v2253_v7, 2  ;;  %v2172_v58 = vadd.f32 %v2171_v27, %v8639_v25  ;;  %v2267_v59 = vrot.slane %v2266_v29, 2  ;;  %v2229_v61 = vadd.f32 %v2228_v35, %v7223_v32  ;;  %v3654_v27 = vld [vmem:[#allocation10 + $0x18] sm:$0xf]  ;;  %v3800_v35 = vld [vmem:[#allocation10 + $0x4] sm:$0xf] }
 0x2cd   :  { %v2069_v24 = vadd.f32 %v2068_v45, %v8640_v9  ;;  %v2353_v49 = vrot.slane %v2352_v0, 2  ;;  %v2365_v19 = vadd.f32 %v2364_v34, %v7289_v56  ;;  %v2138_v18 = vadd.f32 %v2137_v31, %v7264_v54  ;;  %v3642_v56 = vld [vmem:[#allocation10] sm:$0xf] }
 0x2ce   :  { %v2242_v37 = vadd.f32 %v2241_v6, %v7272_v30  ;;  %v2378_v28 = vadd.f32 %v2377_v41, %v2376_v60  ;;  %v2173_v14 = vadd.f32 %v2172_v58, %v8641_v48  ;;  %v3659_v10 = vor.u32 %v3803_v4, %v3656_v12  ;;  %v3801_v6 = vld [vmem:[#allocation10 + $0x8] sm:$0xf0] }
 0x2cf   :  { %v2070_v2 = vrot.slane %v2069_v24, 4  ;;  %v2164_v1 = vadd.f32 %v2163_v42, %v2162_v44  ;;  %v2151_v45 = vadd.f32 %v2150_v33, %v2149_v43  ;;  %v2255_v16 = vadd.f32 %v2254_v22, %v2253_v7 }
 0x2d0   :  { %v3655_v32 = vor.u32 %v3804_v20, %v3654_v27  ;;  %v2268_v34 = vadd.f32 %v2267_v59, %v2266_v29  ;;  %v2174_v31 = vrot.slane %v2173_v14, 4  ;;  %2728 = vmatpush.bf16.msrb.mxu2 %v3659_v10  ;;  %v3647_v30 = vor.u32 %v3800_v35, %v3644_v57 }
 0x2d1   :  { %v2071_v54 = vadd.f32 %v2070_v2, %v2069_v24  ;;  %v2366_v60 = vrot.slane %v2365_v19, 2  ;;  %v2139_v41 = vrot.slane %v2138_v18, 1  ;;  %v2230_v3 = vrot.slane %v2229_v61, 1 }
 0x2d2   :  { %2715 = vmatpush.bf16.msrb.mxu1 %v3655_v32  ;;  %v3643_v58 = vor.u32 %v3801_v6, %v3642_v56  ;;  %v2379_v4 = vrot.slane %v2378_v28, 2  ;;  %v2175_v44 = vadd.f32 %v2174_v31, %v2173_v14  ;;  %v2243_v33 = vrot.slane %v2242_v37, 1 }
 0x2d3   :  { %v2072_v12 = vrot.slane %v2071_v54, 2  ;;  %v2341_v20 = vadd.f32 %v2340_v52, %v7217_v36  ;;  %v2354_v22 = vadd.f32 %v2353_v49, %v2352_v0  ;;  %v2152_v43 = vrot.slane %v2151_v45, 1 }
 0x2d4   :  { %v2256_v7 = vrot.slane %v2255_v16, 1  ;;  %v2165_v29 = vrot.slane %v2164_v1, 1  ;;  %v2269_v2 = vrot.slane %v2268_v34, 1  ;;  %v2176_v10 = vrot.slane %v2175_v44, 2  ;;  %2729 = vmatpush.bf16.msrb.mxu2 %v3647_v30 }
 0x2d5   :  { %v2073_v24 = vadd.f32 %v2072_v12, %v2071_v54  ;;  %v2367_v57 = vadd.f32 %v2366_v60, %v2365_v19  ;;  %v2127_v42 = vadd.f32 %v2126_v38, %v7239_v63  ;;  %v2140_v59 = vadd.f32 %v2139_v41, %v2138_v18  ;;  %v8642_v12 = vld [vmem:[#allocation164_spill] sm:$0xff] }
 0x2d6   :  { %v2231_v27 = vadd.f32 %v2230_v3, %v2229_v61  ;;  %2716 = vmatpush.bf16.msrb.mxu1 %v3643_v58  ;;  %v2380_v32 = vadd.f32 %v2379_v4, %v2378_v28  ;;  %v2177_v14 = vadd.f32 %v2176_v10, %v2175_v44  ;;  %v2244_v56 = vadd.f32 %v2243_v33, %v2242_v37  ;;  %v8644_v3 = vld [vmem:[#allocation168_spill] sm:$0xff] }
 0x2d7   :  { %v2074_v35 = vrot.slane %v2073_v24, 1  ;;  %v2342_v31 = vrot.slane %v2341_v20, 1  ;;  %v2355_v36 = vrot.slane %v2354_v22, 1  ;;  %v2153_v49 = vadd.f32 %v2152_v43, %v2151_v45  ;;  %v8645_v61 = vld [vmem:[#allocation148_spill] sm:$0xff] }
 0x2d8   :  { %v2257_v52 = vadd.f32 %v2256_v7, %v2255_v16  ;;  %v2166_v0 = vadd.f32 %v2165_v29, %v2164_v1  ;;  %v2270_v6 = vadd.f32 %v2269_v2, %v2268_v34  ;;  %v2178_v54 = vrot.slane %v2177_v14, 1  ;;  %v8647_v1 = vld [vmem:[#allocation139_spill] sm:$0xff] }
 0x2d9   :  { %v2075_v62 = vadd.f32 %v2074_v35, %v2073_v24  ;;  %v8643_v19 = vrot.slane %v8642_v12, 1  ;;  %v2368_v63 = vrot.slane %v2367_v57, 1  ;;  %v2275_v38 = vadd.f32 %v2231_v27, %v2127_v42 }
 0x2da   :  { %v2384_v28 = vadd.f32 %v8645_v61, %v8644_v3  ;;  %v8646_v18 = vrot.slane %v6860_v15, 1  ;;  %v2381_v60 = vrot.slane %v2380_v32, 1  ;;  %v2179_v45 = vadd.f32 %v2178_v54, %v2177_v14 }
 0x2db   :  { %v2317_v30 = vadd.f32 %v8643_v19, %v8642_v12  ;;  %v2276_v16 = vadd.f32 %v2244_v56, %v2140_v59  ;;  %v8648_v34 = vrot.slane %v8647_v1, 1  ;;  %v2343_v58 = vadd.f32 %v2342_v31, %v2341_v20 }
 0x2dc   :  { %v2330_v37 = vadd.f32 %v8646_v18, %v6860_v15  ;;  %v2277_v4 = vadd.f32 %v2257_v52, %v2153_v49  ;;  %v2356_v33 = vadd.f32 %v2355_v36, %v2354_v22  ;;  %v2278_v43 = vadd.f32 %v2270_v6, %v2166_v0  ;;  %v3823_v18 = vld [vmem:[#allocation10 + $0xb8] sm:$0xf0] }
 0x2dd   :  { %v2291_v41 = vadd.f32 %v8648_v34, %v8647_v1  ;;  %v2385_v44 = vadd.f32 %v2317_v30, %v7206_v23  ;;  %v2271_v7 = vadd.f32 %v2179_v45, %v2075_v62  ;;  %v2369_v2 = vadd.f32 %v2368_v63, %v2367_v57  ;;  %v3820_v45 = vld [vmem:[#allocation10 + $0xa0] sm:$0xf0] }
 0x2de   :  { %v2386_v29 = vadd.f32 %v2330_v37, %v7215_v53  ;;  %v2387_v24 = vadd.f32 %v2343_v58, %v2275_v38  ;;  %v2382_v10 = vadd.f32 %v2381_v60, %v2380_v32  ;;  %v2388_v42 = vadd.f32 %v2356_v33, %v2276_v16  ;;  %v3722_v60 = vld [vmem:[#allocation10 + $0x98] sm:$0xf]  ;;  %v3710_v58 = vld [vmem:[#allocation10 + $0x80] sm:$0xf] }
 0x2df   :  { %v2383_v15 = vadd.f32 %v2291_v41, %v2271_v7  ;;  %v2392_v27 = vpack.c.bf16 %v2384_v28, %v2384_v28  ;;  %v2389_v59 = vadd.f32 %v2369_v2, %v2277_v4  ;;  %v2393_v35 = vpack.c.bf16 %v2385_v44, %v2385_v44  ;;  %v3734_v28 = vld [vmem:[#allocation10 + $0xb0] sm:$0xf]  ;;  %v3817_v4 = vld [vmem:[#allocation10 + $0x88] sm:$0xf0]  ;;  %v3698_v7 = vld [vmem:[#allocation10 + $0x68] sm:$0xf] }
 0x2e0   :  { %v2390_v14 = vadd.f32 %v2382_v10, %v2278_v43  ;;  %v2394_v54 = vpack.c.bf16 %v2386_v29, %v2386_v29  ;;  %v2395_v20 = vpack.c.bf16 %v2387_v24, %v2387_v24  ;;  %v2396_v31 = vpack.c.bf16 %v2388_v42, %v2388_v42  ;;  %v3814_v29 = vld [vmem:[#allocation10 + $0x70] sm:$0xf0]  ;;  %v3686_v10 = vld [vmem:[#allocation10 + $0x50] sm:$0xf] }
 0x2e1   :  { %v2391_v56 = vpack.c.bf16 %v2383_v15, %v2383_v15  ;;  %v2424_v22 = vunpack.c.l.b16 %v2392_v27  ;;  %v2397_v62 = vpack.c.bf16 %v2389_v59, %v2389_v59  ;;  %v2425_v36 = vunpack.c.l.b16 %v2393_v35  ;;  %v3811_v15 = vld [vmem:[#allocation10 + $0x58] sm:$0xf0]  ;;  %v3674_v59 = vld [vmem:[#allocation10 + $0x38] sm:$0xf]  ;;  %v3808_v35 = vld [vmem:[#allocation10 + $0x40] sm:$0xf0] }
 0x2e2   :  { %v2398_v53 = vpack.c.bf16 %v2390_v14, %v2390_v14  ;;  %v2426_v57 = vunpack.c.l.b16 %v2394_v54  ;;  %v2427_v49 = vunpack.c.l.b16 %v2395_v20  ;;  %v2428_v0 = vunpack.c.l.b16 %v2396_v31  ;;  %v3662_v31 = vld [vmem:[#allocation10 + $0x20] sm:$0xf] }
 0x2e3   :  { %v2423_v23 = vunpack.c.l.b16 %v2391_v56  ;;  %v2429_v12 = vunpack.c.l.b16 %v2397_v62  ;;  %v3735_v37 = vor.u32 %v3823_v18, %v3734_v28  ;;  %v3723_v1 = vor.u32 %v3820_v45, %v3722_v60 }
 0x2e4   :  { %v2430_v30 = vunpack.c.l.b16 %v2398_v53  ;;  %v3711_v33 = vor.u32 %v3817_v4, %v3710_v58  ;;  %v3699_v24 = vor.u32 %v3814_v29, %v3698_v7  ;;  %v3687_v42 = vor.u32 %v3811_v15, %v3686_v10  ;;  %v3829_v10 = vld [vmem:[#allocation11 + $0x28] sm:$0xff]  ;;  %v3828_v15 = vld [vmem:[#allocation11 + $0x20] sm:$0xff] }
 0x2e5   :  { %v2432_v32 = vsel %vm2431_vm7, %v2424_v22, %v2423_v23  ;;  %2735 = vmatpush.bf16.msra.mxu3 %v3735_v37  ;;  %v3675_v56 = vor.u32 %v3808_v35, %v3674_v59  ;;  %v3805_v23 = vld [vmem:[#allocation10 + $0x28] sm:$0xf0] }
 0x2e6   :  { %v2434_v52 = vsel %vm2433_vm8, %v2425_v36, %v2432_v32  ;;  %v3663_v36 = vor.u32 %v3805_v23, %v3662_v31  ;;  %v3650_v32 = vld [vmem:[#allocation10 + $0x8] sm:$0xf] }
 0x2e7   :  { %v2436_v6 = vsel %vm2435_vm9, %v2426_v57, %v2434_v52 }
 0x2e8   :  { %v2438_v19 = vsel %vm2437_vm10, %v2427_v49, %v2436_v6  ;;  %v3802_v49 = vld [vmem:[#allocation10 + $0x10] sm:$0xf0] }
 0x2e9   :  { %v2440_v63 = vsel %vm2439_vm11, %v2428_v0, %v2438_v19  ;;  %2736 = vmatpush.bf16.msra.mxu3 %v3723_v1  ;;  %v3651_v0 = vor.u32 %v3802_v49, %v3650_v32 }
 0x2ea   :  { %v2442_v38 = vsel %vm2441_vm12, %v2429_v12, %v2440_v63 }
 0x2eb   :  { %v2444_v3 = vsel %vm2443_vm13, %v2430_v30, %v2442_v38 }
 0x2ec   :  { %v2445_v61 = vpack.c.b16 %v2444_v3, %v2444_v3 }
 0x2ed   :  { %2737 = vmatpush.bf16.msra.mxu3 %v3711_v33 }
 0x2ee   :  { %2503 = vmatmul.bf16.vlgmr.msrb.gmra.mxu0 %v2445_v61 }
 0x2f1   :  { %2738 = vmatpush.bf16.msra.mxu3 %v3699_v24  ;;  %v3830_v24 = vld [vmem:[#allocation11 + $0x30] sm:$0xff] }
 0x2f5   :  { %2739 = vmatpush.bf16.msra.mxu3 %v3687_v42 }
 0x2f9   :  { %2740 = vmatpush.bf16.msra.mxu3 %v3675_v56 }
 0x2fd   :  { %2741 = vmatpush.bf16.msra.mxu3 %v3663_v36 }
 0x301   :  { %2742 = vmatpush.bf16.msra.mxu3 %v3651_v0 }
 0x36b   :  { %v7779_v16 = vpop.f32.mrf.mxu0 }
 0x36c   :  { %v7782_v34 = vmul.f32 0.70710677, %v7779_v16 }
 0x36e   :  { %v2510_v41 = vand.u32 2147483647, %v7782_v34  ;;  %vm2543_vm2 = vcmp.lt.f32.partialorder %v7782_v34, 0.0  ;;  %v3826_v34 = vld [vmem:[#allocation11 + $0x10] sm:$0xff] }
 0x370   :  { %v2511_v44 = vmul.f32 0.3275911, %v2510_v41  ;;  %v2537_v12 = vsub.f32 0.0, %v2510_v41 }
 0x372   :  { %v2512_v43 = vadd.f32 1.0, %v2511_v44  ;;  %v2538_v63 = vmul.f32 %v2537_v12, %v2510_v41 }
 0x373   :  { %v2506_v2 = vpop.f32.mrf.mxu0 }
 0x374   :  { %3846 = vrcp.f32 %v2512_v43  ;;  %v2524_v20 = vand.u32 2147483648, %v2512_v43  ;;  %v2522_v62 = vand.u32 2147483647, %v2512_v43  ;;  %vm2518_vm15 = vweird.f32 %v2512_v43  ;;  %v3831_v2 = vld [vmem:[#allocation11 + $0x38] sm:$0xff] }
 0x375   :  { %v2539_v61 = vmul.f32 1.442695, %v2538_v63  ;;  %3257 = vmatpush.bf16.msrb.mxu3 %v3831_v2 }
 0x376   :  { %v2525_v57 = vor.u32 1.1754944e-38, %v2524_v20  ;;  %vm2523_vm1 = vcmp.eq.f32.partialorder %v2522_v62, 8.507059e+37  ;;  %v3824_v20 = vld [vmem:[#allocation11] sm:$0xff] }
 0x377   :  { %3848 = vpow2.f32 %v2539_v61 }
 0x379   :  { %3258 = vmatpush.bf16.msrb.mxu3 %v3830_v24 }
 0x37a   :  { %v3847_v27 = vpop.eup %3846 }
 0x37b   :  { %v2514_v14 = vmul.f32 %v3847_v27, %v2512_v43  ;;  %vm2519_vm14 = vweird.f32 %v3847_v27  ;;  %v2508_v43 = vmul.f32 0.5, %v7779_v16  ;;  %v3825_v16 = vld [vmem:[#allocation11 + $0x8] sm:$0xff] }
 0x37c   :  { %vm2520_vm0 = vmor %vm2518_vm15, %vm2519_vm14 }
 0x37d   :  { %v2515_v54 = vsub.f32 1.0, %v2514_v14  ;;  %v3849_v1 = vpop.eup %3848  ;;  %3259 = vmatpush.bf16.msrb.mxu3 %v3829_v10  ;;  %v8651_v10 = vld [vmem:[#allocation113_spill] sm:$0xff] }
 0x37f   :  { %v2516_v22 = vmul.f32 %v3847_v27, %v2515_v54 }
 0x381   :  { %v2517_v53 = vadd.f32 %v3847_v27, %v2516_v22  ;;  %3260 = vmatpush.bf16.msrb.mxu3 %v3828_v15 }
 0x383   :  { %v2521_v52 = vsel %vm2520_vm0, %v3847_v27, %v2517_v53  ;;  %v3827_v27 = vld [vmem:[#allocation11 + $0x18] sm:$0xff] }
 0x384   :  { %v2526_v6 = vsel %vm2523_vm1, %v2525_v57, %v2521_v52 }
 0x385   :  { %v2528_v19 = vmul.f32 1.0614054, %v2526_v6  ;;  %3261 = vmatpush.bf16.msrb.mxu3 %v3827_v27 }
 0x387   :  { %v2529_v30 = vadd.f32 -1.4531521, %v2528_v19 }
 0x389   :  { %v2530_v38 = vmul.f32 %v2529_v30, %v2526_v6  ;;  %3262 = vmatpush.bf16.msrb.mxu3 %v3826_v34 }
 0x38b   :  { %v2531_v3 = vadd.f32 1.4214138, %v2530_v38 }
 0x38d   :  { %v2532_v28 = vmul.f32 %v2531_v3, %v2526_v6  ;;  %3263 = vmatpush.bf16.msrb.mxu3 %v3825_v16 }
 0x38f   :  { %v2533_v18 = vadd.f32 -0.28449672, %v2532_v28 }
 0x391   :  { %v2534_v37 = vmul.f32 %v2533_v18, %v2526_v6  ;;  %3264 = vmatpush.bf16.msrb.mxu3 %v3824_v20  ;;  %v8654_v20 = vld [vmem:[#allocation121_spill] sm:$0xff] }
 0x393   :  { %v2535_v60 = vadd.f32 0.2548296, %v2534_v37 }
 0x395   :  { %v2536_v45 = vmul.f32 %v2535_v60, %v2526_v6 }
 0x397   :  { %v2541_v58 = vmul.f32 %v3849_v1, %v2536_v45 }
 0x399   :  { %v2542_v4 = vsub.f32 1.0, %v2541_v58 }
 0x39b   :  { %v2544_v44 = vsub.f32 0.0, %v2542_v4 }
 0x39d   :  { %v2545_v33 = vsel %vm2543_vm2, %v2544_v44, %v2542_v4  ;;  %v8649_v4 = vld [vmem:[#allocation110_spill] sm:$0xff] }
 0x39e   :  { %v2546_v7 = vadd.f32 1.0, %v2545_v33  ;;  %v8650_v33 = vld [vmem:[#allocation111_spill] sm:$0xff] }
 0x3a0   :  { %v2547_v41 = vmul.f32 %v2546_v7, %v2508_v43 }
 0x3a2   :  { %v2548_v29 = vpack.c.bf16 %v2547_v41, %v2547_v41 }
 0x3a4   :  { %2717 = vmatmul.bf16.vlgmr.msrb.gmra.mxu1 %v2548_v29  ;;  %2730 = vmatmul.bf16.vlgmr.msrb.gmra.mxu2 %v2548_v29 }
 0x3a5   :  { %2743 = vmatmul.bf16.vlgmr.msra.gmra.mxu3 %v2548_v29 }
 0x421   :  { %v2718_v42 = vpop.f32.mrf.mxu1 }
 0x427   :  { %v2731_v59 = vpop.f32.mrf.mxu2 }
 0x428   :  { %v2748_v35 = vmax.f32 %v2718_v42, %v2731_v59  ;;  %v2744_v14 = vpop.f32.mrf.mxu3 }
 0x429   :  { %v2720_v56 = vpop.f32.mrf.mxu1 }
 0x42a   :  { %v2749_v54 = vmax.f32 %v2748_v35, %v2744_v14  ;;  %v8653_v56 = vld [vmem:[#allocation120_spill] sm:$0xff] }
 0x42c   :  { %v2750_v31 = vsub.f32 %v2718_v42, %v2749_v54  ;;  %v2753_v23 = vsub.f32 %v2731_v59, %v2749_v54  ;;  %v2756_v22 = vsub.f32 %v2744_v14, %v2749_v54  ;;  %v8652_v42 = vld [vmem:[#allocation116_spill] sm:$0xff] }
 0x42e   :  { %v2751_v62 = vmul.f32 1.442695, %v2750_v31  ;;  %v2754_v36 = vmul.f32 1.442695, %v2753_v23  ;;  %v2757_v53 = vmul.f32 1.442695, %v2756_v22 }
 0x42f   :  { %v2733_v57 = vpop.f32.mrf.mxu2 }
 0x430   :  { %3850 = vpow2.f32 %v2751_v62  ;;  %v2746_v32 = vpop.f32.mrf.mxu3  ;;  %v8655_v57 = vld [vmem:[#allocation127_spill] sm:$0xff] }
 0x431   :  { %3852 = vpow2.f32 %v2754_v36 }
 0x432   :  { %3854 = vpow2.f32 %v2757_v53 }
 0x436   :  { %v3851_v49 = vpop.eup %3850 }
 0x437   :  { %v3853_v52 = vpop.eup %3852 }
 0x438   :  { %v2759_v0 = vadd.f32 %v3853_v52, %v3851_v49  ;;  %v3855_v6 = vpop.eup %3854 }
 0x43a   :  { %v2760_v12 = vadd.f32 %v3855_v6, %v2759_v0 }
 0x43c   :  { %3856 = vrcp.f32 %v2760_v12 }
 0x442   :  { %v3857_v19 = vpop.eup %3856 }
 0x443   :  { %v7787_v30 = vmul.f32 %v3857_v19, %v3851_v49  ;;  %v7789_v63 = vmul.f32 %v3857_v19, %v3853_v52  ;;  %v7791_v38 = vmul.f32 %v3857_v19, %v3855_v6  ;;  %v8656_v49 = vld [vmem:[#allocation130_spill] sm:$0xff] }
 0x445   :  { %v2789_v3 = vperm.slane %v7787_v30, 0  ;;  %v2869_v61 = vperm.slane %v7789_v63, 0  ;;  %v3013_v28 = vperm.slane %v7791_v38, 0  ;;  %v2764_v12 = vrot.slane %v7787_v30, 1 }
 0x446   :  { %v2773_v19 = vrot.slane %v7789_v63, 1 }
 0x447   :  { %v2805_v18 = vmul.f32 %v2789_v3, %v7676_v11  ;;  %v2806_v37 = vmul.f32 %v2789_v3, %v8621_v13  ;;  %v2885_v60 = vmul.f32 %v2869_v61, %v7708_v46  ;;  %v2886_v45 = vmul.f32 %v2869_v61, %v8626_v51 }
 0x448   :  { %v3029_v44 = vmul.f32 %v3013_v28, %v8649_v4  ;;  %v3030_v43 = vmul.f32 %v3013_v28, %v8650_v33  ;;  %v2807_v2 = vmul.f32 %v2789_v3, %v8625_v21  ;;  %v2808_v11 = vmul.f32 %v2789_v3, %v8628_v47  ;;  %v8661_v33 = vld [vmem:[#allocation117_spill] sm:$0xff] }
 0x449   :  { %v2949_v1 = vadd.f32 %v2885_v60, %v2805_v18  ;;  %v2950_v58 = vadd.f32 %v2886_v45, %v2806_v37  ;;  %v2887_v13 = vmul.f32 %v2869_v61, %v8629_v50  ;;  %v2888_v46 = vmul.f32 %v2869_v61, %v8632_v40  ;;  %v8659_v60 = vld [vmem:[#allocation39_spill] sm:$0xff] }
 0x44a   :  { %v3031_v15 = vmul.f32 %v3013_v28, %v8651_v10  ;;  %v3032_v27 = vmul.f32 %v3013_v28, %v8652_v42  ;;  %v2809_v35 = vmul.f32 %v2789_v3, %v8631_v17  ;;  %v2810_v21 = vmul.f32 %v2789_v3, %v8635_v39  ;;  %v8665_v10 = vld [vmem:[#allocation43_spill] sm:$0xff]  ;;  %v8666_v42 = vld [vmem:[#allocation45_spill] sm:$0xff] }
 0x44b   :  { %v3093_v7 = vadd.f32 %v3029_v44, %v2949_v1  ;;  %v3094_v41 = vadd.f32 %v3030_v43, %v2950_v58  ;;  %v2951_v24 = vadd.f32 %v2887_v13, %v2807_v2  ;;  %v2952_v51 = vadd.f32 %v2888_v46, %v2808_v11  ;;  %v8660_v1 = vld [vmem:[#allocation41_spill] sm:$0xff]  ;;  %v8663_v13 = vld [vmem:[#allocation42_spill] sm:$0xff] }
 0x44c   :  { %v2889_v47 = vmul.f32 %v2869_v61, %v8634_v26  ;;  %v2890_v50 = vmul.f32 %v2869_v61, %v8637_v55  ;;  %v3033_v54 = vmul.f32 %v3013_v28, %v8653_v56  ;;  %v3034_v31 = vmul.f32 %v3013_v28, %v8654_v20  ;;  %v8669_v56 = vld [vmem:[#allocation46_spill] sm:$0xff]  ;;  %v8670_v20 = vld [vmem:[#allocation48_spill] sm:$0xff] }
 0x44d   :  { %v3157_v29 = vpack.c.bf16 %v3094_v41, %v3093_v7  ;;  %v3095_v34 = vadd.f32 %v3031_v15, %v2951_v24  ;;  %v3096_v59 = vadd.f32 %v3032_v27, %v2952_v51  ;;  %v2811_v36 = vmul.f32 %v2789_v3, %v8638_v5  ;;  %v8662_v7 = vld [vmem:[#allocation118_spill] sm:$0xff]  ;;  %v8664_v24 = vld [vmem:[#allocation44_spill] sm:$0xff] }
 0x44e   :  { %v2953_v14 = vadd.f32 %v2889_v47, %v2809_v35  ;;  %v2954_v40 = vadd.f32 %v2890_v50, %v2810_v21  ;;  %v2812_v17 = vmul.f32 %v2789_v3, %v8640_v9  ;;  %v2891_v39 = vmul.f32 %v2869_v61, %v8639_v25  ;;  %v8657_v9 = vld [vmem:[#allocation38_spill] sm:$0xff]  ;;  %v8658_v3 = vld [vmem:[#allocation40_spill] sm:$0xff] }
 0x44f   :  { %3265 = vmatmul.bf16.vlgmr.msrb.gmra.mxu3 %v3157_v29  ;;  %v3158_v16 = vpack.c.bf16 %v3096_v59, %v3095_v34  ;;  %v2892_v26 = vmul.f32 %v2869_v61, %v8641_v48  ;;  %v3035_v32 = vmul.f32 %v3013_v28, %v8655_v57  ;;  %v3036_v52 = vmul.f32 %v3013_v28, %v8656_v49  ;;  %v8668_v21 = vld [vmem:[#allocation126_spill] sm:$0xff] }
 0x450   :  { %v3097_v23 = vadd.f32 %v3033_v54, %v2953_v14  ;;  %v3098_v22 = vadd.f32 %v3034_v31, %v2954_v40  ;;  %v2955_v53 = vadd.f32 %v2891_v39, %v2811_v36  ;;  %v2790_v5 = vperm.slane %v2764_v12, 0  ;;  %v8676_v12 = vld [vmem:[#allocation53_spill] sm:$0xff] }
 0x451   :  { %v2956_v55 = vadd.f32 %v2892_v26, %v2812_v17  ;;  %v2870_v37 = vperm.slane %v2773_v19, 0  ;;  %v2782_v25 = vrot.slane %v7791_v38, 1  ;;  %v8673_v26 = vld [vmem:[#allocation128_spill] sm:$0xff] }
 0x452   :  { %v3159_v62 = vpack.c.bf16 %v3098_v22, %v3097_v23  ;;  %v3099_v0 = vadd.f32 %v3035_v32, %v2955_v53  ;;  %v2813_v48 = vmul.f32 %v2790_v5, %v8657_v9  ;;  %v2814_v61 = vmul.f32 %v2790_v5, %v8658_v3  ;;  %v8671_v23 = vld [vmem:[#allocation47_spill] sm:$0xff]  ;;  %v8678_v9 = vld [vmem:[#allocation54_spill] sm:$0xff] }
 0x453   :  { %v3100_v6 = vadd.f32 %v3036_v52, %v2956_v55  ;;  %v2893_v45 = vmul.f32 %v2870_v37, %v8659_v60  ;;  %v2894_v28 = vmul.f32 %v2870_v37, %v8660_v1  ;;  %v3014_v58 = vperm.slane %v2782_v25, 0  ;;  %v8674_v55 = vld [vmem:[#allocation129_spill] sm:$0xff]  ;;  %v8680_v1 = vld [vmem:[#allocation134_spill] sm:$0xff] }
 0x454   :  { %v2815_v46 = vmul.f32 %v2790_v5, %v8663_v13  ;;  %v2816_v51 = vmul.f32 %v2790_v5, %v8664_v24  ;;  %v2895_v15 = vmul.f32 %v2870_v37, %v8665_v10  ;;  %v2896_v27 = vmul.f32 %v2870_v37, %v8666_v42  ;;  %v8679_v60 = vld [vmem:[#allocation133_spill] sm:$0xff] }
 0x455   :  { %v3160_v18 = vpack.c.bf16 %v3100_v6, %v3099_v0  ;;  %v2957_v4 = vadd.f32 %v2893_v45, %v2813_v48  ;;  %v2958_v44 = vadd.f32 %v2894_v28, %v2814_v61  ;;  %v3037_v43 = vmul.f32 %v3014_v58, %v8661_v33  ;;  %v8675_v0 = vld [vmem:[#allocation50_spill] sm:$0xff] }
 0x456   :  { %v3038_v41 = vmul.f32 %v3014_v58, %v8662_v7  ;;  %v2959_v34 = vadd.f32 %v2895_v15, %v2815_v46  ;;  %v2960_v59 = vadd.f32 %v2896_v27, %v2816_v51  ;;  %v3040_v47 = vmul.f32 %v3014_v58, %v8668_v21  ;;  %v8683_v46 = vld [vmem:[#allocation57_spill] sm:$0xff]  ;;  %v8684_v51 = vld [vmem:[#allocation60_spill] sm:$0xff] }
 0x457   :  { %v3101_v29 = vadd.f32 %v3037_v43, %v2957_v4  ;;  %v2817_v54 = vmul.f32 %v2790_v5, %v8669_v56  ;;  %v2818_v31 = vmul.f32 %v2790_v5, %v8670_v20  ;;  %v2897_v22 = vmul.f32 %v2870_v37, %v8671_v23  ;;  %v8685_v27 = vld [vmem:[#allocation52_spill] sm:$0xff]  ;;  %v8688_v56 = vld [vmem:[#allocation65_spill] sm:$0xff]  ;;  %v8689_v20 = vld [vmem:[#allocation63_spill] sm:$0xff] }
 0x458   :  { %v3102_v2 = vadd.f32 %v3038_v41, %v2958_v44  ;;  %v3104_v14 = vadd.f32 %v3040_v47, %v2960_v59  ;;  %v3041_v53 = vmul.f32 %v3014_v58, %v8673_v26  ;;  %v3042_v57 = vmul.f32 %v3014_v58, %v8674_v55  ;;  %v8686_v59 = vld [vmem:[#allocation55_spill] sm:$0xff]  ;;  %v8690_v23 = vld [vmem:[#allocation66_spill] sm:$0xff]  ;;  %v8692_v55 = vld [vmem:[#allocation61_spill] sm:$0xff] }
 0x459   :  { %v2961_v17 = vadd.f32 %v2897_v22, %v2817_v54  ;;  %v2819_v6 = vmul.f32 %v2790_v5, %v8675_v0  ;;  %v2820_v19 = vmul.f32 %v2790_v5, %v8676_v12  ;;  %v2900_v48 = vmul.f32 %v2870_v37, %v8678_v9  ;;  %v8691_v26 = vld [vmem:[#allocation58_spill] sm:$0xff]  ;;  %v8693_v12 = vld [vmem:[#allocation68_spill] sm:$0xff]  ;;  %v8695_v9 = vld [vmem:[#allocation69_spill] sm:$0xff] }
 0x45a   :  { %v3161_v11 = vpack.c.bf16 %v3102_v2, %v3101_v29  ;;  %v3043_v45 = vmul.f32 %v3014_v58, %v8679_v60  ;;  %v3044_v28 = vmul.f32 %v3014_v58, %v8680_v1  ;;  %v2765_v33 = vrot.slane %v7787_v30, 2  ;;  %v8681_v2 = vld [vmem:[#allocation56_spill] sm:$0xff] }
 0x45b   :  { %v3105_v32 = vadd.f32 %v3041_v53, %v2961_v17  ;;  %v2964_v61 = vadd.f32 %v2900_v48, %v2820_v19  ;;  %v2774_v43 = vrot.slane %v7789_v63, 2  ;;  %v2783_v5 = vrot.slane %v7791_v38, 2 }
 0x45c   :  { %v2791_v41 = vperm.slane %v2765_v33, 0  ;;  %v8698_v33 = vld [vmem:[#allocation67_spill] sm:$0xff] }
 0x45d   :  { %v3108_v44 = vadd.f32 %v3044_v28, %v2964_v61  ;;  %v2871_v29 = vperm.slane %v2774_v43, 0  ;;  %v3015_v10 = vperm.slane %v2783_v5, 0 }
 0x45e   :  { %v2824_v54 = vmul.f32 %v2791_v41, %v8688_v56  ;;  %v2825_v19 = vmul.f32 %v2791_v41, %v8693_v12 }
 0x45f   :  { %3270 = vmatmul.bf16.gmra.mxu3 %v3158_v16  ;;  %v8667_v16 = vld [vmem:[#allocation122_spill] sm:$0xff]  ;;  %v2901_v24 = vmul.f32 %v2871_v29, %v8683_v46  ;;  %v2904_v22 = vmul.f32 %v2871_v29, %v8690_v23  ;;  %v3047_v53 = vmul.f32 %v3015_v10, %v8691_v26  ;;  %v2905_v48 = vmul.f32 %v2871_v29, %v8695_v9  ;;  %v8706_v26 = vld [vmem:[#allocation83_spill] sm:$0xff] }
 0x460   :  { %v3039_v35 = vmul.f32 %v3014_v58, %v8667_v16  ;;  %v2902_v58 = vmul.f32 %v2871_v29, %v8684_v51  ;;  %v3046_v16 = vmul.f32 %v3015_v10, %v8686_v59  ;;  %v3050_v43 = vmul.f32 %v3015_v10, %v8698_v33  ;;  %v8713_v33 = vld [vmem:[#allocation87_spill] sm:$0xff] }
 0x461   :  { %v2969_v1 = vadd.f32 %v2905_v48, %v2825_v19  ;;  %v8709_v19 = vld [vmem:[#allocation76_spill] sm:$0xff] }
 0x462   :  { %v3103_v50 = vadd.f32 %v3039_v35, %v2959_v34  ;;  %v3045_v34 = vmul.f32 %v3015_v10, %v8685_v27 }
 0x464   :  { %v3162_v40 = vpack.c.bf16 %v3104_v14, %v3103_v50  ;;  %v7859_v50 = vld [vmem:[%s8090_s6] ss:$0 sm:$0xff]  ;;  %s4049_s6 = smov [#allocation13]  }
 0x465   :  { %v8687_v14 = vld [vmem:[#allocation62_spill] sm:$0xff]  ;;  %s3494_s9 = sshll.u32 %s4049_s6, 4  ;;  %s3495_s9 = int_to_ptr.vmem [resolvable:$true] %s3494_s9 }
 0x46f   :  { %3275 = vmatmul.bf16.gmra.mxu3 %v3159_v62  ;;  %v8672_v62 = vld [vmem:[#allocation49_spill] sm:$0xff] }
 0x470   :  { %v2898_v36 = vmul.f32 %v2870_v37, %v8672_v62 }
 0x472   :  { %v2962_v39 = vadd.f32 %v2898_v36, %v2818_v31  ;;  %v2903_v31 = vmul.f32 %v2871_v29, %v8689_v20  ;;  %v2766_v20 = vrot.slane %v7787_v30, 3 }
 0x474   :  { %v3106_v49 = vadd.f32 %v3042_v57, %v2962_v39  ;;  %v2968_v39 = vadd.f32 %v2904_v22, %v2824_v54  ;;  %v3048_v57 = vmul.f32 %v3015_v10, %v8692_v55  ;;  %v2792_v22 = vperm.slane %v2766_v20, 0 }
 0x476   :  { %v3163_v52 = vpack.c.bf16 %v3106_v49, %v3105_v32  ;;  %v3112_v49 = vadd.f32 %v3048_v57, %v2968_v39  ;;  %v8708_v57 = vld [vmem:[#allocation84_spill] sm:$0xff] }
 0x47f   :  { %3280 = vmatmul.bf16.gmra.mxu3 %v3160_v18  ;;  %v8677_v18 = vld [vmem:[#allocation51_spill] sm:$0xff] }
 0x480   :  { %v2899_v25 = vmul.f32 %v2870_v37, %v8677_v18  ;;  %v2821_v37 = vmul.f32 %v2791_v41, %v8681_v2  ;;  %v8694_v18 = vld [vmem:[#allocation71_spill] sm:$0xff] }
 0x482   :  { %v2963_v3 = vadd.f32 %v2899_v25, %v2819_v6  ;;  %v2965_v15 = vadd.f32 %v2901_v24, %v2821_v37  ;;  %v2826_v25 = vmul.f32 %v2791_v41, %v8694_v18  ;;  %v8700_v24 = vld [vmem:[#allocation77_spill] sm:$0xff] }
 0x483   :  { %v2828_v51 = vmul.f32 %v2791_v41, %v8700_v24 }
 0x484   :  { %v3107_v4 = vadd.f32 %v3043_v45, %v2963_v3  ;;  %v3109_v35 = vadd.f32 %v3045_v34, %v2965_v15  ;;  %v8696_v3 = vld [vmem:[#allocation72_spill] sm:$0xff] }
 0x485   :  { %v2906_v61 = vmul.f32 %v2871_v29, %v8696_v3 }
 0x486   :  { %v3164_v7 = vpack.c.bf16 %v3108_v44, %v3107_v4  ;;  %v8697_v4 = vld [vmem:[#allocation64_spill] sm:$0xff] }
 0x487   :  { %v2970_v28 = vadd.f32 %v2906_v61, %v2826_v25  ;;  %v3049_v44 = vmul.f32 %v3015_v10, %v8697_v4  ;;  %v8710_v25 = vld [vmem:[#allocation79_spill] sm:$0xff]  ;;  %v8712_v4 = vld [vmem:[#allocation89_spill] sm:$0xff] }
 0x489   :  { %v3114_v5 = vadd.f32 %v3050_v43, %v2970_v28 }
 0x48f   :  { %3285 = vmatmul.bf16.gmra.mxu3 %v3161_v11  ;;  %v8682_v11 = vld [vmem:[#allocation59_spill] sm:$0xff] }
 0x490   :  { %v2822_v13 = vmul.f32 %v2791_v41, %v8682_v11 }
 0x492   :  { %v2966_v42 = vadd.f32 %v2902_v58, %v2822_v13  ;;  %v8699_v13 = vld [vmem:[#allocation74_spill] sm:$0xff]  ;;  %v8701_v58 = vld [vmem:[#allocation75_spill] sm:$0xff] }
 0x493   :  { %v2827_v46 = vmul.f32 %v2791_v41, %v8699_v13  ;;  %v2907_v15 = vmul.f32 %v2871_v29, %v8701_v58 }
 0x494   :  { %v3110_v21 = vadd.f32 %v3046_v16, %v2966_v42  ;;  %v8702_v42 = vld [vmem:[#allocation78_spill] sm:$0xff] }
 0x495   :  { %v2908_v27 = vmul.f32 %v2871_v29, %v8702_v42  ;;  %v2971_v16 = vadd.f32 %v2907_v15, %v2827_v46  ;;  %v8715_v46 = vld [vmem:[#allocation82_spill] sm:$0xff] }
 0x496   :  { %v3165_v47 = vpack.c.bf16 %v3110_v21, %v3109_v35  ;;  %v8703_v21 = vld [vmem:[#allocation70_spill] sm:$0xff] }
 0x497   :  { %v2972_v35 = vadd.f32 %v2908_v27, %v2828_v51  ;;  %v8716_v51 = vld [vmem:[#allocation85_spill] sm:$0xff] }
 0x49f   :  { %3290 = vmatmul.bf16.gmra.mxu3 %v3162_v40  ;;  %v2823_v40 = vmul.f32 %v2791_v41, %v8687_v14  ;;  %v8704_v14 = vld [vmem:[#allocation73_spill] sm:$0xff]  ;;  %v2775_v41 = vrot.slane %v7789_v63, 3 }
 0x4a1   :  { %v2967_v17 = vadd.f32 %v2903_v31, %v2823_v40  ;;  %v3052_v40 = vmul.f32 %v3015_v10, %v8704_v14  ;;  %v8719_v14 = vld [vmem:[#allocation93_spill] sm:$0xff] }
 0x4a3   :  { %v3111_v32 = vadd.f32 %v3047_v53, %v2967_v17  ;;  %v3116_v54 = vadd.f32 %v3052_v40, %v2972_v35  ;;  %v8705_v17 = vld [vmem:[#allocation80_spill] sm:$0xff]  ;;  %v8707_v53 = vld [vmem:[#allocation81_spill] sm:$0xff] }
 0x4a4   :  { %v2829_v39 = vmul.f32 %v2792_v22, %v8705_v17  ;;  %v8722_v17 = vld [vmem:[#allocation91_spill] sm:$0xff] }
 0x4a5   :  { %v3166_v6 = vpack.c.bf16 %v3112_v49, %v3111_v32 }
 0x4af   :  { %3295 = vmatmul.bf16.gmra.mxu3 %v3163_v52 }
 0x4bf   :  { %3300 = vmatmul.bf16.gmra.mxu3 %v3164_v7  ;;  %v3113_v7 = vadd.f32 %v3049_v44, %v2969_v1  ;;  %v8711_v1 = vld [vmem:[#allocation86_spill] sm:$0xff]  ;;  %v2832_v44 = vmul.f32 %v2792_v22, %v8712_v4 }
 0x4c0   :  { %v2831_v28 = vmul.f32 %v2792_v22, %v8711_v1  ;;  %v8728_v1 = vld [vmem:[#allocation158_spill] sm:$0xff] }
 0x4c1   :  { %v3167_v11 = vpack.c.bf16 %v3114_v5, %v3113_v7  ;;  %v8714_v7 = vld [vmem:[#allocation90_spill] sm:$0xff] }
 0x4cf   :  { %3305 = vmatmul.bf16.gmra.mxu3 %v3165_v47  ;;  %v3051_v47 = vmul.f32 %v3015_v10, %v8703_v21  ;;  %v2830_v10 = vmul.f32 %v2792_v22, %v8706_v26  ;;  %v8718_v21 = vld [vmem:[#allocation95_spill] sm:$0xff] }
 0x4d1   :  { %v3115_v56 = vadd.f32 %v3051_v47, %v2971_v16  ;;  %v8717_v16 = vld [vmem:[#allocation92_spill] sm:$0xff]  ;;  %v2834_v47 = vmul.f32 %v2792_v22, %v8718_v21 }
 0x4d2   :  { %v3266_v62 = vpop.f32.mrf.mxu3  ;;  %v2833_v35 = vmul.f32 %v2792_v22, %v8717_v16 }
 0x4d3   :  { %v3267_v36 = vadd.f32 %v7859_v50, %v3266_v62  ;;  %v3168_v29 = vpack.c.bf16 %v3116_v54, %v3115_v56  ;;  %v2872_v62 = vperm.slane %v2775_v41, 0  ;;  %v8720_v56 = vld [vmem:[#allocation96_spill] sm:$0xff] }
 0x4d5   :  { %3426 = vst [vmem:[#allocation13] sm:$0xff] %v3267_v36  ;;  %v2784_v36 = vrot.slane %v7791_v38, 3  ;;  %v2909_v55 = vmul.f32 %v2872_v62, %v8707_v53  ;;  %v2910_v32 = vmul.f32 %v2872_v62, %v8708_v57  ;;  %v2911_v43 = vmul.f32 %v2872_v62, %v8713_v33 }
 0x4d6   :  { %v2912_v5 = vmul.f32 %v2872_v62, %v8714_v7  ;;  %v2913_v40 = vmul.f32 %v2872_v62, %v8719_v14  ;;  %v2914_v54 = vmul.f32 %v2872_v62, %v8720_v56  ;;  %v2767_v33 = vrot.slane %v7787_v30, 4 }
 0x4d7   :  { %v2974_v12 = vadd.f32 %v2910_v32, %v2830_v10  ;;  %v8723_v32 = vld [vmem:[#allocation97_spill] sm:$0xff] }
 0x4d8   :  { %v2976_v13 = vadd.f32 %v2912_v5, %v2832_v44  ;;  %v2793_v5 = vperm.slane %v2767_v33, 0 }
 0x4da   :  { %v3268_v52 = vpop.f32.mrf.mxu3 }
 0x4db   :  { %v3269_v0 = vadd.f32 %v7859_v50, %v3268_v52 }
 0x4dd   :  { %3427 = vst [vmem:[#allocation13 + $0x8] sm:$0xff] %v3269_v0  ;;  %v3016_v0 = vperm.slane %v2784_v36, 0 }
 0x4df   :  { %3310 = vmatmul.bf16.gmra.mxu3 %v3166_v6  ;;  %v2973_v6 = vadd.f32 %v2909_v55, %v2829_v39  ;;  %v3053_v18 = vmul.f32 %v3016_v0, %v8709_v19  ;;  %v3054_v9 = vmul.f32 %v3016_v0, %v8710_v25  ;;  %v3055_v24 = vmul.f32 %v3016_v0, %v8715_v46  ;;  %v8730_v46 = vld [vmem:[#allocation106_spill] sm:$0xff] }
 0x4e0   :  { %v3056_v58 = vmul.f32 %v3016_v0, %v8716_v51  ;;  %v3058_v39 = vmul.f32 %v3016_v0, %v8722_v17  ;;  %v8737_v17 = vld [vmem:[#allocation109_spill] sm:$0xff] }
 0x4e1   :  { %v3117_v48 = vadd.f32 %v3053_v18, %v2973_v6  ;;  %v3118_v3 = vadd.f32 %v3054_v9, %v2974_v12  ;;  %v8725_v12 = vld [vmem:[#allocation98_spill] sm:$0xff]  ;;  %v8726_v18 = vld [vmem:[#allocation101_spill] sm:$0xff] }
 0x4e2   :  { %v3271_v60 = vpop.f32.mrf.mxu3  ;;  %v3120_v42 = vadd.f32 %v3056_v58, %v2976_v13  ;;  %v2915_v19 = vmul.f32 %v2872_v62, %v8725_v12  ;;  %v2916_v25 = vmul.f32 %v2872_v62, %v8726_v18  ;;  %v8732_v58 = vld [vmem:[#allocation107_spill] sm:$0xff] }
 0x4e3   :  { %v3272_v45 = vadd.f32 %v7859_v50, %v3271_v60 }
 0x4e5   :  { %3428 = vst [vmem:[#allocation13 + $0x10] sm:$0xff] %v3272_v45  ;;  %v3169_v45 = vpack.c.bf16 %v3118_v3, %v3117_v48 }
 0x4ea   :  { %v3273_v2 = vpop.f32.mrf.mxu3 }
 0x4eb   :  { %v3274_v37 = vadd.f32 %v7859_v50, %v3273_v2 }
 0x4ed   :  { %3429 = vst [vmem:[#allocation13 + $0x18] sm:$0xff] %v3274_v37 }
 0x4ef   :  { %3315 = vmatmul.bf16.gmra.mxu3 %v3167_v11  ;;  %v2975_v11 = vadd.f32 %v2911_v43, %v2831_v28  ;;  %v3060_v28 = vmul.f32 %v3016_v0, %v8728_v1 }
 0x4f1   :  { %v3119_v15 = vadd.f32 %v3055_v24, %v2975_v11  ;;  %v8729_v11 = vld [vmem:[#allocation103_spill] sm:$0xff]  ;;  %v8731_v24 = vld [vmem:[#allocation104_spill] sm:$0xff] }
 0x4f2   :  { %v3276_v34 = vpop.f32.mrf.mxu3  ;;  %v2837_v13 = vmul.f32 %v2793_v5, %v8729_v11 }
 0x4f3   :  { %v3277_v59 = vadd.f32 %v7859_v50, %v3276_v34 }
 0x4f5   :  { %3430 = vst [vmem:[#allocation13 + $0x20] sm:$0xff] %v3277_v59  ;;  %v3170_v59 = vpack.c.bf16 %v3120_v42, %v3119_v15 }
 0x4fa   :  { %v3278_v31 = vpop.f32.mrf.mxu3 }
 0x4fb   :  { %v3279_v23 = vadd.f32 %v7859_v50, %v3278_v31  ;;  %v2977_v31 = vadd.f32 %v2913_v40, %v2833_v35  ;;  %v8733_v35 = vld [vmem:[#allocation99_spill] sm:$0xff] }
 0x4fd   :  { %3431 = vst [vmem:[#allocation13 + $0x28] sm:$0xff] %v3279_v23  ;;  %v2978_v23 = vadd.f32 %v2914_v54, %v2834_v47  ;;  %v8734_v47 = vld [vmem:[#allocation102_spill] sm:$0xff] }
 0x4ff   :  { %3320 = vmatmul.bf16.gmra.mxu3 %v3168_v29  ;;  %v8721_v29 = vld [vmem:[#allocation88_spill] sm:$0xff]  ;;  %v3122_v10 = vadd.f32 %v3058_v39, %v2978_v23 }
 0x500   :  { %v3057_v36 = vmul.f32 %v3016_v0, %v8721_v29  ;;  %v8736_v29 = vld [vmem:[#allocation114_spill] sm:$0xff] }
 0x502   :  { %v3281_v49 = vpop.f32.mrf.mxu3  ;;  %v3121_v26 = vadd.f32 %v3057_v36, %v2977_v31  ;;  %v8735_v31 = vld [vmem:[#allocation108_spill] sm:$0xff]  ;;  %v2840_v36 = vmul.f32 %v2793_v5, %v8736_v29  ;;  %v2768_v29 = vrot.slane %v7787_v30, 5 }
 0x503   :  { %v3282_v52 = vadd.f32 %v7859_v50, %v3281_v49  ;;  %v2835_v49 = vmul.f32 %v2792_v22, %v8723_v32  ;;  %v2839_v23 = vmul.f32 %v2793_v5, %v8735_v31 }
 0x504   :  { %v3171_v57 = vpack.c.bf16 %v3122_v10, %v3121_v26  ;;  %v8738_v26 = vld [vmem:[#allocation115_spill] sm:$0xff] }
 0x505   :  { %3432 = vst [vmem:[#allocation13 + $0x30] sm:$0xff] %v3282_v52  ;;  %v8724_v52 = vld [vmem:[#allocation100_spill] sm:$0xff]  ;;  %v2979_v3 = vadd.f32 %v2915_v19, %v2835_v49  ;;  %v8739_v49 = vld [vmem:[#allocation105_spill] sm:$0xff] }
 0x506   :  { %v2836_v6 = vmul.f32 %v2792_v22, %v8724_v52  ;;  %v2776_v22 = vrot.slane %v7789_v63, 4 }
 0x50a   :  { %v3283_v61 = vpop.f32.mrf.mxu3 }
 0x50b   :  { %v3284_v60 = vadd.f32 %v7859_v50, %v3283_v61  ;;  %v2980_v61 = vadd.f32 %v2916_v25, %v2836_v6  ;;  %v8740_v6 = vld [vmem:[#allocation169_spill] sm:$0xff] }
 0x50d   :  { %3433 = vst [vmem:[#allocation13 + $0x38] sm:$0xff] %v3284_v60  ;;  %v8727_v60 = vld [vmem:[#allocation94_spill] sm:$0xff]  ;;  %v3124_v44 = vadd.f32 %v3060_v28, %v2980_v61  ;;  %v8741_v61 = vld [vmem:[#allocation124_spill] sm:$0xff]  ;;  %v8743_v28 = vld [vmem:[#allocation125_spill] sm:$0xff] }
 0x50f   :  { %3325 = vmatmul.bf16.gmra.mxu3 %v3169_v45  ;;  %v3059_v45 = vmul.f32 %v3016_v0, %v8727_v60  ;;  %v2838_v0 = vmul.f32 %v2793_v5, %v8730_v46  ;;  %v2842_v60 = vmul.f32 %v2793_v5, %v8741_v61  ;;  %v8757_v61 = vld [vmem:[#allocation174_spill] sm:$0xff] }
 0x511   :  { %v3123_v4 = vadd.f32 %v3059_v45, %v2979_v3  ;;  %v2841_v3 = vmul.f32 %v2793_v5, %v5839_v8  ;;  %v8742_v45 = vld [vmem:[#allocation119_spill] sm:$0xff] }
 0x512   :  { %v3286_v2 = vpop.f32.mrf.mxu3 }
 0x513   :  { %v3287_v37 = vadd.f32 %v7859_v50, %v3286_v2  ;;  %v3172_v62 = vpack.c.bf16 %v3124_v44, %v3123_v4  ;;  %v2873_v2 = vperm.slane %v2776_v22, 0 }
 0x515   :  { %3434 = vst [vmem:[#allocation13 + $0x40] sm:$0xff] %v3287_v37  ;;  %v2785_v37 = vrot.slane %v7791_v38, 4  ;;  %v2917_v51 = vmul.f32 %v2873_v2, %v8731_v24  ;;  %v2918_v15 = vmul.f32 %v2873_v2, %v8732_v58  ;;  %v2919_v39 = vmul.f32 %v2873_v2, %v8737_v17 }
 0x516   :  { %v2920_v10 = vmul.f32 %v2873_v2, %v8738_v26  ;;  %v2921_v1 = vmul.f32 %v2873_v2, %v8742_v45  ;;  %v2922_v4 = vmul.f32 %v2873_v2, %v8743_v28 }
 0x517   :  { %v2982_v16 = vadd.f32 %v2918_v15, %v2838_v0  ;;  %v8747_v15 = vld [vmem:[#allocation135_spill] sm:$0xff] }
 0x518   :  { %v2984_v32 = vadd.f32 %v2920_v10, %v2840_v36  ;;  %v2985_v22 = vadd.f32 %v2921_v1, %v2841_v3  ;;  %v2786_v10 = vrot.slane %v7791_v38, 5 }
 0x51a   :  { %v3288_v27 = vpop.f32.mrf.mxu3 }
 0x51b   :  { %v3289_v34 = vadd.f32 %v7859_v50, %v3288_v27 }
 0x51d   :  { %3435 = vst [vmem:[#allocation13 + $0x48] sm:$0xff] %v3289_v34  ;;  %v3017_v34 = vperm.slane %v2785_v37, 0  ;;  %v8745_v37 = vld [vmem:[#allocation172_spill] sm:$0xff] }
 0x51f   :  { %3330 = vmatmul.bf16.gmra.mxu3 %v3170_v59  ;;  %v2981_v59 = vadd.f32 %v2917_v51, %v2837_v13  ;;  %v3061_v21 = vmul.f32 %v3017_v34, %v8733_v35  ;;  %v3062_v14 = vmul.f32 %v3017_v34, %v8734_v47  ;;  %v3063_v52 = vmul.f32 %v3017_v34, %v8739_v49  ;;  %v8746_v51 = vld [vmem:[#allocation131_spill] sm:$0xff] }
 0x520   :  { %v3064_v12 = vmul.f32 %v3017_v34, %v8740_v6  ;;  %v3066_v11 = vmul.f32 %v3017_v34, %v8745_v37  ;;  %v2843_v58 = vmul.f32 %v2793_v5, %v8746_v51  ;;  %v8762_v51 = vld [vmem:[#allocation177_spill] sm:$0xff] }
 0x521   :  { %v3125_v40 = vadd.f32 %v3061_v21, %v2981_v59  ;;  %v3126_v56 = vadd.f32 %v3062_v14, %v2982_v16  ;;  %v8749_v16 = vld [vmem:[#allocation136_spill] sm:$0xff] }
 0x522   :  { %v3291_v20 = vpop.f32.mrf.mxu3  ;;  %v3128_v18 = vadd.f32 %v3064_v12, %v2984_v32  ;;  %v2924_v35 = vmul.f32 %v2873_v2, %v8749_v16  ;;  %v8754_v32 = vld [vmem:[#allocation138_spill] sm:$0xff] }
 0x523   :  { %v3292_v41 = vadd.f32 %v7859_v50, %v3291_v20 }
 0x525   :  { %3436 = vst [vmem:[#allocation13 + $0x50] sm:$0xff] %v3292_v41  ;;  %v3173_v41 = vpack.c.bf16 %v3126_v56, %v3125_v40  ;;  %v8750_v56 = vld [vmem:[#allocation123_spill] sm:$0xff] }
 0x52a   :  { %v3293_v53 = vpop.f32.mrf.mxu3 }
 0x52b   :  { %v3294_v55 = vadd.f32 %v7859_v50, %v3293_v53 }
 0x52d   :  { %3437 = vst [vmem:[#allocation13 + $0x58] sm:$0xff] %v3294_v55 }
 0x52f   :  { %3335 = vmatmul.bf16.gmra.mxu3 %v3171_v57  ;;  %v2983_v57 = vadd.f32 %v2919_v39, %v2839_v23  ;;  %v2794_v39 = vperm.slane %v2768_v29, 0 }
 0x531   :  { %v3127_v19 = vadd.f32 %v3063_v52, %v2983_v57  ;;  %v8753_v57 = vld [vmem:[#allocation140_spill] sm:$0xff]  ;;  %v8755_v52 = vld [vmem:[#allocation141_spill] sm:$0xff] }
 0x532   :  { %v3296_v9 = vpop.f32.mrf.mxu3 }
 0x533   :  { %v3297_v48 = vadd.f32 %v7859_v50, %v3296_v9 }
 0x535   :  { %3438 = vst [vmem:[#allocation13 + $0x60] sm:$0xff] %v3297_v48  ;;  %v3174_v48 = vpack.c.bf16 %v3128_v18, %v3127_v19  ;;  %v3018_v18 = vperm.slane %v2786_v10, 0  ;;  %v8769_v10 = vld [vmem:[#allocation186_spill] sm:$0xff] }
 0x53a   :  { %v3298_v43 = vpop.f32.mrf.mxu3 }
 0x53b   :  { %v3299_v7 = vadd.f32 %v7859_v50, %v3298_v43  ;;  %v2986_v43 = vadd.f32 %v2922_v4, %v2842_v60  ;;  %v3070_v60 = vmul.f32 %v3018_v18, %v8757_v61 }
 0x53d   :  { %3439 = vst [vmem:[#allocation13 + $0x68] sm:$0xff] %v3299_v7  ;;  %v8744_v7 = vld [vmem:[#allocation112_spill] sm:$0xff]  ;;  %v3130_v46 = vadd.f32 %v3066_v11, %v2986_v43  ;;  %v8759_v43 = vld [vmem:[#allocation143_spill] sm:$0xff] }
 0x53e   :  { %v8761_v11 = vld [vmem:[#allocation144_spill] sm:$0xff] }
 0x53f   :  { %3340 = vmatmul.bf16.gmra.mxu3 %v3172_v62  ;;  %v3065_v62 = vmul.f32 %v3017_v34, %v8744_v7  ;;  %v2848_v7 = vmul.f32 %v2794_v39, %v8759_v43 }
 0x541   :  { %v3129_v13 = vadd.f32 %v3065_v62, %v2985_v22  ;;  %v8760_v62 = vld [vmem:[#allocation142_spill] sm:$0xff] }
 0x542   :  { %v3301_v42 = vpop.f32.mrf.mxu3 }
 0x543   :  { %v3302_v27 = vadd.f32 %v7859_v50, %v3301_v42  ;;  %v3175_v24 = vpack.c.bf16 %v3130_v46, %v3129_v13  ;;  %v2844_v42 = vmul.f32 %v2793_v5, %v8747_v15  ;;  %v2777_v5 = vrot.slane %v7789_v63, 5  ;;  %v8763_v15 = vld [vmem:[#allocation182_spill] sm:$0xff] }
 0x545   :  { %3440 = vst [vmem:[#allocation13 + $0x70] sm:$0xff] %v3302_v27  ;;  %v8748_v27 = vld [vmem:[#allocation132_spill] sm:$0xff]  ;;  %v2988_v40 = vadd.f32 %v2924_v35, %v2844_v42  ;;  %v2874_v26 = vperm.slane %v2777_v5, 0  ;;  %v3072_v42 = vmul.f32 %v3018_v18, %v8763_v15  ;;  %v8779_v15 = vld [vmem:[#allocation163_spill] sm:$0xff] }
 0x546   :  { %v2923_v59 = vmul.f32 %v2873_v2, %v8748_v27 }
 0x547   :  { %v2925_v49 = vmul.f32 %v2874_v26, %v8754_v32  ;;  %v2926_v6 = vmul.f32 %v2874_v26, %v8755_v52  ;;  %v2927_v37 = vmul.f32 %v2874_v26, %v8760_v62  ;;  %v2928_v13 = vmul.f32 %v2874_v26, %v8761_v11  ;;  %v8770_v52 = vld [vmem:[#allocation152_spill] sm:$0xff] }
 0x548   :  { %v2987_v14 = vadd.f32 %v2923_v59, %v2843_v58  ;;  %v3071_v58 = vmul.f32 %v3018_v18, %v8762_v51  ;;  %v8778_v51 = vld [vmem:[#allocation160_spill] sm:$0xff] }
 0x54a   :  { %v3303_v54 = vpop.f32.mrf.mxu3 }
 0x54b   :  { %v3304_v20 = vadd.f32 %v7859_v50, %v3303_v54  ;;  %v3067_v54 = vmul.f32 %v3017_v34, %v8750_v56 }
 0x54d   :  { %3441 = vst [vmem:[#allocation13 + $0x78] sm:$0xff] %v3304_v20  ;;  %v8751_v20 = vld [vmem:[#allocation178_spill] sm:$0xff]  ;;  %v3131_v31 = vadd.f32 %v3067_v54, %v2987_v14 }
 0x54e   :  { %v8766_v54 = vld [vmem:[#allocation146_spill] sm:$0xff] }
 0x54f   :  { %3345 = vmatmul.bf16.gmra.mxu3 %v3173_v41  ;;  %v3068_v41 = vmul.f32 %v3017_v34, %v8751_v20  ;;  %v2846_v34 = vmul.f32 %v2794_v39, %v8753_v57  ;;  %v2929_v20 = vmul.f32 %v2874_v26, %v8766_v54 }
 0x551   :  { %v3132_v23 = vadd.f32 %v3068_v41, %v2988_v40  ;;  %v8765_v40 = vld [vmem:[#allocation149_spill] sm:$0xff]  ;;  %v8767_v41 = vld [vmem:[#allocation150_spill] sm:$0xff] }
 0x552   :  { %v3306_v53 = vpop.f32.mrf.mxu3  ;;  %v2850_v56 = vmul.f32 %v2794_v39, %v8765_v40  ;;  %v8781_v40 = vld [vmem:[#allocation157_spill] sm:$0xff] }
 0x553   :  { %v3307_v55 = vadd.f32 %v7859_v50, %v3306_v53  ;;  %v3176_v2 = vpack.c.bf16 %v3132_v23, %v3131_v31  ;;  %v8752_v53 = vld [vmem:[#allocation137_spill] sm:$0xff]  ;;  %v2930_v31 = vmul.f32 %v2874_v26, %v8767_v41 }
 0x555   :  { %3442 = vst [vmem:[#allocation13 + $0x80] sm:$0xff] %v3307_v55  ;;  %v2845_v55 = vmul.f32 %v2794_v39, %v8752_v53  ;;  %v3074_v53 = vmul.f32 %v3018_v18, %v8769_v10 }
 0x55a   :  { %v3308_v25 = vpop.f32.mrf.mxu3 }
 0x55b   :  { %v3309_v9 = vadd.f32 %v7859_v50, %v3308_v25  ;;  %v2989_v25 = vadd.f32 %v2925_v49, %v2845_v55 }
 0x55d   :  { %3443 = vst [vmem:[#allocation13 + $0x88] sm:$0xff] %v3309_v9  ;;  %v2990_v9 = vadd.f32 %v2926_v6, %v2846_v34  ;;  %v2851_v6 = vmul.f32 %v2794_v39, %v8770_v52  ;;  %v8786_v52 = vld [vmem:[#allocation161_spill] sm:$0xff] }
 0x55f   :  { %3350 = vmatmul.bf16.gmra.mxu3 %v3174_v48  ;;  %v8756_v48 = vld [vmem:[#allocation173_spill] sm:$0xff]  ;;  %v3134_v1 = vadd.f32 %v3070_v60, %v2990_v9 }
 0x560   :  { %v3069_v3 = vmul.f32 %v3018_v18, %v8756_v48  ;;  %v8773_v48 = vld [vmem:[#allocation156_spill] sm:$0xff] }
 0x562   :  { %v3311_v44 = vpop.f32.mrf.mxu3  ;;  %v3133_v45 = vadd.f32 %v3069_v3, %v2989_v25  ;;  %v8772_v25 = vld [vmem:[#allocation153_spill] sm:$0xff]  ;;  %v2932_v3 = vmul.f32 %v2874_v26, %v8773_v48 }
 0x563   :  { %v3312_v33 = vadd.f32 %v7859_v50, %v3311_v44  ;;  %v2931_v9 = vmul.f32 %v2874_v26, %v8772_v25 }
 0x564   :  { %v3177_v44 = vpack.c.bf16 %v3134_v1, %v3133_v45 }
 0x565   :  { %3444 = vst [vmem:[#allocation13 + $0x90] sm:$0xff] %v3312_v33  ;;  %v8758_v33 = vld [vmem:[#allocation181_spill] sm:$0xff]  ;;  %v2995_v45 = vadd.f32 %v2931_v9, %v2851_v6 }
 0x566   :  { %v2847_v22 = vmul.f32 %v2794_v39, %v8758_v33 }
 0x56a   :  { %v3313_v0 = vpop.f32.mrf.mxu3 }
 0x56b   :  { %v3314_v8 = vadd.f32 %v7859_v50, %v3313_v0 }
 0x56d   :  { %3445 = vst [vmem:[#allocation13 + $0x98] sm:$0xff] %v3314_v8  ;;  %v2991_v8 = vadd.f32 %v2927_v37, %v2847_v22 }
 0x56f   :  { %3355 = vmatmul.bf16.gmra.mxu3 %v3175_v24  ;;  %v2992_v24 = vadd.f32 %v2928_v13, %v2848_v7  ;;  %v3135_v27 = vadd.f32 %v3071_v58, %v2991_v8  ;;  %v2769_v7 = vrot.slane %v7787_v30, 6 }
 0x571   :  { %v3136_v59 = vadd.f32 %v3072_v42, %v2992_v24  ;;  %v2795_v11 = vperm.slane %v2769_v7, 0  ;;  %v8777_v24 = vld [vmem:[#allocation162_spill] sm:$0xff] }
 0x572   :  { %v3316_v21 = vpop.f32.mrf.mxu3 }
 0x573   :  { %v3317_v47 = vadd.f32 %v7859_v50, %v3316_v21  ;;  %v3178_v21 = vpack.c.bf16 %v3136_v59, %v3135_v27 }
 0x575   :  { %3446 = vst [vmem:[#allocation13 + $0xa0] sm:$0xff] %v3317_v47  ;;  %v8764_v47 = vld [vmem:[#allocation145_spill] sm:$0xff] }
 0x576   :  { %v2849_v14 = vmul.f32 %v2794_v39, %v8764_v47  ;;  %v8780_v47 = vld [vmem:[#allocation154_spill] sm:$0xff] }
 0x578   :  { %v2993_v5 = vadd.f32 %v2929_v20, %v2849_v14 }
 0x57a   :  { %v3318_v36 = vpop.f32.mrf.mxu3 }
 0x57b   :  { %v3319_v17 = vadd.f32 %v7859_v50, %v3318_v36  ;;  %v2994_v36 = vadd.f32 %v2930_v31, %v2850_v56 }
 0x57d   :  { %3447 = vst [vmem:[#allocation13 + $0xa8] sm:$0xff] %v3319_v17  ;;  %v8768_v17 = vld [vmem:[#allocation183_spill] sm:$0xff]  ;;  %v3138_v57 = vadd.f32 %v3074_v53, %v2994_v36  ;;  %v8783_v36 = vld [vmem:[#allocation170_spill] sm:$0xff] }
 0x57e   :  { %v8785_v53 = vld [vmem:[#allocation171_spill] sm:$0xff] }
 0x57f   :  { %3360 = vmatmul.bf16.gmra.mxu3 %v3176_v2  ;;  %v3073_v2 = vmul.f32 %v3018_v18, %v8768_v17  ;;  %v2856_v17 = vmul.f32 %v2795_v11, %v8783_v36 }
 0x581   :  { %v3137_v55 = vadd.f32 %v3073_v2, %v2993_v5  ;;  %v8784_v2 = vld [vmem:[#allocation167_spill] sm:$0xff] }
 0x582   :  { %v3321_v12 = vpop.f32.mrf.mxu3 }
 0x583   :  { %v3322_v19 = vadd.f32 %v7859_v50, %v3321_v12  ;;  %v3179_v49 = vpack.c.bf16 %v3138_v57, %v3137_v55  ;;  %v8771_v12 = vld [vmem:[#allocation155_spill] sm:$0xff] }
 0x585   :  { %3448 = vst [vmem:[#allocation13 + $0xb0] sm:$0xff] %v3322_v19  ;;  %v2852_v19 = vmul.f32 %v2794_v39, %v8771_v12  ;;  %v2778_v39 = vrot.slane %v7789_v63, 6  ;;  %v8787_v12 = vld [vmem:[#allocation165_spill] sm:$0xff] }
 0x587   :  { %v2996_v1 = vadd.f32 %v2932_v3, %v2852_v19  ;;  %v2875_v13 = vperm.slane %v2778_v39, 0 }
 0x589   :  { %v2933_v58 = vmul.f32 %v2875_v13, %v8778_v51  ;;  %v2934_v42 = vmul.f32 %v2875_v13, %v8779_v15  ;;  %v2935_v10 = vmul.f32 %v2875_v13, %v8784_v2  ;;  %v2936_v55 = vmul.f32 %v2875_v13, %v8785_v53  ;;  %v8794_v15 = vld [vmem:[#allocation184_spill] sm:$0xff] }
 0x58a   :  { %v3323_v28 = vpop.f32.mrf.mxu3 }
 0x58b   :  { %v3324_v4 = vadd.f32 %v7859_v50, %v3323_v28  ;;  %v8774_v28 = vld [vmem:[#allocation147_spill] sm:$0xff] }
 0x58d   :  { %3449 = vst [vmem:[#allocation13 + $0xb8] sm:$0xff] %v3324_v4  ;;  %v3075_v4 = vmul.f32 %v3018_v18, %v8774_v28 }
 0x58f   :  { %3365 = vmatmul.bf16.gmra.mxu3 %v3177_v44  ;;  %v8775_v44 = vld [vmem:[#allocation151_spill] sm:$0xff]  ;;  %v3139_v22 = vadd.f32 %v3075_v4, %v2995_v45  ;;  %v8790_v4 = vld [vmem:[#allocation176_spill] sm:$0xff] }
 0x590   :  { %v3076_v33 = vmul.f32 %v3018_v18, %v8775_v44  ;;  %v2854_v18 = vmul.f32 %v2795_v11, %v8777_v24  ;;  %v2937_v44 = vmul.f32 %v2875_v13, %v8790_v4 }
 0x592   :  { %v3326_v46 = vpop.f32.mrf.mxu3  ;;  %v3140_v43 = vadd.f32 %v3076_v33, %v2996_v1  ;;  %v8789_v1 = vld [vmem:[#allocation179_spill] sm:$0xff]  ;;  %v8791_v33 = vld [vmem:[#allocation180_spill] sm:$0xff] }
 0x593   :  { %v3327_v0 = vadd.f32 %v7859_v50, %v3326_v46  ;;  %v2787_v46 = vrot.slane %v7791_v38, 6  ;;  %v2858_v28 = vmul.f32 %v2795_v11, %v8789_v1 }
 0x594   :  { %v3180_v26 = vpack.c.bf16 %v3140_v43, %v3139_v22  ;;  %v2938_v22 = vmul.f32 %v2875_v13, %v8791_v33  ;;  %v8806_v33 = vld [vmem:[#allocation200_spill] sm:$0xff] }
 0x595   :  { %3450 = vst [vmem:[#allocation13 + $0xc0] sm:$0xff] %v3327_v0  ;;  %v8776_v0 = vld [vmem:[#allocation159_spill] sm:$0xff] }
 0x596   :  { %v2853_v8 = vmul.f32 %v2795_v11, %v8776_v0 }
 0x59a   :  { %v3328_v16 = vpop.f32.mrf.mxu3 }
 0x59b   :  { %v3329_v35 = vadd.f32 %v7859_v50, %v3328_v16  ;;  %v3019_v16 = vperm.slane %v2787_v46, 0  ;;  %v8793_v46 = vld [vmem:[#allocation190_spill] sm:$0xff] }
 0x59d   :  { %3451 = vst [vmem:[#allocation13 + $0xc8] sm:$0xff] %v3329_v35  ;;  %v2997_v35 = vadd.f32 %v2933_v58, %v2853_v8  ;;  %v3077_v14 = vmul.f32 %v3019_v16, %v8780_v47  ;;  %v3078_v56 = vmul.f32 %v3019_v16, %v8781_v40  ;;  %v3079_v6 = vmul.f32 %v3019_v16, %v8786_v52  ;;  %v8797_v47 = vld [vmem:[#allocation188_spill] sm:$0xff]  ;;  %v8802_v52 = vld [vmem:[#allocation199_spill] sm:$0xff] }
 0x59e   :  { %v3080_v19 = vmul.f32 %v3019_v16, %v8787_v12  ;;  %v3082_v0 = vmul.f32 %v3019_v16, %v8793_v46  ;;  %v8803_v12 = vld [vmem:[#allocation197_spill] sm:$0xff] }
 0x59f   :  { %3370 = vmatmul.bf16.gmra.mxu3 %v3178_v21  ;;  %v2998_v21 = vadd.f32 %v2934_v42, %v2854_v18  ;;  %v3141_v54 = vadd.f32 %v3077_v14, %v2997_v35  ;;  %v2859_v42 = vmul.f32 %v2795_v11, %v8794_v15  ;;  %v8796_v35 = vld [vmem:[#allocation185_spill] sm:$0xff]  ;;  %v2940_v14 = vmul.f32 %v2875_v13, %v8797_v47  ;;  %v8812_v47 = vld [vmem:[#allocation206_spill] sm:$0xff] }
 0x5a1   :  { %v3142_v20 = vadd.f32 %v3078_v56, %v2998_v21  ;;  %v2939_v21 = vmul.f32 %v2875_v13, %v8796_v35 }
 0x5a2   :  { %v3331_v23 = vpop.f32.mrf.mxu3 }
 0x5a3   :  { %v3332_v29 = vadd.f32 %v7859_v50, %v3331_v23  ;;  %v3181_v23 = vpack.c.bf16 %v3142_v20, %v3141_v54  ;;  %v3003_v54 = vadd.f32 %v2939_v21, %v2859_v42 }
 0x5a5   :  { %3452 = vst [vmem:[#allocation13 + $0xd0] sm:$0xff] %v3332_v29  ;;  %v8782_v29 = vld [vmem:[#allocation166_spill] sm:$0xff] }
 0x5a6   :  { %v2855_v5 = vmul.f32 %v2795_v11, %v8782_v29 }
 0x5aa   :  { %v3333_v34 = vpop.f32.mrf.mxu3 }
 0x5ab   :  { %v3334_v32 = vadd.f32 %v7859_v50, %v3333_v34 }
 0x5ad   :  { %3453 = vst [vmem:[#allocation13 + $0xd8] sm:$0xff] %v3334_v32  ;;  %v2999_v32 = vadd.f32 %v2935_v10, %v2855_v5 }
 0x5af   :  { %3375 = vmatmul.bf16.gmra.mxu3 %v3179_v49  ;;  %v3000_v49 = vadd.f32 %v2936_v55, %v2856_v17  ;;  %v3143_v25 = vadd.f32 %v3079_v6, %v2999_v32  ;;  %v2770_v17 = vrot.slane %v7787_v30, 7 }
 0x5b1   :  { %v3144_v9 = vadd.f32 %v3080_v19, %v3000_v49  ;;  %v2796_v53 = vperm.slane %v2770_v17, 0  ;;  %v8801_v49 = vld [vmem:[#allocation196_spill] sm:$0xff]  ;;  %v8816_v17 = vld [vmem:[#allocation205_spill] sm:$0xff] }
 0x5b2   :  { %v3336_v61 = vpop.f32.mrf.mxu3 }
 0x5b3   :  { %v3337_v60 = vadd.f32 %v7859_v50, %v3336_v61  ;;  %v3182_v61 = vpack.c.bf16 %v3144_v9, %v3143_v25 }
 0x5b5   :  { %3454 = vst [vmem:[#allocation13 + $0xe0] sm:$0xff] %v3337_v60  ;;  %v8788_v60 = vld [vmem:[#allocation175_spill] sm:$0xff] }
 0x5b6   :  { %v2857_v45 = vmul.f32 %v2795_v11, %v8788_v60  ;;  %v8805_v60 = vld [vmem:[#allocation194_spill] sm:$0xff] }
 0x5b8   :  { %v3001_v39 = vadd.f32 %v2937_v44, %v2857_v45 }
 0x5ba   :  { %v3338_v62 = vpop.f32.mrf.mxu3 }
 0x5bb   :  { %v3339_v37 = vadd.f32 %v7859_v50, %v3338_v62  ;;  %v3002_v62 = vadd.f32 %v2938_v22, %v2858_v28  ;;  %v2863_v22 = vmul.f32 %v2796_v53, %v8806_v33 }
 0x5bd   :  { %3455 = vst [vmem:[#allocation13 + $0xe8] sm:$0xff] %v3339_v37  ;;  %v8792_v37 = vld [vmem:[#allocation189_spill] sm:$0xff]  ;;  %v3146_v24 = vadd.f32 %v3082_v0, %v3002_v62 }
 0x5bf   :  { %3380 = vmatmul.bf16.gmra.mxu3 %v3180_v26  ;;  %v3081_v26 = vmul.f32 %v3019_v16, %v8792_v37  ;;  %v8809_v37 = vld [vmem:[#allocation204_spill] sm:$0xff] }
 0x5c1   :  { %v3145_v8 = vadd.f32 %v3081_v26, %v3001_v39  ;;  %v8808_v39 = vld [vmem:[#allocation202_spill] sm:$0xff] }
 0x5c2   :  { %v3341_v27 = vpop.f32.mrf.mxu3 }
 0x5c3   :  { %v3342_v59 = vadd.f32 %v7859_v50, %v3341_v27  ;;  %v3183_v58 = vpack.c.bf16 %v3146_v24, %v3145_v8  ;;  %v8795_v27 = vld [vmem:[#allocation187_spill] sm:$0xff] }
 0x5c5   :  { %3456 = vst [vmem:[#allocation13 + $0xf0] sm:$0xff] %v3342_v59  ;;  %v2860_v59 = vmul.f32 %v2795_v11, %v8795_v27  ;;  %v2779_v11 = vrot.slane %v7789_v63, 7 }
 0x5c7   :  { %v3004_v20 = vadd.f32 %v2940_v14, %v2860_v59  ;;  %v2876_v55 = vperm.slane %v2779_v11, 0  ;;  %v2865_v14 = vmul.f32 %v2796_v53, %v8812_v47 }
 0x5c9   :  { %v2941_v6 = vmul.f32 %v2876_v55, %v8802_v52  ;;  %v2942_v30 = vmul.f32 %v2876_v55, %v8803_v12  ;;  %v2943_v62 = vmul.f32 %v2876_v55, %v8808_v39  ;;  %v2944_v26 = vmul.f32 %v2876_v55, %v8809_v37 }
 0x5ca   :  { %v3343_v41 = vpop.f32.mrf.mxu3 }
 0x5cb   :  { %v3344_v31 = vadd.f32 %v7859_v50, %v3343_v41  ;;  %v8798_v41 = vld [vmem:[#allocation191_spill] sm:$0xff]  ;;  %v3007_v8 = vadd.f32 %v2943_v62, %v2863_v22 }
 0x5cd   :  { %3457 = vst [vmem:[#allocation13 + $0xf8] sm:$0xff] %v3344_v31  ;;  %v3083_v31 = vmul.f32 %v3019_v16, %v8798_v41  ;;  %v8815_v41 = vld [vmem:[#allocation210_spill] sm:$0xff] }
 0x5cf   :  { %3385 = vmatmul.bf16.gmra.mxu3 %v3181_v23  ;;  %v8799_v23 = vld [vmem:[#allocation192_spill] sm:$0xff]  ;;  %v3147_v5 = vadd.f32 %v3083_v31, %v3003_v54  ;;  %v8814_v54 = vld [vmem:[#allocation207_spill] sm:$0xff]  ;;  %v2946_v31 = vmul.f32 %v2876_v55, %v8815_v41 }
 0x5d0   :  { %v3084_v29 = vmul.f32 %v3019_v16, %v8799_v23  ;;  %v2862_v16 = vmul.f32 %v2796_v53, %v8801_v49 }
 0x5d2   :  { %v3346_v57 = vpop.f32.mrf.mxu3  ;;  %v3148_v36 = vadd.f32 %v3084_v29, %v3004_v20  ;;  %v2945_v20 = vmul.f32 %v2876_v55, %v8814_v54 }
 0x5d3   :  { %v3347_v34 = vadd.f32 %v7859_v50, %v3346_v57  ;;  %v2788_v57 = vrot.slane %v7791_v38, 7 }
 0x5d4   :  { %v3184_v13 = vpack.c.bf16 %v3148_v36, %v3147_v5  ;;  %v3009_v5 = vadd.f32 %v2945_v20, %v2865_v14 }
 0x5d5   :  { %3458 = vst [vmem:[#allocation13 + $0x100] sm:$0xff] %v3347_v34  ;;  %v8800_v34 = vld [vmem:[#allocation195_spill] sm:$0xff]  ;;  %v3020_v25 = vperm.slane %v2788_v57, 0 }
 0x5d6   :  { %v2861_v32 = vmul.f32 %v2796_v53, %v8800_v34 }
 0x5d7   :  { %v3086_v45 = vmul.f32 %v3020_v25, %v8805_v60  ;;  %v3089_v11 = vmul.f32 %v3020_v25, %v8816_v17 }
 0x5d8   :  { %v3005_v9 = vadd.f32 %v2941_v6, %v2861_v32  ;;  %v8819_v6 = vld [vmem:[#allocation22_spill] sm:$0xff] }
 0x5d9   :  { %v2868_v12 = vmul.f32 %v2796_v53, %v8819_v6 }
 0x5da   :  { %v3348_v48 = vpop.f32.mrf.mxu3 }
 0x5db   :  { %v3349_v3 = vadd.f32 %v7859_v50, %v3348_v48  ;;  %v3006_v48 = vadd.f32 %v2942_v30, %v2862_v16  ;;  %v8818_v16 = vld [vmem:[#allocation19_spill] sm:$0xff]  ;;  %v8820_v30 = vld [vmem:[#allocation20_spill] sm:$0xff] }
 0x5dc   :  { %v2867_v52 = vmul.f32 %v2796_v53, %v8818_v16 }
 0x5dd   :  { %3459 = vst [vmem:[#allocation13 + $0x108] sm:$0xff] %v3349_v3  ;;  %v8804_v3 = vld [vmem:[#allocation193_spill] sm:$0xff]  ;;  %v3150_v1 = vadd.f32 %v3086_v45, %v3006_v48  ;;  %v8822_v45 = vld [vmem:[#allocation211_spill] sm:$0xff] }
 0x5df   :  { %3390 = vmatmul.bf16.gmra.mxu3 %v3182_v61  ;;  %v3085_v61 = vmul.f32 %v3020_v25, %v8804_v3 }
 0x5e1   :  { %v3149_v38 = vadd.f32 %v3085_v61, %v3005_v9 }
 0x5e2   :  { %v3351_v43 = vpop.f32.mrf.mxu3 }
 0x5e3   :  { %v3352_v7 = vadd.f32 %v7859_v50, %v3351_v43  ;;  %v3185_v44 = vpack.c.bf16 %v3150_v1, %v3149_v38  ;;  %v8807_v43 = vld [vmem:[#allocation203_spill] sm:$0xff]  ;;  %v3091_v38 = vmul.f32 %v3020_v25, %v8822_v45  ;;  %v8823_v1 = vld [vmem:[#allocation21_spill] sm:$0xff] }
 0x5e5   :  { %3460 = vst [vmem:[#allocation13 + $0x110] sm:$0xff] %v3352_v7  ;;  %v2864_v7 = vmul.f32 %v2796_v53, %v8807_v43 }
 0x5e7   :  { %v3008_v24 = vadd.f32 %v2944_v26, %v2864_v7 }
 0x5ea   :  { %v3353_v18 = vpop.f32.mrf.mxu3 }
 0x5eb   :  { %v3354_v51 = vadd.f32 %v7859_v50, %v3353_v18  ;;  %v8810_v18 = vld [vmem:[#allocation198_spill] sm:$0xff] }
 0x5ed   :  { %3461 = vst [vmem:[#allocation13 + $0x118] sm:$0xff] %v3354_v51  ;;  %v3087_v51 = vmul.f32 %v3020_v25, %v8810_v18 }
 0x5ef   :  { %3395 = vmatmul.bf16.gmra.mxu3 %v3183_v58  ;;  %v8811_v58 = vld [vmem:[#allocation201_spill] sm:$0xff]  ;;  %v3151_v42 = vadd.f32 %v3087_v51, %v3007_v8 }
 0x5f0   :  { %v3088_v15 = vmul.f32 %v3020_v25, %v8811_v58 }
 0x5f2   :  { %v3356_v40 = vpop.f32.mrf.mxu3  ;;  %v3152_v27 = vadd.f32 %v3088_v15, %v3008_v24 }
 0x5f3   :  { %v3357_v56 = vadd.f32 %v7859_v50, %v3356_v40  ;;  %v8813_v40 = vld [vmem:[#allocation209_spill] sm:$0xff] }
 0x5f4   :  { %v3186_v21 = vpack.c.bf16 %v3152_v27, %v3151_v42 }
 0x5f5   :  { %3462 = vst [vmem:[#allocation13 + $0x120] sm:$0xff] %v3357_v56  ;;  %v2866_v56 = vmul.f32 %v2796_v53, %v8813_v40 }
 0x5f7   :  { %v3010_v36 = vadd.f32 %v2946_v31, %v2866_v56 }
 0x5fa   :  { %v3358_v2 = vpop.f32.mrf.mxu3 }
 0x5fb   :  { %v3359_v10 = vadd.f32 %v7859_v50, %v3358_v2  ;;  %v8817_v2 = vld [vmem:[#allocation208_spill] sm:$0xff] }
 0x5fd   :  { %3463 = vst [vmem:[#allocation13 + $0x128] sm:$0xff] %v3359_v10  ;;  %v3090_v10 = vmul.f32 %v3020_v25, %v8817_v2 }
 0x5ff   :  { %3400 = vmatmul.bf16.gmra.mxu3 %v3184_v13  ;;  %v3153_v13 = vadd.f32 %v3089_v11, %v3009_v5  ;;  %v3154_v57 = vadd.f32 %v3090_v10, %v3010_v36 }
 0x601   :  { %v3187_v49 = vpack.c.bf16 %v3154_v57, %v3153_v13 }
 0x602   :  { %v3361_v19 = vpop.f32.mrf.mxu3 }
 0x603   :  { %v3362_v63 = vadd.f32 %v7859_v50, %v3361_v19  ;;  %v2947_v19 = vmul.f32 %v2876_v55, %v8820_v30 }
 0x605   :  { %3464 = vst [vmem:[#allocation13 + $0x130] sm:$0xff] %v3362_v63  ;;  %v8821_v63 = vld [vmem:[#allocation24_spill] sm:$0xff]  ;;  %v3011_v61 = vadd.f32 %v2947_v19, %v2867_v52 }
 0x606   :  { %v2948_v9 = vmul.f32 %v2876_v55, %v8821_v63 }
 0x608   :  { %v3012_v60 = vadd.f32 %v2948_v9, %v2868_v12 }
 0x60a   :  { %v3363_v28 = vpop.f32.mrf.mxu3 }
 0x60b   :  { %v3364_v4 = vadd.f32 %v7859_v50, %v3363_v28  ;;  %v3092_v28 = vmul.f32 %v3020_v25, %v8823_v1 }
 0x60d   :  { %3465 = vst [vmem:[#allocation13 + $0x138] sm:$0xff] %v3364_v4  ;;  %v3155_v4 = vadd.f32 %v3091_v38, %v3011_v61 }
 0x60f   :  { %3405 = vmatmul.bf16.gmra.mxu3 %v3185_v44  ;;  %v3156_v44 = vadd.f32 %v3092_v28, %v3012_v60 }
 0x611   :  { %v3188_v53 = vpack.c.bf16 %v3156_v44, %v3155_v4 }
 0x612   :  { %v3366_v46 = vpop.f32.mrf.mxu3 }
 0x613   :  { %v3367_v0 = vadd.f32 %v7859_v50, %v3366_v46 }
 0x615   :  { %3466 = vst [vmem:[#allocation13 + $0x140] sm:$0xff] %v3367_v0 }
 0x61a   :  { %v3368_v59 = vpop.f32.mrf.mxu3 }
 0x61b   :  { %v3369_v35 = vadd.f32 %v7859_v50, %v3368_v59 }
 0x61d   :  { %3467 = vst [vmem:[#allocation13 + $0x148] sm:$0xff] %v3369_v35 }
 0x61f   :  { %3410 = vmatmul.bf16.gmra.mxu3 %v3186_v21 }
 0x622   :  { %v3371_v23 = vpop.f32.mrf.mxu3 }
 0x623   :  { %v3372_v29 = vadd.f32 %v7859_v50, %v3371_v23 }
 0x625   :  { %3468 = vst [vmem:[#allocation13 + $0x150] sm:$0xff] %v3372_v29 }
 0x62a   :  { %v3373_v34 = vpop.f32.mrf.mxu3 }
 0x62b   :  { %v3374_v32 = vadd.f32 %v7859_v50, %v3373_v34 }
 0x62d   :  { %3469 = vst [vmem:[#allocation13 + $0x158] sm:$0xff] %v3374_v32 }
 0x62f   :  { %3415 = vmatmul.bf16.gmra.mxu3 %v3187_v49 }
 0x632   :  { %v3376_v48 = vpop.f32.mrf.mxu3 }
 0x633   :  { %v3377_v3 = vadd.f32 %v7859_v50, %v3376_v48 }
 0x635   :  { %3470 = vst [vmem:[#allocation13 + $0x160] sm:$0xff] %v3377_v3 }
 0x63a   :  { %v3378_v33 = vpop.f32.mrf.mxu3 }
 0x63b   :  { %v3379_v22 = vadd.f32 %v7859_v50, %v3378_v33 }
 0x63d   :  { %3471 = vst [vmem:[#allocation13 + $0x168] sm:$0xff] %v3379_v22 }
 0x63f   :  { %3420 = vmatmul.bf16.gmra.mxu3 %v3188_v53 }
 0x642   :  { %v3381_v43 = vpop.f32.mrf.mxu3 }
 0x643   :  { %v3382_v55 = vadd.f32 %v7859_v50, %v3381_v43 }
 0x645   :  { %3472 = vst [vmem:[#allocation13 + $0x170] sm:$0xff] %v3382_v55 }
 0x64a   :  { %v3383_v7 = vpop.f32.mrf.mxu3 }
 0x64b   :  { %v3384_v39 = vadd.f32 %v7859_v50, %v3383_v7 }
 0x64d   :  { %3473 = vst [vmem:[#allocation13 + $0x178] sm:$0xff] %v3384_v39 }
 0x652   :  { %v3386_v62 = vpop.f32.mrf.mxu3 }
 0x653   :  { %v3387_v37 = vadd.f32 %v7859_v50, %v3386_v62 }
 0x655   :  { %3474 = vst [vmem:[#allocation13 + $0x180] sm:$0xff] %v3387_v37 }
 0x65a   :  { %v3388_v25 = vpop.f32.mrf.mxu3 }
 0x65b   :  { %v3389_v26 = vadd.f32 %v7859_v50, %v3388_v25 }
 0x65d   :  { %3475 = vst [vmem:[#allocation13 + $0x188] sm:$0xff] %v3389_v26 }
 0x662   :  { %v3391_v46 = vpop.f32.mrf.mxu3 }
 0x663   :  { %v3392_v0 = vadd.f32 %v7859_v50, %v3391_v46 }
 0x665   :  { %3476 = vst [vmem:[#allocation13 + $0x190] sm:$0xff] %v3392_v0 }
 0x66a   :  { %v3393_v8 = vpop.f32.mrf.mxu3 }
 0x66b   :  { %v3394_v24 = vadd.f32 %v7859_v50, %v3393_v8 }
 0x66d   :  { %3477 = vst [vmem:[#allocation13 + $0x198] sm:$0xff] %v3394_v24 }
 0x672   :  { %v3396_v18 = vpop.f32.mrf.mxu3 }
 0x673   :  { %v3397_v51 = vadd.f32 %v7859_v50, %v3396_v18 }
 0x675   :  { %3478 = vst [vmem:[#allocation13 + $0x1a0] sm:$0xff] %v3397_v51 }
 0x67a   :  { %v3398_v58 = vpop.f32.mrf.mxu3 }
 0x67b   :  { %v3399_v15 = vadd.f32 %v7859_v50, %v3398_v58 }
 0x67d   :  { %3479 = vst [vmem:[#allocation13 + $0x1a8] sm:$0xff] %v3399_v15 }
 0x682   :  { %v3401_v42 = vpop.f32.mrf.mxu3 }
 0x683   :  { %v3402_v27 = vadd.f32 %v7859_v50, %v3401_v42 }
 0x685   :  { %3480 = vst [vmem:[#allocation13 + $0x1b0] sm:$0xff] %v3402_v27 }
 0x68a   :  { %v3403_v59 = vpop.f32.mrf.mxu3 }
 0x68b   :  { %v3404_v35 = vadd.f32 %v7859_v50, %v3403_v59 }
 0x68d   :  { %3481 = vst [vmem:[#allocation13 + $0x1b8] sm:$0xff] %v3404_v35 }
 0x692   :  { %v3406_v21 = vpop.f32.mrf.mxu3 }
 0x693   :  { %v3407_v47 = vadd.f32 %v7859_v50, %v3406_v21 }
 0x695   :  { %3482 = vst [vmem:[#allocation13 + $0x1c0] sm:$0xff] %v3407_v47 }
 0x69a   :  { %v3408_v14 = vpop.f32.mrf.mxu3 }
 0x69b   :  { %v3409_v40 = vadd.f32 %v7859_v50, %v3408_v14 }
 0x69d   :  { %3483 = vst [vmem:[#allocation13 + $0x1c8] sm:$0xff] %v3409_v40 }
 0x6a2   :  { %v3411_v56 = vpop.f32.mrf.mxu3 }
 0x6a3   :  { %v3412_v54 = vadd.f32 %v7859_v50, %v3411_v56 }
 0x6a5   :  { %3484 = vst [vmem:[#allocation13 + $0x1d0] sm:$0xff] %v3412_v54 }
 0x6aa   :  { %v3413_v20 = vpop.f32.mrf.mxu3 }
 0x6ab   :  { %v3414_v41 = vadd.f32 %v7859_v50, %v3413_v20 }
 0x6ad   :  { %3485 = vst [vmem:[#allocation13 + $0x1d8] sm:$0xff] %v3414_v41 }
 0x6b2   :  { %v3416_v31 = vpop.f32.mrf.mxu3 }
 0x6b3   :  { %v3417_v23 = vadd.f32 %v7859_v50, %v3416_v31 }
 0x6b5   :  { %3486 = vst [vmem:[#allocation13 + $0x1e0] sm:$0xff] %v3417_v23 }
 0x6ba   :  { %v3418_v29 = vpop.f32.mrf.mxu3 }
 0x6bb   :  { %v3419_v5 = vadd.f32 %v7859_v50, %v3418_v29 }
 0x6bd   :  { %3487 = vst [vmem:[#allocation13 + $0x1e8] sm:$0xff] %v3419_v5 }
 0x6c2   :  { %v3421_v36 = vpop.f32.mrf.mxu3 }
 0x6c3   :  { %v3422_v17 = vadd.f32 %v7859_v50, %v3421_v36 }
 0x6c5   :  { %3488 = vst [vmem:[#allocation13 + $0x1f0] sm:$0xff] %v3422_v17 }
 0x6ca   :  { %v3423_v11 = vpop.f32.mrf.mxu3 }
 0x6cb   :  { %v3424_v2 = vadd.f32 %v7859_v50, %v3423_v11 }
 0x6cd   :  { %3489 = vst [vmem:[#allocation13 + $0x1f8] sm:$0xff] %v3424_v2 }
 0x6ce   :  { %3502 = dma.vmem_to_hbm [thread:$0]  %s3495_s9, 8192, %s3497_s1, [#allocation4], %s4044_s21, %s4044_s21, %s4045_s22  }
 0x6cf   :  { %4035 = dma.done.wait [#allocation4], 8192  }
 0x6d0   :  { %4036 = vsyncadd [#allocation4], 4294959104 }
 0x6d1   :  { %3507 = vsyncpa [#allocation3], 1 }
 0x6d2   :  { %3508 = vsyncpa [#allocation6], 1 }
 0x6d3   :  { %3509 = vsyncpa [#allocation9], 1 }
 0x6d4   :  { %3510 = vsyncpa [#allocation12], 1 }
 0x6d5   :  { %3511 = vsyncpa [#allocation4], 1 }

// kernel: tpu_custom_call.1
= control target key start
LH: loop header
LB: loop body
LE: loop exit
PB: predicated region body
PF: predicated region fallthrough
CT: control target
= control target key end

     0   :  { %12 = vsyncpa [#allocation3], 0  ;;  %s7026_s0 = inlined_call_operand.hbm [shape: f32[8,8,8,128], index: 0, kind: input, shape index: {}]   ;;  %s7027_s1 = inlined_call_operand.hbm [shape: bf16[128,384], index: 1, kind: input, shape index: {}]   ;;  %s7028_s2 = inlined_call_operand.hbm [shape: f32[1,384], index: 2, kind: input, shape index: {}]   ;;  %s7029_s3 = inlined_call_operand.hbm [shape: bf16[128,128], index: 3, kind: input, shape index: {}]   ;;  %s7030_s4 = inlined_call_operand.hbm [shape: bf16[128,384], index: 4, kind: input, shape index: {}]   ;;  %s7031_s5 = inlined_call_operand.hbm [shape: bf16[128,128], index: 5, kind: input, shape index: {}]   ;;  %s7032_s6 = inlined_call_operand.vmem [shape: f32[1,128], index: 6, kind: input, shape index: {}]   ;;  %s7033_s7 = inlined_call_operand.hbm [shape: f32[8,8,8,128], index: 7, kind: output, shape index: {}]  }
   0x1   :  { %13 = vsyncpa [#allocation6], 0 }
   0x2   :  { %14 = vsyncpa [#allocation9], 0 }
   0x3   :  { %15 = vsyncpa [#allocation12], 0  ;;  %s34_s26 = sshll.u32 %s7027_s1, 4  ;;  %s35_s26 = int_to_ptr.hbm [resolvable:$true] %s34_s26 }
   0x4   :  { %16 = vsyncpa [#allocation4], 0  ;;  %s4157_s27 = smov [#allocation5]   ;;  %s58_s8 = sshll.u32 %s7029_s3, 4  ;;  %s59_s8 = int_to_ptr.hbm [resolvable:$true] %s58_s8 }
   0x5   :  { %s36_s28 = sshll.u32 %s4157_s27, 4  ;;  %s4158_s9 = smov 192   ;;  %s37_s28 = int_to_ptr.vmem [resolvable:$true] %s36_s28 }
   0x6   :  { %s4159_s10 = smov 12   ;;  %s4160_s11 = smov [#allocation8]  }
   0x7   :  { %42 = dma.hbm_to_vmem [thread:$0]  %s35_s26, 3072, %s37_s28, [#allocation6], %s4158_s9, %s4158_s9, %s4159_s10  }
   0x8   :  { %s60_s12 = sshll.u32 %s4160_s11, 4  ;;  %s4161_s1 = smov 64   ;;  %s61_s12 = int_to_ptr.vmem [resolvable:$true] %s60_s12 }
   0x9   :  { %s4162_s13 = smov 4   ;;  %s21_s3 = sshll.u32 %s7026_s0, 4  ;;  %s22_s3 = int_to_ptr.hbm [resolvable:$true] %s21_s3 }
   0xa   :  { %66 = dma.hbm_to_vmem [thread:$0]  %s59_s8, 1024, %s61_s12, [#allocation9], %s4161_s1, %s4161_s1, %s4162_s13  }
   0xb   :  { %s4163_s16 = smov [#allocation2]   ;;  %s48_s20 = sshll.u32 %s7028_s2, 4  ;;  %s49_s20 = int_to_ptr.hbm [resolvable:$true] %s48_s20 }
   0xc   :  { %s23_s17 = sshll.u32 %s4163_s16, 4  ;;  %s4164_s21 = smov 128   ;;  %s24_s17 = int_to_ptr.vmem [resolvable:$true] %s23_s17 }
   0xd   :  { %s4165_s22 = smov 8   ;;  %s4166_s23 = smov [#allocation7]  }
   0xe   :  { %29 = dma.hbm_to_vmem [thread:$0]  %s22_s3, 8192, %s24_s17, [#allocation3], %s4164_s21, %s4164_s21, %s4165_s22  }
   0xf   :  { %s50_s24 = sshll.u32 %s4166_s23, 4  ;;  %s71_s0 = sshll.u32 %s7030_s4, 4  ;;  %s51_s24 = int_to_ptr.vmem [resolvable:$true] %s50_s24  ;;  %s72_s0 = int_to_ptr.hbm [resolvable:$true] %s71_s0 }
  0x10   :  { %53 = dma.hbm_to_vmem [thread:$0]  %s49_s20, 48, %s51_s24, [#allocation6]  }
  0x11   :  { %s84_s2 = sshll.u32 %s7031_s5, 4  ;;  %s4167_s29 = smov [#allocation10]   ;;  %s85_s2 = int_to_ptr.hbm [resolvable:$true] %s84_s2 }
  0x12   :  { %s73_s30 = sshll.u32 %s4167_s29, 4  ;;  %s4168_s8 = smov [#allocation11]   ;;  %s74_s30 = int_to_ptr.vmem [resolvable:$true] %s73_s30 }
  0x13   :  { %79 = dma.hbm_to_vmem [thread:$0]  %s72_s0, 3072, %s74_s30, [#allocation9], %s4158_s9, %s4158_s9, %s4159_s10  }
  0x14   :  { %s86_s11 = sshll.u32 %s4168_s8, 4  ;;  %s87_s11 = int_to_ptr.vmem [resolvable:$true] %s86_s11 }
  0x15   :  { %92 = dma.hbm_to_vmem [thread:$0]  %s85_s2, 1024, %s87_s11, [#allocation12], %s4161_s1, %s4161_s1, %s4162_s13  }
  0x16   :  { %4147 = dma.done.wait [#allocation3], 8192  }
  0x17   :  { %4148 = vsyncadd [#allocation3], 4294959104 }
  0x18   :  { %4149 = dma.done.wait [#allocation6], 3120  }
  0x19   :  { %4150 = vsyncadd [#allocation6], 4294964176 }
  0x1a   :  { %4151 = dma.done.wait [#allocation9], 4096  }
  0x1b   :  { %4152 = vsyncadd [#allocation9], 4294963200 }
  0x1c   :  { %4153 = dma.done.wait [#allocation12], 1024  }
  0x1d   :  { %4154 = vsyncadd [#allocation12], 4294966272  ;;  %v3718_v0 = vld [vmem:[#allocation5 + $0xa8] sm:$0xf]  ;;  %v3910_v1 = vld [vmem:[#allocation5 + $0xb0] sm:$0xf0] }
  0x1e   :  { %v3909_v2 = vld [vmem:[#allocation5 + $0xac] sm:$0xf]  ;;  %v3719_v3 = vor.u32 %v3910_v1, %v3718_v0  ;;  %v3720_v4 = vld [vmem:[#allocation5 + $0xb4] sm:$0xf0]  ;;  %v3726_v5 = vld [vmem:[#allocation5 + $0xb0] sm:$0xf] }
  0x1f   :  { %v3911_v6 = vld [vmem:[#allocation5 + $0xb8] sm:$0xf0]  ;;  %v3723_v7 = vor.u32 %v3909_v2, %v3720_v4  ;;  %v3706_v9 = vld [vmem:[#allocation5 + $0x90] sm:$0xf]  ;;  %v3906_v11 = vld [vmem:[#allocation5 + $0x94] sm:$0xf] }
  0x20   :  { %v3727_v8 = vor.u32 %v3911_v6, %v3726_v5  ;;  %v3907_v10 = vld [vmem:[#allocation5 + $0x98] sm:$0xf0]  ;;  %388 = vmatpush.bf16.msra.mxu0 %v3719_v3  ;;  %v3708_v13 = vld [vmem:[#allocation5 + $0x9c] sm:$0xf0]  ;;  %v3714_v14 = vld [vmem:[#allocation5 + $0x98] sm:$0xf] }
  0x21   :  { %v3707_v12 = vor.u32 %v3907_v10, %v3706_v9  ;;  %v3908_v15 = vld [vmem:[#allocation5 + $0xa0] sm:$0xf0]  ;;  %557 = vmatpush.bf16.msra.mxu1 %v3723_v7  ;;  %v3711_v16 = vor.u32 %v3906_v11, %v3708_v13  ;;  %v3694_v18 = vld [vmem:[#allocation5 + $0x78] sm:$0xf]  ;;  %v3903_v20 = vld [vmem:[#allocation5 + $0x7c] sm:$0xf] }
  0x22   :  { %726 = vmatpush.bf16.msra.mxu2 %v3727_v8  ;;  %v3715_v17 = vor.u32 %v3908_v15, %v3714_v14  ;;  %v3904_v19 = vld [vmem:[#allocation5 + $0x80] sm:$0xf0]  ;;  %v3696_v21 = vld [vmem:[#allocation5 + $0x84] sm:$0xf0]  ;;  %v3702_v22 = vld [vmem:[#allocation5 + $0x80] sm:$0xf] }
  0x23   :  { %v3905_v23 = vld [vmem:[#allocation5 + $0x88] sm:$0xf0]  ;;  %v3695_v24 = vor.u32 %v3904_v19, %v3694_v18  ;;  %v3699_v25 = vor.u32 %v3903_v20, %v3696_v21  ;;  %v3682_v27 = vld [vmem:[#allocation5 + $0x60] sm:$0xf]  ;;  %v3900_v29 = vld [vmem:[#allocation5 + $0x64] sm:$0xf] }
  0x24   :  { %389 = vmatpush.bf16.msra.mxu0 %v3707_v12  ;;  %v3703_v26 = vor.u32 %v3905_v23, %v3702_v22  ;;  %v3901_v28 = vld [vmem:[#allocation5 + $0x68] sm:$0xf0]  ;;  %v3684_v30 = vld [vmem:[#allocation5 + $0x6c] sm:$0xf0]  ;;  %v3690_v31 = vld [vmem:[#allocation5 + $0x68] sm:$0xf] }
  0x25   :  { %558 = vmatpush.bf16.msra.mxu1 %v3711_v16  ;;  %v3902_v32 = vld [vmem:[#allocation5 + $0x70] sm:$0xf0]  ;;  %v3683_v33 = vor.u32 %v3901_v28, %v3682_v27  ;;  %v3687_v34 = vor.u32 %v3900_v29, %v3684_v30  ;;  %v3670_v36 = vld [vmem:[#allocation5 + $0x48] sm:$0xf]  ;;  %v3897_v38 = vld [vmem:[#allocation5 + $0x4c] sm:$0xf] }
  0x26   :  { %727 = vmatpush.bf16.msra.mxu2 %v3715_v17  ;;  %v3691_v35 = vor.u32 %v3902_v32, %v3690_v31  ;;  %v3898_v37 = vld [vmem:[#allocation5 + $0x50] sm:$0xf0]  ;;  %v3672_v39 = vld [vmem:[#allocation5 + $0x54] sm:$0xf0]  ;;  %v3678_v40 = vld [vmem:[#allocation5 + $0x50] sm:$0xf] }
  0x27   :  { %v3899_v41 = vld [vmem:[#allocation5 + $0x58] sm:$0xf0]  ;;  %v3671_v42 = vor.u32 %v3898_v37, %v3670_v36  ;;  %v3658_v43 = vld [vmem:[#allocation5 + $0x30] sm:$0xf]  ;;  %v3675_v44 = vor.u32 %v3897_v38, %v3672_v39  ;;  %v3894_v47 = vld [vmem:[#allocation5 + $0x34] sm:$0xf]  ;;  %v119_v36 = vlaneseq }
  0x28   :  { %390 = vmatpush.bf16.msra.mxu0 %v3695_v24  ;;  %v3679_v45 = vor.u32 %v3899_v41, %v3678_v40  ;;  %v3895_v46 = vld [vmem:[#allocation5 + $0x38] sm:$0xf0]  ;;  %v3660_v48 = vld [vmem:[#allocation5 + $0x3c] sm:$0xf0]  ;;  %v3666_v49 = vld [vmem:[#allocation5 + $0x38] sm:$0xf] }
  0x29   :  { %559 = vmatpush.bf16.msra.mxu1 %v3699_v25  ;;  %v3896_v50 = vld [vmem:[#allocation5 + $0x40] sm:$0xf0]  ;;  %v3659_v51 = vor.u32 %v3895_v46, %v3658_v43  ;;  %v3663_v52 = vor.u32 %v3894_v47, %v3660_v48  ;;  %v3646_v54 = vld [vmem:[#allocation5 + $0x18] sm:$0xf]  ;;  %v3891_v56 = vld [vmem:[#allocation5 + $0x1c] sm:$0xf] }
  0x2a   :  { %728 = vmatpush.bf16.msra.mxu2 %v3703_v26  ;;  %v3667_v53 = vor.u32 %v3896_v50, %v3666_v49  ;;  %v3892_v55 = vld [vmem:[#allocation5 + $0x20] sm:$0xf0]  ;;  %v3648_v57 = vld [vmem:[#allocation5 + $0x24] sm:$0xf0]  ;;  %v3654_v58 = vld [vmem:[#allocation5 + $0x20] sm:$0xf] }
  0x2b   :  { %v3893_v59 = vld [vmem:[#allocation5 + $0x28] sm:$0xf0]  ;;  %v3647_v60 = vor.u32 %v3892_v55, %v3646_v54  ;;  %v3651_v61 = vor.u32 %v3891_v56, %v3648_v57  ;;  %v3634_v63 = vld [vmem:[#allocation5] sm:$0xf]  ;;  %v3888_v1 = vld [vmem:[#allocation5 + $0x4] sm:$0xf] }
  0x2c   :  { %391 = vmatpush.bf16.msra.mxu0 %v3683_v33  ;;  %v3655_v62 = vor.u32 %v3893_v59, %v3654_v58  ;;  %v3889_v0 = vld [vmem:[#allocation5 + $0x8] sm:$0xf0]  ;;  %v3636_v2 = vld [vmem:[#allocation5 + $0xc] sm:$0xf0]  ;;  %v3642_v3 = vld [vmem:[#allocation5 + $0x8] sm:$0xf] }
  0x2d   :  { %560 = vmatpush.bf16.msra.mxu1 %v3687_v34  ;;  %v3890_v4 = vld [vmem:[#allocation5 + $0x10] sm:$0xf0]  ;;  %v3635_v5 = vor.u32 %v3889_v0, %v3634_v63  ;;  %v124_v6 = vld [vmem:[#allocation2] sm:$0xff]  ;;  %v125_v7 = vld [vmem:[#allocation2 + $0x8] sm:$0xff]  ;;  %v3639_v8 = vor.u32 %v3888_v1, %v3636_v2  ;;  %v4248_v43 = vand.u32 127, %v119_v36  ;;  %vm1087_vm0 = vcmask 1040384  }
  0x2e   :  { %729 = vmatpush.bf16.msra.mxu2 %v3691_v35  ;;  %v3643_v9 = vor.u32 %v3890_v4, %v3642_v3  ;;  %v188_v10 = vpack.c.bf16 %v125_v7, %v124_v6  ;;  %v126_v11 = vld [vmem:[#allocation2 + $0x10] sm:$0xff]  ;;  %v127_v12 = vld [vmem:[#allocation2 + $0x18] sm:$0xff]  ;;  %v128_v14 = vld [vmem:[#allocation2 + $0x20] sm:$0xff]  ;;  %vm1280_vm1 = vcmask 1046528   ;;  %vm2551_vm5 = vcmask 1041409   ;;  %s3616_s1 = sshll.u32 %s7033_s7, 4  ;;  %s3617_s1 = int_to_ptr.hbm [resolvable:$true] %s3616_s1 }
  0x2f   :  { %v189_v13 = vpack.c.bf16 %v127_v12, %v126_v11  ;;  %v129_v15 = vld [vmem:[#allocation2 + $0x28] sm:$0xff]  ;;  %v130_v17 = vld [vmem:[#allocation2 + $0x30] sm:$0xff]  ;;  %v131_v18 = vld [vmem:[#allocation2 + $0x38] sm:$0xff]  ;;  %vm123_vm2 = vcmp.lt.s32.totalorder %v4248_v43, 96  ;;  %vm122_vm3 = vcmp.lt.s32.totalorder %v4248_v43, 64  ;;  %vm121_vm4 = vcmp.lt.s32.totalorder %v4248_v43, 32 }
  0x30   :  { %392 = vmatpush.bf16.msra.mxu0 %v3671_v42  ;;  %v190_v16 = vpack.c.bf16 %v129_v15, %v128_v14  ;;  %v191_v19 = vpack.c.bf16 %v131_v18, %v130_v17  ;;  %v132_v20 = vld [vmem:[#allocation2 + $0x40] sm:$0xff]  ;;  %v133_v21 = vld [vmem:[#allocation2 + $0x48] sm:$0xff]  ;;  %v134_v23 = vld [vmem:[#allocation2 + $0x50] sm:$0xff]  ;;  %vm2553_vm6 = vcmask 1042434   ;;  %vm2555_vm7 = vcmask 1043459  }
  0x31   :  { %561 = vmatpush.bf16.msra.mxu1 %v3675_v44  ;;  %v192_v22 = vpack.c.bf16 %v133_v21, %v132_v20  ;;  %v135_v24 = vld [vmem:[#allocation2 + $0x58] sm:$0xff]  ;;  %v136_v26 = vld [vmem:[#allocation2 + $0x60] sm:$0xff]  ;;  %v137_v27 = vld [vmem:[#allocation2 + $0x68] sm:$0xff]  ;;  %vm2557_vm8 = vcmask 1044484   ;;  %vm2559_vm9 = vcmask 1045509   ;;  %vm2561_vm10 = vcmask 1046534  }
  0x32   :  { %730 = vmatpush.bf16.msra.mxu2 %v3679_v45  ;;  %v193_v25 = vpack.c.bf16 %v135_v24, %v134_v23  ;;  %v194_v28 = vpack.c.bf16 %v137_v27, %v136_v26  ;;  %v138_v29 = vld [vmem:[#allocation2 + $0x70] sm:$0xff]  ;;  %v139_v30 = vld [vmem:[#allocation2 + $0x78] sm:$0xff]  ;;  %v252_v32 = vld [vmem:[#allocation7] sm:$0x7]  ;;  %vm2563_vm11 = vcmask 1047559  }
  0x33   :  { %v195_v31 = vpack.c.bf16 %v139_v30, %v138_v29  ;;  %v140_v33 = vld [vmem:[#allocation2 + $0x80] sm:$0xff]  ;;  %v141_v34 = vld [vmem:[#allocation2 + $0x88] sm:$0xff]  ;;  %v4243_v35 = vperm.slane %v252_v32, 0  ;;  %v4245_v40 = vperm.slane %v252_v32, 1  ;;  %v142_v63 = vld [vmem:[#allocation2 + $0x90] sm:$0xff] }
  0x34   :  { %393 = vmatpush.bf16.msra.mxu0 %v3659_v51  ;;  %v196_v37 = vpack.c.bf16 %v141_v34, %v140_v33  ;;  %v3919_v38 = vld [vmem:[#allocation8 + $0x38] sm:$0xff] }
  0x35   :  { %562 = vmatpush.bf16.msra.mxu1 %v3663_v52  ;;  %v143_v0 = vld [vmem:[#allocation2 + $0x98] sm:$0xff] }
  0x36   :  { %731 = vmatpush.bf16.msra.mxu2 %v3667_v53  ;;  %v197_v7 = vpack.c.bf16 %v143_v0, %v142_v63 }
  0x38   :  { %394 = vmatpush.bf16.msra.mxu0 %v3647_v60 }
  0x39   :  { %563 = vmatpush.bf16.msra.mxu1 %v3651_v61 }
  0x3a   :  { %732 = vmatpush.bf16.msra.mxu2 %v3655_v62 }
  0x3c   :  { %395 = vmatpush.bf16.msra.mxu0 %v3635_v5 }
  0x3d   :  { %564 = vmatpush.bf16.msra.mxu1 %v3639_v8 }
  0x3e   :  { %733 = vmatpush.bf16.msra.mxu2 %v3643_v9 }
  0x3f   :  { %396 = vmatmul.bf16.vlgmr.msra.gmra.mxu0 %v188_v10 }
  0x40   :  { %565 = vmatmul.bf16.vlgmr.msra.gmra.mxu1 %v188_v10  ;;  %2615 = vmatpush.bf16.msrb.mxu0 %v3919_v38 }
  0x41   :  { %734 = vmatmul.bf16.vlgmr.msra.gmra.mxu2 %v188_v10 }
  0x4f   :  { %401 = vmatmul.bf16.gmra.mxu0 %v189_v13 }
  0x50   :  { %570 = vmatmul.bf16.gmra.mxu1 %v189_v13 }
  0x51   :  { %739 = vmatmul.bf16.gmra.mxu2 %v189_v13 }
  0x5f   :  { %406 = vmatmul.bf16.gmra.mxu0 %v190_v16 }
  0x60   :  { %575 = vmatmul.bf16.gmra.mxu1 %v190_v16 }
  0x61   :  { %744 = vmatmul.bf16.gmra.mxu2 %v190_v16 }
  0x6f   :  { %411 = vmatmul.bf16.gmra.mxu0 %v191_v19 }
  0x70   :  { %580 = vmatmul.bf16.gmra.mxu1 %v191_v19 }
  0x71   :  { %749 = vmatmul.bf16.gmra.mxu2 %v191_v19 }
  0x7f   :  { %416 = vmatmul.bf16.gmra.mxu0 %v192_v22 }
  0x80   :  { %585 = vmatmul.bf16.gmra.mxu1 %v192_v22 }
  0x81   :  { %754 = vmatmul.bf16.gmra.mxu2 %v192_v22 }
  0x8f   :  { %421 = vmatmul.bf16.gmra.mxu0 %v193_v25 }
  0x90   :  { %590 = vmatmul.bf16.gmra.mxu1 %v193_v25 }
  0x91   :  { %759 = vmatmul.bf16.gmra.mxu2 %v193_v25 }
  0x9f   :  { %426 = vmatmul.bf16.gmra.mxu0 %v194_v28 }
  0xa0   :  { %595 = vmatmul.bf16.gmra.mxu1 %v194_v28 }
  0xa1   :  { %764 = vmatmul.bf16.gmra.mxu2 %v194_v28 }
  0xaf   :  { %431 = vmatmul.bf16.gmra.mxu0 %v195_v31 }
  0xb0   :  { %600 = vmatmul.bf16.gmra.mxu1 %v195_v31 }
  0xb1   :  { %769 = vmatmul.bf16.gmra.mxu2 %v195_v31 }
  0xbc   :  { %v397_v39 = vpop.f32.mrf.mxu0 }
  0xbd   :  { %v398_v41 = vadd.f32 %v397_v39, %v4243_v35  ;;  %v566_v42 = vpop.f32.mrf.mxu1 }
  0xbe   :  { %v567_v46 = vadd.f32 %v566_v42, %v4245_v40  ;;  %v144_v42 = vld [vmem:[#allocation2 + $0xa0] sm:$0xff] }
  0xbf   :  { %v959_v44 = vrot.slane %v398_v41, 7  ;;  %v1152_v45 = vrot.slane %v398_v41, 1  ;;  %436 = vmatmul.bf16.gmra.mxu0 %v196_v37 }
  0xc0   :  { %605 = vmatmul.bf16.gmra.mxu1 %v196_v37  ;;  %v1799_v50 = vrot.slane %v567_v46, 1  ;;  %v1607_v52 = vrot.slane %v567_v46, 7 }
  0xc1   :  { %774 = vmatmul.bf16.gmra.mxu2 %v196_v37  ;;  %v1088_v47 = vsel %vm1087_vm0, %v398_v41, %v959_v44  ;;  %v1281_v48 = vsel %vm1280_vm1, %v1152_v45, %v398_v41  ;;  %v145_v44 = vld [vmem:[#allocation2 + $0xa8] sm:$0xff] }
  0xc2   :  { %v1347_v55 = vsel %vm123_vm2, %v1088_v47, %v1281_v48  ;;  %v1927_v60 = vsel %vm1280_vm1, %v1799_v50, %v567_v46  ;;  %v1735_v1 = vsel %vm1087_vm0, %v567_v46, %v1607_v52  ;;  %v198_v52 = vpack.c.bf16 %v145_v44, %v144_v42 }
  0xc4   :  { %v4254_v49 = vpop.f32.mrf.mxu2  ;;  %v399_v51 = vpop.f32.mrf.mxu0 }
  0xc5   :  { %v400_v53 = vadd.f32 %v399_v51, %v4243_v35  ;;  %v568_v54 = vpop.f32.mrf.mxu1 }
  0xc6   :  { %v569_v56 = vadd.f32 %v568_v54, %v4245_v40 }
  0xc7   :  { %v960_v57 = vrot.slane %v400_v53, 7  ;;  %v1153_v58 = vrot.slane %v400_v53, 1  ;;  %v1413_v59 = vsel %vm122_vm3, %v400_v53, %v1347_v55 }
  0xc8   :  { %v4267_v61 = vsel %vm121_vm4, %v398_v41, %v1413_v59  ;;  %v1991_v62 = vsel %vm123_vm2, %v567_v46, %v569_v56  ;;  %v1800_v8 = vrot.slane %v569_v56, 1  ;;  %v1608_v10 = vrot.slane %v569_v56, 7 }
  0xc9   :  { %7209 = vst [vmem:[#allocation19_spill] sm:$0xff] %v4267_v61  ;;  %v2055_v2 = vsel %vm122_vm3, %v1927_v60, %v1991_v62  ;;  %v1089_v4 = vsel %vm1087_vm0, %v400_v53, %v960_v57  ;;  %v1282_v5 = vsel %vm1280_vm1, %v1153_v58, %v400_v53 }
  0xca   :  { %v4276_v3 = vsel %vm121_vm4, %v1735_v1, %v2055_v2  ;;  %v1348_v13 = vsel %vm123_vm2, %v1089_v4, %v1282_v5  ;;  %v1928_v18 = vsel %vm1280_vm1, %v1800_v8, %v569_v56  ;;  %v1736_v21 = vsel %vm1087_vm0, %v569_v56, %v1608_v10 }
  0xcb   :  { %7210 = vst [vmem:[#allocation20_spill] sm:$0xff] %v4276_v3 }
  0xcc   :  { %v4280_v6 = vpop.f32.mrf.mxu2  ;;  %v402_v9 = vpop.f32.mrf.mxu0 }
  0xcd   :  { %v403_v11 = vadd.f32 %v402_v9, %v4243_v35  ;;  %v571_v12 = vpop.f32.mrf.mxu1 }
  0xce   :  { %v572_v14 = vadd.f32 %v571_v12, %v4245_v40 }
  0xcf   :  { %v961_v15 = vrot.slane %v403_v11, 7  ;;  %v1154_v16 = vrot.slane %v403_v11, 1  ;;  %v1414_v17 = vsel %vm122_vm3, %v403_v11, %v1348_v13  ;;  %441 = vmatmul.bf16.gmra.mxu0 %v197_v7 }
  0xd0   :  { %v4291_v19 = vsel %vm121_vm4, %v398_v41, %v1414_v17  ;;  %v1992_v20 = vsel %vm123_vm2, %v567_v46, %v572_v14  ;;  %610 = vmatmul.bf16.gmra.mxu1 %v197_v7  ;;  %v1801_v27 = vrot.slane %v572_v14, 1  ;;  %v1609_v29 = vrot.slane %v572_v14, 7 }
  0xd1   :  { %7211 = vst [vmem:[#allocation21_spill] sm:$0xff] %v4291_v19  ;;  %779 = vmatmul.bf16.gmra.mxu2 %v197_v7  ;;  %v2056_v22 = vsel %vm122_vm3, %v1928_v18, %v1992_v20  ;;  %v1090_v24 = vsel %vm1087_vm0, %v403_v11, %v961_v15  ;;  %v1283_v25 = vsel %vm1280_vm1, %v1154_v16, %v403_v11 }
  0xd2   :  { %v4300_v23 = vsel %vm121_vm4, %v1736_v21, %v2056_v22  ;;  %v1349_v32 = vsel %vm123_vm2, %v1090_v24, %v1283_v25  ;;  %v1929_v38 = vsel %vm1280_vm1, %v1801_v27, %v572_v14  ;;  %v1737_v45 = vsel %vm1087_vm0, %v572_v14, %v1609_v29  ;;  %v146_v27 = vld [vmem:[#allocation2 + $0xb0] sm:$0xff] }
  0xd3   :  { %7212 = vst [vmem:[#allocation22_spill] sm:$0xff] %v4300_v23 }
  0xd4   :  { %v4304_v26 = vpop.f32.mrf.mxu2  ;;  %v404_v28 = vpop.f32.mrf.mxu0 }
  0xd5   :  { %v405_v30 = vadd.f32 %v404_v28, %v4243_v35  ;;  %v573_v31 = vpop.f32.mrf.mxu1  ;;  %v147_v28 = vld [vmem:[#allocation2 + $0xb8] sm:$0xff] }
  0xd6   :  { %v574_v33 = vadd.f32 %v573_v31, %v4245_v40 }
  0xd7   :  { %v962_v34 = vrot.slane %v405_v30, 7  ;;  %v1155_v36 = vrot.slane %v405_v30, 1  ;;  %v1415_v37 = vsel %vm122_vm3, %v405_v30, %v1349_v32 }
  0xd8   :  { %v4315_v39 = vsel %vm121_vm4, %v400_v53, %v1415_v37  ;;  %v1993_v41 = vsel %vm123_vm2, %v569_v56, %v574_v33  ;;  %v1802_v53 = vrot.slane %v574_v33, 1  ;;  %v1610_v55 = vrot.slane %v574_v33, 7 }
  0xd9   :  { %7213 = vst [vmem:[#allocation23_spill] sm:$0xff] %v4315_v39  ;;  %v2057_v46 = vsel %vm122_vm3, %v1929_v38, %v1993_v41  ;;  %v1091_v48 = vsel %vm1087_vm0, %v405_v30, %v962_v34  ;;  %v1284_v50 = vsel %vm1280_vm1, %v1155_v36, %v405_v30  ;;  %v199_v37 = vpack.c.bf16 %v147_v28, %v146_v27 }
  0xda   :  { %v4324_v47 = vsel %vm121_vm4, %v1737_v45, %v2057_v46  ;;  %v1350_v58 = vsel %vm123_vm2, %v1091_v48, %v1284_v50  ;;  %v1930_v0 = vsel %vm1280_vm1, %v1802_v53, %v574_v33  ;;  %v1738_v4 = vsel %vm1087_vm0, %v574_v33, %v1610_v55 }
  0xdb   :  { %7214 = vst [vmem:[#allocation24_spill] sm:$0xff] %v4324_v47 }
  0xdc   :  { %v4328_v51 = vpop.f32.mrf.mxu2  ;;  %v407_v54 = vpop.f32.mrf.mxu0 }
  0xdd   :  { %v408_v56 = vadd.f32 %v407_v54, %v4243_v35  ;;  %v576_v57 = vpop.f32.mrf.mxu1 }
  0xde   :  { %v577_v59 = vadd.f32 %v576_v57, %v4245_v40 }
  0xdf   :  { %v963_v60 = vrot.slane %v408_v56, 7  ;;  %v1156_v62 = vrot.slane %v408_v56, 1  ;;  %v1416_v63 = vsel %vm122_vm3, %v408_v56, %v1350_v58  ;;  %446 = vmatmul.bf16.gmra.mxu0 %v198_v52 }
  0xe0   :  { %v4339_v1 = vsel %vm121_vm4, %v403_v11, %v1416_v63  ;;  %v1994_v2 = vsel %vm123_vm2, %v572_v14, %v577_v59  ;;  %615 = vmatmul.bf16.gmra.mxu1 %v198_v52  ;;  %v1803_v11 = vrot.slane %v577_v59, 1  ;;  %v1611_v13 = vrot.slane %v577_v59, 7 }
  0xe1   :  { %7215 = vst [vmem:[#allocation25_spill] sm:$0xff] %v4339_v1  ;;  %784 = vmatmul.bf16.gmra.mxu2 %v198_v52  ;;  %v2058_v5 = vsel %vm122_vm3, %v1930_v0, %v1994_v2  ;;  %v1092_v8 = vsel %vm1087_vm0, %v408_v56, %v963_v60  ;;  %v1285_v9 = vsel %vm1280_vm1, %v1156_v62, %v408_v56 }
  0xe2   :  { %v4348_v7 = vsel %vm121_vm4, %v1738_v4, %v2058_v5  ;;  %v1351_v16 = vsel %vm123_vm2, %v1092_v8, %v1285_v9  ;;  %v1931_v22 = vsel %vm1280_vm1, %v1803_v11, %v577_v59  ;;  %v1739_v29 = vsel %vm1087_vm0, %v577_v59, %v1611_v13 }
  0xe3   :  { %7216 = vst [vmem:[#allocation26_spill] sm:$0xff] %v4348_v7 }
  0xe4   :  { %v4352_v10 = vpop.f32.mrf.mxu2  ;;  %v409_v12 = vpop.f32.mrf.mxu0 }
  0xe5   :  { %v410_v14 = vadd.f32 %v409_v12, %v4243_v35  ;;  %v578_v15 = vpop.f32.mrf.mxu1 }
  0xe6   :  { %v579_v17 = vadd.f32 %v578_v15, %v4245_v40 }
  0xe7   :  { %v964_v18 = vrot.slane %v410_v14, 7  ;;  %v1157_v20 = vrot.slane %v410_v14, 1  ;;  %v1417_v21 = vsel %vm122_vm3, %v410_v14, %v1351_v16 }
  0xe8   :  { %v4363_v24 = vsel %vm121_vm4, %v405_v30, %v1417_v21  ;;  %v1995_v25 = vsel %vm123_vm2, %v574_v33, %v579_v17  ;;  %v1804_v38 = vrot.slane %v579_v17, 1  ;;  %v1612_v41 = vrot.slane %v579_v17, 7 }
  0xe9   :  { %7217 = vst [vmem:[#allocation27_spill] sm:$0xff] %v4363_v24  ;;  %v2059_v31 = vsel %vm122_vm3, %v1931_v22, %v1995_v25  ;;  %v1093_v34 = vsel %vm1087_vm0, %v410_v14, %v964_v18  ;;  %v1286_v36 = vsel %vm1280_vm1, %v1157_v20, %v410_v14  ;;  %v148_v22 = vld [vmem:[#allocation2 + $0xc0] sm:$0xff]  ;;  %v149_v25 = vld [vmem:[#allocation2 + $0xc8] sm:$0xff] }
  0xea   :  { %v4372_v32 = vsel %vm121_vm4, %v1739_v29, %v2059_v31  ;;  %v1352_v45 = vsel %vm123_vm2, %v1093_v34, %v1286_v36  ;;  %v1932_v53 = vsel %vm1280_vm1, %v1804_v38, %v579_v17  ;;  %v1740_v57 = vsel %vm1087_vm0, %v579_v17, %v1612_v41 }
  0xeb   :  { %7218 = vst [vmem:[#allocation28_spill] sm:$0xff] %v4372_v32 }
  0xec   :  { %v4376_v30 = vpop.f32.mrf.mxu2  ;;  %v412_v33 = vpop.f32.mrf.mxu0 }
  0xed   :  { %v413_v42 = vadd.f32 %v412_v33, %v4243_v35  ;;  %v581_v44 = vpop.f32.mrf.mxu1 }
  0xee   :  { %v582_v46 = vadd.f32 %v581_v44, %v4245_v40  ;;  %v200_v44 = vpack.c.bf16 %v149_v25, %v148_v22 }
  0xef   :  { %v965_v48 = vrot.slane %v413_v42, 7  ;;  %v1158_v50 = vrot.slane %v413_v42, 1  ;;  %v1418_v52 = vsel %vm122_vm3, %v413_v42, %v1352_v45  ;;  %451 = vmatmul.bf16.gmra.mxu0 %v199_v37  ;;  %v3918_v45 = vld [vmem:[#allocation8 + $0x30] sm:$0xff] }
  0xf0   :  { %v4387_v54 = vsel %vm121_vm4, %v408_v56, %v1418_v52  ;;  %v1996_v55 = vsel %vm123_vm2, %v577_v59, %v582_v46  ;;  %620 = vmatmul.bf16.gmra.mxu1 %v199_v37  ;;  %v1613_v56 = vrot.slane %v582_v46, 7  ;;  %v1805_v59 = vrot.slane %v582_v46, 1  ;;  %2616 = vmatpush.bf16.msrb.mxu0 %v3918_v45 }
  0xf1   :  { %7219 = vst [vmem:[#allocation29_spill] sm:$0xff] %v4387_v54  ;;  %789 = vmatmul.bf16.gmra.mxu2 %v199_v37  ;;  %v2060_v58 = vsel %vm122_vm3, %v1932_v53, %v1996_v55  ;;  %v1094_v62 = vsel %vm1087_vm0, %v413_v42, %v965_v48  ;;  %v1287_v63 = vsel %vm1280_vm1, %v1158_v50, %v413_v42 }
  0xf2   :  { %v4396_v60 = vsel %vm121_vm4, %v1740_v57, %v2060_v58  ;;  %v1353_v8 = vsel %vm123_vm2, %v1094_v62, %v1287_v63  ;;  %v1741_v11 = vsel %vm1087_vm0, %v582_v46, %v1613_v56  ;;  %v1933_v27 = vsel %vm1280_vm1, %v1805_v59, %v582_v46 }
  0xf3   :  { %7220 = vst [vmem:[#allocation30_spill] sm:$0xff] %v4396_v60 }
  0xf4   :  { %v4400_v0 = vpop.f32.mrf.mxu2  ;;  %v414_v2 = vpop.f32.mrf.mxu0 }
  0xf5   :  { %v415_v4 = vadd.f32 %v414_v2, %v4243_v35  ;;  %v583_v5 = vpop.f32.mrf.mxu1 }
  0xf6   :  { %v584_v9 = vadd.f32 %v583_v5, %v4245_v40 }
  0xf7   :  { %v966_v12 = vrot.slane %v415_v4, 7  ;;  %v1159_v13 = vrot.slane %v415_v4, 1  ;;  %v1419_v15 = vsel %vm122_vm3, %v415_v4, %v1353_v8 }
  0xf8   :  { %v4411_v16 = vsel %vm121_vm4, %v410_v14, %v1419_v15  ;;  %v1614_v18 = vrot.slane %v584_v9, 7  ;;  %v1806_v20 = vrot.slane %v584_v9, 1  ;;  %v1997_v21 = vsel %vm123_vm2, %v579_v17, %v584_v9  ;;  %v150_v15 = vld [vmem:[#allocation2 + $0xd0] sm:$0xff] }
  0xf9   :  { %7221 = vst [vmem:[#allocation31_spill] sm:$0xff] %v4411_v16  ;;  %v1095_v28 = vsel %vm1087_vm0, %v415_v4, %v966_v12  ;;  %v1288_v29 = vsel %vm1280_vm1, %v1159_v13, %v415_v4  ;;  %v1998_v31 = vsel %vm123_vm2, %v582_v46, %v584_v9  ;;  %v2061_v17 = vsel %vm122_vm3, %v1933_v27, %v1997_v21 }
  0xfa   :  { %v1354_v14 = vsel %vm123_vm2, %v1095_v28, %v1288_v29  ;;  %v1742_v34 = vsel %vm1087_vm0, %v584_v9, %v1614_v18  ;;  %v1934_v36 = vsel %vm1280_vm1, %v1806_v20, %v584_v9  ;;  %v4432_v33 = vsel %vm121_vm4, %v1741_v11, %v2061_v17  ;;  %v151_v18 = vld [vmem:[#allocation2 + $0xd8] sm:$0xff] }
  0xfb   :  { %v1420_v37 = vsel %vm122_vm3, %v415_v4, %v1354_v14  ;;  %v2062_v38 = vsel %vm122_vm3, %v1934_v36, %v1998_v31  ;;  %7222 = vst [vmem:[#allocation32_spill] sm:$0xff] %v4432_v33  ;;  %v201_v25 = vpack.c.bf16 %v151_v18, %v150_v15 }
  0xfc   :  { %v4434_v41 = vpop.f32.mrf.mxu2  ;;  %v4438_v46 = vsel %vm121_vm4, %v413_v42, %v1420_v37  ;;  %v4442_v48 = vsel %vm121_vm4, %v1742_v34, %v2062_v38  ;;  %v417_v50 = vpop.f32.mrf.mxu0 }
  0xfd   :  { %7223 = vst [vmem:[#allocation33_spill] sm:$0xff] %v4438_v46  ;;  %v418_v52 = vadd.f32 %v417_v50, %v4243_v35  ;;  %v586_v53 = vpop.f32.mrf.mxu1 }
  0xfe   :  { %7224 = vst [vmem:[#allocation34_spill] sm:$0xff] %v4442_v48  ;;  %v587_v58 = vadd.f32 %v586_v53, %v4245_v40 }
  0xff   :  { %v967_v55 = vrot.slane %v418_v52, 7  ;;  %v1160_v57 = vrot.slane %v418_v52, 1  ;;  %456 = vmatmul.bf16.gmra.mxu0 %v200_v44 }
 0x100   :  { %625 = vmatmul.bf16.gmra.mxu1 %v200_v44  ;;  %v1807_v5 = vrot.slane %v587_v58, 1  ;;  %v1615_v9 = vrot.slane %v587_v58, 7 }
 0x101   :  { %794 = vmatmul.bf16.gmra.mxu2 %v200_v44  ;;  %v1096_v62 = vsel %vm1087_vm0, %v418_v52, %v967_v55  ;;  %v1289_v42 = vsel %vm1280_vm1, %v1160_v57, %v418_v52 }
 0x102   :  { %v1355_v4 = vsel %vm123_vm2, %v1096_v62, %v1289_v42  ;;  %v1935_v21 = vsel %vm1280_vm1, %v1807_v5, %v587_v58  ;;  %v1743_v27 = vsel %vm1087_vm0, %v587_v58, %v1615_v9 }
 0x104   :  { %v4448_v63 = vpop.f32.mrf.mxu2  ;;  %v419_v56 = vpop.f32.mrf.mxu0 }
 0x105   :  { %v420_v2 = vadd.f32 %v419_v56, %v4243_v35  ;;  %v588_v59 = vpop.f32.mrf.mxu1 }
 0x106   :  { %v589_v8 = vadd.f32 %v588_v59, %v4245_v40 }
 0x107   :  { %v968_v11 = vrot.slane %v420_v2, 7  ;;  %v1161_v12 = vrot.slane %v420_v2, 1  ;;  %v1421_v13 = vsel %vm122_vm3, %v420_v2, %v1355_v4 }
 0x108   :  { %v4458_v20 = vsel %vm121_vm4, %v418_v52, %v1421_v13  ;;  %v1999_v22 = vsel %vm123_vm2, %v587_v58, %v589_v8  ;;  %v1808_v38 = vrot.slane %v589_v8, 1  ;;  %v1616_v50 = vrot.slane %v589_v8, 7 }
 0x109   :  { %7225 = vst [vmem:[#allocation35_spill] sm:$0xff] %v4458_v20  ;;  %v1097_v28 = vsel %vm1087_vm0, %v420_v2, %v968_v11  ;;  %v1290_v29 = vsel %vm1280_vm1, %v1161_v12, %v420_v2  ;;  %v2063_v31 = vsel %vm122_vm3, %v1935_v21, %v1999_v22 }
 0x10a   :  { %v4472_v34 = vsel %vm121_vm4, %v1743_v27, %v2063_v31  ;;  %v1356_v44 = vsel %vm123_vm2, %v1097_v28, %v1290_v29  ;;  %v1936_v56 = vsel %vm1280_vm1, %v1808_v38, %v589_v8  ;;  %v1744_v59 = vsel %vm1087_vm0, %v589_v8, %v1616_v50  ;;  %v153_v38 = vld [vmem:[#allocation2 + $0xe8] sm:$0xff] }
 0x10b   :  { %7226 = vst [vmem:[#allocation36_spill] sm:$0xff] %v4472_v34 }
 0x10c   :  { %v4468_v14 = vpop.f32.mrf.mxu2  ;;  %v422_v36 = vpop.f32.mrf.mxu0 }
 0x10d   :  { %v423_v17 = vadd.f32 %v422_v36, %v4243_v35  ;;  %v591_v37 = vpop.f32.mrf.mxu1 }
 0x10e   :  { %v592_v45 = vadd.f32 %v591_v37, %v4245_v40  ;;  %v152_v37 = vld [vmem:[#allocation2 + $0xe0] sm:$0xff] }
 0x10f   :  { %v969_v53 = vrot.slane %v423_v17, 7  ;;  %v1162_v55 = vrot.slane %v423_v17, 1  ;;  %v1422_v57 = vsel %vm122_vm3, %v423_v17, %v1356_v44  ;;  %461 = vmatmul.bf16.gmra.mxu0 %v201_v25 }
 0x110   :  { %v4482_v62 = vsel %vm121_vm4, %v418_v52, %v1422_v57  ;;  %630 = vmatmul.bf16.gmra.mxu1 %v201_v25  ;;  %v2000_v42 = vsel %vm123_vm2, %v587_v58, %v592_v45  ;;  %v1809_v52 = vrot.slane %v592_v45, 1  ;;  %v1617_v58 = vrot.slane %v592_v45, 7 }
 0x111   :  { %7227 = vst [vmem:[#allocation37_spill] sm:$0xff] %v4482_v62  ;;  %799 = vmatmul.bf16.gmra.mxu2 %v201_v25  ;;  %v1098_v4 = vsel %vm1087_vm0, %v423_v17, %v969_v53  ;;  %v1291_v5 = vsel %vm1280_vm1, %v1162_v55, %v423_v17  ;;  %v2064_v9 = vsel %vm122_vm3, %v1936_v56, %v2000_v42 }
 0x112   :  { %v4496_v12 = vsel %vm121_vm4, %v1744_v59, %v2064_v9  ;;  %v1357_v21 = vsel %vm123_vm2, %v1098_v4, %v1291_v5  ;;  %v1937_v29 = vsel %vm1280_vm1, %v1809_v52, %v592_v45  ;;  %v1745_v44 = vsel %vm1087_vm0, %v592_v45, %v1617_v58 }
 0x113   :  { %7228 = vst [vmem:[#allocation38_spill] sm:$0xff] %v4496_v12  ;;  %v202_v42 = vpack.c.bf16 %v153_v38, %v152_v37 }
 0x114   :  { %v4492_v11 = vpop.f32.mrf.mxu2  ;;  %v424_v13 = vpop.f32.mrf.mxu0 }
 0x115   :  { %v425_v15 = vadd.f32 %v424_v13, %v4243_v35  ;;  %v593_v18 = vpop.f32.mrf.mxu1 }
 0x116   :  { %v594_v22 = vadd.f32 %v593_v18, %v4245_v40 }
 0x117   :  { %v970_v25 = vrot.slane %v425_v15, 7  ;;  %v1163_v27 = vrot.slane %v425_v15, 1  ;;  %v1423_v28 = vsel %vm122_vm3, %v425_v15, %v1357_v21 }
 0x118   :  { %v4507_v31 = vsel %vm121_vm4, %v420_v2, %v1423_v28  ;;  %v2001_v36 = vsel %vm123_vm2, %v589_v8, %v594_v22  ;;  %v1810_v56 = vrot.slane %v594_v22, 1  ;;  %v1618_v59 = vrot.slane %v594_v22, 7 }
 0x119   :  { %7229 = vst [vmem:[#allocation39_spill] sm:$0xff] %v4507_v31  ;;  %v2065_v50 = vsel %vm122_vm3, %v1937_v29, %v2001_v36  ;;  %v1099_v55 = vsel %vm1087_vm0, %v425_v15, %v970_v25  ;;  %v1292_v57 = vsel %vm1280_vm1, %v1163_v27, %v425_v15 }
 0x11a   :  { %v4516_v53 = vsel %vm121_vm4, %v1745_v44, %v2065_v50  ;;  %v1358_v9 = vsel %vm123_vm2, %v1099_v55, %v1292_v57  ;;  %v1938_v21 = vsel %vm1280_vm1, %v1810_v56, %v594_v22  ;;  %v1746_v28 = vsel %vm1087_vm0, %v594_v22, %v1618_v59 }
 0x11b   :  { %7230 = vst [vmem:[#allocation40_spill] sm:$0xff] %v4516_v53 }
 0x11c   :  { %v4520_v2 = vpop.f32.mrf.mxu2  ;;  %v427_v8 = vpop.f32.mrf.mxu0 }
 0x11d   :  { %v428_v4 = vadd.f32 %v427_v8, %v4243_v35  ;;  %v596_v5 = vpop.f32.mrf.mxu1 }
 0x11e   :  { %v597_v52 = vadd.f32 %v596_v5, %v4245_v40 }
 0x11f   :  { %v971_v13 = vrot.slane %v428_v4, 7  ;;  %v1164_v58 = vrot.slane %v428_v4, 1  ;;  %v1424_v18 = vsel %vm122_vm3, %v428_v4, %v1358_v9  ;;  %466 = vmatmul.bf16.gmra.mxu0 %v202_v42 }
 0x120   :  { %v4531_v25 = vsel %vm121_vm4, %v423_v17, %v1424_v18  ;;  %v2002_v27 = vsel %vm123_vm2, %v592_v45, %v597_v52  ;;  %635 = vmatmul.bf16.gmra.mxu1 %v202_v42  ;;  %v1811_v44 = vrot.slane %v597_v52, 1  ;;  %v1619_v45 = vrot.slane %v597_v52, 7  ;;  %v154_v18 = vld [vmem:[#allocation2 + $0xf0] sm:$0xff] }
 0x121   :  { %7231 = vst [vmem:[#allocation41_spill] sm:$0xff] %v4531_v25  ;;  %804 = vmatmul.bf16.gmra.mxu2 %v202_v42  ;;  %v2066_v29 = vsel %vm122_vm3, %v1938_v21, %v2002_v27  ;;  %v1100_v37 = vsel %vm1087_vm0, %v428_v4, %v971_v13  ;;  %v1293_v38 = vsel %vm1280_vm1, %v1164_v58, %v428_v4  ;;  %v155_v21 = vld [vmem:[#allocation2 + $0xf8] sm:$0xff] }
 0x122   :  { %v4540_v36 = vsel %vm121_vm4, %v1746_v28, %v2066_v29  ;;  %v1359_v42 = vsel %vm123_vm2, %v1100_v37, %v1293_v38  ;;  %v1939_v9 = vsel %vm1280_vm1, %v1811_v44, %v597_v52  ;;  %v1747_v27 = vsel %vm1087_vm0, %v597_v52, %v1619_v45 }
 0x123   :  { %7232 = vst [vmem:[#allocation42_spill] sm:$0xff] %v4540_v36  ;;  %v203_v44 = vpack.c.bf16 %v155_v21, %v154_v18 }
 0x124   :  { %v4544_v17 = vpop.f32.mrf.mxu2  ;;  %v429_v50 = vpop.f32.mrf.mxu0 }
 0x125   :  { %7233 = vst [vmem:[#allocation43_spill] sm:$0xff] %v4544_v17  ;;  %v430_v55 = vadd.f32 %v429_v50, %v4243_v35  ;;  %v598_v57 = vpop.f32.mrf.mxu1 }
 0x126   :  { %v599_v56 = vadd.f32 %v598_v57, %v4245_v40 }
 0x127   :  { %v972_v8 = vrot.slane %v430_v55, 7  ;;  %v1165_v59 = vrot.slane %v430_v55, 1  ;;  %v1425_v5 = vsel %vm122_vm3, %v430_v55, %v1359_v42 }
 0x128   :  { %v4555_v13 = vsel %vm121_vm4, %v425_v15, %v1425_v5  ;;  %v2003_v58 = vsel %vm123_vm2, %v594_v22, %v599_v56  ;;  %v1812_v50 = vrot.slane %v599_v56, 1  ;;  %v1620_v57 = vrot.slane %v599_v56, 7 }
 0x129   :  { %7234 = vst [vmem:[#allocation44_spill] sm:$0xff] %v4555_v13  ;;  %v2067_v28 = vsel %vm122_vm3, %v1939_v9, %v2003_v58  ;;  %v1101_v37 = vsel %vm1087_vm0, %v430_v55, %v972_v8  ;;  %v1294_v38 = vsel %vm1280_vm1, %v1165_v59, %v430_v55 }
 0x12a   :  { %v4564_v29 = vsel %vm121_vm4, %v1747_v27, %v2067_v28  ;;  %v1360_v5 = vsel %vm123_vm2, %v1101_v37, %v1294_v38  ;;  %v1940_v59 = vsel %vm1280_vm1, %v1812_v50, %v599_v56  ;;  %v1748_v28 = vsel %vm1087_vm0, %v599_v56, %v1620_v57 }
 0x12b   :  { %7235 = vst [vmem:[#allocation45_spill] sm:$0xff] %v4564_v29 }
 0x12c   :  { %v4568_v15 = vpop.f32.mrf.mxu2  ;;  %v432_v22 = vpop.f32.mrf.mxu0 }
 0x12d   :  { %7236 = vst [vmem:[#allocation46_spill] sm:$0xff] %v4568_v15  ;;  %v433_v42 = vadd.f32 %v432_v22, %v4243_v35  ;;  %v601_v45 = vpop.f32.mrf.mxu1 }
 0x12e   :  { %v602_v9 = vadd.f32 %v601_v45, %v4245_v40 }
 0x12f   :  { %v973_v58 = vrot.slane %v433_v42, 7  ;;  %v1166_v27 = vrot.slane %v433_v42, 1  ;;  %v1426_v8 = vsel %vm122_vm3, %v433_v42, %v1360_v5  ;;  %471 = vmatmul.bf16.gmra.mxu0 %v203_v44 }
 0x130   :  { %v4579_v18 = vsel %vm121_vm4, %v428_v4, %v1426_v8  ;;  %v2004_v21 = vsel %vm123_vm2, %v597_v52, %v602_v9  ;;  %640 = vmatmul.bf16.gmra.mxu1 %v203_v44  ;;  %v1621_v4 = vrot.slane %v602_v9, 7  ;;  %v1813_v52 = vrot.slane %v602_v9, 1 }
 0x131   :  { %7237 = vst [vmem:[#allocation47_spill] sm:$0xff] %v4579_v18  ;;  %809 = vmatmul.bf16.gmra.mxu2 %v203_v44  ;;  %v2068_v37 = vsel %vm122_vm3, %v1940_v59, %v2004_v21  ;;  %v1102_v50 = vsel %vm1087_vm0, %v433_v42, %v973_v58  ;;  %v1295_v22 = vsel %vm1280_vm1, %v1166_v27, %v433_v42  ;;  %v156_v18 = vld [vmem:[#allocation2 + $0x100] sm:$0xff] }
 0x132   :  { %v4588_v38 = vsel %vm121_vm4, %v1748_v28, %v2068_v37  ;;  %v1361_v57 = vsel %vm123_vm2, %v1102_v50, %v1295_v22  ;;  %v1749_v21 = vsel %vm1087_vm0, %v602_v9, %v1621_v4  ;;  %v157_v50 = vld [vmem:[#allocation2 + $0x108] sm:$0xff]  ;;  %v1941_v22 = vsel %vm1280_vm1, %v1813_v52, %v602_v9 }
 0x133   :  { %7238 = vst [vmem:[#allocation48_spill] sm:$0xff] %v4588_v38 }
 0x134   :  { %v4592_v45 = vpop.f32.mrf.mxu2  ;;  %v434_v5 = vpop.f32.mrf.mxu0 }
 0x135   :  { %7239 = vst [vmem:[#allocation49_spill] sm:$0xff] %v4592_v45  ;;  %v435_v44 = vadd.f32 %v434_v5, %v4243_v35  ;;  %v603_v8 = vpop.f32.mrf.mxu1 }
 0x136   :  { %v604_v59 = vadd.f32 %v603_v8, %v4245_v40 }
 0x137   :  { %v974_v28 = vrot.slane %v435_v44, 7  ;;  %v1167_v37 = vrot.slane %v435_v44, 1  ;;  %v1427_v58 = vsel %vm122_vm3, %v435_v44, %v1361_v57 }
 0x138   :  { %v4603_v27 = vsel %vm121_vm4, %v430_v55, %v1427_v58  ;;  %v1622_v45 = vrot.slane %v604_v59, 7  ;;  %v1814_v38 = vrot.slane %v604_v59, 1  ;;  %v2005_v5 = vsel %vm123_vm2, %v599_v56, %v604_v59 }
 0x139   :  { %7240 = vst [vmem:[#allocation50_spill] sm:$0xff] %v4603_v27  ;;  %v1103_v4 = vsel %vm1087_vm0, %v435_v44, %v974_v28  ;;  %v1296_v8 = vsel %vm1280_vm1, %v1167_v37, %v435_v44  ;;  %v2006_v57 = vsel %vm123_vm2, %v602_v9, %v604_v59  ;;  %v2069_v56 = vsel %vm122_vm3, %v1941_v22, %v2005_v5 }
 0x13a   :  { %v1362_v55 = vsel %vm123_vm2, %v1103_v4, %v1296_v8  ;;  %v1750_v58 = vsel %vm1087_vm0, %v604_v59, %v1622_v45  ;;  %v1942_v27 = vsel %vm1280_vm1, %v1814_v38, %v604_v59  ;;  %v4624_v37 = vsel %vm121_vm4, %v1749_v21, %v2069_v56  ;;  %v3917_v8 = vld [vmem:[#allocation8 + $0x28] sm:$0xff] }
 0x13b   :  { %v1428_v52 = vsel %vm122_vm3, %v435_v44, %v1362_v55  ;;  %v2070_v28 = vsel %vm122_vm3, %v1942_v27, %v2006_v57  ;;  %7241 = vst [vmem:[#allocation51_spill] sm:$0xff] %v4624_v37  ;;  %v204_v4 = vpack.c.bf16 %v157_v50, %v156_v18  ;;  %2617 = vmatpush.bf16.msrb.mxu0 %v3917_v8 }
 0x13c   :  { %v4626_v9 = vpop.f32.mrf.mxu2  ;;  %v4630_v38 = vsel %vm121_vm4, %v433_v42, %v1428_v52  ;;  %v4634_v45 = vsel %vm121_vm4, %v1750_v58, %v2070_v28  ;;  %v437_v44 = vpop.f32.mrf.mxu0 }
 0x13d   :  { %7242 = vst [vmem:[#allocation52_spill] sm:$0xff] %v4626_v9  ;;  %v438_v59 = vadd.f32 %v437_v44, %v4243_v35  ;;  %v606_v27 = vpop.f32.mrf.mxu1 }
 0x13e   :  { %7243 = vst [vmem:[#allocation53_spill] sm:$0xff] %v4630_v38  ;;  %v607_v18 = vadd.f32 %v606_v27, %v4245_v40 }
 0x13f   :  { %7244 = vst [vmem:[#allocation54_spill] sm:$0xff] %v4634_v45  ;;  %v975_v5 = vrot.slane %v438_v59, 7  ;;  %v1168_v21 = vrot.slane %v438_v59, 1  ;;  %476 = vmatmul.bf16.gmra.mxu0 %v204_v4 }
 0x140   :  { %645 = vmatmul.bf16.gmra.mxu1 %v204_v4  ;;  %v1815_v52 = vrot.slane %v607_v18, 1  ;;  %v1623_v8 = vrot.slane %v607_v18, 7 }
 0x141   :  { %814 = vmatmul.bf16.gmra.mxu2 %v204_v4  ;;  %v1104_v50 = vsel %vm1087_vm0, %v438_v59, %v975_v5  ;;  %v1297_v42 = vsel %vm1280_vm1, %v1168_v21, %v438_v59  ;;  %v158_v5 = vld [vmem:[#allocation2 + $0x110] sm:$0xff]  ;;  %v159_v21 = vld [vmem:[#allocation2 + $0x118] sm:$0xff] }
 0x142   :  { %v1363_v56 = vsel %vm123_vm2, %v1104_v50, %v1297_v42  ;;  %v205_v42 = vpack.c.bf16 %v159_v21, %v158_v5 }
 0x144   :  { %v4640_v22 = vpop.f32.mrf.mxu2  ;;  %v439_v57 = vpop.f32.mrf.mxu0 }
 0x145   :  { %7245 = vst [vmem:[#allocation55_spill] sm:$0xff] %v4640_v22  ;;  %v440_v55 = vadd.f32 %v439_v57, %v4243_v35  ;;  %v608_v58 = vpop.f32.mrf.mxu1  ;;  %v1943_v57 = vsel %vm1280_vm1, %v1815_v52, %v607_v18 }
 0x146   :  { %v609_v28 = vadd.f32 %v608_v58, %v4245_v40  ;;  %v1751_v58 = vsel %vm1087_vm0, %v607_v18, %v1623_v8 }
 0x147   :  { %v976_v4 = vrot.slane %v440_v55, 7  ;;  %v1169_v44 = vrot.slane %v440_v55, 1  ;;  %v1429_v27 = vsel %vm122_vm3, %v440_v55, %v1363_v56 }
 0x148   :  { %v4650_v22 = vsel %vm121_vm4, %v438_v59, %v1429_v27  ;;  %v2007_v50 = vsel %vm123_vm2, %v607_v18, %v609_v28  ;;  %v1816_v5 = vrot.slane %v609_v28, 1 }
 0x149   :  { %7246 = vst [vmem:[#allocation56_spill] sm:$0xff] %v4650_v22  ;;  %v1105_v45 = vsel %vm1087_vm0, %v440_v55, %v976_v4  ;;  %v1298_v38 = vsel %vm1280_vm1, %v1169_v44, %v440_v55  ;;  %v2071_v56 = vsel %vm122_vm3, %v1943_v57, %v2007_v50  ;;  %v1624_v44 = vrot.slane %v609_v28, 7 }
 0x14a   :  { %v4664_v27 = vsel %vm121_vm4, %v1751_v58, %v2071_v56  ;;  %v1364_v8 = vsel %vm123_vm2, %v1105_v45, %v1298_v38  ;;  %v1944_v38 = vsel %vm1280_vm1, %v1816_v5, %v609_v28 }
 0x14b   :  { %7248 = vst [vmem:[#allocation58_spill] sm:$0xff] %v4664_v27 }
 0x14c   :  { %v4660_v9 = vpop.f32.mrf.mxu2  ;;  %v442_v52 = vpop.f32.mrf.mxu0 }
 0x14d   :  { %7247 = vst [vmem:[#allocation57_spill] sm:$0xff] %v4660_v9  ;;  %v443_v22 = vadd.f32 %v442_v52, %v4243_v35  ;;  %v611_v37 = vpop.f32.mrf.mxu1 }
 0x14e   :  { %v612_v4 = vadd.f32 %v611_v37, %v4245_v40  ;;  %v1752_v37 = vsel %vm1087_vm0, %v609_v28, %v1624_v44 }
 0x14f   :  { %v977_v21 = vrot.slane %v443_v22, 7  ;;  %v1170_v15 = vrot.slane %v443_v22, 1  ;;  %v1430_v57 = vsel %vm122_vm3, %v443_v22, %v1364_v8  ;;  %481 = vmatmul.bf16.gmra.mxu0 %v205_v42 }
 0x150   :  { %v4674_v50 = vsel %vm121_vm4, %v438_v59, %v1430_v57  ;;  %650 = vmatmul.bf16.gmra.mxu1 %v205_v42  ;;  %v2008_v58 = vsel %vm123_vm2, %v607_v18, %v612_v4  ;;  %v1817_v59 = vrot.slane %v612_v4, 1  ;;  %v1625_v18 = vrot.slane %v612_v4, 7 }
 0x151   :  { %7249 = vst [vmem:[#allocation59_spill] sm:$0xff] %v4674_v50  ;;  %819 = vmatmul.bf16.gmra.mxu2 %v205_v42  ;;  %v1106_v45 = vsel %vm1087_vm0, %v443_v22, %v977_v21  ;;  %v1299_v56 = vsel %vm1280_vm1, %v1170_v15, %v443_v22  ;;  %v2072_v52 = vsel %vm122_vm3, %v1944_v38, %v2008_v58 }
 0x152   :  { %v4688_v42 = vsel %vm121_vm4, %v1752_v37, %v2072_v52  ;;  %v1365_v44 = vsel %vm123_vm2, %v1106_v45, %v1299_v56  ;;  %v1945_v38 = vsel %vm1280_vm1, %v1817_v59, %v612_v4  ;;  %v1753_v45 = vsel %vm1087_vm0, %v612_v4, %v1625_v18 }
 0x153   :  { %7251 = vst [vmem:[#allocation61_spill] sm:$0xff] %v4688_v42  ;;  %v161_v42 = vld [vmem:[#allocation2 + $0x128] sm:$0xff] }
 0x154   :  { %v4684_v8 = vpop.f32.mrf.mxu2  ;;  %v444_v57 = vpop.f32.mrf.mxu0 }
 0x155   :  { %7250 = vst [vmem:[#allocation60_spill] sm:$0xff] %v4684_v8  ;;  %v445_v5 = vadd.f32 %v444_v57, %v4243_v35  ;;  %v613_v27 = vpop.f32.mrf.mxu1  ;;  %v160_v57 = vld [vmem:[#allocation2 + $0x120] sm:$0xff] }
 0x156   :  { %v614_v15 = vadd.f32 %v613_v27, %v4245_v40 }
 0x157   :  { %v978_v21 = vrot.slane %v445_v5, 7  ;;  %v1171_v50 = vrot.slane %v445_v5, 1  ;;  %v1431_v58 = vsel %vm122_vm3, %v445_v5, %v1365_v44 }
 0x158   :  { %v4699_v37 = vsel %vm121_vm4, %v440_v55, %v1431_v58  ;;  %v2009_v52 = vsel %vm123_vm2, %v609_v28, %v614_v15  ;;  %v206_v58 = vpack.c.bf16 %v161_v42, %v160_v57  ;;  %v1626_v8 = vrot.slane %v614_v15, 7 }
 0x159   :  { %7252 = vst [vmem:[#allocation62_spill] sm:$0xff] %v4699_v37  ;;  %v2073_v27 = vsel %vm122_vm3, %v1945_v38, %v2009_v52  ;;  %v1107_v59 = vsel %vm1087_vm0, %v445_v5, %v978_v21  ;;  %v1300_v44 = vsel %vm1280_vm1, %v1171_v50, %v445_v5  ;;  %v1818_v37 = vrot.slane %v614_v15, 1 }
 0x15a   :  { %v4708_v56 = vsel %vm121_vm4, %v1753_v45, %v2073_v27  ;;  %v1366_v38 = vsel %vm123_vm2, %v1107_v59, %v1300_v44  ;;  %v1754_v59 = vsel %vm1087_vm0, %v614_v15, %v1626_v8 }
 0x15b   :  { %7253 = vst [vmem:[#allocation63_spill] sm:$0xff] %v4708_v56  ;;  %v1946_v50 = vsel %vm1280_vm1, %v1818_v37, %v614_v15 }
 0x15c   :  { %v4712_v55 = vpop.f32.mrf.mxu2  ;;  %v447_v28 = vpop.f32.mrf.mxu0 }
 0x15d   :  { %7254 = vst [vmem:[#allocation64_spill] sm:$0xff] %v4712_v55  ;;  %v448_v9 = vadd.f32 %v447_v28, %v4243_v35  ;;  %v616_v18 = vpop.f32.mrf.mxu1 }
 0x15e   :  { %v617_v52 = vadd.f32 %v616_v18, %v4245_v40 }
 0x15f   :  { %v979_v45 = vrot.slane %v448_v9, 7  ;;  %v1172_v27 = vrot.slane %v448_v9, 1  ;;  %v1432_v21 = vsel %vm122_vm3, %v448_v9, %v1366_v38  ;;  %486 = vmatmul.bf16.gmra.mxu0 %v206_v58 }
 0x160   :  { %v4723_v42 = vsel %vm121_vm4, %v443_v22, %v1432_v21  ;;  %v2010_v57 = vsel %vm123_vm2, %v612_v4, %v617_v52  ;;  %655 = vmatmul.bf16.gmra.mxu1 %v206_v58  ;;  %v1819_v38 = vrot.slane %v617_v52, 1  ;;  %v1627_v4 = vrot.slane %v617_v52, 7 }
 0x161   :  { %7255 = vst [vmem:[#allocation65_spill] sm:$0xff] %v4723_v42  ;;  %824 = vmatmul.bf16.gmra.mxu2 %v206_v58  ;;  %v2074_v44 = vsel %vm122_vm3, %v1946_v50, %v2010_v57  ;;  %v1108_v37 = vsel %vm1087_vm0, %v448_v9, %v979_v45  ;;  %v1301_v18 = vsel %vm1280_vm1, %v1172_v27, %v448_v9 }
 0x162   :  { %v4732_v28 = vsel %vm121_vm4, %v1754_v59, %v2074_v44  ;;  %v1367_v8 = vsel %vm123_vm2, %v1108_v37, %v1301_v18  ;;  %v1947_v27 = vsel %vm1280_vm1, %v1819_v38, %v617_v52  ;;  %v1755_v37 = vsel %vm1087_vm0, %v617_v52, %v1627_v4 }
 0x163   :  { %7256 = vst [vmem:[#allocation66_spill] sm:$0xff] %v4732_v28  ;;  %v163_v28 = vld [vmem:[#allocation2 + $0x138] sm:$0xff] }
 0x164   :  { %v4736_v22 = vpop.f32.mrf.mxu2  ;;  %v449_v21 = vpop.f32.mrf.mxu0 }
 0x165   :  { %7257 = vst [vmem:[#allocation67_spill] sm:$0xff] %v4736_v22  ;;  %v450_v58 = vadd.f32 %v449_v21, %v4243_v35  ;;  %v618_v42 = vpop.f32.mrf.mxu1  ;;  %v162_v22 = vld [vmem:[#allocation2 + $0x130] sm:$0xff] }
 0x166   :  { %v619_v50 = vadd.f32 %v618_v42, %v4245_v40 }
 0x167   :  { %v980_v57 = vrot.slane %v450_v58, 7  ;;  %v1173_v59 = vrot.slane %v450_v58, 1  ;;  %v1433_v45 = vsel %vm122_vm3, %v450_v58, %v1367_v8 }
 0x168   :  { %v4747_v44 = vsel %vm121_vm4, %v445_v5, %v1433_v45  ;;  %v2011_v21 = vsel %vm123_vm2, %v614_v15, %v619_v50  ;;  %v207_v45 = vpack.c.bf16 %v163_v28, %v162_v22  ;;  %v1628_v56 = vrot.slane %v619_v50, 7 }
 0x169   :  { %7258 = vst [vmem:[#allocation68_spill] sm:$0xff] %v4747_v44  ;;  %v2075_v42 = vsel %vm122_vm3, %v1947_v27, %v2011_v21  ;;  %v1109_v38 = vsel %vm1087_vm0, %v450_v58, %v980_v57  ;;  %v1302_v8 = vsel %vm1280_vm1, %v1173_v59, %v450_v58  ;;  %v1820_v44 = vrot.slane %v619_v50, 1 }
 0x16a   :  { %v4756_v18 = vsel %vm121_vm4, %v1755_v37, %v2075_v42  ;;  %v1368_v27 = vsel %vm123_vm2, %v1109_v38, %v1302_v8  ;;  %v1756_v38 = vsel %vm1087_vm0, %v619_v50, %v1628_v56  ;;  %v3941_v56 = vld [vmem:[#allocation10 + $0xac] sm:$0xf] }
 0x16b   :  { %7259 = vst [vmem:[#allocation69_spill] sm:$0xff] %v4756_v18  ;;  %v1948_v59 = vsel %vm1280_vm1, %v1820_v44, %v619_v50  ;;  %v3848_v18 = vld [vmem:[#allocation10 + $0xb4] sm:$0xf0] }
 0x16c   :  { %v4760_v5 = vpop.f32.mrf.mxu2  ;;  %v452_v15 = vpop.f32.mrf.mxu0 }
 0x16d   :  { %7260 = vst [vmem:[#allocation70_spill] sm:$0xff] %v4760_v5  ;;  %v453_v55 = vadd.f32 %v452_v15, %v4243_v35  ;;  %v621_v4 = vpop.f32.mrf.mxu1 }
 0x16e   :  { %v622_v21 = vadd.f32 %v621_v4, %v4245_v40 }
 0x16f   :  { %v981_v37 = vrot.slane %v453_v55, 7  ;;  %v1174_v42 = vrot.slane %v453_v55, 1  ;;  %v1434_v57 = vsel %vm122_vm3, %v453_v55, %v1368_v27  ;;  %491 = vmatmul.bf16.gmra.mxu0 %v207_v45 }
 0x170   :  { %v4771_v28 = vsel %vm121_vm4, %v448_v9, %v1434_v57  ;;  %v2012_v22 = vsel %vm123_vm2, %v617_v52, %v622_v21  ;;  %660 = vmatmul.bf16.gmra.mxu1 %v207_v45  ;;  %v1629_v15 = vrot.slane %v622_v21, 7  ;;  %v1821_v52 = vrot.slane %v622_v21, 1 }
 0x171   :  { %7261 = vst [vmem:[#allocation71_spill] sm:$0xff] %v4771_v28  ;;  %829 = vmatmul.bf16.gmra.mxu2 %v207_v45  ;;  %v2076_v8 = vsel %vm122_vm3, %v1948_v59, %v2012_v22  ;;  %v1110_v44 = vsel %vm1087_vm0, %v453_v55, %v981_v37  ;;  %v1303_v9 = vsel %vm1280_vm1, %v1174_v42, %v453_v55  ;;  %v3846_v37 = vld [vmem:[#allocation10 + $0xa8] sm:$0xf] }
 0x172   :  { %v4780_v4 = vsel %vm121_vm4, %v1756_v38, %v2076_v8  ;;  %v1369_v59 = vsel %vm123_vm2, %v1110_v44, %v1303_v9  ;;  %v1757_v22 = vsel %vm1087_vm0, %v622_v21, %v1629_v15  ;;  %v3851_v8 = vor.u32 %v3941_v56, %v3848_v18  ;;  %v164_v44 = vld [vmem:[#allocation2 + $0x140] sm:$0xff] }
 0x173   :  { %7262 = vst [vmem:[#allocation72_spill] sm:$0xff] %v4780_v4  ;;  %v3942_v4 = vld [vmem:[#allocation10 + $0xb0] sm:$0xf0]  ;;  %v1949_v18 = vsel %vm1280_vm1, %v1821_v52, %v622_v21 }
 0x174   :  { %v4784_v27 = vpop.f32.mrf.mxu2  ;;  %v454_v57 = vpop.f32.mrf.mxu0  ;;  %v3847_v29 = vor.u32 %v3942_v4, %v3846_v37  ;;  %2842 = vmatpush.bf16.msrb.mxu2 %v3851_v8  ;;  %v3916_v37 = vld [vmem:[#allocation8 + $0x20] sm:$0xff] }
 0x175   :  { %7263 = vst [vmem:[#allocation73_spill] sm:$0xff] %v4784_v27  ;;  %v455_v45 = vadd.f32 %v454_v57, %v4243_v35  ;;  %v623_v28 = vpop.f32.mrf.mxu1  ;;  %2618 = vmatpush.bf16.msrb.mxu0 %v3916_v37  ;;  %v166_v37 = vld [vmem:[#allocation2 + $0x150] sm:$0xff] }
 0x176   :  { %v624_v38 = vadd.f32 %v623_v28, %v4245_v40  ;;  %v165_v28 = vld [vmem:[#allocation2 + $0x148] sm:$0xff]  ;;  %2829 = vmatpush.bf16.msrb.mxu1 %v3847_v29 }
 0x177   :  { %v982_v42 = vrot.slane %v455_v45, 7  ;;  %v1175_v5 = vrot.slane %v455_v45, 1  ;;  %v1435_v27 = vsel %vm122_vm3, %v455_v45, %v1369_v59  ;;  %v208_v8 = vpack.c.bf16 %v165_v28, %v164_v44 }
 0x178   :  { %v4795_v57 = vsel %vm121_vm4, %v450_v58, %v1435_v27  ;;  %v1630_v13 = vrot.slane %v624_v38, 7  ;;  %v1822_v17 = vrot.slane %v624_v38, 1  ;;  %v2013_v15 = vsel %vm123_vm2, %v619_v50, %v624_v38 }
 0x179   :  { %7264 = vst [vmem:[#allocation74_spill] sm:$0xff] %v4795_v57  ;;  %v1111_v9 = vsel %vm1087_vm0, %v455_v45, %v982_v42  ;;  %v1304_v56 = vsel %vm1280_vm1, %v1175_v5, %v455_v45  ;;  %v2014_v4 = vsel %vm123_vm2, %v622_v21, %v624_v38  ;;  %v2077_v59 = vsel %vm122_vm3, %v1949_v18, %v2013_v15 }
 0x17a   :  { %v1370_v58 = vsel %vm123_vm2, %v1111_v9, %v1304_v56  ;;  %v1758_v27 = vsel %vm1087_vm0, %v624_v38, %v1630_v13  ;;  %v1950_v50 = vsel %vm1280_vm1, %v1822_v17, %v624_v38  ;;  %v4816_v21 = vsel %vm121_vm4, %v1757_v22, %v2077_v59 }
 0x17b   :  { %v1436_v52 = vsel %vm122_vm3, %v455_v45, %v1370_v58  ;;  %v2078_v5 = vsel %vm122_vm3, %v1950_v50, %v2014_v4  ;;  %7265 = vst [vmem:[#allocation75_spill] sm:$0xff] %v4816_v21 }
 0x17c   :  { %v4818_v29 = vpop.f32.mrf.mxu2  ;;  %v4822_v17 = vsel %vm121_vm4, %v453_v55, %v1436_v52  ;;  %v4826_v13 = vsel %vm121_vm4, %v1758_v27, %v2078_v5  ;;  %v457_v45 = vpop.f32.mrf.mxu0 }
 0x17d   :  { %7266 = vst [vmem:[#allocation76_spill] sm:$0xff] %v4818_v29  ;;  %v458_v38 = vadd.f32 %v457_v45, %v4243_v35  ;;  %v626_v42 = vpop.f32.mrf.mxu1  ;;  %v167_v45 = vld [vmem:[#allocation2 + $0x158] sm:$0xff] }
 0x17e   :  { %7267 = vst [vmem:[#allocation77_spill] sm:$0xff] %v4822_v17  ;;  %v627_v44 = vadd.f32 %v626_v42, %v4245_v40 }
 0x17f   :  { %7268 = vst [vmem:[#allocation78_spill] sm:$0xff] %v4826_v13  ;;  %v983_v15 = vrot.slane %v458_v38, 7  ;;  %v1176_v22 = vrot.slane %v458_v38, 1  ;;  %496 = vmatmul.bf16.gmra.mxu0 %v208_v8 }
 0x180   :  { %665 = vmatmul.bf16.gmra.mxu1 %v208_v8  ;;  %v1823_v27 = vrot.slane %v627_v44, 1  ;;  %v1631_v59 = vrot.slane %v627_v44, 7 }
 0x181   :  { %834 = vmatmul.bf16.gmra.mxu2 %v208_v8  ;;  %v1112_v28 = vsel %vm1087_vm0, %v458_v38, %v983_v15  ;;  %v1305_v55 = vsel %vm1280_vm1, %v1176_v22, %v458_v38 }
 0x182   :  { %v1371_v58 = vsel %vm123_vm2, %v1112_v28, %v1305_v55  ;;  %v1951_v15 = vsel %vm1280_vm1, %v1823_v27, %v627_v44  ;;  %v209_v28 = vpack.c.bf16 %v167_v45, %v166_v37  ;;  %v1759_v55 = vsel %vm1087_vm0, %v627_v44, %v1631_v59 }
 0x184   :  { %v4832_v18 = vpop.f32.mrf.mxu2  ;;  %v459_v9 = vpop.f32.mrf.mxu0 }
 0x185   :  { %7269 = vst [vmem:[#allocation79_spill] sm:$0xff] %v4832_v18  ;;  %v460_v56 = vadd.f32 %v459_v9, %v4243_v35  ;;  %v628_v4 = vpop.f32.mrf.mxu1 }
 0x186   :  { %v629_v50 = vadd.f32 %v628_v4, %v4245_v40 }
 0x187   :  { %v984_v52 = vrot.slane %v460_v56, 7  ;;  %v1177_v5 = vrot.slane %v460_v56, 1  ;;  %v1437_v8 = vsel %vm122_vm3, %v460_v56, %v1371_v58 }
 0x188   :  { %v4842_v42 = vsel %vm121_vm4, %v458_v38, %v1437_v8  ;;  %v2015_v22 = vsel %vm123_vm2, %v627_v44, %v629_v50  ;;  %v1824_v37 = vrot.slane %v629_v50, 1 }
 0x189   :  { %7270 = vst [vmem:[#allocation80_spill] sm:$0xff] %v4842_v42  ;;  %v1113_v9 = vsel %vm1087_vm0, %v460_v56, %v984_v52  ;;  %v1306_v4 = vsel %vm1280_vm1, %v1177_v5, %v460_v56  ;;  %v2079_v58 = vsel %vm122_vm3, %v1951_v15, %v2015_v22  ;;  %v1632_v5 = vrot.slane %v629_v50, 7 }
 0x18a   :  { %v4856_v8 = vsel %vm121_vm4, %v1759_v55, %v2079_v58  ;;  %v1372_v59 = vsel %vm123_vm2, %v1113_v9, %v1306_v4  ;;  %v1952_v9 = vsel %vm1280_vm1, %v1824_v37, %v629_v50 }
 0x18b   :  { %7272 = vst [vmem:[#allocation82_spill] sm:$0xff] %v4856_v8 }
 0x18c   :  { %v4852_v18 = vpop.f32.mrf.mxu2  ;;  %v462_v27 = vpop.f32.mrf.mxu0 }
 0x18d   :  { %7271 = vst [vmem:[#allocation81_spill] sm:$0xff] %v4852_v18  ;;  %v463_v42 = vadd.f32 %v462_v27, %v4243_v35  ;;  %v631_v13 = vpop.f32.mrf.mxu1 }
 0x18e   :  { %v632_v52 = vadd.f32 %v631_v13, %v4245_v40  ;;  %v1760_v13 = vsel %vm1087_vm0, %v629_v50, %v1632_v5 }
 0x18f   :  { %v985_v45 = vrot.slane %v463_v42, 7  ;;  %v1178_v17 = vrot.slane %v463_v42, 1  ;;  %v1438_v15 = vsel %vm122_vm3, %v463_v42, %v1372_v59  ;;  %501 = vmatmul.bf16.gmra.mxu0 %v209_v28 }
 0x190   :  { %v4866_v22 = vsel %vm121_vm4, %v458_v38, %v1438_v15  ;;  %670 = vmatmul.bf16.gmra.mxu1 %v209_v28  ;;  %v2016_v55 = vsel %vm123_vm2, %v627_v44, %v632_v52  ;;  %v1825_v38 = vrot.slane %v632_v52, 1  ;;  %v1633_v44 = vrot.slane %v632_v52, 7 }
 0x191   :  { %7273 = vst [vmem:[#allocation83_spill] sm:$0xff] %v4866_v22  ;;  %839 = vmatmul.bf16.gmra.mxu2 %v209_v28  ;;  %v1114_v4 = vsel %vm1087_vm0, %v463_v42, %v985_v45  ;;  %v1307_v58 = vsel %vm1280_vm1, %v1178_v17, %v463_v42  ;;  %v2080_v27 = vsel %vm122_vm3, %v1952_v9, %v2016_v55 }
 0x192   :  { %v4880_v28 = vsel %vm121_vm4, %v1760_v13, %v2080_v27  ;;  %v1373_v5 = vsel %vm123_vm2, %v1114_v4, %v1307_v58  ;;  %v1953_v9 = vsel %vm1280_vm1, %v1825_v38, %v632_v52  ;;  %v1761_v4 = vsel %vm1087_vm0, %v632_v52, %v1633_v44 }
 0x193   :  { %7275 = vst [vmem:[#allocation85_spill] sm:$0xff] %v4880_v28  ;;  %v169_v28 = vld [vmem:[#allocation2 + $0x168] sm:$0xff] }
 0x194   :  { %v4876_v59 = vpop.f32.mrf.mxu2  ;;  %v464_v15 = vpop.f32.mrf.mxu0 }
 0x195   :  { %7274 = vst [vmem:[#allocation84_spill] sm:$0xff] %v4876_v59  ;;  %v465_v37 = vadd.f32 %v464_v15, %v4243_v35  ;;  %v633_v22 = vpop.f32.mrf.mxu1  ;;  %v168_v15 = vld [vmem:[#allocation2 + $0x160] sm:$0xff] }
 0x196   :  { %v634_v17 = vadd.f32 %v633_v22, %v4245_v40 }
 0x197   :  { %v986_v45 = vrot.slane %v465_v37, 7  ;;  %v1179_v8 = vrot.slane %v465_v37, 1  ;;  %v1439_v55 = vsel %vm122_vm3, %v465_v37, %v1373_v5 }
 0x198   :  { %v4891_v13 = vsel %vm121_vm4, %v460_v56, %v1439_v55  ;;  %v2017_v27 = vsel %vm123_vm2, %v629_v50, %v634_v17  ;;  %v210_v55 = vpack.c.bf16 %v169_v28, %v168_v15  ;;  %v1634_v59 = vrot.slane %v634_v17, 7 }
 0x199   :  { %7276 = vst [vmem:[#allocation86_spill] sm:$0xff] %v4891_v13  ;;  %v2081_v22 = vsel %vm122_vm3, %v1953_v9, %v2017_v27  ;;  %v1115_v38 = vsel %vm1087_vm0, %v465_v37, %v986_v45  ;;  %v1308_v5 = vsel %vm1280_vm1, %v1179_v8, %v465_v37  ;;  %v1826_v13 = vrot.slane %v634_v17, 1 }
 0x19a   :  { %v4900_v58 = vsel %vm121_vm4, %v1761_v4, %v2081_v22  ;;  %v1374_v9 = vsel %vm123_vm2, %v1115_v38, %v1308_v5  ;;  %v1762_v38 = vsel %vm1087_vm0, %v634_v17, %v1634_v59 }
 0x19b   :  { %7277 = vst [vmem:[#allocation87_spill] sm:$0xff] %v4900_v58  ;;  %v1954_v8 = vsel %vm1280_vm1, %v1826_v13, %v634_v17 }
 0x19c   :  { %v4904_v56 = vpop.f32.mrf.mxu2  ;;  %v467_v50 = vpop.f32.mrf.mxu0 }
 0x19d   :  { %7278 = vst [vmem:[#allocation88_spill] sm:$0xff] %v4904_v56  ;;  %v468_v18 = vadd.f32 %v467_v50, %v4243_v35  ;;  %v636_v44 = vpop.f32.mrf.mxu1 }
 0x19e   :  { %v637_v27 = vadd.f32 %v636_v44, %v4245_v40 }
 0x19f   :  { %v987_v4 = vrot.slane %v468_v18, 7  ;;  %v1180_v22 = vrot.slane %v468_v18, 1  ;;  %v1440_v45 = vsel %vm122_vm3, %v468_v18, %v1374_v9  ;;  %506 = vmatmul.bf16.gmra.mxu0 %v210_v55 }
 0x1a0   :  { %v4915_v28 = vsel %vm121_vm4, %v463_v42, %v1440_v45  ;;  %v2018_v15 = vsel %vm123_vm2, %v632_v52, %v637_v27  ;;  %675 = vmatmul.bf16.gmra.mxu1 %v210_v55  ;;  %v1827_v9 = vrot.slane %v637_v27, 1  ;;  %v1635_v52 = vrot.slane %v637_v27, 7 }
 0x1a1   :  { %7279 = vst [vmem:[#allocation89_spill] sm:$0xff] %v4915_v28  ;;  %844 = vmatmul.bf16.gmra.mxu2 %v210_v55  ;;  %v2082_v5 = vsel %vm122_vm3, %v1954_v8, %v2018_v15  ;;  %v1116_v13 = vsel %vm1087_vm0, %v468_v18, %v987_v4  ;;  %v1309_v44 = vsel %vm1280_vm1, %v1180_v22, %v468_v18 }
 0x1a2   :  { %v4924_v50 = vsel %vm121_vm4, %v1762_v38, %v2082_v5  ;;  %v1375_v59 = vsel %vm123_vm2, %v1116_v13, %v1309_v44  ;;  %v1955_v22 = vsel %vm1280_vm1, %v1827_v9, %v637_v27  ;;  %v1763_v13 = vsel %vm1087_vm0, %v637_v27, %v1635_v52 }
 0x1a3   :  { %7280 = vst [vmem:[#allocation90_spill] sm:$0xff] %v4924_v50  ;;  %v170_v50 = vld [vmem:[#allocation2 + $0x170] sm:$0xff] }
 0x1a4   :  { %v4928_v42 = vpop.f32.mrf.mxu2  ;;  %v469_v45 = vpop.f32.mrf.mxu0 }
 0x1a5   :  { %7281 = vst [vmem:[#allocation91_spill] sm:$0xff] %v4928_v42  ;;  %v470_v55 = vadd.f32 %v469_v45, %v4243_v35  ;;  %v638_v28 = vpop.f32.mrf.mxu1  ;;  %v171_v42 = vld [vmem:[#allocation2 + $0x178] sm:$0xff] }
 0x1a6   :  { %v639_v8 = vadd.f32 %v638_v28, %v4245_v40 }
 0x1a7   :  { %v988_v15 = vrot.slane %v470_v55, 7  ;;  %v1181_v38 = vrot.slane %v470_v55, 1  ;;  %v1441_v4 = vsel %vm122_vm3, %v470_v55, %v1375_v59 }
 0x1a8   :  { %v4939_v5 = vsel %vm121_vm4, %v465_v37, %v1441_v4  ;;  %v2019_v45 = vsel %vm123_vm2, %v634_v17, %v639_v8  ;;  %v211_v4 = vpack.c.bf16 %v171_v42, %v170_v50  ;;  %v1636_v58 = vrot.slane %v639_v8, 7 }
 0x1a9   :  { %7282 = vst [vmem:[#allocation92_spill] sm:$0xff] %v4939_v5  ;;  %v2083_v28 = vsel %vm122_vm3, %v1955_v22, %v2019_v45  ;;  %v1117_v9 = vsel %vm1087_vm0, %v470_v55, %v988_v15  ;;  %v1310_v59 = vsel %vm1280_vm1, %v1181_v38, %v470_v55  ;;  %v1828_v5 = vrot.slane %v639_v8, 1 }
 0x1aa   :  { %v4948_v44 = vsel %vm121_vm4, %v1763_v13, %v2083_v28  ;;  %v1376_v22 = vsel %vm123_vm2, %v1117_v9, %v1310_v59  ;;  %v1764_v9 = vsel %vm1087_vm0, %v639_v8, %v1636_v58  ;;  %v3938_v58 = vld [vmem:[#allocation10 + $0x94] sm:$0xf] }
 0x1ab   :  { %7283 = vst [vmem:[#allocation93_spill] sm:$0xff] %v4948_v44  ;;  %v1956_v38 = vsel %vm1280_vm1, %v1828_v5, %v639_v8 }
 0x1ac   :  { %v4952_v37 = vpop.f32.mrf.mxu2  ;;  %v472_v17 = vpop.f32.mrf.mxu0 }
 0x1ad   :  { %7284 = vst [vmem:[#allocation94_spill] sm:$0xff] %v4952_v37  ;;  %v473_v56 = vadd.f32 %v472_v17, %v4243_v35  ;;  %v641_v52 = vpop.f32.mrf.mxu1  ;;  %v3836_v37 = vld [vmem:[#allocation10 + $0x9c] sm:$0xf0] }
 0x1ae   :  { %v642_v45 = vadd.f32 %v641_v52, %v4245_v40 }
 0x1af   :  { %v989_v13 = vrot.slane %v473_v56, 7  ;;  %v1182_v28 = vrot.slane %v473_v56, 1  ;;  %v1442_v15 = vsel %vm122_vm3, %v473_v56, %v1376_v22  ;;  %511 = vmatmul.bf16.gmra.mxu0 %v211_v4 }
 0x1b0   :  { %v4963_v50 = vsel %vm121_vm4, %v468_v18, %v1442_v15  ;;  %v2020_v42 = vsel %vm123_vm2, %v637_v27, %v642_v45  ;;  %680 = vmatmul.bf16.gmra.mxu1 %v211_v4  ;;  %v1637_v17 = vrot.slane %v642_v45, 7  ;;  %v1829_v27 = vrot.slane %v642_v45, 1 }
 0x1b1   :  { %7285 = vst [vmem:[#allocation95_spill] sm:$0xff] %v4963_v50  ;;  %849 = vmatmul.bf16.gmra.mxu2 %v211_v4  ;;  %v2084_v59 = vsel %vm122_vm3, %v1956_v38, %v2020_v42  ;;  %v1118_v5 = vsel %vm1087_vm0, %v473_v56, %v989_v13  ;;  %v1311_v18 = vsel %vm1280_vm1, %v1182_v28, %v473_v56  ;;  %v3834_v13 = vld [vmem:[#allocation10 + $0x90] sm:$0xf] }
 0x1b2   :  { %v4972_v52 = vsel %vm121_vm4, %v1764_v9, %v2084_v59  ;;  %v1377_v38 = vsel %vm123_vm2, %v1118_v5, %v1311_v18  ;;  %v1765_v42 = vsel %vm1087_vm0, %v642_v45, %v1637_v17  ;;  %v3839_v59 = vor.u32 %v3938_v58, %v3836_v37  ;;  %v172_v5 = vld [vmem:[#allocation2 + $0x180] sm:$0xff] }
 0x1b3   :  { %7286 = vst [vmem:[#allocation96_spill] sm:$0xff] %v4972_v52  ;;  %v3939_v52 = vld [vmem:[#allocation10 + $0x98] sm:$0xf0]  ;;  %v1957_v37 = vsel %vm1280_vm1, %v1829_v27, %v642_v45 }
 0x1b4   :  { %v4976_v22 = vpop.f32.mrf.mxu2  ;;  %v474_v15 = vpop.f32.mrf.mxu0  ;;  %v3835_v21 = vor.u32 %v3939_v52, %v3834_v13  ;;  %2843 = vmatpush.bf16.msrb.mxu2 %v3839_v59  ;;  %v3915_v13 = vld [vmem:[#allocation8 + $0x18] sm:$0xff] }
 0x1b5   :  { %7287 = vst [vmem:[#allocation97_spill] sm:$0xff] %v4976_v22  ;;  %v475_v4 = vadd.f32 %v474_v15, %v4243_v35  ;;  %v643_v50 = vpop.f32.mrf.mxu1  ;;  %2619 = vmatpush.bf16.msrb.mxu0 %v3915_v13  ;;  %v174_v13 = vld [vmem:[#allocation2 + $0x190] sm:$0xff] }
 0x1b6   :  { %v644_v9 = vadd.f32 %v643_v50, %v4245_v40  ;;  %v173_v50 = vld [vmem:[#allocation2 + $0x188] sm:$0xff]  ;;  %2830 = vmatpush.bf16.msrb.mxu1 %v3835_v21 }
 0x1b7   :  { %v990_v28 = vrot.slane %v475_v4, 7  ;;  %v1183_v44 = vrot.slane %v475_v4, 1  ;;  %v1443_v22 = vsel %vm122_vm3, %v475_v4, %v1377_v38  ;;  %v212_v59 = vpack.c.bf16 %v173_v50, %v172_v5 }
 0x1b8   :  { %v4987_v15 = vsel %vm121_vm4, %v470_v55, %v1443_v22  ;;  %v1638_v29 = vrot.slane %v644_v9, 7  ;;  %v1830_v57 = vrot.slane %v644_v9, 1  ;;  %v2021_v17 = vsel %vm123_vm2, %v639_v8, %v644_v9 }
 0x1b9   :  { %7288 = vst [vmem:[#allocation98_spill] sm:$0xff] %v4987_v15  ;;  %v1119_v18 = vsel %vm1087_vm0, %v475_v4, %v990_v28  ;;  %v1312_v58 = vsel %vm1280_vm1, %v1183_v44, %v475_v4  ;;  %v2022_v52 = vsel %vm123_vm2, %v642_v45, %v644_v9  ;;  %v2085_v38 = vsel %vm122_vm3, %v1957_v37, %v2021_v17 }
 0x1ba   :  { %v1378_v55 = vsel %vm123_vm2, %v1119_v18, %v1312_v58  ;;  %v1766_v22 = vsel %vm1087_vm0, %v644_v9, %v1638_v29  ;;  %v1958_v8 = vsel %vm1280_vm1, %v1830_v57, %v644_v9  ;;  %v5008_v45 = vsel %vm121_vm4, %v1765_v42, %v2085_v38 }
 0x1bb   :  { %v1444_v27 = vsel %vm122_vm3, %v475_v4, %v1378_v55  ;;  %v2086_v44 = vsel %vm122_vm3, %v1958_v8, %v2022_v52  ;;  %7289 = vst [vmem:[#allocation99_spill] sm:$0xff] %v5008_v45 }
 0x1bc   :  { %v5010_v21 = vpop.f32.mrf.mxu2  ;;  %v5014_v57 = vsel %vm121_vm4, %v473_v56, %v1444_v27  ;;  %v5018_v29 = vsel %vm121_vm4, %v1766_v22, %v2086_v44  ;;  %v477_v4 = vpop.f32.mrf.mxu0 }
 0x1bd   :  { %7290 = vst [vmem:[#allocation100_spill] sm:$0xff] %v5014_v57  ;;  %v478_v9 = vadd.f32 %v477_v4, %v4243_v35  ;;  %v646_v28 = vpop.f32.mrf.mxu1  ;;  %v175_v4 = vld [vmem:[#allocation2 + $0x198] sm:$0xff] }
 0x1be   :  { %7291 = vst [vmem:[#allocation101_spill] sm:$0xff] %v5018_v29  ;;  %v647_v5 = vadd.f32 %v646_v28, %v4245_v40 }
 0x1bf   :  { %v991_v17 = vrot.slane %v478_v9, 7  ;;  %v1184_v42 = vrot.slane %v478_v9, 1  ;;  %516 = vmatmul.bf16.gmra.mxu0 %v212_v59 }
 0x1c0   :  { %685 = vmatmul.bf16.gmra.mxu1 %v212_v59  ;;  %v1831_v22 = vrot.slane %v647_v5, 1  ;;  %v1639_v38 = vrot.slane %v647_v5, 7 }
 0x1c1   :  { %854 = vmatmul.bf16.gmra.mxu2 %v212_v59  ;;  %v1120_v50 = vsel %vm1087_vm0, %v478_v9, %v991_v17  ;;  %v1313_v56 = vsel %vm1280_vm1, %v1184_v42, %v478_v9 }
 0x1c2   :  { %v1379_v55 = vsel %vm123_vm2, %v1120_v50, %v1313_v56  ;;  %v1959_v17 = vsel %vm1280_vm1, %v1831_v22, %v647_v5  ;;  %v213_v50 = vpack.c.bf16 %v175_v4, %v174_v13  ;;  %v1767_v56 = vsel %vm1087_vm0, %v647_v5, %v1639_v38 }
 0x1c4   :  { %v5024_v37 = vpop.f32.mrf.mxu2  ;;  %v479_v18 = vpop.f32.mrf.mxu0 }
 0x1c5   :  { %7292 = vst [vmem:[#allocation102_spill] sm:$0xff] %v5024_v37  ;;  %v480_v58 = vadd.f32 %v479_v18, %v4243_v35  ;;  %v648_v52 = vpop.f32.mrf.mxu1 }
 0x1c6   :  { %v649_v8 = vadd.f32 %v648_v52, %v4245_v40 }
 0x1c7   :  { %v992_v27 = vrot.slane %v480_v58, 7  ;;  %v1185_v44 = vrot.slane %v480_v58, 1  ;;  %v1445_v59 = vsel %vm122_vm3, %v480_v58, %v1379_v55 }
 0x1c8   :  { %v5034_v28 = vsel %vm121_vm4, %v478_v9, %v1445_v59  ;;  %v2023_v42 = vsel %vm123_vm2, %v647_v5, %v649_v8  ;;  %v1832_v13 = vrot.slane %v649_v8, 1 }
 0x1c9   :  { %7293 = vst [vmem:[#allocation103_spill] sm:$0xff] %v5034_v28  ;;  %v1121_v18 = vsel %vm1087_vm0, %v480_v58, %v992_v27  ;;  %v1314_v52 = vsel %vm1280_vm1, %v1185_v44, %v480_v58  ;;  %v2087_v55 = vsel %vm122_vm3, %v1959_v17, %v2023_v42  ;;  %v1640_v44 = vrot.slane %v649_v8, 7 }
 0x1ca   :  { %v5048_v59 = vsel %vm121_vm4, %v1767_v56, %v2087_v55  ;;  %v1380_v38 = vsel %vm123_vm2, %v1121_v18, %v1314_v52  ;;  %v1960_v18 = vsel %vm1280_vm1, %v1832_v13, %v649_v8 }
 0x1cb   :  { %7295 = vst [vmem:[#allocation105_spill] sm:$0xff] %v5048_v59 }
 0x1cc   :  { %v5044_v37 = vpop.f32.mrf.mxu2  ;;  %v482_v22 = vpop.f32.mrf.mxu0 }
 0x1cd   :  { %7294 = vst [vmem:[#allocation104_spill] sm:$0xff] %v5044_v37  ;;  %v483_v28 = vadd.f32 %v482_v22, %v4243_v35  ;;  %v651_v29 = vpop.f32.mrf.mxu1 }
 0x1ce   :  { %v652_v27 = vadd.f32 %v651_v29, %v4245_v40  ;;  %v1768_v29 = vsel %vm1087_vm0, %v649_v8, %v1640_v44 }
 0x1cf   :  { %v993_v4 = vrot.slane %v483_v28, 7  ;;  %v1186_v57 = vrot.slane %v483_v28, 1  ;;  %v1446_v17 = vsel %vm122_vm3, %v483_v28, %v1380_v38  ;;  %521 = vmatmul.bf16.gmra.mxu0 %v213_v50 }
 0x1d0   :  { %v5058_v42 = vsel %vm121_vm4, %v478_v9, %v1446_v17  ;;  %690 = vmatmul.bf16.gmra.mxu1 %v213_v50  ;;  %v2024_v56 = vsel %vm123_vm2, %v647_v5, %v652_v27  ;;  %v1833_v9 = vrot.slane %v652_v27, 1  ;;  %v1641_v5 = vrot.slane %v652_v27, 7 }
 0x1d1   :  { %7296 = vst [vmem:[#allocation106_spill] sm:$0xff] %v5058_v42  ;;  %859 = vmatmul.bf16.gmra.mxu2 %v213_v50  ;;  %v1122_v52 = vsel %vm1087_vm0, %v483_v28, %v993_v4  ;;  %v1315_v55 = vsel %vm1280_vm1, %v1186_v57, %v483_v28  ;;  %v2088_v22 = vsel %vm122_vm3, %v1960_v18, %v2024_v56 }
 0x1d2   :  { %v5072_v50 = vsel %vm121_vm4, %v1768_v29, %v2088_v22  ;;  %v1381_v44 = vsel %vm123_vm2, %v1122_v52, %v1315_v55  ;;  %v1961_v18 = vsel %vm1280_vm1, %v1833_v9, %v652_v27  ;;  %v1769_v52 = vsel %vm1087_vm0, %v652_v27, %v1641_v5 }
 0x1d3   :  { %7298 = vst [vmem:[#allocation108_spill] sm:$0xff] %v5072_v50  ;;  %v177_v50 = vld [vmem:[#allocation2 + $0x1a8] sm:$0xff] }
 0x1d4   :  { %v5068_v38 = vpop.f32.mrf.mxu2  ;;  %v484_v17 = vpop.f32.mrf.mxu0 }
 0x1d5   :  { %7297 = vst [vmem:[#allocation107_spill] sm:$0xff] %v5068_v38  ;;  %v485_v13 = vadd.f32 %v484_v17, %v4243_v35  ;;  %v653_v59 = vpop.f32.mrf.mxu1  ;;  %v176_v17 = vld [vmem:[#allocation2 + $0x1a0] sm:$0xff] }
 0x1d6   :  { %v654_v57 = vadd.f32 %v653_v59, %v4245_v40 }
 0x1d7   :  { %v994_v4 = vrot.slane %v485_v13, 7  ;;  %v1187_v42 = vrot.slane %v485_v13, 1  ;;  %v1447_v56 = vsel %vm122_vm3, %v485_v13, %v1381_v44 }
 0x1d8   :  { %v5083_v29 = vsel %vm121_vm4, %v480_v58, %v1447_v56  ;;  %v2025_v22 = vsel %vm123_vm2, %v649_v8, %v654_v57  ;;  %v214_v56 = vpack.c.bf16 %v177_v50, %v176_v17  ;;  %v1642_v38 = vrot.slane %v654_v57, 7 }
 0x1d9   :  { %7299 = vst [vmem:[#allocation109_spill] sm:$0xff] %v5083_v29  ;;  %v2089_v59 = vsel %vm122_vm3, %v1961_v18, %v2025_v22  ;;  %v1123_v9 = vsel %vm1087_vm0, %v485_v13, %v994_v4  ;;  %v1316_v44 = vsel %vm1280_vm1, %v1187_v42, %v485_v13  ;;  %v1834_v29 = vrot.slane %v654_v57, 1 }
 0x1da   :  { %v5092_v55 = vsel %vm121_vm4, %v1769_v52, %v2089_v59  ;;  %v1382_v18 = vsel %vm123_vm2, %v1123_v9, %v1316_v44  ;;  %v1770_v9 = vsel %vm1087_vm0, %v654_v57, %v1642_v38 }
 0x1db   :  { %7300 = vst [vmem:[#allocation110_spill] sm:$0xff] %v5092_v55  ;;  %v1962_v17 = vsel %vm1280_vm1, %v1834_v29, %v654_v57 }
 0x1dc   :  { %v5096_v58 = vpop.f32.mrf.mxu2  ;;  %v487_v8 = vpop.f32.mrf.mxu0 }
 0x1dd   :  { %v5099_v37 = vadd.f32 %v487_v8, %v4243_v35  ;;  %v656_v5 = vpop.f32.mrf.mxu1  ;;  %v3978_v8 = vld [vmem:[#allocation7] sm:$0x7] }
 0x1de   :  { %v5104_v22 = vadd.f32 %v656_v5, %v4245_v40  ;;  %v5122_v5 = vperm.slane %v3978_v8, 2 }
 0x1df   :  { %v995_v4 = vrot.slane %v5099_v37, 7  ;;  %v1188_v42 = vrot.slane %v5099_v37, 1  ;;  %v1448_v50 = vsel %vm122_vm3, %v5099_v37, %v1382_v18  ;;  %526 = vmatmul.bf16.gmra.mxu0 %v214_v56 }
 0x1e0   :  { %v5114_v52 = vsel %vm121_vm4, %v483_v28, %v1448_v50  ;;  %v2026_v59 = vsel %vm123_vm2, %v652_v27, %v5104_v22  ;;  %695 = vmatmul.bf16.gmra.mxu1 %v214_v56  ;;  %v1835_v38 = vrot.slane %v5104_v22, 1  ;;  %v5137_v50 = vadd.f32 %v4280_v6, %v5122_v5 }
 0x1e1   :  { %7301 = vst [vmem:[#allocation111_spill] sm:$0xff] %v5114_v52  ;;  %864 = vmatmul.bf16.gmra.mxu2 %v214_v56  ;;  %v2090_v44 = vsel %vm122_vm3, %v1962_v17, %v2026_v59  ;;  %v1124_v28 = vsel %vm1087_vm0, %v5099_v37, %v995_v4  ;;  %v1317_v27 = vsel %vm1280_vm1, %v1188_v42, %v5099_v37  ;;  %v1643_v17 = vrot.slane %v5104_v22, 7 }
 0x1e2   :  { %v5126_v29 = vsel %vm121_vm4, %v1770_v9, %v2090_v44  ;;  %7304 = vst [vmem:[#allocation114_spill] sm:$0xff] %v5137_v50  ;;  %v5145_v4 = vadd.f32 %v4254_v49, %v5122_v5  ;;  %v1383_v42 = vsel %vm123_vm2, %v1124_v28, %v1317_v27  ;;  %v5154_v6 = vadd.f32 %v4304_v26, %v5122_v5 }
 0x1e3   :  { %7302 = vst [vmem:[#allocation112_spill] sm:$0xff] %v5126_v29  ;;  %v2183_v49 = vadd.f32 %v4291_v19, %v4267_v61  ;;  %v1963_v28 = vsel %vm1280_vm1, %v1835_v38, %v5104_v22  ;;  %v179_v29 = vld [vmem:[#allocation2 + $0x1b8] sm:$0xff]  ;;  %v1771_v38 = vsel %vm1087_vm0, %v5104_v22, %v1643_v17 }
 0x1e4   :  { %v5132_v18 = vpop.f32.mrf.mxu2  ;;  %v489_v56 = vpop.f32.mrf.mxu0  ;;  %7305 = vst [vmem:[#allocation115_spill] sm:$0xff] %v5145_v4  ;;  %v2399_v52 = vadd.f32 %v5137_v50, %v5145_v4 }
 0x1e5   :  { %7303 = vst [vmem:[#allocation113_spill] sm:$0xff] %v5132_v18  ;;  %v5141_v59 = vadd.f32 %v489_v56, %v4243_v35  ;;  %v658_v9 = vpop.f32.mrf.mxu1 }
 0x1e6   :  { %v5150_v44 = vadd.f32 %v658_v9, %v4245_v40  ;;  %7306 = vst [vmem:[#allocation116_spill] sm:$0xff] %v5154_v6  ;;  %v178_v9 = vld [vmem:[#allocation2 + $0x1b0] sm:$0xff]  ;;  %v2400_v50 = vadd.f32 %v2399_v52, %v5154_v6  ;;  %v5202_v52 = vadd.f32 %v4352_v10, %v5122_v5 }
 0x1e7   :  { %v996_v8 = vrot.slane %v5141_v59, 7  ;;  %v1189_v56 = vrot.slane %v5141_v59, 1  ;;  %v1449_v18 = vsel %vm122_vm3, %v5141_v59, %v1383_v42  ;;  %v5176_v42 = vadd.f32 %v4328_v51, %v5122_v5 }
 0x1e8   :  { %v5167_v27 = vsel %vm121_vm4, %v485_v13, %v1449_v18  ;;  %v2027_v26 = vsel %vm123_vm2, %v654_v57, %v5150_v44  ;;  %v2287_v18 = vadd.f32 %v4300_v23, %v4276_v3  ;;  %v2184_v57 = vadd.f32 %v2183_v49, %v4315_v39  ;;  %7309 = vst [vmem:[#allocation119_spill] sm:$0xff] %v5202_v52  ;;  %v7353_v3 = vld [vmem:[#allocation58_spill] sm:$0xff] }
 0x1e9   :  { %7307 = vst [vmem:[#allocation117_spill] sm:$0xff] %v5167_v27  ;;  %v2091_v13 = vsel %vm122_vm3, %v1963_v28, %v2027_v26  ;;  %v1125_v51 = vsel %vm1087_vm0, %v5141_v59, %v996_v8  ;;  %v1318_v17 = vsel %vm1280_vm1, %v1189_v56, %v5141_v59  ;;  %v215_v28 = vpack.c.bf16 %v179_v29, %v178_v9 }
 0x1ea   :  { %7308 = vst [vmem:[#allocation118_spill] sm:$0xff] %v5176_v42  ;;  %v5187_v19 = vsel %vm121_vm4, %v1771_v38, %v2091_v13  ;;  %v2288_v26 = vadd.f32 %v2287_v18, %v4324_v47  ;;  %v2185_v23 = vadd.f32 %v2184_v57, %v4339_v1  ;;  %v1836_v49 = vrot.slane %v5150_v44, 1 }
 0x1eb   :  { %v2401_v38 = vadd.f32 %v2400_v50, %v5176_v42  ;;  %v1644_v8 = vrot.slane %v5150_v44, 7  ;;  %v1384_v18 = vsel %vm123_vm2, %v1125_v51, %v1318_v17  ;;  %v5215_v50 = vadd.f32 %v4376_v30, %v5122_v5 }
 0x1ec   :  { %v5194_v4 = vpop.f32.mrf.mxu2  ;;  %v492_v39 = vpop.f32.mrf.mxu0  ;;  %v2289_v29 = vadd.f32 %v2288_v26, %v4348_v7  ;;  %v2186_v9 = vadd.f32 %v2185_v23, %v4363_v24  ;;  %v1964_v23 = vsel %vm1280_vm1, %v1836_v49, %v5150_v44 }
 0x1ed   :  { %v5206_v56 = vadd.f32 %v492_v39, %v4243_v35  ;;  %v661_v13 = vpop.f32.mrf.mxu1  ;;  %7310 = vst [vmem:[#allocation120_spill] sm:$0xff] %v5215_v50  ;;  %v2402_v17 = vadd.f32 %v2401_v38, %v5202_v52  ;;  %v1772_v26 = vsel %vm1087_vm0, %v5150_v44, %v1644_v8 }
 0x1ee   :  { %v662_v57 = vadd.f32 %v661_v13, %v4245_v40  ;;  %v2290_v49 = vadd.f32 %v2289_v29, %v4372_v32  ;;  %v5253_v29 = vadd.f32 %v4400_v0, %v5122_v5 }
 0x1ef   :  { %v997_v10 = vrot.slane %v5206_v56, 7  ;;  %v1190_v42 = vrot.slane %v5206_v56, 1  ;;  %v1450_v39 = vsel %vm122_vm3, %v5206_v56, %v1384_v18  ;;  %531 = vmatmul.bf16.gmra.mxu0 %v215_v28  ;;  %v2187_v18 = vadd.f32 %v2186_v9, %v4387_v54 }
 0x1f0   :  { %v5227_v51 = vsel %vm121_vm4, %v5099_v37, %v1450_v39  ;;  %v2028_v30 = vsel %vm123_vm2, %v5104_v22, %v662_v57  ;;  %700 = vmatmul.bf16.gmra.mxu1 %v215_v28  ;;  %v1645_v37 = vrot.slane %v662_v57, 7  ;;  %v2403_v8 = vadd.f32 %v2402_v17, %v5215_v50  ;;  %7312 = vst [vmem:[#allocation122_spill] sm:$0xff] %v5253_v29 }
 0x1f1   :  { %869 = vmatmul.bf16.gmra.mxu2 %v215_v28  ;;  %v2092_v13 = vsel %vm122_vm3, %v1964_v23, %v2028_v30  ;;  %v1126_v22 = vsel %vm1087_vm0, %v5206_v56, %v997_v10  ;;  %v1319_v28 = vsel %vm1280_vm1, %v1190_v42, %v5206_v56  ;;  %v2291_v23 = vadd.f32 %v2290_v49, %v4396_v60  ;;  %v3936_v60 = vld [vmem:[#allocation10 + $0x80] sm:$0xf0] }
 0x1f2   :  { %v5241_v39 = vsel %vm121_vm4, %v1772_v26, %v2092_v13  ;;  %v2188_v9 = vadd.f32 %v2187_v18, %v4411_v16  ;;  %v3935_v26 = vld [vmem:[#allocation10 + $0x7c] sm:$0xf]  ;;  %v3824_v13 = vld [vmem:[#allocation10 + $0x84] sm:$0xf0]  ;;  %v5258_v10 = vadd.f32 %v4434_v41, %v5122_v5  ;;  %v1837_v42 = vrot.slane %v662_v57, 1 }
 0x1f3   :  { %7311 = vst [vmem:[#allocation121_spill] sm:$0xff] %v5241_v39  ;;  %v3827_v17 = vor.u32 %v3935_v26, %v3824_v13  ;;  %v2292_v49 = vadd.f32 %v2291_v23, %v4432_v33  ;;  %v1385_v0 = vsel %vm123_vm2, %v1126_v22, %v1319_v28  ;;  %v1773_v50 = vsel %vm1087_vm0, %v662_v57, %v1645_v37  ;;  %v3822_v16 = vld [vmem:[#allocation10 + $0x78] sm:$0xf]  ;;  %v180_v37 = vld [vmem:[#allocation2 + $0x1c0] sm:$0xff]  ;;  %v181_v28 = vld [vmem:[#allocation2 + $0x1c8] sm:$0xff] }
 0x1f4   :  { %v5247_v38 = vpop.f32.mrf.mxu2  ;;  %v494_v30 = vpop.f32.mrf.mxu0  ;;  %7313 = vst [vmem:[#allocation123_spill] sm:$0xff] %v5258_v10  ;;  %v1965_v13 = vsel %vm1280_vm1, %v1837_v42, %v662_v57 }
 0x1f5   :  { %v495_v52 = vadd.f32 %v494_v30, %v4243_v35  ;;  %v663_v32 = vpop.f32.mrf.mxu1  ;;  %2844 = vmatpush.bf16.msrb.mxu2 %v3827_v17  ;;  %v3823_v30 = vor.u32 %v3936_v60, %v3822_v16 }
 0x1f6   :  { %v664_v18 = vadd.f32 %v663_v32, %v4245_v40 }
 0x1f7   :  { %v998_v54 = vrot.slane %v495_v52, 7  ;;  %v1191_v24 = vrot.slane %v495_v52, 1  ;;  %v1451_v41 = vsel %vm122_vm3, %v495_v52, %v1385_v0  ;;  %2831 = vmatpush.bf16.msrb.mxu1 %v3823_v30  ;;  %v2189_v30 = vadd.f32 %v2188_v9, %v4438_v46 }
 0x1f8   :  { %v5271_v23 = vsel %vm121_vm4, %v5141_v59, %v1451_v41  ;;  %v1646_v26 = vrot.slane %v664_v18, 7  ;;  %v1838_v22 = vrot.slane %v664_v18, 1  ;;  %v2029_v32 = vsel %vm123_vm2, %v5150_v44, %v664_v18  ;;  %v3914_v41 = vld [vmem:[#allocation8 + $0x10] sm:$0xff] }
 0x1f9   :  { %7314 = vst [vmem:[#allocation124_spill] sm:$0xff] %v5271_v23  ;;  %v1127_v33 = vsel %vm1087_vm0, %v495_v52, %v998_v54  ;;  %v1320_v17 = vsel %vm1280_vm1, %v1191_v24, %v495_v52  ;;  %v2030_v60 = vsel %vm123_vm2, %v662_v57, %v664_v18  ;;  %v2093_v44 = vsel %vm122_vm3, %v1965_v13, %v2029_v32 }
 0x1fa   :  { %v1386_v16 = vsel %vm123_vm2, %v1127_v33, %v1320_v17  ;;  %v1774_v59 = vsel %vm1087_vm0, %v664_v18, %v1646_v26  ;;  %v1966_v0 = vsel %vm1280_vm1, %v1838_v22, %v664_v18  ;;  %v5293_v54 = vsel %vm121_vm4, %v1773_v50, %v2093_v44  ;;  %2620 = vmatpush.bf16.msrb.mxu0 %v3914_v41  ;;  %v182_v41 = vld [vmem:[#allocation2 + $0x1d0] sm:$0xff] }
 0x1fb   :  { %v1452_v42 = vsel %vm122_vm3, %v495_v52, %v1386_v16  ;;  %v2094_v24 = vsel %vm122_vm3, %v1966_v0, %v2030_v60  ;;  %7315 = vst [vmem:[#allocation125_spill] sm:$0xff] %v5293_v54  ;;  %v216_v33 = vpack.c.bf16 %v181_v28, %v180_v37  ;;  %v2293_v18 = vadd.f32 %v2292_v49, %v4442_v48 }
 0x1fc   :  { %v5295_v57 = vpop.f32.mrf.mxu2  ;;  %v5302_v26 = vsel %vm121_vm4, %v5206_v56, %v1452_v42  ;;  %v5306_v52 = vsel %vm121_vm4, %v1774_v59, %v2094_v24  ;;  %v497_v22 = vpop.f32.mrf.mxu0  ;;  %v2404_v32 = vadd.f32 %v2403_v8, %v5253_v29  ;;  %v2190_v37 = vrot.slane %v2189_v30, 4 }
 0x1fd   :  { %7316 = vst [vmem:[#allocation126_spill] sm:$0xff] %v5306_v52  ;;  %v666_v50 = vpop.f32.mrf.mxu1  ;;  %v2294_v28 = vrot.slane %v2293_v18, 4  ;;  %v5337_v48 = vadd.f32 %v4492_v11, %v5122_v5 }
 0x1fe   :  { %v2405_v9 = vadd.f32 %v2404_v32, %v5258_v10  ;;  %v2191_v56 = vadd.f32 %v2190_v37, %v2189_v30  ;;  %v183_v32 = vld [vmem:[#allocation2 + $0x1d8] sm:$0xff]  ;;  %v5323_v30 = vadd.f32 %v4448_v63, %v5122_v5  ;;  %v2196_v63 = vadd.f32 %v4482_v62, %v4458_v20 }
 0x1ff   :  { %536 = vmatmul.bf16.gmra.mxu0 %v216_v33  ;;  %v2295_v13 = vadd.f32 %v2294_v28, %v2293_v18  ;;  %7319 = vst [vmem:[#allocation129_spill] sm:$0xff] %v5337_v48  ;;  %v7330_v20 = vld [vmem:[#allocation49_spill] sm:$0xff] }
 0x200   :  { %705 = vmatmul.bf16.gmra.mxu1 %v216_v33  ;;  %v2406_v17 = vrot.slane %v2405_v9, 4  ;;  %v2192_v44 = vrot.slane %v2191_v56, 2  ;;  %7318 = vst [vmem:[#allocation128_spill] sm:$0xff] %v5323_v30  ;;  %v5430_v46 = vadd.f32 %v7330_v20, %v5122_v5 }
 0x201   :  { %874 = vmatmul.bf16.gmra.mxu2 %v216_v33  ;;  %v2296_v42 = vrot.slane %v2295_v13, 2  ;;  %v5319_v33 = vadd.f32 %v4468_v14, %v5122_v5 }
 0x202   :  { %v2407_v24 = vadd.f32 %v2406_v17, %v2405_v9  ;;  %v2193_v9 = vadd.f32 %v2192_v44, %v2191_v56  ;;  %v2300_v56 = vadd.f32 %v4496_v12, %v4472_v34  ;;  %7331 = vst [vmem:[#allocation49_spill] sm:$0xff] %v5430_v46 }
 0x203   :  { %7317 = vst [vmem:[#allocation127_spill] sm:$0xff] %v5319_v33  ;;  %v2297_v17 = vadd.f32 %v2296_v42, %v2295_v13  ;;  %v2412_v14 = vadd.f32 %v5319_v33, %v5323_v30  ;;  %v5345_v13 = vadd.f32 %v497_v22, %v4243_v35  ;;  %v2197_v33 = vadd.f32 %v2196_v63, %v4507_v31 }
 0x204   :  { %v5310_v49 = vpop.f32.mrf.mxu2  ;;  %v499_v60 = vpop.f32.mrf.mxu0  ;;  %v2408_v10 = vrot.slane %v2407_v24, 2  ;;  %v2194_v22 = vrot.slane %v2193_v9, 1 }
 0x205   :  { %v5313_v16 = vadd.f32 %v499_v60, %v4243_v35  ;;  %v668_v59 = vpop.f32.mrf.mxu1  ;;  %v217_v60 = vpack.c.bf16 %v183_v32, %v182_v41  ;;  %v5353_v41 = vadd.f32 %v666_v50, %v4245_v40 }
 0x206   :  { %v5377_v63 = vadd.f32 %v2408_v10, %v2407_v24  ;;  %v2195_v10 = vadd.f32 %v2194_v22, %v2193_v9  ;;  %v2298_v24 = vrot.slane %v2297_v17, 1  ;;  %v5405_v9 = vadd.f32 %v668_v59, %v4245_v40 }
 0x207   :  { %v1000_v0 = vrot.slane %v5313_v16, 7  ;;  %v1193_v8 = vrot.slane %v5313_v16, 1 }
 0x209   :  { %v1129_v18 = vsel %vm1087_vm0, %v5313_v16, %v1000_v0  ;;  %v1322_v37 = vsel %vm1280_vm1, %v1193_v8, %v5313_v16 }
 0x20a   :  { %v1388_v44 = vsel %vm123_vm2, %v1129_v18, %v1322_v37  ;;  %v5363_v18 = vadd.f32 %v4520_v2, %v5122_v5  ;;  %v2301_v37 = vadd.f32 %v2300_v56, %v4516_v53  ;;  %v2413_v2 = vadd.f32 %v2412_v14, %v5337_v48 }
 0x20c   :  { %v5329_v28 = vpop.f32.mrf.mxu2  ;;  %v502_v29 = vpop.f32.mrf.mxu0  ;;  %7320 = vst [vmem:[#allocation130_spill] sm:$0xff] %v5363_v18  ;;  %v2302_v31 = vadd.f32 %v2301_v37, %v4540_v36  ;;  %v2414_v14 = vadd.f32 %v2413_v2, %v5363_v18  ;;  %v7324_v37 = vld [vmem:[#allocation44_spill] sm:$0xff] }
 0x20d   :  { %v5340_v0 = vadd.f32 %v502_v29, %v4243_v35  ;;  %v671_v8 = vpop.f32.mrf.mxu1 }
 0x20e   :  { %v5350_v42 = vadd.f32 %v671_v8, %v4245_v40 }
 0x20f   :  { %v1001_v11 = vrot.slane %v5340_v0, 7  ;;  %v1194_v29 = vrot.slane %v5340_v0, 1  ;;  %v1454_v32 = vsel %vm122_vm3, %v5340_v0, %v1388_v44  ;;  %541 = vmatmul.bf16.gmra.mxu0 %v217_v60  ;;  %v2198_v44 = vadd.f32 %v2197_v33, %v4531_v25  ;;  %v7325_v25 = vld [vmem:[#allocation45_spill] sm:$0xff] }
 0x210   :  { %v5368_v50 = vsel %vm121_vm4, %v5345_v13, %v1454_v32  ;;  %710 = vmatmul.bf16.gmra.mxu1 %v217_v60  ;;  %v5375_v8 = vsel %vm123_vm2, %v5353_v41, %v5350_v42  ;;  %v7322_v32 = vld [vmem:[#allocation43_spill] sm:$0xff]  ;;  %v1841_v33 = vrot.slane %v5350_v42, 1  ;;  %v1649_v12 = vrot.slane %v5350_v42, 7 }
 0x211   :  { %7321 = vst [vmem:[#allocation131_spill] sm:$0xff] %v5368_v50  ;;  %879 = vmatmul.bf16.gmra.mxu2 %v217_v60  ;;  %v5384_v30 = vadd.f32 %v7322_v32, %v5122_v5  ;;  %v1130_v60 = vsel %vm1087_vm0, %v5340_v0, %v1001_v11  ;;  %v1323_v56 = vsel %vm1280_vm1, %v1194_v29, %v5340_v0  ;;  %v7326_v29 = vld [vmem:[#allocation46_spill] sm:$0xff] }
 0x212   :  { %v2199_v36 = vadd.f32 %v2198_v44, %v7324_v37  ;;  %v2303_v32 = vadd.f32 %v2302_v31, %v7325_v25  ;;  %v5402_v62 = vadd.f32 %v7326_v29, %v5122_v5  ;;  %v1389_v22 = vsel %vm123_vm2, %v1130_v60, %v1323_v56  ;;  %v7328_v25 = vld [vmem:[#allocation47_spill] sm:$0xff]  ;;  %v7329_v37 = vld [vmem:[#allocation48_spill] sm:$0xff] }
 0x213   :  { %7323 = vst [vmem:[#allocation43_spill] sm:$0xff] %v5384_v30  ;;  %v2415_v31 = vadd.f32 %v2414_v14, %v5384_v30  ;;  %v1969_v60 = vsel %vm1280_vm1, %v1841_v33, %v5350_v42  ;;  %v184_v56 = vld [vmem:[#allocation2 + $0x1e0] sm:$0xff]  ;;  %v185_v14 = vld [vmem:[#allocation2 + $0x1e8] sm:$0xff]  ;;  %v2299_v30 = vadd.f32 %v2298_v24, %v2297_v17 }
 0x214   :  { %v5390_v53 = vpop.f32.mrf.mxu2  ;;  %v504_v48 = vpop.f32.mrf.mxu0  ;;  %7327 = vst [vmem:[#allocation46_spill] sm:$0xff] %v5402_v62  ;;  %v2200_v59 = vadd.f32 %v2199_v36, %v7328_v25  ;;  %v2304_v18 = vadd.f32 %v2303_v32, %v7329_v37  ;;  %v1777_v36 = vsel %vm1087_vm0, %v5350_v42, %v1649_v12  ;;  %v7333_v25 = vld [vmem:[#allocation51_spill] sm:$0xff]  ;;  %v7335_v17 = vld [vmem:[#allocation52_spill] sm:$0xff] }
 0x215   :  { %v5398_v11 = vadd.f32 %v504_v48, %v4243_v35  ;;  %v673_v34 = vpop.f32.mrf.mxu1  ;;  %v2416_v33 = vadd.f32 %v2415_v31, %v5402_v62  ;;  %v5445_v20 = vadd.f32 %v7335_v17, %v5122_v5  ;;  %v218_v31 = vpack.c.bf16 %v185_v14, %v184_v56 }
 0x216   :  { %v5410_v2 = vadd.f32 %v673_v34, %v4245_v40  ;;  %v2305_v6 = vadd.f32 %v2304_v18, %v7333_v25  ;;  %v2391_v62 = vadd.f32 %v2299_v30, %v2195_v10 }
 0x217   :  { %v1002_v44 = vrot.slane %v5398_v11, 7  ;;  %v1195_v48 = vrot.slane %v5398_v11, 1  ;;  %v5418_v29 = vsel %vm122_vm3, %v5398_v11, %v1389_v22  ;;  %v7332_v22 = vld [vmem:[#allocation50_spill] sm:$0xff]  ;;  %7336 = vst [vmem:[#allocation52_spill] sm:$0xff] %v5445_v20 }
 0x218   :  { %v2033_v34 = vsel %vm123_vm2, %v5405_v9, %v5410_v2  ;;  %v2201_v37 = vadd.f32 %v2200_v59, %v7332_v22  ;;  %v2410_v59 = vrot.slane %v5377_v63, 1  ;;  %v1842_v18 = vrot.slane %v5410_v2, 1 }
 0x219   :  { %v2097_v32 = vsel %vm122_vm3, %v1969_v60, %v2033_v34  ;;  %v1131_v12 = vsel %vm1087_vm0, %v5398_v11, %v1002_v44  ;;  %v1324_v24 = vsel %vm1280_vm1, %v1195_v48, %v5398_v11  ;;  %v1650_v17 = vrot.slane %v5410_v2, 7  ;;  %v7339_v48 = vld [vmem:[#allocation54_spill] sm:$0xff] }
 0x21a   :  { %v5441_v7 = vsel %vm121_vm4, %v1777_v36, %v2097_v32  ;;  %v2417_v36 = vadd.f32 %v2416_v33, %v5430_v46  ;;  %v7338_v32 = vld [vmem:[#allocation53_spill] sm:$0xff]  ;;  %v2306_v47 = vadd.f32 %v2305_v6, %v7339_v48  ;;  %v1390_v56 = vsel %vm123_vm2, %v1131_v12, %v1324_v24  ;;  %v7348_v48 = vld [vmem:[#allocation60_spill] sm:$0xff] }
 0x21b   :  { %7334 = vst [vmem:[#allocation132_spill] sm:$0xff] %v5441_v7  ;;  %v2202_v25 = vadd.f32 %v2201_v37, %v7338_v32  ;;  %v1970_v6 = vsel %vm1280_vm1, %v1842_v18, %v5410_v2  ;;  %v1778_v24 = vsel %vm1087_vm0, %v5410_v2, %v1650_v17  ;;  %v2411_v18 = vadd.f32 %v2410_v59, %v5377_v63 }
 0x21c   :  { %v5451_v60 = vpop.f32.mrf.mxu2  ;;  %v507_v34 = vpop.f32.mrf.mxu0  ;;  %v2418_v1 = vadd.f32 %v2417_v36, %v5445_v20 }
 0x21d   :  { %7337 = vst [vmem:[#allocation133_spill] sm:$0xff] %v5451_v60  ;;  %v5459_v22 = vadd.f32 %v507_v34, %v4243_v35  ;;  %v676_v44 = vpop.f32.mrf.mxu1  ;;  %v2203_v12 = vrot.slane %v2202_v25, 4 }
 0x21e   :  { %v5465_v14 = vadd.f32 %v676_v44, %v4245_v40  ;;  %v2307_v44 = vrot.slane %v2306_v47, 4  ;;  %v2419_v63 = vrot.slane %v2418_v1, 4 }
 0x21f   :  { %v1003_v33 = vrot.slane %v5459_v22, 7  ;;  %v1196_v37 = vrot.slane %v5459_v22, 1  ;;  %v1456_v34 = vsel %vm122_vm3, %v5459_v22, %v1390_v56  ;;  %546 = vmatmul.bf16.gmra.mxu0 %v218_v31  ;;  %v7342_v56 = vld [vmem:[#allocation57_spill] sm:$0xff] }
 0x220   :  { %v5478_v30 = vsel %vm121_vm4, %v5340_v0, %v1456_v34  ;;  %v2034_v10 = vsel %vm123_vm2, %v5350_v42, %v5465_v14  ;;  %715 = vmatmul.bf16.gmra.mxu1 %v218_v31  ;;  %v5495_v34 = vadd.f32 %v7342_v56, %v5122_v5  ;;  %v1843_v59 = vrot.slane %v5465_v14, 1 }
 0x221   :  { %7340 = vst [vmem:[#allocation134_spill] sm:$0xff] %v5478_v30  ;;  %884 = vmatmul.bf16.gmra.mxu2 %v218_v31  ;;  %v2098_v36 = vsel %vm122_vm3, %v1970_v6, %v2034_v10  ;;  %v1132_v42 = vsel %vm1087_vm0, %v5459_v22, %v1003_v33  ;;  %v1325_v31 = vsel %vm1280_vm1, %v1196_v37, %v5459_v22  ;;  %v1651_v56 = vrot.slane %v5465_v14, 7 }
 0x222   :  { %v5491_v0 = vsel %vm121_vm4, %v1778_v24, %v2098_v36  ;;  %7343 = vst [vmem:[#allocation57_spill] sm:$0xff] %v5495_v34  ;;  %v5503_v6 = vadd.f32 %v2411_v18, %v2391_v62  ;;  %v2204_v24 = vadd.f32 %v2203_v12, %v2202_v25  ;;  %v7346_v36 = vld [vmem:[#allocation55_spill] sm:$0xff]  ;;  %v2308_v37 = vadd.f32 %v2307_v44, %v2306_v47  ;;  %v7350_v44 = vld [vmem:[#allocation56_spill] sm:$0xff] }
 0x223   :  { %7341 = vst [vmem:[#allocation135_spill] sm:$0xff] %v5491_v0  ;;  %v5508_v20 = vadd.f32 %v7346_v36, %v5122_v5  ;;  %v5516_v62 = vadd.f32 %v7348_v48, %v5122_v5  ;;  %v1391_v18 = vsel %vm123_vm2, %v1132_v42, %v1325_v31  ;;  %v7351_v48 = vld [vmem:[#allocation59_spill] sm:$0xff]  ;;  %v1971_v42 = vsel %vm1280_vm1, %v1843_v59, %v5465_v14 }
 0x224   :  { %v5501_v17 = vpop.f32.mrf.mxu2  ;;  %7345 = vst [vmem:[#allocation137_spill] sm:$0xff] %v5503_v6  ;;  %v509_v10 = vpop.f32.mrf.mxu0  ;;  %v2209_v32 = vadd.f32 %v7351_v48, %v7350_v44  ;;  %v7355_v48 = vld [vmem:[#allocation64_spill] sm:$0xff]  ;;  %v1779_v59 = vsel %vm1087_vm0, %v5465_v14, %v1651_v56 }
 0x225   :  { %7344 = vst [vmem:[#allocation136_spill] sm:$0xff] %v5501_v17  ;;  %v5512_v33 = vadd.f32 %v509_v10, %v4243_v35  ;;  %v678_v46 = vpop.f32.mrf.mxu1  ;;  %v2425_v12 = vadd.f32 %v5495_v34, %v5508_v20  ;;  %v186_v34 = vld [vmem:[#allocation2 + $0x1f0] sm:$0xff]  ;;  %v5547_v44 = vadd.f32 %v7355_v48, %v5122_v5 }
 0x226   :  { %7347 = vst [vmem:[#allocation55_spill] sm:$0xff] %v5508_v20  ;;  %v5521_v25 = vadd.f32 %v678_v46, %v4245_v40  ;;  %v187_v20 = vld [vmem:[#allocation2 + $0x1f8] sm:$0xff] }
 0x227   :  { %7349 = vst [vmem:[#allocation60_spill] sm:$0xff] %v5516_v62  ;;  %v1004_v36 = vrot.slane %v5512_v33, 7  ;;  %v1197_v10 = vrot.slane %v5512_v33, 1  ;;  %v1457_v47 = vsel %vm122_vm3, %v5512_v33, %v1391_v18  ;;  %v7354_v18 = vld [vmem:[#allocation61_spill] sm:$0xff]  ;;  %v2426_v6 = vadd.f32 %v2425_v12, %v5516_v62 }
 0x228   :  { %v5537_v46 = vsel %vm121_vm4, %v5398_v11, %v1457_v47  ;;  %v2035_v31 = vsel %vm123_vm2, %v5410_v2, %v5521_v25  ;;  %v2313_v61 = vadd.f32 %v7354_v18, %v7353_v3  ;;  %7356 = vst [vmem:[#allocation64_spill] sm:$0xff] %v5547_v44  ;;  %v5553_v47 = vadd.f32 %v2419_v63, %v2418_v1  ;;  %v7357_v2 = vld [vmem:[#allocation62_spill] sm:$0xff]  ;;  %v7359_v18 = vld [vmem:[#allocation63_spill] sm:$0xff]  ;;  %v7361_v12 = vld [vmem:[#allocation65_spill] sm:$0xff] }
 0x229   :  { %7352 = vst [vmem:[#allocation138_spill] sm:$0xff] %v5537_v46  ;;  %v2099_v11 = vsel %vm122_vm3, %v1971_v42, %v2035_v31  ;;  %v2210_v46 = vadd.f32 %v2209_v32, %v7357_v2  ;;  %v1133_v48 = vsel %vm1087_vm0, %v5512_v33, %v1004_v36  ;;  %v1326_v56 = vsel %vm1280_vm1, %v1197_v10, %v5512_v33  ;;  %v7363_v2 = vld [vmem:[#allocation67_spill] sm:$0xff] }
 0x22a   :  { %v5559_v17 = vsel %vm121_vm4, %v1779_v59, %v2099_v11  ;;  %v2314_v3 = vadd.f32 %v2313_v61, %v7359_v18  ;;  %v219_v1 = vpack.c.bf16 %v187_v20, %v186_v34  ;;  %v2205_v63 = vrot.slane %v2204_v24, 2  ;;  %v7362_v11 = vld [vmem:[#allocation66_spill] sm:$0xff]  ;;  %v7365_v34 = vld [vmem:[#allocation68_spill] sm:$0xff] }
 0x22b   :  { %7358 = vst [vmem:[#allocation139_spill] sm:$0xff] %v5559_v17  ;;  %v2309_v42 = vrot.slane %v2308_v37, 2  ;;  %v2211_v31 = vadd.f32 %v2210_v46, %v7361_v12  ;;  %v1844_v32 = vrot.slane %v5521_v25, 1  ;;  %v2427_v59 = vadd.f32 %v2426_v6, %v5547_v44  ;;  %v7366_v6 = vld [vmem:[#allocation70_spill] sm:$0xff]  ;;  %v3933_v17 = vld [vmem:[#allocation10 + $0x68] sm:$0xf0] }
 0x22c   :  { %v5566_v0 = vpop.f32.mrf.mxu2  ;;  %v512_v62 = vpop.f32.mrf.mxu0  ;;  %v2315_v61 = vadd.f32 %v2314_v3, %v7362_v11  ;;  %v1652_v18 = vrot.slane %v5521_v25, 7  ;;  %v5578_v20 = vadd.f32 %v7363_v2, %v5122_v5  ;;  %v1392_v46 = vsel %vm123_vm2, %v1133_v48, %v1326_v56 }
 0x22d   :  { %7360 = vst [vmem:[#allocation140_spill] sm:$0xff] %v5566_v0  ;;  %v5574_v36 = vadd.f32 %v512_v62, %v4243_v35  ;;  %v681_v10 = vpop.f32.mrf.mxu1  ;;  %v2212_v0 = vadd.f32 %v2211_v31, %v7365_v34  ;;  %v5586_v3 = vadd.f32 %v7366_v6, %v5122_v5  ;;  %v1972_v48 = vsel %vm1280_vm1, %v1844_v32, %v5521_v25 }
 0x22e   :  { %7364 = vst [vmem:[#allocation67_spill] sm:$0xff] %v5578_v20  ;;  %v682_v12 = vadd.f32 %v681_v10, %v4245_v40  ;;  %v5604_v6 = vadd.f32 %v2205_v63, %v2204_v24  ;;  %v1780_v31 = vsel %vm1087_vm0, %v5521_v25, %v1652_v18  ;;  %v2428_v11 = vadd.f32 %v2427_v59, %v5578_v20  ;;  %v7372_v24 = vld [vmem:[#allocation72_spill] sm:$0xff]  ;;  %v3932_v20 = vld [vmem:[#allocation10 + $0x64] sm:$0xf] }
 0x22f   :  { %7367 = vst [vmem:[#allocation70_spill] sm:$0xff] %v5586_v3  ;;  %v1005_v44 = vrot.slane %v5574_v36, 7  ;;  %v1198_v62 = vrot.slane %v5574_v36, 1  ;;  %v1458_v2 = vsel %vm122_vm3, %v5574_v36, %v1392_v46  ;;  %551 = vmatmul.bf16.gmra.mxu0 %v219_v1  ;;  %v7369_v46 = vld [vmem:[#allocation69_spill] sm:$0xff] }
 0x230   :  { %v5599_v56 = vsel %vm121_vm4, %v5459_v22, %v1458_v2  ;;  %v2036_v10 = vsel %vm123_vm2, %v5465_v14, %v682_v12  ;;  %720 = vmatmul.bf16.gmra.mxu1 %v219_v1  ;;  %v2316_v34 = vadd.f32 %v2315_v61, %v7369_v46  ;;  %v7370_v22 = vld [vmem:[#allocation71_spill] sm:$0xff]  ;;  %v2429_v59 = vadd.f32 %v2428_v11, %v5586_v3  ;;  %v7380_v3 = vld [vmem:[#allocation81_spill] sm:$0xff] }
 0x231   :  { %7368 = vst [vmem:[#allocation141_spill] sm:$0xff] %v5599_v56  ;;  %889 = vmatmul.bf16.gmra.mxu2 %v219_v1  ;;  %v2100_v32 = vsel %vm122_vm3, %v1972_v48, %v2036_v10  ;;  %v2213_v2 = vadd.f32 %v2212_v0, %v7370_v22  ;;  %v1653_v56 = vrot.slane %v682_v12, 7  ;;  %v5617_v1 = vadd.f32 %v2309_v42, %v2308_v37  ;;  %v7374_v0 = vld [vmem:[#allocation73_spill] sm:$0xff]  ;;  %v7377_v37 = vld [vmem:[#allocation76_spill] sm:$0xff] }
 0x232   :  { %v5615_v14 = vsel %vm121_vm4, %v1780_v31, %v2100_v32  ;;  %v2317_v63 = vadd.f32 %v2316_v34, %v7372_v24  ;;  %v1134_v61 = vsel %vm1087_vm0, %v5574_v36, %v1005_v44  ;;  %v1327_v18 = vsel %vm1280_vm1, %v1198_v62, %v5574_v36  ;;  %v7376_v31 = vld [vmem:[#allocation74_spill] sm:$0xff]  ;;  %v3812_v44 = vld [vmem:[#allocation10 + $0x6c] sm:$0xf0]  ;;  %v7379_v24 = vld [vmem:[#allocation75_spill] sm:$0xff] }
 0x233   :  { %7371 = vst [vmem:[#allocation142_spill] sm:$0xff] %v5615_v14  ;;  %v5629_v10 = vadd.f32 %v7374_v0, %v5122_v5  ;;  %v2214_v32 = vadd.f32 %v2213_v2, %v7376_v31  ;;  %v5634_v42 = vadd.f32 %v7377_v37, %v5122_v5  ;;  %v1845_v62 = vrot.slane %v682_v12, 1  ;;  %v3810_v14 = vld [vmem:[#allocation10 + $0x60] sm:$0xf] }
 0x234   :  { %v5624_v48 = vpop.f32.mrf.mxu2  ;;  %v514_v34 = vpop.f32.mrf.mxu0  ;;  %v2318_v46 = vadd.f32 %v2317_v63, %v7379_v24  ;;  %v3815_v11 = vor.u32 %v3932_v20, %v3812_v44  ;;  %v5640_v0 = vadd.f32 %v7380_v3, %v5122_v5  ;;  %v1781_v2 = vsel %vm1087_vm0, %v682_v12, %v1653_v56 }
 0x235   :  { %7373 = vst [vmem:[#allocation143_spill] sm:$0xff] %v5624_v48  ;;  %v515_v22 = vadd.f32 %v514_v34, %v4243_v35  ;;  %v683_v48 = vpop.f32.mrf.mxu1  ;;  %v1393_v37 = vsel %vm123_vm2, %v1134_v61, %v1327_v18  ;;  %v3811_v20 = vor.u32 %v3933_v17, %v3810_v14  ;;  %v1973_v18 = vsel %vm1280_vm1, %v1845_v62, %v682_v12 }
 0x236   :  { %7375 = vst [vmem:[#allocation73_spill] sm:$0xff] %v5629_v10  ;;  %v684_v31 = vadd.f32 %v683_v48, %v4245_v40  ;;  %2845 = vmatpush.bf16.msrb.mxu2 %v3815_v11 }
 0x237   :  { %7378 = vst [vmem:[#allocation76_spill] sm:$0xff] %v5634_v42  ;;  %v1006_v30 = vrot.slane %v515_v22, 7  ;;  %v1199_v63 = vrot.slane %v515_v22, 1  ;;  %v1459_v34 = vsel %vm122_vm3, %v515_v22, %v1393_v37  ;;  %2832 = vmatpush.bf16.msrb.mxu1 %v3811_v20  ;;  %v7383_v37 = vld [vmem:[#allocation77_spill] sm:$0xff]  ;;  %v7386_v20 = vld [vmem:[#allocation78_spill] sm:$0xff] }
 0x238   :  { %7381 = vst [vmem:[#allocation81_spill] sm:$0xff] %v5640_v0  ;;  %v5651_v3 = vsel %vm121_vm4, %v5512_v33, %v1459_v34  ;;  %v1654_v56 = vrot.slane %v684_v31, 7  ;;  %v1846_v44 = vrot.slane %v684_v31, 1  ;;  %v2037_v61 = vsel %vm123_vm2, %v5521_v25, %v684_v31  ;;  %v3913_v34 = vld [vmem:[#allocation8 + $0x8] sm:$0xff] }
 0x239   :  { %7382 = vst [vmem:[#allocation144_spill] sm:$0xff] %v5651_v3  ;;  %v1135_v48 = vsel %vm1087_vm0, %v515_v22, %v1006_v30  ;;  %v1328_v24 = vsel %vm1280_vm1, %v1199_v63, %v515_v22  ;;  %v2038_v17 = vsel %vm123_vm2, %v682_v12, %v684_v31  ;;  %v2101_v25 = vsel %vm122_vm3, %v1973_v18, %v2037_v61  ;;  %v7404_v3 = vld [vmem:[#allocation90_spill] sm:$0xff] }
 0x23a   :  { %v1394_v33 = vsel %vm123_vm2, %v1135_v48, %v1328_v24  ;;  %v1782_v14 = vsel %vm1087_vm0, %v684_v31, %v1654_v56  ;;  %v1974_v11 = vsel %vm1280_vm1, %v1846_v44, %v684_v31  ;;  %v2215_v62 = vadd.f32 %v2214_v32, %v7383_v37  ;;  %v7387_v56 = vld [vmem:[#allocation79_spill] sm:$0xff]  ;;  %v7392_v48 = vld [vmem:[#allocation84_spill] sm:$0xff]  ;;  %2621 = vmatpush.bf16.msrb.mxu0 %v3913_v34 }
 0x23b   :  { %v1460_v30 = vsel %vm122_vm3, %v515_v22, %v1394_v33  ;;  %v2102_v63 = vsel %vm122_vm3, %v1974_v11, %v2038_v17  ;;  %v5674_v12 = vsel %vm121_vm4, %v1781_v2, %v2101_v25  ;;  %v2319_v31 = vadd.f32 %v2318_v46, %v7386_v20 }
 0x23c   :  { %7384 = vst [vmem:[#allocation145_spill] sm:$0xff] %v5674_v12  ;;  %v5676_v24 = vpop.f32.mrf.mxu2  ;;  %v5681_v44 = vadd.f32 %v7387_v56, %v5122_v5  ;;  %v5686_v22 = vsel %vm121_vm4, %v5574_v36, %v1460_v30  ;;  %v5690_v32 = vsel %vm121_vm4, %v1782_v14, %v2102_v63  ;;  %v517_v2 = vpop.f32.mrf.mxu0  ;;  %v2207_v61 = vrot.slane %v5604_v6, 1  ;;  %v7394_v30 = vld [vmem:[#allocation82_spill] sm:$0xff]  ;;  %v7395_v63 = vld [vmem:[#allocation85_spill] sm:$0xff]  ;;  %v7396_v56 = vld [vmem:[#allocation80_spill] sm:$0xff] }
 0x23d   :  { %7385 = vst [vmem:[#allocation146_spill] sm:$0xff] %v5676_v24  ;;  %v7391_v18 = vrot.slane %v5553_v47, 2  ;;  %v5700_v17 = vadd.f32 %v7392_v48, %v5122_v5  ;;  %v5703_v33 = vadd.f32 %v517_v2, %v4243_v35  ;;  %v686_v36 = vpop.f32.mrf.mxu1  ;;  %v2311_v14 = vrot.slane %v5617_v1, 1  ;;  %v7398_v48 = vld [vmem:[#allocation88_spill] sm:$0xff] }
 0x23e   :  { %7388 = vst [vmem:[#allocation79_spill] sm:$0xff] %v5681_v44  ;;  %v2430_v11 = vadd.f32 %v2429_v59, %v5629_v10  ;;  %v2438_v25 = vadd.f32 %v5640_v0, %v5681_v44  ;;  %v5715_v37 = vadd.f32 %v7398_v48, %v5122_v5  ;;  %v7400_v10 = vld [vmem:[#allocation87_spill] sm:$0xff]  ;;  %v2208_v24 = vadd.f32 %v2207_v61, %v5604_v6  ;;  %v7405_v44 = vld [vmem:[#allocation89_spill] sm:$0xff] }
 0x23f   :  { %7389 = vst [vmem:[#allocation147_spill] sm:$0xff] %v5686_v22  ;;  %v5696_v46 = vadd.f32 %v7391_v18, %v5553_v47  ;;  %v2326_v47 = vadd.f32 %v7395_v63, %v7394_v30  ;;  %v7397_v18 = vld [vmem:[#allocation83_spill] sm:$0xff]  ;;  %v1007_v2 = vrot.slane %v5703_v33, 7  ;;  %v1200_v34 = vrot.slane %v5703_v33, 1  ;;  %v7401_v30 = vld [vmem:[#allocation86_spill] sm:$0xff] }
 0x240   :  { %7390 = vst [vmem:[#allocation148_spill] sm:$0xff] %v5690_v32  ;;  %v2222_v20 = vadd.f32 %v7397_v18, %v7396_v56  ;;  %v2216_v32 = vrot.slane %v2215_v62, 4  ;;  %v2320_v22 = vrot.slane %v2319_v31, 4  ;;  %v2431_v59 = vadd.f32 %v2430_v11, %v5634_v42  ;;  %v7402_v56 = vld [vmem:[#allocation91_spill] sm:$0xff] }
 0x241   :  { %7393 = vst [vmem:[#allocation84_spill] sm:$0xff] %v5700_v17  ;;  %v2327_v0 = vadd.f32 %v2326_v47, %v7400_v10  ;;  %v2439_v63 = vadd.f32 %v2438_v25, %v5700_v17  ;;  %v5726_v48 = vadd.f32 %v7402_v56, %v5122_v5  ;;  %v2312_v12 = vadd.f32 %v2311_v14, %v5617_v1  ;;  %v7406_v14 = vld [vmem:[#allocation93_spill] sm:$0xff] }
 0x242   :  { %7399 = vst [vmem:[#allocation88_spill] sm:$0xff] %v5715_v37  ;;  %v2223_v18 = vadd.f32 %v2222_v20, %v7401_v30  ;;  %v5732_v11 = vadd.f32 %v686_v36, %v4245_v40  ;;  %v1136_v20 = vsel %vm1087_vm0, %v5703_v33, %v1007_v2  ;;  %v1329_v25 = vsel %vm1280_vm1, %v1200_v34, %v5703_v33 }
 0x243   :  { %7403 = vst [vmem:[#allocation91_spill] sm:$0xff] %v5726_v48  ;;  %v2328_v60 = vadd.f32 %v2327_v0, %v7404_v3  ;;  %v2440_v47 = vadd.f32 %v2439_v63, %v5715_v37  ;;  %v2217_v6 = vadd.f32 %v2216_v32, %v2215_v62  ;;  %v2321_v61 = vadd.f32 %v2320_v22, %v2319_v31  ;;  %v7407_v3 = vld [vmem:[#allocation92_spill] sm:$0xff] }
 0x244   :  { %v2224_v10 = vadd.f32 %v2223_v18, %v7405_v44  ;;  %v5740_v56 = vpop.f32.mrf.mxu2  ;;  %v2432_v1 = vrot.slane %v2431_v59, 4  ;;  %v519_v17 = vpop.f32.mrf.mxu0  ;;  %v7408_v18 = vld [vmem:[#allocation94_spill] sm:$0xff]  ;;  %v7410_v44 = vld [vmem:[#allocation96_spill] sm:$0xff]  ;;  %v1847_v62 = vrot.slane %v5732_v11, 1 }
 0x245   :  { %v2329_v0 = vadd.f32 %v2328_v60, %v7406_v14  ;;  %v2441_v36 = vadd.f32 %v2440_v47, %v5726_v48  ;;  %v5747_v37 = vadd.f32 %v7408_v18, %v5122_v5  ;;  %v5750_v2 = vadd.f32 %v519_v17, %v4243_v35  ;;  %v688_v34 = vpop.f32.mrf.mxu1  ;;  %v7412_v48 = vld [vmem:[#allocation97_spill] sm:$0xff] }
 0x246   :  { %v2225_v63 = vadd.f32 %v2224_v10, %v7407_v3  ;;  %v1395_v60 = vsel %vm123_vm2, %v1136_v20, %v1329_v25  ;;  %v5757_v31 = vadd.f32 %v688_v34, %v4245_v40  ;;  %v1655_v10 = vrot.slane %v5732_v11, 7 }
 0x247   :  { %7409 = vst [vmem:[#allocation94_spill] sm:$0xff] %v5747_v37  ;;  %v2330_v30 = vadd.f32 %v2329_v0, %v7410_v44  ;;  %v1008_v22 = vrot.slane %v5750_v2, 7  ;;  %v1201_v32 = vrot.slane %v5750_v2, 1  ;;  %v1461_v17 = vsel %vm122_vm3, %v5750_v2, %v1395_v60  ;;  %v7411_v0 = vld [vmem:[#allocation95_spill] sm:$0xff] }
 0x248   :  { %v2218_v47 = vrot.slane %v2217_v6, 2  ;;  %v2226_v18 = vadd.f32 %v2225_v63, %v7411_v0  ;;  %v5768_v44 = vadd.f32 %v7412_v48, %v5122_v5  ;;  %v5773_v20 = vsel %vm121_vm4, %v5703_v33, %v1461_v17 }
 0x249   :  { %7414 = vst [vmem:[#allocation149_spill] sm:$0xff] %v5773_v20  ;;  %v2392_v25 = vadd.f32 %v2312_v12, %v2208_v24  ;;  %v2433_v34 = vadd.f32 %v2432_v1, %v2431_v59  ;;  %v2442_v14 = vadd.f32 %v2441_v36, %v5747_v37  ;;  %v2331_v3 = vadd.f32 %v2330_v30, %v5008_v45  ;;  %v7417_v45 = vld [vmem:[#allocation100_spill] sm:$0xff] }
 0x24a   :  { %7413 = vst [vmem:[#allocation97_spill] sm:$0xff] %v5768_v44  ;;  %v2227_v60 = vadd.f32 %v2226_v18, %v4987_v15  ;;  %v5780_v63 = vadd.f32 %v5010_v21, %v5122_v5  ;;  %v1975_v48 = vsel %vm1280_vm1, %v1847_v62, %v5732_v11  ;;  %v2039_v17 = vsel %vm123_vm2, %v5732_v11, %v5757_v31 }
 0x24b   :  { %v1783_v12 = vsel %vm1087_vm0, %v5732_v11, %v1655_v10  ;;  %v1137_v24 = vsel %vm1087_vm0, %v5750_v2, %v1008_v22  ;;  %v1330_v30 = vsel %vm1280_vm1, %v1201_v32, %v5750_v2  ;;  %v2103_v21 = vsel %vm122_vm3, %v1975_v48, %v2039_v17  ;;  %v7418_v22 = vld [vmem:[#allocation101_spill] sm:$0xff] }
 0x24c   :  { %7415 = vst [vmem:[#allocation150_spill] sm:$0xff] %v5780_v63  ;;  %v5796_v59 = vpop.f32.mrf.mxu2  ;;  %v2219_v1 = vadd.f32 %v2218_v47, %v2217_v6  ;;  %v2322_v36 = vrot.slane %v2321_v61, 2  ;;  %v2443_v62 = vadd.f32 %v2442_v14, %v5768_v44  ;;  %v5801_v18 = vsel %vm121_vm4, %v1783_v12, %v2103_v21  ;;  %v522_v10 = vpop.f32.mrf.mxu0 }
 0x24d   :  { %7416 = vst [vmem:[#allocation151_spill] sm:$0xff] %v5801_v18  ;;  %v2228_v15 = vadd.f32 %v2227_v60, %v7417_v45  ;;  %v2332_v37 = vadd.f32 %v2331_v3, %v7418_v22  ;;  %v1848_v32 = vrot.slane %v5757_v31, 1  ;;  %v5807_v0 = vadd.f32 %v522_v10, %v4243_v35  ;;  %v691_v48 = vpop.f32.mrf.mxu1 }
 0x24e   :  { %v2444_v6 = vadd.f32 %v2443_v62, %v5780_v63  ;;  %v1656_v47 = vrot.slane %v5757_v31, 7  ;;  %v1396_v14 = vsel %vm123_vm2, %v1137_v24, %v1330_v30  ;;  %v5814_v17 = vadd.f32 %v691_v48, %v4245_v40 }
 0x24f   :  { %v2434_v12 = vrot.slane %v2433_v34, 2  ;;  %v1009_v60 = vrot.slane %v5807_v0, 7  ;;  %v1202_v3 = vrot.slane %v5807_v0, 1  ;;  %v1462_v21 = vsel %vm122_vm3, %v5807_v0, %v1396_v14 }
 0x250   :  { %v7419_v62 = vrot.slane %v5696_v46, 1  ;;  %v2220_v63 = vrot.slane %v2219_v1, 1  ;;  %v2323_v44 = vadd.f32 %v2322_v36, %v2321_v61  ;;  %v5827_v24 = vsel %vm121_vm4, %v5703_v33, %v1462_v21 }
 0x251   :  { %7420 = vst [vmem:[#allocation152_spill] sm:$0xff] %v5827_v24  ;;  %v2229_v30 = vrot.slane %v2228_v15, 4  ;;  %v2333_v48 = vrot.slane %v2332_v37, 4  ;;  %v1976_v22 = vsel %vm1280_vm1, %v1848_v32, %v5757_v31  ;;  %v2040_v14 = vsel %vm123_vm2, %v5732_v11, %v5814_v17 }
 0x252   :  { %v2424_v10 = vadd.f32 %v7419_v62, %v5696_v46  ;;  %v2445_v46 = vrot.slane %v2444_v6, 4  ;;  %v1784_v61 = vsel %vm1087_vm0, %v5757_v31, %v1656_v47  ;;  %v2104_v33 = vsel %vm122_vm3, %v1976_v22, %v2040_v14 }
 0x253   :  { %v5841_v36 = vadd.f32 %v2434_v12, %v2433_v34  ;;  %v1138_v21 = vsel %vm1087_vm0, %v5807_v0, %v1009_v60  ;;  %v1331_v32 = vsel %vm1280_vm1, %v1202_v3, %v5807_v0  ;;  %v5849_v11 = vsel %vm121_vm4, %v1784_v61, %v2104_v33 }
 0x254   :  { %v5835_v45 = vadd.f32 %v2424_v10, %v2392_v25  ;;  %7423 = vst [vmem:[#allocation155_spill] sm:$0xff] %v5849_v11  ;;  %v5851_v25 = vpop.f32.mrf.mxu2  ;;  %v5853_v62 = vadd.f32 %v2220_v63, %v2219_v1  ;;  %v2324_v47 = vrot.slane %v2323_v44, 1  ;;  %v7425_v10 = vld [vmem:[#allocation104_spill] sm:$0xff]  ;;  %v1849_v34 = vrot.slane %v5814_v17, 1  ;;  %v524_v12 = vpop.f32.mrf.mxu0  ;;  %v7427_v63 = vld [vmem:[#allocation102_spill] sm:$0xff] }
 0x255   :  { %7422 = vst [vmem:[#allocation154_spill] sm:$0xff] %v5841_v36  ;;  %v5857_v22 = vadd.f32 %v7425_v10, %v5122_v5  ;;  %v2230_v60 = vadd.f32 %v2229_v30, %v2228_v15  ;;  %v5860_v14 = vadd.f32 %v2333_v48, %v2332_v37  ;;  %v1657_v3 = vrot.slane %v5814_v17, 7  ;;  %v693_v33 = vpop.f32.mrf.mxu1  ;;  %v7429_v15 = vld [vmem:[#allocation107_spill] sm:$0xff]  ;;  %v7437_v36 = vld [vmem:[#allocation108_spill] sm:$0xff] }
 0x256   :  { %7421 = vst [vmem:[#allocation153_spill] sm:$0xff] %v5835_v45  ;;  %v5864_v61 = vadd.f32 %v524_v12, %v4243_v35  ;;  %v5866_v42 = vadd.f32 %v2445_v46, %v2444_v6  ;;  %v5870_v1 = vadd.f32 %v7427_v63, %v5122_v5  ;;  %v1397_v10 = vsel %vm123_vm2, %v1138_v21, %v1331_v32  ;;  %v7433_v63 = vld [vmem:[#allocation106_spill] sm:$0xff] }
 0x257   :  { %7424 = vst [vmem:[#allocation156_spill] sm:$0xff] %v5853_v62  ;;  %v5875_v45 = vadd.f32 %v693_v33, %v4245_v40  ;;  %v5879_v37 = vadd.f32 %v7429_v15, %v5122_v5  ;;  %v1977_v21 = vsel %vm1280_vm1, %v1849_v34, %v5814_v17  ;;  %v7432_v33 = vld [vmem:[#allocation103_spill] sm:$0xff]  ;;  %v1785_v34 = vsel %vm1087_vm0, %v5814_v17, %v1657_v3 }
 0x258   :  { %7426 = vst [vmem:[#allocation104_spill] sm:$0xff] %v5857_v22  ;;  %v1010_v30 = vrot.slane %v5864_v61, 7  ;;  %v1203_v48 = vrot.slane %v5864_v61, 1  ;;  %v1463_v6 = vsel %vm122_vm3, %v5864_v61, %v1397_v10  ;;  %v2451_v46 = vadd.f32 %v5857_v22, %v5870_v1 }
 0x259   :  { %7428 = vst [vmem:[#allocation102_spill] sm:$0xff] %v5870_v1  ;;  %v5893_v32 = vsel %vm121_vm4, %v5750_v2, %v1463_v6  ;;  %v2041_v12 = vsel %vm123_vm2, %v5757_v31, %v5875_v45  ;;  %v2235_v15 = vadd.f32 %v7433_v63, %v7432_v33  ;;  %v5903_v10 = vadd.f32 %v5096_v58, %v5122_v5  ;;  %v7436_v1 = vld [vmem:[#allocation105_spill] sm:$0xff] }
 0x25a   :  { %7430 = vst [vmem:[#allocation107_spill] sm:$0xff] %v5879_v37  ;;  %v2105_v22 = vsel %vm122_vm3, %v1977_v21, %v2041_v12  ;;  %v5909_v2 = vadd.f32 %v2324_v47, %v2323_v44  ;;  %v2231_v6 = vrot.slane %v2230_v60, 2  ;;  %v2339_v62 = vadd.f32 %v7437_v36, %v7436_v1  ;;  %v7439_v58 = vld [vmem:[#allocation109_spill] sm:$0xff]  ;;  %v7441_v1 = vld [vmem:[#allocation112_spill] sm:$0xff] }
 0x25b   :  { %7431 = vst [vmem:[#allocation157_spill] sm:$0xff] %v5893_v32  ;;  %v5915_v31 = vsel %vm121_vm4, %v1785_v34, %v2105_v22  ;;  %v2452_v63 = vadd.f32 %v2451_v46, %v5879_v37  ;;  %v2236_v33 = vadd.f32 %v2235_v15, %v7439_v58  ;;  %v1139_v3 = vsel %vm1087_vm0, %v5864_v61, %v1010_v30  ;;  %v7440_v15 = vld [vmem:[#allocation111_spill] sm:$0xff]  ;;  %v7442_v47 = vld [vmem:[#allocation113_spill] sm:$0xff] }
 0x25c   :  { %7434 = vst [vmem:[#allocation158_spill] sm:$0xff] %v5903_v10  ;;  %v1332_v21 = vsel %vm1280_vm1, %v1203_v48, %v5864_v61  ;;  %v5923_v44 = vpop.f32.mrf.mxu2  ;;  %v2340_v36 = vadd.f32 %v2339_v62, %v5092_v55  ;;  %v1850_v22 = vrot.slane %v5875_v45, 1  ;;  %v527_v34 = vpop.f32.mrf.mxu0  ;;  %v1658_v30 = vrot.slane %v5875_v45, 7 }
 0x25d   :  { %7435 = vst [vmem:[#allocation159_spill] sm:$0xff] %v5909_v2  ;;  %v2453_v46 = vadd.f32 %v2452_v63, %v5903_v10  ;;  %v2237_v37 = vadd.f32 %v2236_v33, %v7440_v15  ;;  %v5933_v58 = vadd.f32 %v527_v34, %v4243_v35  ;;  %v696_v48 = vpop.f32.mrf.mxu1  ;;  %v5938_v12 = vadd.f32 %v7442_v47, %v5122_v5 }
 0x25e   :  { %7438 = vst [vmem:[#allocation160_spill] sm:$0xff] %v5915_v31  ;;  %v2341_v2 = vadd.f32 %v2340_v36, %v7441_v1  ;;  %v1398_v62 = vsel %vm123_vm2, %v1139_v3, %v1332_v21  ;;  %v5943_v55 = vadd.f32 %v696_v48, %v4245_v40  ;;  %v5953_v47 = vadd.f32 %v5194_v4, %v5122_v5 }
 0x25f   :  { %7443 = vst [vmem:[#allocation111_spill] sm:$0xff] %v5938_v12  ;;  %v2238_v33 = vadd.f32 %v2237_v37, %v5167_v27  ;;  %v1011_v63 = vrot.slane %v5933_v58, 7  ;;  %v1204_v34 = vrot.slane %v5933_v58, 1  ;;  %v1464_v36 = vsel %vm122_vm3, %v5933_v58, %v1398_v62 }
 0x260   :  { %7444 = vst [vmem:[#allocation112_spill] sm:$0xff] %v5953_v47  ;;  %v1978_v3 = vsel %vm1280_vm1, %v1850_v22, %v5875_v45  ;;  %v5960_v21 = vsel %vm121_vm4, %v5807_v0, %v1464_v36  ;;  %v2042_v37 = vsel %vm123_vm2, %v5814_v17, %v5943_v55  ;;  %v5966_v48 = vadd.f32 %v2231_v6, %v2230_v60 }
 0x261   :  { %7445 = vst [vmem:[#allocation113_spill] sm:$0xff] %v5960_v21  ;;  %v2342_v62 = vadd.f32 %v2341_v2, %v5187_v19  ;;  %v1786_v4 = vsel %vm1087_vm0, %v5875_v45, %v1658_v30  ;;  %v2106_v22 = vsel %vm122_vm3, %v1978_v3, %v2042_v37  ;;  %v2454_v27 = vadd.f32 %v2453_v46, %v5938_v12 }
 0x262   :  { %v2239_v0 = vadd.f32 %v2238_v33, %v5227_v51  ;;  %v999_v36 = vrot.slane %v5345_v13, 7  ;;  %v5978_v10 = vsel %vm121_vm4, %v1786_v4, %v2106_v22  ;;  %v1192_v60 = vrot.slane %v5345_v13, 1 }
 0x263   :  { %7446 = vst [vmem:[#allocation161_spill] sm:$0xff] %v5978_v10  ;;  %v2343_v17 = vadd.f32 %v2342_v62, %v5241_v39  ;;  %v1140_v2 = vsel %vm1087_vm0, %v5933_v58, %v1011_v63  ;;  %v1333_v6 = vsel %vm1280_vm1, %v1204_v34, %v5933_v58  ;;  %v2455_v46 = vadd.f32 %v2454_v27, %v5953_v47 }
 0x264   :  { %v5986_v30 = vpop.f32.mrf.mxu2  ;;  %v5991_v33 = vadd.f32 %v5247_v38, %v5122_v5  ;;  %v2240_v3 = vadd.f32 %v2239_v0, %v5271_v23  ;;  %v1851_v37 = vrot.slane %v5943_v55, 1  ;;  %v529_v62 = vpop.f32.mrf.mxu0  ;;  %v1647_v63 = vrot.slane %v5353_v41, 7 }
 0x265   :  { %v2344_v4 = vadd.f32 %v2343_v17, %v5293_v54  ;;  %v1659_v22 = vrot.slane %v5943_v55, 7  ;;  %v5999_v34 = vadd.f32 %v529_v62, %v4243_v35  ;;  %v698_v12 = vpop.f32.mrf.mxu1  ;;  %v1128_v27 = vsel %vm1087_vm0, %v5345_v13, %v999_v36 }
 0x266   :  { %7447 = vst [vmem:[#allocation162_spill] sm:$0xff] %v5991_v33  ;;  %v1839_v38 = vrot.slane %v5353_v41, 1  ;;  %v1399_v0 = vsel %vm123_vm2, %v1140_v2, %v1333_v6  ;;  %v6007_v23 = vadd.f32 %v698_v12, %v4245_v40  ;;  %v1321_v17 = vsel %vm1280_vm1, %v1192_v60, %v5345_v13 }
 0x267   :  { %v1012_v54 = vrot.slane %v5999_v34, 7  ;;  %v1205_v62 = vrot.slane %v5999_v34, 1  ;;  %v1465_v47 = vsel %vm122_vm3, %v5999_v34, %v1399_v0  ;;  %v1840_v36 = vrot.slane %v5405_v9, 1 }
 0x268   :  { %v1979_v39 = vsel %vm1280_vm1, %v1851_v37, %v5943_v55  ;;  %v6022_v12 = vsel %vm121_vm4, %v5864_v61, %v1465_v47  ;;  %v2043_v60 = vsel %vm123_vm2, %v5875_v45, %v6007_v23  ;;  %v2456_v2 = vadd.f32 %v2455_v46, %v5991_v33 }
 0x269   :  { %7448 = vst [vmem:[#allocation163_spill] sm:$0xff] %v6022_v12  ;;  %v6031_v6 = vadd.f32 %v5295_v57, %v5122_v5  ;;  %v1787_v0 = vsel %vm1087_vm0, %v5943_v55, %v1659_v22  ;;  %v2107_v37 = vsel %vm122_vm3, %v1979_v39, %v2043_v60  ;;  %v6038_v61 = vadd.f32 %v2240_v3, %v5302_v26 }
 0x26a   :  { %v6041_v47 = vadd.f32 %v2344_v4, %v5306_v52  ;;  %v1648_v45 = vrot.slane %v5405_v9, 7  ;;  %v6046_v46 = vsel %vm121_vm4, %v1787_v0, %v2107_v37  ;;  %v1387_v57 = vsel %vm123_vm2, %v1128_v27, %v1321_v17 }
 0x26b   :  { %7449 = vst [vmem:[#allocation164_spill] sm:$0xff] %v6046_v46  ;;  %v2031_v39 = vsel %vm123_vm2, %v5353_v41, %v5405_v9  ;;  %v1141_v3 = vsel %vm1087_vm0, %v5999_v34, %v1012_v54  ;;  %v1334_v4 = vsel %vm1280_vm1, %v1205_v62, %v5999_v34  ;;  %v1775_v60 = vsel %vm1087_vm0, %v5353_v41, %v1647_v63 }
 0x26c   :  { %v6058_v22 = vpop.f32.mrf.mxu2  ;;  %v1967_v0 = vsel %vm1280_vm1, %v1839_v38, %v5353_v41  ;;  %v1968_v27 = vsel %vm1280_vm1, %v1840_v36, %v5405_v9  ;;  %v1852_v17 = vrot.slane %v6007_v23, 1  ;;  %v532_v37 = vpop.f32.mrf.mxu0  ;;  %v1453_v54 = vsel %vm122_vm3, %v5313_v16, %v1387_v57 }
 0x26d   :  { %v2096_v62 = vsel %vm122_vm3, %v1968_v27, %v5375_v8  ;;  %v1660_v33 = vrot.slane %v6007_v23, 7  ;;  %v6075_v63 = vadd.f32 %v532_v37, %v4243_v35  ;;  %v701_v41 = vpop.f32.mrf.mxu1  ;;  %v1776_v38 = vsel %vm1087_vm0, %v5405_v9, %v1648_v45 }
 0x26e   :  { %v2095_v36 = vsel %vm122_vm3, %v1967_v0, %v2031_v39  ;;  %v1400_v52 = vsel %vm123_vm2, %v1141_v3, %v1334_v4  ;;  %v6084_v57 = vadd.f32 %v701_v41, %v4245_v40  ;;  %v6088_v8 = vadd.f32 %v5329_v28, %v5122_v5 }
 0x26f   :  { %v1013_v27 = vrot.slane %v6075_v63, 7  ;;  %v1206_v37 = vrot.slane %v6075_v63, 1  ;;  %v1466_v9 = vsel %vm122_vm3, %v6075_v63, %v1400_v52  ;;  %v6097_v45 = vsel %vm121_vm4, %v1776_v38, %v2096_v62 }
 0x270   :  { %7450 = vst [vmem:[#allocation165_spill] sm:$0xff] %v6088_v8  ;;  %v1980_v39 = vsel %vm1280_vm1, %v1852_v17, %v6007_v23  ;;  %v6104_v28 = vsel %vm121_vm4, %v5933_v58, %v1466_v9  ;;  %v2044_v3 = vsel %vm123_vm2, %v5943_v55, %v6084_v57  ;;  %v6113_v52 = vsel %vm121_vm4, %v5345_v13, %v1453_v54  ;;  %v3929_v9 = vld [vmem:[#allocation10 + $0x4c] sm:$0xf] }
 0x271   :  { %7451 = vst [vmem:[#allocation166_spill] sm:$0xff] %v6097_v45  ;;  %v6119_v4 = vsel %vm121_vm4, %v5313_v16, %v5418_v29  ;;  %v1788_v58 = vsel %vm1087_vm0, %v6007_v23, %v1660_v33  ;;  %v2108_v0 = vsel %vm122_vm3, %v1980_v39, %v2044_v3  ;;  %v6127_v55 = vadd.f32 %v5310_v49, %v5122_v5  ;;  %v3800_v39 = vld [vmem:[#allocation10 + $0x54] sm:$0xf0] }
 0x272   :  { %7452 = vst [vmem:[#allocation167_spill] sm:$0xff] %v6104_v28  ;;  %v6131_v13 = vsel %vm121_vm4, %v1775_v60, %v2095_v36  ;;  %v2248_v17 = vadd.f32 %v5368_v50, %v6113_v52  ;;  %v6137_v16 = vsel %vm121_vm4, %v1788_v58, %v2108_v0  ;;  %v6140_v29 = vadd.f32 %v2456_v2, %v6031_v6  ;;  %v7462_v50 = vld [vmem:[#allocation135_spill] sm:$0xff] }
 0x273   :  { %7453 = vst [vmem:[#allocation168_spill] sm:$0xff] %v6113_v52  ;;  %v2352_v33 = vadd.f32 %v6097_v45, %v6131_v13  ;;  %v1142_v49 = vsel %vm1087_vm0, %v6075_v63, %v1013_v27  ;;  %v1335_v60 = vsel %vm1280_vm1, %v1206_v37, %v6075_v63  ;;  %v2242_v62 = vrot.slane %v6038_v61, 4 }
 0x274   :  { %7454 = vst [vmem:[#allocation169_spill] sm:$0xff] %v6119_v4  ;;  %v6148_v54 = vpop.f32.mrf.mxu2  ;;  %v2464_v41 = vadd.f32 %v6088_v8, %v6127_v55  ;;  %v6155_v2 = vadd.f32 %v5390_v53, %v5122_v5  ;;  %v2249_v38 = vadd.f32 %v2248_v17, %v6119_v4  ;;  %v534_v36 = vpop.f32.mrf.mxu0  ;;  %v1853_v37 = vrot.slane %v6084_v57, 1  ;;  %v7459_v8 = vld [vmem:[#allocation133_spill] sm:$0xff] }
 0x275   :  { %7455 = vst [vmem:[#allocation170_spill] sm:$0xff] %v6127_v55  ;;  %v2353_v27 = vadd.f32 %v2352_v33, %v5441_v7  ;;  %v6161_v3 = vadd.f32 %v534_v36, %v4243_v35  ;;  %v703_v58 = vpop.f32.mrf.mxu1  ;;  %v3803_v0 = vor.u32 %v3929_v9, %v3800_v39  ;;  %v6165_v55 = vadd.f32 %v7459_v8, %v5122_v5  ;;  %v3798_v33 = vld [vmem:[#allocation10 + $0x48] sm:$0xf]  ;;  %v3930_v7 = vld [vmem:[#allocation10 + $0x50] sm:$0xf0]  ;;  %v7461_v36 = vld [vmem:[#allocation134_spill] sm:$0xff] }
 0x276   :  { %7456 = vst [vmem:[#allocation171_spill] sm:$0xff] %v6131_v13  ;;  %v1661_v53 = vrot.slane %v6084_v57, 7  ;;  %v1401_v17 = vsel %vm123_vm2, %v1142_v49, %v1335_v60  ;;  %v6171_v4 = vadd.f32 %v703_v58, %v4245_v40  ;;  %v2346_v45 = vrot.slane %v6041_v47, 4  ;;  %v7464_v58 = vld [vmem:[#allocation136_spill] sm:$0xff] }
 0x277   :  { %7457 = vst [vmem:[#allocation172_spill] sm:$0xff] %v6137_v16  ;;  %v2250_v13 = vadd.f32 %v2249_v38, %v7461_v36  ;;  %v1467_v9 = vsel %vm122_vm3, %v6161_v3, %v1401_v17  ;;  %2846 = vmatpush.bf16.msrb.mxu2 %v3803_v0  ;;  %v3799_v8 = vor.u32 %v3930_v7, %v3798_v33  ;;  %v2458_v38 = vrot.slane %v6140_v29, 4  ;;  %v7465_v7 = vld [vmem:[#allocation138_spill] sm:$0xff]  ;;  %v7466_v17 = vld [vmem:[#allocation139_spill] sm:$0xff] }
 0x278   :  { %7458 = vst [vmem:[#allocation173_spill] sm:$0xff] %v6155_v2  ;;  %v2465_v39 = vadd.f32 %v2464_v41, %v6155_v2  ;;  %v2354_v52 = vadd.f32 %v2353_v27, %v7462_v50  ;;  %v6183_v49 = vsel %vm121_vm4, %v5999_v34, %v1467_v9  ;;  %v2045_v60 = vsel %vm123_vm2, %v6007_v23, %v6171_v4  ;;  %v7467_v2 = vld [vmem:[#allocation141_spill] sm:$0xff] }
 0x279   :  { %7460 = vst [vmem:[#allocation133_spill] sm:$0xff] %v6165_v55  ;;  %v6192_v0 = vadd.f32 %v7464_v58, %v5122_v5  ;;  %v2251_v41 = vadd.f32 %v2250_v13, %v7465_v7  ;;  %v1981_v27 = vsel %vm1280_vm1, %v1853_v37, %v6084_v57  ;;  %2833 = vmatpush.bf16.msrb.mxu1 %v3799_v8  ;;  %v1014_v58 = vrot.slane %v6161_v3, 7 }
 0x27a   :  { %7463 = vst [vmem:[#allocation134_spill] sm:$0xff] %v6183_v49  ;;  %v2466_v34 = vadd.f32 %v2465_v39, %v6165_v55  ;;  %v2355_v33 = vadd.f32 %v2354_v52, %v7466_v17  ;;  %v1789_v9 = vsel %vm1087_vm0, %v6084_v57, %v1661_v53  ;;  %v2109_v23 = vsel %vm122_vm3, %v1981_v27, %v2045_v60  ;;  %v3912_v39 = vld [vmem:[#allocation8] sm:$0xff]  ;;  %v7469_v60 = vld [vmem:[#allocation140_spill] sm:$0xff]  ;;  %v7470_v27 = vld [vmem:[#allocation142_spill] sm:$0xff] }
 0x27b   :  { %v2252_v50 = vadd.f32 %v2251_v41, %v7467_v2  ;;  %v1207_v13 = vrot.slane %v6161_v3, 1  ;;  %v6208_v37 = vsel %vm121_vm4, %v1789_v9, %v2109_v23  ;;  %v6213_v52 = vadd.f32 %v2242_v62, %v6038_v61  ;;  %v7471_v23 = vld [vmem:[#allocation143_spill] sm:$0xff]  ;;  %v7472_v55 = vld [vmem:[#allocation144_spill] sm:$0xff]  ;;  %2622 = vmatpush.bf16.msrb.mxu0 %v3912_v39  ;;  %v7474_v62 = vld [vmem:[#allocation145_spill] sm:$0xff] }
 0x27c   :  { %7468 = vst [vmem:[#allocation136_spill] sm:$0xff] %v6208_v37  ;;  %v6210_v8 = vpop.f32.mrf.mxu2  ;;  %v6216_v53 = vadd.f32 %v2346_v45, %v6041_v47  ;;  %v6220_v41 = vadd.f32 %v7469_v60, %v5122_v5  ;;  %v2356_v17 = vadd.f32 %v2355_v33, %v7470_v27  ;;  %v6223_v2 = vpop.f32.mrf.mxu0  ;;  %v2467_v9 = vadd.f32 %v2466_v34, %v6192_v0 }
 0x27d   :  { %v6228_v7 = vadd.f32 %v7471_v23, %v5122_v5  ;;  %v2253_v61 = vadd.f32 %v2252_v50, %v7472_v55  ;;  %v6233_v47 = vadd.f32 %v5796_v59, %v5122_v5  ;;  %v6235_v45 = vpop.f32.mrf.mxu1  ;;  %v6240_v33 = vadd.f32 %v5740_v56, %v5122_v5 }
 0x27e   :  { %v2357_v60 = vadd.f32 %v2356_v17, %v7474_v62  ;;  %v2261_v34 = vadd.f32 %v5827_v24, %v5773_v20  ;;  %v2365_v23 = vadd.f32 %v5849_v11, %v5801_v18  ;;  %v6248_v50 = vadd.f32 %v5851_v25, %v5122_v5  ;;  %v7477_v62 = vld [vmem:[#allocation146_spill] sm:$0xff]  ;;  %v7478_v20 = vld [vmem:[#allocation147_spill] sm:$0xff] }
 0x27f   :  { %7473 = vst [vmem:[#allocation140_spill] sm:$0xff] %v6233_v47  ;;  %v1143_v59 = vsel %vm1087_vm0, %v6161_v3, %v1014_v58  ;;  %v1336_v17 = vsel %vm1280_vm1, %v1207_v13, %v6161_v3  ;;  %v1854_v39 = vrot.slane %v6171_v4, 1  ;;  %v2468_v56 = vadd.f32 %v2467_v9, %v6220_v41 }
 0x280   :  { %7475 = vst [vmem:[#allocation142_spill] sm:$0xff] %v6240_v33  ;;  %v6258_v24 = vadd.f32 %v7477_v62, %v5122_v5  ;;  %v2254_v11 = vadd.f32 %v2253_v61, %v7478_v20  ;;  %v2366_v18 = vadd.f32 %v2365_v23, %v5915_v31  ;;  %v2459_v25 = vadd.f32 %v2458_v38, %v6140_v29  ;;  %v7480_v31 = vld [vmem:[#allocation148_spill] sm:$0xff] }
 0x281   :  { %7476 = vst [vmem:[#allocation143_spill] sm:$0xff] %v6248_v50  ;;  %v2477_v58 = vadd.f32 %v6233_v47, %v6240_v33  ;;  %v2262_v55 = vadd.f32 %v2261_v34, %v5893_v32  ;;  %v6268_v13 = vadd.f32 %v5923_v44, %v5122_v5  ;;  %v2469_v9 = vadd.f32 %v2468_v56, %v6228_v7 }
 0x282   :  { %v2367_v62 = vadd.f32 %v2366_v18, %v5978_v10  ;;  %v1402_v61 = vsel %vm123_vm2, %v1143_v59, %v1336_v17  ;;  %v1662_v23 = vrot.slane %v6171_v4, 7  ;;  %v2358_v29 = vadd.f32 %v2357_v60, %v7480_v31 }
 0x283   :  { %7479 = vst [vmem:[#allocation146_spill] sm:$0xff] %v6268_v13  ;;  %v2478_v38 = vadd.f32 %v2477_v58, %v6248_v50  ;;  %v2263_v47 = vadd.f32 %v2262_v55, %v5960_v21  ;;  %v1982_v34 = vsel %vm1280_vm1, %v1854_v39, %v6171_v4  ;;  %v2255_v32 = vrot.slane %v2254_v11, 4 }
 0x284   :  { %v6280_v44 = vpop.f32.mrf.mxu2  ;;  %v2470_v56 = vadd.f32 %v2469_v9, %v6258_v24  ;;  %v6285_v18 = vadd.f32 %v5986_v30, %v5122_v5  ;;  %v2368_v59 = vadd.f32 %v2367_v62, %v6046_v46  ;;  %v539_v17 = vpop.f32.mrf.mxu0  ;;  %v1468_v55 = vsel %vm122_vm3, %v6161_v3, %v1402_v61 }
 0x285   :  { %v2479_v60 = vadd.f32 %v2478_v38, %v6268_v13  ;;  %v2264_v58 = vadd.f32 %v2263_v47, %v6022_v12  ;;  %v2046_v39 = vsel %vm123_vm2, %v6084_v57, %v6171_v4  ;;  %v6297_v9 = vpop.f32.mrf.mxu1  ;;  %v6301_v30 = vadd.f32 %v6058_v22, %v5122_v5 }
 0x286   :  { %7481 = vst [vmem:[#allocation147_spill] sm:$0xff] %v6285_v18  ;;  %v2369_v62 = vadd.f32 %v2368_v59, %v6137_v16  ;;  %v1790_v47 = vsel %vm1087_vm0, %v6171_v4, %v1662_v23  ;;  %v2110_v38 = vsel %vm122_vm3, %v1982_v34, %v2046_v39  ;;  %v7483_v3 = vrot.slane %v5860_v14, 2 }
 0x287   :  { %7482 = vst [vmem:[#allocation148_spill] sm:$0xff] %v6301_v30  ;;  %v2244_v57 = vrot.slane %v6213_v52, 2  ;;  %v2359_v46 = vrot.slane %v2358_v29, 4  ;;  %v2265_v12 = vadd.f32 %v2264_v58, %v6104_v28  ;;  %v2480_v22 = vadd.f32 %v2479_v60, %v6285_v18 }
 0x288   :  { %v2336_v61 = vadd.f32 %v7483_v3, %v5860_v14  ;;  %v6316_v59 = vadd.f32 %v6148_v54, %v5122_v5  ;;  %v6321_v4 = vsel %vm121_vm4, %v6075_v63, %v1468_v55  ;;  %v2370_v23 = vadd.f32 %v2369_v62, %v6208_v37 }
 0x289   :  { %7485 = vst [vmem:[#allocation175_spill] sm:$0xff] %v6321_v4  ;;  %v2348_v14 = vrot.slane %v6216_v53, 2  ;;  %v2460_v34 = vrot.slane %v2459_v25, 2  ;;  %v2266_v39 = vadd.f32 %v2265_v12, %v6183_v49  ;;  %v6328_v58 = vsel %vm121_vm4, %v1790_v47, %v2110_v38 }
 0x28a   :  { %7484 = vst [vmem:[#allocation174_spill] sm:$0xff] %v6316_v59  ;;  %v2256_v60 = vadd.f32 %v2255_v32, %v2254_v11  ;;  %v2471_v3 = vrot.slane %v2470_v56, 4  ;;  %v2481_v54 = vadd.f32 %v2480_v22, %v6301_v30  ;;  %v6333_v18 = vadd.f32 %v6210_v8, %v5122_v5 }
 0x28b   :  { %7486 = vst [vmem:[#allocation176_spill] sm:$0xff] %v6328_v58  ;;  %v7488_v63 = vrot.slane %v5866_v42, 2  ;;  %v2245_v62 = vadd.f32 %v2244_v57, %v6213_v52  ;;  %v2360_v12 = vadd.f32 %v2359_v46, %v2358_v29  ;;  %v2267_v37 = vadd.f32 %v2266_v39, %v6321_v4  ;;  %v7491_v46 = vld [vmem:[#allocation154_spill] sm:$0xff] }
 0x28c   :  { %7487 = vst [vmem:[#allocation177_spill] sm:$0xff] %v6333_v18  ;;  %v6342_v47 = vpop.f32.mrf.mxu2  ;;  %v2233_v11 = vrot.slane %v5966_v48, 1  ;;  %v2482_v32 = vadd.f32 %v2481_v54, %v6316_v59  ;;  %v2371_v38 = vadd.f32 %v2370_v23, %v6328_v58  ;;  %v6349_v8 = vadd.f32 %v6223_v2, %v4243_v35  ;;  %v542_v22 = vpop.f32.mrf.mxu0 }
 0x28d   :  { %v6338_v55 = vadd.f32 %v7488_v63, %v5866_v42  ;;  %v7489_v42 = vld [vmem:[#allocation156_spill] sm:$0xff]  ;;  %v7490_v63 = vld [vmem:[#allocation159_spill] sm:$0xff]  ;;  %v2337_v29 = vrot.slane %v2336_v61, 1  ;;  %v2349_v57 = vadd.f32 %v2348_v14, %v6216_v53  ;;  %v711_v39 = vpop.f32.mrf.mxu1  ;;  %v6357_v4 = vadd.f32 %v2460_v34, %v2459_v25 }
 0x28e   :  { %v6353_v49 = vadd.f32 %v7490_v63, %v7489_v42  ;;  %v2257_v54 = vrot.slane %v2256_v60, 2  ;;  %v2472_v59 = vadd.f32 %v2471_v3, %v2470_v56  ;;  %v2483_v23 = vadd.f32 %v2482_v32, %v6333_v18 }
 0x28f   :  { %v2246_v58 = vrot.slane %v2245_v62, 1  ;;  %v2361_v2 = vrot.slane %v2360_v12, 2  ;;  %v2268_v30 = vrot.slane %v2267_v37, 4  ;;  %v707_v16 = vadd.f32 %v6235_v45, %v4245_v40 }
 0x290   :  { %v6363_v42 = vadd.f32 %v2233_v11, %v5966_v48  ;;  %v2372_v52 = vrot.slane %v2371_v38, 4  ;;  %v1015_v53 = vrot.slane %v6349_v8, 7  ;;  %v6367_v25 = vadd.f32 %v2337_v29, %v2336_v61 }
 0x291   :  { %v2350_v14 = vrot.slane %v2349_v57, 1  ;;  %v1208_v56 = vrot.slane %v6349_v8, 1  ;;  %v6371_v34 = vadd.f32 %v539_v17, %v4243_v35  ;;  %v6374_v32 = vadd.f32 %v2257_v54, %v2256_v60 }
 0x292   :  { %v2473_v45 = vrot.slane %v2472_v59, 2  ;;  %v2484_v48 = vrot.slane %v2483_v23, 4  ;;  %v6376_v11 = vadd.f32 %v2246_v58, %v2245_v62  ;;  %v6378_v63 = vadd.f32 %v2361_v2, %v2360_v12 }
 0x293   :  { %v2269_v18 = vadd.f32 %v2268_v30, %v2267_v37  ;;  %v1663_v28 = vrot.slane %v707_v16, 7  ;;  %v2373_v29 = vadd.f32 %v2372_v52, %v2371_v38  ;;  %v1144_v13 = vsel %vm1087_vm0, %v6349_v8, %v1015_v53 }
 0x294   :  { %v6380_v61 = vpop.f32.mrf.mxu2  ;;  %v1855_v17 = vrot.slane %v707_v16, 1  ;;  %v709_v3 = vadd.f32 %v6297_v9, %v4245_v40  ;;  %v544_v60 = vpop.f32.mrf.mxu0  ;;  %v1337_v54 = vsel %vm1280_vm1, %v1208_v56, %v6349_v8  ;;  %v1016_v58 = vrot.slane %v6371_v34, 7 }
 0x295   :  { %v1209_v62 = vrot.slane %v6371_v34, 1  ;;  %v6391_v37 = vadd.f32 %v542_v22, %v4243_v35  ;;  %v713_v30 = vpop.f32.mrf.mxu1  ;;  %v6393_v12 = vadd.f32 %v2350_v14, %v2349_v57  ;;  %v6396_v52 = vadd.f32 %v2473_v45, %v2472_v59 }
 0x296   :  { %v6398_v2 = vadd.f32 %v2484_v48, %v2483_v23  ;;  %v2270_v53 = vrot.slane %v2269_v18, 2  ;;  %v1791_v56 = vsel %vm1087_vm0, %v707_v16, %v1663_v28  ;;  %v6403_v50 = vadd.f32 %v711_v39, %v4245_v40 }
 0x297   :  { %v2374_v10 = vrot.slane %v2373_v29, 2  ;;  %v1983_v22 = vsel %vm1280_vm1, %v1855_v17, %v707_v16  ;;  %v1403_v57 = vsel %vm123_vm2, %v1144_v13, %v1337_v54  ;;  %v1856_v14 = vrot.slane %v709_v3, 1 }
 0x298   :  { %v1145_v59 = vsel %vm1087_vm0, %v6371_v34, %v1016_v58  ;;  %v1338_v23 = vsel %vm1280_vm1, %v1209_v62, %v6371_v34  ;;  %v2047_v45 = vsel %vm123_vm2, %v707_v16, %v709_v3  ;;  %v1017_v28 = vrot.slane %v6391_v37, 7 }
 0x299   :  { %v6418_v48 = vadd.f32 %v6280_v44, %v5122_v5  ;;  %v1210_v13 = vrot.slane %v6391_v37, 1  ;;  %v6422_v17 = vadd.f32 %v544_v60, %v4243_v35  ;;  %v6424_v54 = vadd.f32 %v2270_v53, %v2269_v18 }
 0x29a   :  { %v1469_v58 = vsel %vm122_vm3, %v6371_v34, %v1403_v57  ;;  %v1664_v62 = vrot.slane %v709_v3, 7  ;;  %v2048_v9 = vsel %vm123_vm2, %v707_v16, %v6403_v50  ;;  %v1984_v44 = vsel %vm1280_vm1, %v1856_v14, %v709_v3 }
 0x29b   :  { %7492 = vst [vmem:[#allocation156_spill] sm:$0xff] %v6418_v48  ;;  %v2111_v39 = vsel %vm122_vm3, %v1983_v22, %v2047_v45  ;;  %v1404_v60 = vsel %vm123_vm2, %v1145_v59, %v1338_v23  ;;  %v714_v18 = vadd.f32 %v713_v30, %v4245_v40  ;;  %v6440_v57 = vadd.f32 %v6342_v47, %v5122_v5 }
 0x29c   :  { %v882_v38 = vpop.f32.mrf.mxu2  ;;  %v547_v53 = vpop.f32.mrf.mxu0  ;;  %v1146_v21 = vsel %vm1087_vm0, %v6391_v37, %v1017_v28  ;;  %v1470_v16 = vsel %vm122_vm3, %v6391_v37, %v1404_v60  ;;  %v1857_v14 = vrot.slane %v6403_v50, 1  ;;  %v1339_v59 = vsel %vm1280_vm1, %v1210_v13, %v6391_v37 }
 0x29d   :  { %7493 = vst [vmem:[#allocation159_spill] sm:$0xff] %v6440_v57  ;;  %v716_v22 = vpop.f32.mrf.mxu1  ;;  %v2112_v30 = vsel %vm122_vm3, %v1984_v44, %v2048_v9  ;;  %v1018_v23 = vrot.slane %v6422_v17, 7  ;;  %v1211_v47 = vrot.slane %v6422_v17, 1  ;;  %v6455_v28 = vadd.f32 %v2374_v10, %v2373_v29 }
 0x29e   :  { %v6460_v60 = vsel %vm121_vm4, %v6349_v8, %v1469_v58  ;;  %v1665_v33 = vrot.slane %v6403_v50, 7  ;;  %v1792_v13 = vsel %vm1087_vm0, %v709_v3, %v1664_v62  ;;  %v6467_v9 = vsel %vm121_vm4, %v6349_v8, %v1470_v16 }
 0x29f   :  { %7494 = vst [vmem:[#allocation154_spill] sm:$0xff] %v6460_v60  ;;  %v2049_v44 = vsel %vm123_vm2, %v709_v3, %v714_v18  ;;  %v6472_v10 = vadd.f32 %v547_v53, %v4243_v35  ;;  %v6476_v29 = vsel %vm121_vm4, %v1791_v56, %v2111_v39  ;;  %v2490_v58 = vadd.f32 %v6440_v57, %v6418_v48 }
 0x2a0   :  { %7495 = vst [vmem:[#allocation178_spill] sm:$0xff] %v6467_v9  ;;  %v6482_v62 = vsel %vm121_vm4, %v1792_v13, %v2112_v30  ;;  %v1405_v8 = vsel %vm123_vm2, %v1146_v21, %v1339_v59  ;;  %v1985_v3 = vsel %vm1280_vm1, %v1857_v14, %v6403_v50  ;;  %v1147_v53 = vsel %vm1087_vm0, %v6422_v17, %v1018_v23 }
 0x2a1   :  { %7496 = vst [vmem:[#allocation179_spill] sm:$0xff] %v6476_v29  ;;  %v1340_v56 = vsel %vm1280_vm1, %v1211_v47, %v6422_v17  ;;  %v1471_v39 = vsel %vm122_vm3, %v6422_v17, %v1405_v8  ;;  %v2274_v16 = vadd.f32 %v6467_v9, %v6460_v60  ;;  %v1793_v30 = vsel %vm1087_vm0, %v6403_v50, %v1665_v33 }
 0x2a2   :  { %7497 = vst [vmem:[#allocation180_spill] sm:$0xff] %v6482_v62  ;;  %v2113_v21 = vsel %vm122_vm3, %v1985_v3, %v2049_v44  ;;  %v717_v14 = vadd.f32 %v716_v22, %v4245_v40  ;;  %v2378_v23 = vadd.f32 %v6482_v62, %v6476_v29  ;;  %v6506_v47 = vadd.f32 %v6380_v61, %v5122_v5 }
 0x2a3   :  { %v1019_v13 = vrot.slane %v6472_v10, 7  ;;  %v1212_v8 = vrot.slane %v6472_v10, 1  ;;  %v6513_v33 = vsel %vm121_vm4, %v6371_v34, %v1471_v39  ;;  %v1858_v44 = vrot.slane %v714_v18, 1 }
 0x2a4   :  { %v885_v59 = vpop.f32.mrf.mxu2  ;;  %7498 = vst [vmem:[#allocation181_spill] sm:$0xff] %v6506_v47  ;;  %v549_v45 = vpop.f32.mrf.mxu0  ;;  %v1406_v22 = vsel %vm123_vm2, %v1147_v53, %v1340_v56  ;;  %v1666_v61 = vrot.slane %v714_v18, 7  ;;  %v6522_v48 = vsel %vm121_vm4, %v1793_v30, %v2113_v21  ;;  %v6531_v39 = vadd.f32 %v882_v38, %v5122_v5 }
 0x2a5   :  { %v6518_v3 = vadd.f32 %v549_v45, %v4243_v35  ;;  %v718_v57 = vpop.f32.mrf.mxu1  ;;  %7499 = vst [vmem:[#allocation182_spill] sm:$0xff] %v6522_v48  ;;  %v1472_v62 = vsel %vm122_vm3, %v6472_v10, %v1406_v22  ;;  %v2050_v45 = vsel %vm123_vm2, %v6403_v50, %v717_v14  ;;  %v2491_v30 = vadd.f32 %v2490_v58, %v6506_v47 }
 0x2a6   :  { %v6528_v34 = vadd.f32 %v718_v57, %v4245_v40  ;;  %7500 = vst [vmem:[#allocation183_spill] sm:$0xff] %v6531_v39  ;;  %v1148_v21 = vsel %vm1087_vm0, %v6472_v10, %v1019_v13  ;;  %v1341_v57 = vsel %vm1280_vm1, %v1212_v8, %v6472_v10  ;;  %v1859_v22 = vrot.slane %v717_v14, 1 }
 0x2a7   :  { %v1020_v53 = vrot.slane %v6518_v3, 7  ;;  %v1213_v56 = vrot.slane %v6518_v3, 1  ;;  %v2275_v38 = vadd.f32 %v2274_v16, %v6513_v33  ;;  %v1986_v29 = vsel %vm1280_vm1, %v1858_v44, %v714_v18 }
 0x2a8   :  { %v6548_v50 = vsel %vm121_vm4, %v6391_v37, %v1472_v62  ;;  %v1667_v9 = vrot.slane %v717_v14, 7  ;;  %v1794_v60 = vsel %vm1087_vm0, %v714_v18, %v1666_v61  ;;  %v2379_v58 = vadd.f32 %v2378_v23, %v6522_v48 }
 0x2a9   :  { %7501 = vst [vmem:[#allocation184_spill] sm:$0xff] %v6548_v50  ;;  %v2114_v13 = vsel %vm122_vm3, %v1986_v29, %v2050_v45  ;;  %v2051_v8 = vsel %vm123_vm2, %v714_v18, %v6528_v34  ;;  %v2492_v16 = vadd.f32 %v2491_v30, %v6531_v39  ;;  %v1149_v44 = vsel %vm1087_vm0, %v6518_v3, %v1020_v53 }
 0x2aa   :  { %v1342_v37 = vsel %vm1280_vm1, %v1213_v56, %v6518_v3  ;;  %v1407_v62 = vsel %vm123_vm2, %v1148_v21, %v1341_v57  ;;  %v2276_v23 = vadd.f32 %v2275_v38, %v6548_v50  ;;  %v1987_v29 = vsel %vm1280_vm1, %v1859_v22, %v717_v14 }
 0x2ab   :  { %v1473_v18 = vsel %vm122_vm3, %v6518_v3, %v1407_v62  ;;  %v1860_v45 = vrot.slane %v6528_v34, 1  ;;  %v1795_v53 = vsel %vm1087_vm0, %v717_v14, %v1667_v9  ;;  %v6573_v56 = vsel %vm121_vm4, %v1794_v60, %v2114_v13 }
 0x2ac   :  { %v887_v61 = vpop.f32.mrf.mxu2  ;;  %v552_v30 = vpop.f32.mrf.mxu0  ;;  %7502 = vst [vmem:[#allocation185_spill] sm:$0xff] %v6573_v56  ;;  %v2115_v21 = vsel %vm122_vm3, %v1987_v29, %v2051_v8  ;;  %v6581_v38 = vadd.f32 %v885_v59, %v5122_v5  ;;  %v1668_v62 = vrot.slane %v6528_v34, 7  ;;  %v1408_v39 = vsel %vm123_vm2, %v1149_v44, %v1342_v37 }
 0x2ad   :  { %v6578_v57 = vadd.f32 %v552_v30, %v4243_v35  ;;  %v721_v22 = vpop.f32.mrf.mxu1  ;;  %v6590_v60 = vsel %vm121_vm4, %v6422_v17, %v1473_v18  ;;  %v2380_v29 = vadd.f32 %v2379_v58, %v6573_v56  ;;  %v1988_v44 = vsel %vm1280_vm1, %v1860_v45, %v6528_v34 }
 0x2ae   :  { %7503 = vst [vmem:[#allocation186_spill] sm:$0xff] %v6581_v38  ;;  %v722_v9 = vadd.f32 %v721_v22, %v4245_v40  ;;  %v6602_v37 = vsel %vm121_vm4, %v1795_v53, %v2115_v21  ;;  %v6607_v18 = vadd.f32 %v887_v61, %v5122_v5  ;;  %v2493_v58 = vadd.f32 %v2492_v16, %v6581_v38  ;;  %v3788_v61 = vld [vmem:[#allocation10 + $0x3c] sm:$0xf0]  ;;  %v3786_v21 = vld [vmem:[#allocation10 + $0x30] sm:$0xf] }
 0x2af   :  { %7504 = vst [vmem:[#allocation187_spill] sm:$0xff] %v6590_v60  ;;  %v1021_v13 = vrot.slane %v6578_v57, 7  ;;  %v1214_v8 = vrot.slane %v6578_v57, 1  ;;  %v1474_v59 = vsel %vm122_vm3, %v6578_v57, %v1408_v39  ;;  %v2277_v47 = vadd.f32 %v2276_v23, %v6590_v60 }
 0x2b0   :  { %v2052_v17 = vsel %vm123_vm2, %v717_v14, %v722_v9  ;;  %v1669_v30 = vrot.slane %v722_v9, 7  ;;  %v1861_v22 = vrot.slane %v722_v9, 1  ;;  %v1796_v45 = vsel %vm1087_vm0, %v6528_v34, %v1668_v62  ;;  %v3926_v14 = vld [vmem:[#allocation10 + $0x34] sm:$0xf] }
 0x2b1   :  { %v2116_v39 = vsel %vm122_vm3, %v1988_v44, %v2052_v17  ;;  %v6618_v53 = vsel %vm121_vm4, %v6472_v10, %v1474_v59  ;;  %v1150_v56 = vsel %vm1087_vm0, %v6578_v57, %v1021_v13  ;;  %v1343_v44 = vsel %vm1280_vm1, %v1214_v8, %v6578_v57  ;;  %v3927_v17 = vld [vmem:[#allocation10 + $0x38] sm:$0xf0] }
 0x2b2   :  { %v6626_v16 = vsel %vm121_vm4, %v1796_v45, %v2116_v39  ;;  %v3791_v62 = vor.u32 %v3926_v14, %v3788_v61  ;;  %v2376_v38 = vrot.slane %v6455_v28, 1  ;;  %v2381_v10 = vadd.f32 %v2380_v29, %v6602_v37 }
 0x2b3   :  { %v3787_v48 = vor.u32 %v3927_v17, %v3786_v21  ;;  %v2494_v13 = vadd.f32 %v2493_v58, %v6607_v18  ;;  %v2278_v8 = vadd.f32 %v2277_v47, %v6618_v53  ;;  %v1797_v50 = vsel %vm1087_vm0, %v722_v9, %v1669_v30 }
 0x2b4   :  { %v890_v23 = vpop.f32.mrf.mxu2  ;;  %v554_v60 = vpop.f32.mrf.mxu0  ;;  %2847 = vmatpush.bf16.msrb.mxu2 %v3791_v62  ;;  %v1989_v14 = vsel %vm1280_vm1, %v1861_v22, %v722_v9  ;;  %v2382_v61 = vadd.f32 %v2381_v10, %v6626_v16  ;;  %v1409_v29 = vsel %vm123_vm2, %v1150_v56, %v1343_v44  ;;  %v7507_v43 = vrot.slane %v6374_v32, 1 }
 0x2b5   :  { %v6631_v59 = vadd.f32 %v890_v23, %v5122_v5  ;;  %v555_v39 = vadd.f32 %v554_v60, %v4243_v35  ;;  %v723_v45 = vpop.f32.mrf.mxu1  ;;  %2834 = vmatpush.bf16.msrb.mxu1 %v3787_v48  ;;  %v3776_v48 = vld [vmem:[#allocation10 + $0x24] sm:$0xf0] }
 0x2b6   :  { %v724_v23 = vadd.f32 %v723_v45, %v4245_v40  ;;  %v3923_v40 = vld [vmem:[#allocation10 + $0x1c] sm:$0xf] }
 0x2b7   :  { %7505 = vst [vmem:[#allocation188_spill] sm:$0xff] %v6631_v59  ;;  %v2495_v58 = vadd.f32 %v2494_v13, %v6631_v59  ;;  %v1022_v21 = vrot.slane %v555_v39, 7  ;;  %v1215_v47 = vrot.slane %v555_v39, 1  ;;  %v1475_v30 = vsel %vm122_vm3, %v555_v39, %v1409_v29  ;;  %v3774_v13 = vld [vmem:[#allocation10 + $0x18] sm:$0xf] }
 0x2b8   :  { %v6648_v35 = vsel %vm121_vm4, %v6518_v3, %v1475_v30  ;;  %v1670_v60 = vrot.slane %v724_v23, 7  ;;  %v1862_v22 = vrot.slane %v724_v23, 1  ;;  %v2053_v56 = vsel %vm123_vm2, %v6528_v34, %v724_v23  ;;  %v3924_v30 = vld [vmem:[#allocation10 + $0x20] sm:$0xf0]  ;;  %v3764_v59 = vld [vmem:[#allocation10 + $0xc] sm:$0xf0] }
 0x2b9   :  { %v1151_v44 = vsel %vm1087_vm0, %v555_v39, %v1022_v21  ;;  %v1344_v62 = vsel %vm1280_vm1, %v1215_v47, %v555_v39  ;;  %v2279_v17 = vadd.f32 %v2278_v8, %v6648_v35  ;;  %v2054_v10 = vsel %vm123_vm2, %v722_v9, %v724_v23  ;;  %v3920_v21 = vld [vmem:[#allocation10 + $0x4] sm:$0xf] }
 0x2ba   :  { %v1410_v3 = vsel %vm123_vm2, %v1151_v44, %v1344_v62  ;;  %v1798_v45 = vsel %vm1087_vm0, %v724_v23, %v1670_v60  ;;  %v1990_v29 = vsel %vm1280_vm1, %v1862_v22, %v724_v23  ;;  %v2117_v34 = vsel %vm122_vm3, %v1989_v14, %v2053_v56  ;;  %v3762_v56 = vld [vmem:[#allocation10] sm:$0xf]  ;;  %v3921_v62 = vld [vmem:[#allocation10 + $0x8] sm:$0xf0] }
 0x2bb   :  { %v1476_v8 = vsel %vm122_vm3, %v555_v39, %v1410_v3  ;;  %v2118_v9 = vsel %vm122_vm3, %v1990_v29, %v2054_v10  ;;  %v6670_v47 = vsel %vm121_vm4, %v1797_v50, %v2117_v34  ;;  %v3779_v60 = vor.u32 %v3923_v40, %v3776_v48 }
 0x2bc   :  { %v892_v44 = vpop.f32.mrf.mxu2  ;;  %v6675_v23 = vsel %vm121_vm4, %v6578_v57, %v1476_v8  ;;  %v6679_v14 = vsel %vm121_vm4, %v1798_v45, %v2118_v9  ;;  %v2383_v22 = vadd.f32 %v2382_v61, %v6670_v47  ;;  %v7506_v50 = vrot.slane %v6398_v2, 2 }
 0x2bd   :  { %v6682_v39 = vadd.f32 %v892_v44, %v5122_v5  ;;  %v2280_v48 = vadd.f32 %v2279_v17, %v6675_v23  ;;  %2848 = vmatpush.bf16.msrb.mxu2 %v3779_v60  ;;  %v3775_v57 = vor.u32 %v3924_v30, %v3774_v13  ;;  %v3767_v10 = vor.u32 %v3920_v21, %v3764_v59 }
 0x2be   :  { %v2487_v40 = vadd.f32 %v7506_v50, %v6398_v2  ;;  %v2260_v3 = vadd.f32 %v7507_v43, %v6374_v32  ;;  %v7508_v5 = vrot.slane %v6378_v63, 1  ;;  %v2384_v61 = vadd.f32 %v2383_v22, %v6679_v14 }
 0x2bf   :  { %v2496_v29 = vadd.f32 %v2495_v58, %v6682_v39  ;;  %v7509_v2 = vrot.slane %v6424_v54, 1  ;;  %v2377_v17 = vadd.f32 %v2376_v38, %v6455_v28  ;;  %v2281_v13 = vrot.slane %v2280_v48, 4  ;;  %2835 = vmatpush.bf16.msrb.mxu1 %v3775_v57 }
 0x2c0   :  { %v2364_v45 = vadd.f32 %v7508_v5, %v6378_v63  ;;  %v3763_v59 = vor.u32 %v3921_v62, %v3762_v56  ;;  %v2394_v32 = vadd.f32 %v6367_v25, %v6363_v42  ;;  %v2475_v30 = vrot.slane %v6396_v52, 1 }
 0x2c1   :  { %v2273_v34 = vadd.f32 %v7509_v2, %v6424_v54  ;;  %v2385_v21 = vrot.slane %v2384_v61, 4  ;;  %v2497_v63 = vrot.slane %v2496_v29, 4  ;;  %v7510_v8 = vrot.slane %v7491_v46, 1  ;;  %2849 = vmatpush.bf16.msrb.mxu2 %v3767_v10 }
 0x2c2   :  { %v2395_v9 = vadd.f32 %v6393_v12, %v6376_v11  ;;  %v2488_v54 = vrot.slane %v2487_v40, 1  ;;  %v2282_v44 = vadd.f32 %v2281_v13, %v2280_v48  ;;  %v7511_v28 = vrot.slane %v6338_v55, 1 }
 0x2c3   :  { %v2437_v58 = vadd.f32 %v7510_v8, %v7491_v46  ;;  %v2396_v60 = vadd.f32 %v2364_v45, %v2260_v3  ;;  %v2386_v42 = vadd.f32 %v2385_v21, %v2384_v61  ;;  %v2498_v25 = vadd.f32 %v2497_v63, %v2496_v29  ;;  %2836 = vmatpush.bf16.msrb.mxu1 %v3763_v59  ;;  %v7513_v3 = vld [vmem:[#allocation153_spill] sm:$0xff] }
 0x2c4   :  { %v2450_v38 = vadd.f32 %v7511_v28, %v6338_v55  ;;  %v7512_v56 = vrot.slane %v6357_v4, 1  ;;  %v2397_v46 = vadd.f32 %v2377_v17, %v2273_v34  ;;  %v2283_v50 = vrot.slane %v2282_v44, 2  ;;  %v7514_v29 = vld [vmem:[#allocation137_spill] sm:$0xff] }
 0x2c5   :  { %v2505_v22 = vadd.f32 %v2437_v58, %v6353_v49  ;;  %v2476_v12 = vadd.f32 %v2475_v30, %v6396_v52  ;;  %v2387_v48 = vrot.slane %v2386_v42, 2  ;;  %v2499_v57 = vrot.slane %v2498_v25, 2 }
 0x2c6   :  { %v2463_v62 = vadd.f32 %v7512_v56, %v6357_v4  ;;  %v2506_v11 = vadd.f32 %v2450_v38, %v2394_v32  ;;  %v2489_v43 = vadd.f32 %v2488_v54, %v2487_v40  ;;  %v2284_v55 = vadd.f32 %v2283_v50, %v2282_v44 }
 0x2c7   :  { %v2512_v5 = vpack.c.bf16 %v7513_v3, %v7513_v3  ;;  %v2508_v45 = vadd.f32 %v2476_v12, %v2396_v60  ;;  %v2388_v49 = vadd.f32 %v2387_v48, %v2386_v42  ;;  %v2500_v61 = vadd.f32 %v2499_v57, %v2498_v25 }
 0x2c8   :  { %v2507_v10 = vadd.f32 %v2463_v62, %v2395_v9  ;;  %v2511_v4 = vpack.c.bf16 %v7514_v29, %v7514_v29  ;;  %v2513_v2 = vpack.c.bf16 %v2505_v22, %v2505_v22  ;;  %v2509_v34 = vadd.f32 %v2489_v43, %v2397_v46  ;;  %v3854_v43 = vld [vmem:[#allocation10 + $0xb0] sm:$0xf] }
 0x2c9   :  { %v2285_v17 = vrot.slane %v2284_v55, 1  ;;  %v2514_v13 = vpack.c.bf16 %v2506_v11, %v2506_v11  ;;  %v2389_v59 = vrot.slane %v2388_v49, 1  ;;  %v2501_v52 = vrot.slane %v2500_v61, 1 }
 0x2ca   :  { %v2515_v32 = vpack.c.bf16 %v2507_v10, %v2507_v10  ;;  %v2544_v21 = vunpack.c.l.b16 %v2512_v5  ;;  %v2516_v40 = vpack.c.bf16 %v2508_v45, %v2508_v45  ;;  %v2543_v8 = vunpack.c.l.b16 %v2511_v4  ;;  %v3842_v5 = vld [vmem:[#allocation10 + $0x98] sm:$0xf]  ;;  %v3940_v45 = vld [vmem:[#allocation10 + $0xa0] sm:$0xf0]  ;;  %v3830_v4 = vld [vmem:[#allocation10 + $0x80] sm:$0xf] }
 0x2cb   :  { %v2286_v30 = vadd.f32 %v2285_v17, %v2284_v55  ;;  %v2390_v63 = vadd.f32 %v2389_v59, %v2388_v49  ;;  %v2545_v58 = vunpack.c.l.b16 %v2513_v2  ;;  %v2517_v9 = vpack.c.bf16 %v2509_v34, %v2509_v34  ;;  %v3943_v55 = vld [vmem:[#allocation10 + $0xb8] sm:$0xf0]  ;;  %v3937_v2 = vld [vmem:[#allocation10 + $0x88] sm:$0xf0]  ;;  %v3818_v59 = vld [vmem:[#allocation10 + $0x68] sm:$0xf] }
 0x2cc   :  { %v2546_v54 = vunpack.c.l.b16 %v2514_v13  ;;  %v2502_v28 = vadd.f32 %v2501_v52, %v2500_v61  ;;  %v2547_v38 = vunpack.c.l.b16 %v2515_v32  ;;  %v2552_v60 = vsel %vm2551_vm5, %v2544_v21, %v2543_v8  ;;  %v3934_v52 = vld [vmem:[#allocation10 + $0x70] sm:$0xf0] }
 0x2cd   :  { %v2398_v44 = vadd.f32 %v2390_v63, %v2286_v30  ;;  %v2548_v42 = vunpack.c.l.b16 %v2516_v40  ;;  %v2554_v22 = vsel %vm2553_vm6, %v2545_v58, %v2552_v60  ;;  %v2549_v56 = vunpack.c.l.b16 %v2517_v9  ;;  %v3806_v40 = vld [vmem:[#allocation10 + $0x50] sm:$0xf]  ;;  %v3931_v63 = vld [vmem:[#allocation10 + $0x58] sm:$0xf0]  ;;  %v3794_v58 = vld [vmem:[#allocation10 + $0x38] sm:$0xf] }
 0x2ce   :  { %v2556_v46 = vsel %vm2555_vm7, %v2546_v54, %v2554_v22  ;;  %v3855_v3 = vor.u32 %v3943_v55, %v3854_v43  ;;  %v3843_v49 = vor.u32 %v3940_v45, %v3842_v5  ;;  %v3831_v17 = vor.u32 %v3937_v2, %v3830_v4  ;;  %v3928_v9 = vld [vmem:[#allocation10 + $0x40] sm:$0xf0]  ;;  %v3925_v60 = vld [vmem:[#allocation10 + $0x28] sm:$0xf0] }
 0x2cf   :  { %v2510_v25 = vadd.f32 %v2502_v28, %v2398_v44  ;;  %v2558_v50 = vsel %vm2557_vm8, %v2547_v38, %v2556_v46  ;;  %v3819_v30 = vor.u32 %v3934_v52, %v3818_v59  ;;  %v3807_v8 = vor.u32 %v3931_v63, %v3806_v40  ;;  %v3782_v38 = vld [vmem:[#allocation10 + $0x20] sm:$0xf]  ;;  %v3770_v46 = vld [vmem:[#allocation10 + $0x8] sm:$0xf] }
 0x2d0   :  { %v2560_v12 = vsel %vm2559_vm9, %v2548_v42, %v2558_v50  ;;  %2855 = vmatpush.bf16.msra.mxu3 %v3855_v3  ;;  %v3795_v54 = vor.u32 %v3928_v9, %v3794_v58  ;;  %v3922_v50 = vld [vmem:[#allocation10 + $0x10] sm:$0xf0] }
 0x2d1   :  { %v2518_v62 = vpack.c.bf16 %v2510_v25, %v2510_v25  ;;  %v2562_v48 = vsel %vm2561_vm10, %v2549_v56, %v2560_v12  ;;  %v3783_v25 = vor.u32 %v3925_v60, %v3782_v38  ;;  %v3771_v12 = vor.u32 %v3922_v50, %v3770_v46  ;;  %v3948_v38 = vld [vmem:[#allocation11 + $0x20] sm:$0xff]  ;;  %v3947_v60 = vld [vmem:[#allocation11 + $0x18] sm:$0xff] }
 0x2d2   :  { %v3944_v46 = vld [vmem:[#allocation11] sm:$0xff] }
 0x2d3   :  { %v2550_v11 = vunpack.c.l.b16 %v2518_v62 }
 0x2d4   :  { %2856 = vmatpush.bf16.msra.mxu3 %v3843_v49 }
 0x2d5   :  { %v2564_v57 = vsel %vm2563_vm11, %v2550_v11, %v2562_v48 }
 0x2d6   :  { %v2565_v10 = vpack.c.b16 %v2564_v57, %v2564_v57 }
 0x2d8   :  { %2623 = vmatmul.bf16.vlgmr.msrb.gmra.mxu0 %v2565_v10  ;;  %2857 = vmatpush.bf16.msra.mxu3 %v3831_v17 }
 0x2dc   :  { %2858 = vmatpush.bf16.msra.mxu3 %v3819_v30 }
 0x2e0   :  { %2859 = vmatpush.bf16.msra.mxu3 %v3807_v8 }
 0x2e4   :  { %2860 = vmatpush.bf16.msra.mxu3 %v3795_v54  ;;  %v3951_v54 = vld [vmem:[#allocation11 + $0x38] sm:$0xff] }
 0x2e8   :  { %2861 = vmatpush.bf16.msra.mxu3 %v3783_v25 }
 0x2ec   :  { %2862 = vmatpush.bf16.msra.mxu3 %v3771_v12 }
 0x2f0   :  { %3377 = vmatpush.bf16.msrb.mxu3 %v3951_v54  ;;  %v7518_v54 = vld [vmem:[#allocation22_spill] sm:$0xff] }
 0x355   :  { %v6721_v61 = vpop.f32.mrf.mxu0 }
 0x356   :  { %v6724_v29 = vmul.f32 0.70710677, %v6721_v61  ;;  %v2628_v8 = vmul.f32 0.5, %v6721_v61  ;;  %v3945_v61 = vld [vmem:[#allocation11 + $0x8] sm:$0xff] }
 0x358   :  { %v2630_v34 = vand.u32 2147483647, %v6724_v29  ;;  %vm2663_vm0 = vcmp.lt.f32.partialorder %v6724_v29, 0.0  ;;  %v3946_v29 = vld [vmem:[#allocation11 + $0x10] sm:$0xff] }
 0x35a   :  { %v2631_v13 = vmul.f32 0.3275911, %v2630_v34  ;;  %v2657_v43 = vsub.f32 0.0, %v2630_v34 }
 0x35c   :  { %v2632_v32 = vadd.f32 1.0, %v2631_v13  ;;  %v2658_v5 = vmul.f32 %v2657_v43, %v2630_v34 }
 0x35d   :  { %v2626_v21 = vpop.f32.mrf.mxu0 }
 0x35e   :  { %3966 = vrcp.f32 %v2632_v32  ;;  %v2644_v22 = vand.u32 2147483648, %v2632_v32  ;;  %v2642_v62 = vand.u32 2147483647, %v2632_v32  ;;  %vm2638_vm13 = vweird.f32 %v2632_v32 }
 0x35f   :  { %v2659_v4 = vmul.f32 1.442695, %v2658_v5 }
 0x360   :  { %v2645_v48 = vor.u32 1.1754944e-38, %v2644_v22  ;;  %vm2643_vm15 = vcmp.eq.f32.partialorder %v2642_v62, 8.507059e+37 }
 0x361   :  { %3968 = vpow2.f32 %v2659_v4 }
 0x364   :  { %v3967_v44 = vpop.eup %3966 }
 0x365   :  { %v2634_v28 = vmul.f32 %v3967_v44, %v2632_v32  ;;  %vm2639_vm12 = vweird.f32 %v3967_v44 }
 0x366   :  { %vm2640_vm14 = vmor %vm2638_vm13, %vm2639_vm12 }
 0x367   :  { %v2635_v42 = vsub.f32 1.0, %v2634_v28  ;;  %v3969_v32 = vpop.eup %3968  ;;  %v3949_v28 = vld [vmem:[#allocation11 + $0x28] sm:$0xff] }
 0x369   :  { %v2636_v56 = vmul.f32 %v3967_v44, %v2635_v42 }
 0x36b   :  { %v2637_v11 = vadd.f32 %v3967_v44, %v2636_v56 }
 0x36d   :  { %v2641_v57 = vsel %vm2640_vm14, %v3967_v44, %v2637_v11  ;;  %v3950_v44 = vld [vmem:[#allocation11 + $0x30] sm:$0xff] }
 0x36e   :  { %v2646_v10 = vsel %vm2643_vm15, %v2645_v48, %v2641_v57  ;;  %3378 = vmatpush.bf16.msrb.mxu3 %v3950_v44 }
 0x36f   :  { %v2648_v55 = vmul.f32 1.0614054, %v2646_v10 }
 0x371   :  { %v2649_v3 = vadd.f32 -1.4531521, %v2648_v55 }
 0x372   :  { %3379 = vmatpush.bf16.msrb.mxu3 %v3949_v28 }
 0x373   :  { %v2650_v45 = vmul.f32 %v2649_v3, %v2646_v10 }
 0x375   :  { %v2651_v49 = vadd.f32 1.4214138, %v2650_v45 }
 0x376   :  { %3380 = vmatpush.bf16.msrb.mxu3 %v3948_v38 }
 0x377   :  { %v2652_v2 = vmul.f32 %v2651_v49, %v2646_v10 }
 0x379   :  { %v2653_v17 = vadd.f32 -0.28449672, %v2652_v2 }
 0x37a   :  { %3381 = vmatpush.bf16.msrb.mxu3 %v3947_v60  ;;  %v7519_v60 = vld [vmem:[#allocation115_spill] sm:$0xff] }
 0x37b   :  { %v2654_v13 = vmul.f32 %v2653_v17, %v2646_v10 }
 0x37d   :  { %v2655_v59 = vadd.f32 0.2548296, %v2654_v13 }
 0x37e   :  { %3382 = vmatpush.bf16.msrb.mxu3 %v3946_v29  ;;  %v7520_v29 = vld [vmem:[#allocation114_spill] sm:$0xff] }
 0x37f   :  { %v2656_v52 = vmul.f32 %v2655_v59, %v2646_v10 }
 0x381   :  { %v2661_v30 = vmul.f32 %v3969_v32, %v2656_v52 }
 0x382   :  { %3383 = vmatpush.bf16.msrb.mxu3 %v3945_v61 }
 0x383   :  { %v2662_v21 = vsub.f32 1.0, %v2661_v30 }
 0x385   :  { %v2664_v40 = vsub.f32 0.0, %v2662_v21 }
 0x386   :  { %3384 = vmatpush.bf16.msrb.mxu3 %v3944_v46 }
 0x387   :  { %v2665_v63 = vsel %vm2663_vm0, %v2664_v40, %v2662_v21  ;;  %v7515_v40 = vld [vmem:[#allocation19_spill] sm:$0xff] }
 0x388   :  { %v2666_v58 = vadd.f32 1.0, %v2665_v63 }
 0x38a   :  { %v2667_v34 = vmul.f32 %v2666_v58, %v2628_v8  ;;  %v7516_v8 = vld [vmem:[#allocation21_spill] sm:$0xff] }
 0x38c   :  { %v2668_v9 = vpack.c.bf16 %v2667_v34, %v2667_v34  ;;  %v7517_v34 = vld [vmem:[#allocation20_spill] sm:$0xff] }
 0x38e   :  { %2837 = vmatmul.bf16.vlgmr.msrb.gmra.mxu1 %v2668_v9  ;;  %2850 = vmatmul.bf16.vlgmr.msrb.gmra.mxu2 %v2668_v9 }
 0x38f   :  { %2863 = vmatmul.bf16.vlgmr.msra.gmra.mxu3 %v2668_v9 }
 0x40b   :  { %v2838_v42 = vpop.f32.mrf.mxu1 }
 0x411   :  { %v2851_v25 = vpop.f32.mrf.mxu2 }
 0x412   :  { %v2868_v22 = vmax.f32 %v2838_v42, %v2851_v25  ;;  %v2864_v56 = vpop.f32.mrf.mxu3 }
 0x413   :  { %v2840_v62 = vpop.f32.mrf.mxu1 }
 0x414   :  { %v2869_v50 = vmax.f32 %v2868_v22, %v2864_v56  ;;  %v7521_v62 = vld [vmem:[#allocation23_spill] sm:$0xff] }
 0x416   :  { %v2870_v11 = vsub.f32 %v2838_v42, %v2869_v50  ;;  %v2873_v12 = vsub.f32 %v2851_v25, %v2869_v50  ;;  %v2876_v48 = vsub.f32 %v2864_v56, %v2869_v50  ;;  %v7522_v50 = vld [vmem:[#allocation25_spill] sm:$0xff] }
 0x418   :  { %v2871_v57 = vmul.f32 1.442695, %v2870_v11  ;;  %v2874_v10 = vmul.f32 1.442695, %v2873_v12  ;;  %v2877_v43 = vmul.f32 1.442695, %v2876_v48 }
 0x419   :  { %v2853_v55 = vpop.f32.mrf.mxu2  ;;  %v7523_v12 = vld [vmem:[#allocation24_spill] sm:$0xff] }
 0x41a   :  { %3970 = vpow2.f32 %v2871_v57  ;;  %v2866_v3 = vpop.f32.mrf.mxu3  ;;  %v7524_v57 = vld [vmem:[#allocation26_spill] sm:$0xff] }
 0x41b   :  { %3972 = vpow2.f32 %v2874_v10  ;;  %v7525_v3 = vld [vmem:[#allocation116_spill] sm:$0xff] }
 0x41c   :  { %3974 = vpow2.f32 %v2877_v43 }
 0x420   :  { %v3971_v5 = vpop.eup %3970 }
 0x421   :  { %v3973_v45 = vpop.eup %3972 }
 0x422   :  { %v2879_v49 = vadd.f32 %v3973_v45, %v3971_v5  ;;  %v3975_v4 = vpop.eup %3974 }
 0x424   :  { %v2880_v2 = vadd.f32 %v3975_v4, %v2879_v49 }
 0x426   :  { %3976 = vrcp.f32 %v2880_v2 }
 0x42c   :  { %v3977_v17 = vpop.eup %3976 }
 0x42d   :  { %v6729_v13 = vmul.f32 %v3977_v17, %v3971_v5  ;;  %v6731_v59 = vmul.f32 %v3977_v17, %v3973_v45  ;;  %v6733_v52 = vmul.f32 %v3977_v17, %v3975_v4  ;;  %v7526_v45 = vld [vmem:[#allocation118_spill] sm:$0xff] }
 0x42f   :  { %v2909_v32 = vperm.slane %v6729_v13, 0  ;;  %v2989_v30 = vperm.slane %v6731_v59, 0  ;;  %v3133_v21 = vperm.slane %v6733_v52, 0 }
 0x431   :  { %v2925_v63 = vmul.f32 %v2909_v32, %v7515_v40  ;;  %v2926_v58 = vmul.f32 %v2909_v32, %v7516_v8  ;;  %v3005_v9 = vmul.f32 %v2989_v30, %v7517_v34  ;;  %v3006_v44 = vmul.f32 %v2989_v30, %v7518_v54  ;;  %v7527_v40 = vld [vmem:[#allocation27_spill] sm:$0xff]  ;;  %v7528_v8 = vld [vmem:[#allocation29_spill] sm:$0xff]  ;;  %v7529_v34 = vld [vmem:[#allocation28_spill] sm:$0xff] }
 0x432   :  { %v3149_v42 = vmul.f32 %v3133_v21, %v7519_v60  ;;  %v3150_v61 = vmul.f32 %v3133_v21, %v7520_v29  ;;  %v2927_v46 = vmul.f32 %v2909_v32, %v7521_v62  ;;  %v2928_v11 = vmul.f32 %v2909_v32, %v7522_v50  ;;  %v7530_v54 = vld [vmem:[#allocation30_spill] sm:$0xff]  ;;  %v7531_v60 = vld [vmem:[#allocation119_spill] sm:$0xff]  ;;  %v7532_v29 = vld [vmem:[#allocation120_spill] sm:$0xff] }
 0x433   :  { %v3069_v28 = vadd.f32 %v3005_v9, %v2925_v63  ;;  %v3070_v38 = vadd.f32 %v3006_v44, %v2926_v58  ;;  %v3007_v48 = vmul.f32 %v2989_v30, %v7523_v12  ;;  %v3008_v10 = vmul.f32 %v2989_v30, %v7524_v57  ;;  %v7533_v62 = vld [vmem:[#allocation31_spill] sm:$0xff]  ;;  %v7534_v50 = vld [vmem:[#allocation33_spill] sm:$0xff]  ;;  %v7535_v12 = vld [vmem:[#allocation32_spill] sm:$0xff] }
 0x434   :  { %v3151_v5 = vmul.f32 %v3133_v21, %v7525_v3  ;;  %v3152_v49 = vmul.f32 %v3133_v21, %v7526_v45  ;;  %v2929_v63 = vmul.f32 %v2909_v32, %v7527_v40  ;;  %v2930_v58 = vmul.f32 %v2909_v32, %v7528_v8  ;;  %v7536_v57 = vld [vmem:[#allocation34_spill] sm:$0xff]  ;;  %v7538_v45 = vld [vmem:[#allocation123_spill] sm:$0xff] }
 0x435   :  { %v3213_v25 = vadd.f32 %v3149_v42, %v3069_v28  ;;  %v3214_v22 = vadd.f32 %v3150_v61, %v3070_v38  ;;  %v3071_v43 = vadd.f32 %v3007_v48, %v2927_v46  ;;  %v3072_v55 = vadd.f32 %v3008_v10, %v2928_v11  ;;  %v7537_v3 = vld [vmem:[#allocation122_spill] sm:$0xff] }
 0x436   :  { %v3009_v9 = vmul.f32 %v2989_v30, %v7529_v34  ;;  %v3010_v44 = vmul.f32 %v2989_v30, %v7530_v54  ;;  %v3153_v42 = vmul.f32 %v3133_v21, %v7531_v60  ;;  %v3154_v61 = vmul.f32 %v3133_v21, %v7532_v29  ;;  %v7539_v34 = vld [vmem:[#allocation35_spill] sm:$0xff] }
 0x437   :  { %v3277_v56 = vpack.c.bf16 %v3214_v22, %v3213_v25  ;;  %v3215_v4 = vadd.f32 %v3151_v5, %v3071_v43  ;;  %v3216_v2 = vadd.f32 %v3152_v49, %v3072_v55  ;;  %v2931_v46 = vmul.f32 %v2909_v32, %v7533_v62 }
 0x438   :  { %v3073_v28 = vadd.f32 %v3009_v9, %v2929_v63  ;;  %v3074_v38 = vadd.f32 %v3010_v44, %v2930_v58  ;;  %v2932_v11 = vmul.f32 %v2909_v32, %v7534_v50  ;;  %v3011_v48 = vmul.f32 %v2989_v30, %v7535_v12  ;;  %v7540_v9 = vld [vmem:[#allocation37_spill] sm:$0xff]  ;;  %v7541_v44 = vld [vmem:[#allocation36_spill] sm:$0xff] }
 0x439   :  { %3385 = vmatmul.bf16.vlgmr.msrb.gmra.mxu3 %v3277_v56  ;;  %v3278_v17 = vpack.c.bf16 %v3216_v2, %v3215_v4  ;;  %v3012_v10 = vmul.f32 %v2989_v30, %v7536_v57  ;;  %v3155_v5 = vmul.f32 %v3133_v21, %v7537_v3  ;;  %v3156_v49 = vmul.f32 %v3133_v21, %v7538_v45 }
 0x43a   :  { %v3217_v25 = vadd.f32 %v3153_v42, %v3073_v28  ;;  %v3218_v22 = vadd.f32 %v3154_v61, %v3074_v38  ;;  %v3075_v43 = vadd.f32 %v3011_v48, %v2931_v46  ;;  %v2893_v40 = vrot.slane %v6731_v59, 1  ;;  %v7542_v38 = vld [vmem:[#allocation38_spill] sm:$0xff]  ;;  %v7543_v61 = vld [vmem:[#allocation128_spill] sm:$0xff]  ;;  %v7546_v48 = vld [vmem:[#allocation41_spill] sm:$0xff] }
 0x43b   :  { %v3076_v55 = vadd.f32 %v3012_v10, %v2932_v11  ;;  %v2902_v32 = vrot.slane %v6733_v52, 1  ;;  %v7545_v11 = vld [vmem:[#allocation39_spill] sm:$0xff]  ;;  %v7547_v10 = vld [vmem:[#allocation40_spill] sm:$0xff] }
 0x43c   :  { %v3279_v56 = vpack.c.bf16 %v3218_v22, %v3217_v25  ;;  %v3219_v4 = vadd.f32 %v3155_v5, %v3075_v43  ;;  %v2990_v58 = vperm.slane %v2893_v40, 0  ;;  %v7544_v22 = vld [vmem:[#allocation127_spill] sm:$0xff] }
 0x43d   :  { %v3220_v2 = vadd.f32 %v3156_v49, %v3076_v55  ;;  %v3134_v60 = vperm.slane %v2902_v32, 0  ;;  %v7548_v55 = vld [vmem:[#allocation42_spill] sm:$0xff]  ;;  %v7549_v49 = vld [vmem:[#allocation129_spill] sm:$0xff] }
 0x43e   :  { %v3013_v28 = vmul.f32 %v2990_v58, %v7541_v44  ;;  %v3014_v21 = vmul.f32 %v2990_v58, %v7542_v38  ;;  %v3015_v43 = vmul.f32 %v2990_v58, %v7547_v10  ;;  %v3016_v3 = vmul.f32 %v2990_v58, %v7548_v55  ;;  %v7553_v44 = vld [vmem:[#allocation45_spill] sm:$0xff]  ;;  %v7554_v38 = vld [vmem:[#allocation48_spill] sm:$0xff]  ;;  %v7559_v10 = vld [vmem:[#allocation51_spill] sm:$0xff] }
 0x43f   :  { %v3280_v63 = vpack.c.bf16 %v3220_v2, %v3219_v4  ;;  %v3157_v25 = vmul.f32 %v3134_v60, %v7543_v61  ;;  %v3159_v4 = vmul.f32 %v3134_v60, %v7549_v49  ;;  %v7550_v2 = vld [vmem:[#allocation130_spill] sm:$0xff]  ;;  %v7555_v61 = vld [vmem:[#allocation43_spill] sm:$0xff]  ;;  %v7561_v49 = vld [vmem:[#allocation49_spill] sm:$0xff] }
 0x440   :  { %v7560_v55 = vld [vmem:[#allocation54_spill] sm:$0xff] }
 0x449   :  { %3390 = vmatmul.bf16.gmra.mxu3 %v3278_v17  ;;  %v2884_v17 = vrot.slane %v6729_v13, 1 }
 0x44b   :  { %v2910_v8 = vperm.slane %v2884_v17, 0  ;;  %v3160_v17 = vmul.f32 %v3134_v60, %v7550_v2  ;;  %v7562_v2 = vld [vmem:[#allocation52_spill] sm:$0xff] }
 0x44d   :  { %v2933_v30 = vmul.f32 %v2910_v8, %v7539_v34  ;;  %v2934_v54 = vmul.f32 %v2910_v8, %v7540_v9  ;;  %v2935_v12 = vmul.f32 %v2910_v8, %v7545_v11  ;;  %v2936_v57 = vmul.f32 %v2910_v8, %v7546_v48  ;;  %v7551_v34 = vld [vmem:[#allocation44_spill] sm:$0xff]  ;;  %v7552_v9 = vld [vmem:[#allocation47_spill] sm:$0xff]  ;;  %v7557_v11 = vld [vmem:[#allocation50_spill] sm:$0xff] }
 0x44e   :  { %v7558_v48 = vld [vmem:[#allocation53_spill] sm:$0xff] }
 0x44f   :  { %v3077_v42 = vadd.f32 %v3013_v28, %v2933_v30  ;;  %v3078_v29 = vadd.f32 %v3014_v21, %v2934_v54  ;;  %v3079_v5 = vadd.f32 %v3015_v43, %v2935_v12  ;;  %v3080_v45 = vadd.f32 %v3016_v3, %v2936_v57 }
 0x450   :  { %v2937_v30 = vmul.f32 %v2910_v8, %v7551_v34  ;;  %v2938_v54 = vmul.f32 %v2910_v8, %v7552_v9  ;;  %v3017_v28 = vmul.f32 %v2990_v58, %v7553_v44  ;;  %v3018_v21 = vmul.f32 %v2990_v58, %v7554_v38  ;;  %v7563_v44 = vld [vmem:[#allocation56_spill] sm:$0xff] }
 0x451   :  { %v3221_v62 = vadd.f32 %v3157_v25, %v3077_v42  ;;  %v3223_v40 = vadd.f32 %v3159_v4, %v3079_v5  ;;  %v3161_v25 = vmul.f32 %v3134_v60, %v7555_v61  ;;  %v2939_v12 = vmul.f32 %v2910_v8, %v7557_v11 }
 0x452   :  { %v3081_v42 = vadd.f32 %v3017_v28, %v2937_v30  ;;  %v2940_v57 = vmul.f32 %v2910_v8, %v7558_v48  ;;  %v3019_v43 = vmul.f32 %v2990_v58, %v7559_v10  ;;  %v3020_v3 = vmul.f32 %v2990_v58, %v7560_v55  ;;  %v7564_v28 = vld [vmem:[#allocation59_spill] sm:$0xff]  ;;  %v7569_v10 = vld [vmem:[#allocation62_spill] sm:$0xff]  ;;  %v7570_v55 = vld [vmem:[#allocation65_spill] sm:$0xff] }
 0x453   :  { %v3163_v4 = vmul.f32 %v3134_v60, %v7561_v49  ;;  %v2894_v34 = vrot.slane %v6731_v59, 2  ;;  %v2903_v8 = vrot.slane %v6733_v52, 2  ;;  %v7572_v49 = vld [vmem:[#allocation66_spill] sm:$0xff] }
 0x454   :  { %v3083_v5 = vadd.f32 %v3019_v43, %v2939_v12 }
 0x455   :  { %v3135_v61 = vperm.slane %v2903_v8, 0 }
 0x459   :  { %3395 = vmatmul.bf16.gmra.mxu3 %v3279_v56  ;;  %v3158_v56 = vmul.f32 %v3134_v60, %v7544_v22  ;;  %v7556_v22 = vld [vmem:[#allocation46_spill] sm:$0xff] }
 0x45b   :  { %v3222_v46 = vadd.f32 %v3158_v56, %v3078_v29  ;;  %v3082_v29 = vadd.f32 %v3018_v21, %v2938_v54  ;;  %v3162_v56 = vmul.f32 %v3134_v60, %v7556_v22  ;;  %v2991_v54 = vperm.slane %v2894_v34, 0  ;;  %v7565_v21 = vld [vmem:[#allocation58_spill] sm:$0xff] }
 0x45d   :  { %v3281_v50 = vpack.c.bf16 %v3222_v46, %v3221_v62  ;;  %v3225_v62 = vadd.f32 %v3161_v25, %v3081_v42  ;;  %v3226_v46 = vadd.f32 %v3162_v56, %v3082_v29  ;;  %v3021_v42 = vmul.f32 %v2991_v54, %v7565_v21  ;;  %v7566_v29 = vld [vmem:[#allocation61_spill] sm:$0xff]  ;;  %v7567_v56 = vld [vmem:[#allocation55_spill] sm:$0xff] }
 0x469   :  { %3400 = vmatmul.bf16.gmra.mxu3 %v3280_v63  ;;  %v3224_v63 = vadd.f32 %v3160_v17, %v3080_v45  ;;  %v3084_v45 = vadd.f32 %v3020_v3, %v2940_v57  ;;  %v3164_v17 = vmul.f32 %v3134_v60, %v7562_v2  ;;  %v3022_v60 = vmul.f32 %v2991_v54, %v7566_v29  ;;  %v6801_v57 = vld [vmem:[%s7032_s6] ss:$0 sm:$0xff]  ;;  %s4169_s6 = smov [#allocation13]  }
 0x46a   :  { %s3614_s9 = sshll.u32 %s4169_s6, 4  ;;  %s3615_s9 = int_to_ptr.vmem [resolvable:$true] %s3614_s9 }
 0x46b   :  { %v3282_v32 = vpack.c.bf16 %v3224_v63, %v3223_v40  ;;  %v3227_v40 = vadd.f32 %v3163_v4, %v3083_v5  ;;  %v3228_v63 = vadd.f32 %v3164_v17, %v3084_v45  ;;  %v7571_v5 = vld [vmem:[#allocation63_spill] sm:$0xff]  ;;  %v3024_v4 = vmul.f32 %v2991_v54, %v7572_v49 }
 0x46c   :  { %v3023_v45 = vmul.f32 %v2991_v54, %v7571_v5 }
 0x46d   :  { %v3284_v30 = vpack.c.bf16 %v3228_v63, %v3227_v40 }
 0x479   :  { %3405 = vmatmul.bf16.gmra.mxu3 %v3281_v50  ;;  %v3283_v50 = vpack.c.bf16 %v3226_v46, %v3225_v62  ;;  %v3165_v62 = vmul.f32 %v3135_v61, %v7567_v56  ;;  %v7568_v46 = vld [vmem:[#allocation57_spill] sm:$0xff] }
 0x489   :  { %3410 = vmatmul.bf16.gmra.mxu3 %v3282_v32  ;;  %v2885_v32 = vrot.slane %v6729_v13, 2 }
 0x48b   :  { %v2911_v9 = vperm.slane %v2885_v32, 0  ;;  %v7573_v32 = vld [vmem:[#allocation60_spill] sm:$0xff] }
 0x48c   :  { %v3167_v34 = vmul.f32 %v3135_v61, %v7573_v32 }
 0x48d   :  { %v2941_v58 = vmul.f32 %v2911_v9, %v7563_v44  ;;  %v2942_v38 = vmul.f32 %v2911_v9, %v7564_v28  ;;  %v2943_v43 = vmul.f32 %v2911_v9, %v7569_v10  ;;  %v2944_v3 = vmul.f32 %v2911_v9, %v7570_v55  ;;  %v7579_v10 = vld [vmem:[#allocation67_spill] sm:$0xff]  ;;  %v7580_v55 = vld [vmem:[#allocation70_spill] sm:$0xff] }
 0x48f   :  { %v3085_v25 = vadd.f32 %v3021_v42, %v2941_v58  ;;  %v3086_v22 = vadd.f32 %v3022_v60, %v2942_v38  ;;  %v3087_v40 = vadd.f32 %v3023_v45, %v2943_v43  ;;  %v3088_v63 = vadd.f32 %v3024_v4, %v2944_v3  ;;  %v7575_v42 = vld [vmem:[#allocation68_spill] sm:$0xff]  ;;  %v7576_v60 = vld [vmem:[#allocation71_spill] sm:$0xff] }
 0x490   :  { %v2945_v29 = vmul.f32 %v2911_v9, %v7575_v42  ;;  %v3169_v43 = vmul.f32 %v3135_v61, %v7579_v10  ;;  %v3170_v3 = vmul.f32 %v3135_v61, %v7580_v55  ;;  %v7585_v42 = vld [vmem:[#allocation73_spill] sm:$0xff]  ;;  %v7587_v10 = vld [vmem:[#allocation80_spill] sm:$0xff]  ;;  %v7588_v55 = vld [vmem:[#allocation83_spill] sm:$0xff] }
 0x491   :  { %v3229_v11 = vadd.f32 %v3165_v62, %v3085_v25  ;;  %v3231_v44 = vadd.f32 %v3167_v34, %v3087_v40  ;;  %v2946_v25 = vmul.f32 %v2911_v9, %v7576_v60  ;;  %v7578_v62 = vld [vmem:[#allocation72_spill] sm:$0xff]  ;;  %v7583_v34 = vld [vmem:[#allocation75_spill] sm:$0xff] }
 0x492   :  { %v7586_v60 = vld [vmem:[#allocation76_spill] sm:$0xff] }
 0x499   :  { %3415 = vmatmul.bf16.gmra.mxu3 %v3283_v50  ;;  %v3166_v50 = vmul.f32 %v3135_v61, %v7568_v46  ;;  %v3026_v46 = vmul.f32 %v2991_v54, %v7578_v62  ;;  %v2886_v62 = vrot.slane %v6729_v13, 3 }
 0x49b   :  { %v3230_v12 = vadd.f32 %v3166_v50, %v3086_v22  ;;  %v7577_v22 = vld [vmem:[#allocation69_spill] sm:$0xff] }
 0x49c   :  { %v3025_v56 = vmul.f32 %v2991_v54, %v7577_v22 }
 0x49d   :  { %v3285_v48 = vpack.c.bf16 %v3230_v12, %v3229_v11 }
 0x49e   :  { %v3089_v12 = vadd.f32 %v3025_v56, %v2945_v29  ;;  %v3171_v29 = vmul.f32 %v3135_v61, %v7585_v42  ;;  %v7593_v42 = vld [vmem:[#allocation86_spill] sm:$0xff] }
 0x4a0   :  { %v3233_v5 = vadd.f32 %v3169_v43, %v3089_v12 }
 0x4a9   :  { %3420 = vmatmul.bf16.gmra.mxu3 %v3284_v30  ;;  %v7574_v30 = vld [vmem:[#allocation64_spill] sm:$0xff] }
 0x4aa   :  { %v3168_v8 = vmul.f32 %v3135_v61, %v7574_v30  ;;  %v3027_v30 = vmul.f32 %v2991_v54, %v7583_v34 }
 0x4ac   :  { %v3232_v58 = vadd.f32 %v3168_v8, %v3088_v63  ;;  %v7582_v63 = vld [vmem:[#allocation77_spill] sm:$0xff]  ;;  %v7584_v8 = vld [vmem:[#allocation78_spill] sm:$0xff] }
 0x4ad   :  { %v2948_v32 = vmul.f32 %v2911_v9, %v7582_v63 }
 0x4ae   :  { %v3286_v21 = vpack.c.bf16 %v3232_v58, %v3231_v44  ;;  %v3028_v44 = vmul.f32 %v2991_v54, %v7584_v8 }
 0x4b9   :  { %3425 = vmatmul.bf16.gmra.mxu3 %v3285_v48  ;;  %v3090_v48 = vadd.f32 %v3026_v46, %v2946_v25  ;;  %v3172_v25 = vmul.f32 %v3135_v61, %v7586_v60  ;;  %v7594_v60 = vld [vmem:[#allocation89_spill] sm:$0xff] }
 0x4bb   :  { %v3234_v45 = vadd.f32 %v3170_v3, %v3090_v48  ;;  %v2904_v48 = vrot.slane %v6733_v52, 3  ;;  %v7589_v3 = vld [vmem:[#allocation82_spill] sm:$0xff] }
 0x4bc   :  { %v3386_v2 = vpop.f32.mrf.mxu3 }
 0x4bd   :  { %v3387_v17 = vadd.f32 %v6801_v57, %v3386_v2  ;;  %v3287_v2 = vpack.c.bf16 %v3234_v45, %v3233_v5  ;;  %v7590_v45 = vld [vmem:[#allocation85_spill] sm:$0xff] }
 0x4bf   :  { %3546 = vst [vmem:[#allocation13] sm:$0xff] %v3387_v17  ;;  %v7581_v17 = vld [vmem:[#allocation74_spill] sm:$0xff] }
 0x4c0   :  { %v2947_v40 = vmul.f32 %v2911_v9, %v7581_v17  ;;  %v2895_v9 = vrot.slane %v6731_v59, 3  ;;  %v3136_v17 = vperm.slane %v2904_v48, 0 }
 0x4c2   :  { %v2992_v12 = vperm.slane %v2895_v9, 0 }
 0x4c4   :  { %v3388_v28 = vpop.f32.mrf.mxu3  ;;  %v3029_v5 = vmul.f32 %v2992_v12, %v7589_v3 }
 0x4c5   :  { %v3389_v38 = vadd.f32 %v6801_v57, %v3388_v28 }
 0x4c7   :  { %3547 = vst [vmem:[#allocation13 + $0x8] sm:$0xff] %v3389_v38  ;;  %v3091_v38 = vadd.f32 %v3027_v30, %v2947_v40  ;;  %v7592_v30 = vld [vmem:[#allocation81_spill] sm:$0xff] }
 0x4c8   :  { %v3174_v8 = vmul.f32 %v3136_v17, %v7592_v30 }
 0x4c9   :  { %3430 = vmatmul.bf16.gmra.mxu3 %v3286_v21  ;;  %v3092_v21 = vadd.f32 %v3028_v44, %v2948_v32  ;;  %v3235_v22 = vadd.f32 %v3171_v29, %v3091_v38  ;;  %v7591_v32 = vld [vmem:[#allocation79_spill] sm:$0xff] }
 0x4ca   :  { %v3173_v34 = vmul.f32 %v3136_v17, %v7591_v32 }
 0x4cb   :  { %v3236_v56 = vadd.f32 %v3172_v25, %v3092_v21 }
 0x4cc   :  { %v3391_v50 = vpop.f32.mrf.mxu3 }
 0x4cd   :  { %v3392_v11 = vadd.f32 %v6801_v57, %v3391_v50  ;;  %v3288_v54 = vpack.c.bf16 %v3236_v56, %v3235_v22  ;;  %v7595_v22 = vld [vmem:[#allocation87_spill] sm:$0xff] }
 0x4ce   :  { %v3031_v56 = vmul.f32 %v2992_v12, %v7595_v22 }
 0x4cf   :  { %3548 = vst [vmem:[#allocation13 + $0x10] sm:$0xff] %v3392_v11  ;;  %v2912_v11 = vperm.slane %v2886_v62, 0  ;;  %v7596_v62 = vld [vmem:[#allocation90_spill] sm:$0xff] }
 0x4d0   :  { %v3032_v9 = vmul.f32 %v2992_v12, %v7596_v62 }
 0x4d1   :  { %v2949_v43 = vmul.f32 %v2912_v11, %v7587_v10  ;;  %v2950_v61 = vmul.f32 %v2912_v11, %v7588_v55  ;;  %v2951_v29 = vmul.f32 %v2912_v11, %v7593_v42  ;;  %v2952_v25 = vmul.f32 %v2912_v11, %v7594_v60  ;;  %v7597_v10 = vld [vmem:[#allocation84_spill] sm:$0xff]  ;;  %v7603_v42 = vld [vmem:[#allocation91_spill] sm:$0xff]  ;;  %v7604_v60 = vld [vmem:[#allocation94_spill] sm:$0xff] }
 0x4d2   :  { %v7598_v55 = vld [vmem:[#allocation88_spill] sm:$0xff] }
 0x4d3   :  { %v3093_v40 = vadd.f32 %v3029_v5, %v2949_v43  ;;  %v3096_v48 = vadd.f32 %v3032_v9, %v2952_v25  ;;  %v3175_v43 = vmul.f32 %v3136_v17, %v7597_v10  ;;  %v3178_v25 = vmul.f32 %v3136_v17, %v7604_v60  ;;  %v7612_v60 = vld [vmem:[#allocation106_spill] sm:$0xff] }
 0x4d4   :  { %v3393_v49 = vpop.f32.mrf.mxu3 }
 0x4d5   :  { %v3394_v4 = vadd.f32 %v6801_v57, %v3393_v49  ;;  %v3030_v49 = vmul.f32 %v2992_v12, %v7590_v45  ;;  %v3237_v44 = vadd.f32 %v3173_v34, %v3093_v40  ;;  %v7601_v34 = vld [vmem:[#allocation93_spill] sm:$0xff] }
 0x4d6   :  { %v3033_v30 = vmul.f32 %v2992_v12, %v7601_v34 }
 0x4d7   :  { %3549 = vst [vmem:[#allocation13 + $0x18] sm:$0xff] %v3394_v4  ;;  %v3094_v63 = vadd.f32 %v3030_v49, %v2950_v61  ;;  %v3176_v61 = vmul.f32 %v3136_v17, %v7598_v55 }
 0x4d9   :  { %3435 = vmatmul.bf16.gmra.mxu3 %v3287_v2  ;;  %v3240_v5 = vadd.f32 %v3176_v61, %v3096_v48  ;;  %v7606_v48 = vld [vmem:[#allocation100_spill] sm:$0xff]  ;;  %v7608_v61 = vld [vmem:[#allocation101_spill] sm:$0xff] }
 0x4da   :  { %v2956_v10 = vmul.f32 %v2912_v11, %v7606_v48 }
 0x4dc   :  { %v3396_v58 = vpop.f32.mrf.mxu3 }
 0x4dd   :  { %v3397_v28 = vadd.f32 %v6801_v57, %v3396_v58  ;;  %v3238_v58 = vadd.f32 %v3174_v8, %v3094_v63  ;;  %v7600_v63 = vld [vmem:[#allocation95_spill] sm:$0xff]  ;;  %v7602_v8 = vld [vmem:[#allocation96_spill] sm:$0xff] }
 0x4de   :  { %v2954_v32 = vmul.f32 %v2912_v11, %v7600_v63  ;;  %v7610_v63 = vld [vmem:[#allocation150_spill] sm:$0xff] }
 0x4df   :  { %3550 = vst [vmem:[#allocation13 + $0x20] sm:$0xff] %v3397_v28  ;;  %v3289_v21 = vpack.c.bf16 %v3238_v58, %v3237_v44  ;;  %v3034_v44 = vmul.f32 %v2992_v12, %v7602_v8  ;;  %v2887_v8 = vrot.slane %v6729_v13, 4 }
 0x4e4   :  { %v3398_v46 = vpop.f32.mrf.mxu3 }
 0x4e5   :  { %v3399_v50 = vadd.f32 %v6801_v57, %v3398_v46 }
 0x4e7   :  { %3551 = vst [vmem:[#allocation13 + $0x28] sm:$0xff] %v3399_v50 }
 0x4e9   :  { %3440 = vmatmul.bf16.gmra.mxu3 %v3288_v54  ;;  %v3095_v54 = vadd.f32 %v3031_v56, %v2951_v29  ;;  %v3177_v29 = vmul.f32 %v3136_v17, %v7603_v42  ;;  %v7611_v42 = vld [vmem:[#allocation103_spill] sm:$0xff] }
 0x4eb   :  { %v3239_v3 = vadd.f32 %v3175_v43, %v3095_v54  ;;  %v7607_v43 = vld [vmem:[#allocation99_spill] sm:$0xff] }
 0x4ec   :  { %v3401_v4 = vpop.f32.mrf.mxu3  ;;  %v3035_v55 = vmul.f32 %v2992_v12, %v7607_v43 }
 0x4ed   :  { %v3402_v2 = vadd.f32 %v6801_v57, %v3401_v4  ;;  %v3290_v4 = vpack.c.bf16 %v3240_v5, %v3239_v3  ;;  %v3036_v3 = vmul.f32 %v2992_v12, %v7608_v61 }
 0x4ef   :  { %3552 = vst [vmem:[#allocation13 + $0x30] sm:$0xff] %v3402_v2  ;;  %v7599_v2 = vld [vmem:[#allocation92_spill] sm:$0xff] }
 0x4f0   :  { %v2953_v40 = vmul.f32 %v2912_v11, %v7599_v2  ;;  %v7609_v2 = vld [vmem:[#allocation97_spill] sm:$0xff] }
 0x4f4   :  { %v3403_v28 = vpop.f32.mrf.mxu3 }
 0x4f5   :  { %v3404_v38 = vadd.f32 %v6801_v57, %v3403_v28 }
 0x4f7   :  { %3553 = vst [vmem:[#allocation13 + $0x38] sm:$0xff] %v3404_v38  ;;  %v3097_v38 = vadd.f32 %v3033_v30, %v2953_v40  ;;  %v3179_v40 = vmul.f32 %v3136_v17, %v7609_v2  ;;  %v7617_v2 = vld [vmem:[#allocation109_spill] sm:$0xff] }
 0x4f9   :  { %3445 = vmatmul.bf16.gmra.mxu3 %v3289_v21  ;;  %v3098_v21 = vadd.f32 %v3034_v44, %v2954_v32  ;;  %v3241_v22 = vadd.f32 %v3177_v29, %v3097_v38  ;;  %v3180_v32 = vmul.f32 %v3136_v17, %v7610_v63 }
 0x4fb   :  { %v3242_v56 = vadd.f32 %v3178_v25, %v3098_v21  ;;  %v2905_v21 = vrot.slane %v6733_v52, 4  ;;  %v7613_v25 = vld [vmem:[#allocation105_spill] sm:$0xff] }
 0x4fc   :  { %v3406_v46 = vpop.f32.mrf.mxu3 }
 0x4fd   :  { %v3407_v50 = vadd.f32 %v6801_v57, %v3406_v46  ;;  %v3291_v46 = vpack.c.bf16 %v3242_v56, %v3241_v22  ;;  %v7614_v56 = vld [vmem:[#allocation108_spill] sm:$0xff] }
 0x4ff   :  { %3554 = vst [vmem:[#allocation13 + $0x40] sm:$0xff] %v3407_v50  ;;  %v7605_v50 = vld [vmem:[#allocation98_spill] sm:$0xff] }
 0x500   :  { %v2955_v54 = vmul.f32 %v2912_v11, %v7605_v50  ;;  %v2896_v11 = vrot.slane %v6731_v59, 4  ;;  %v3137_v50 = vperm.slane %v2905_v21, 0 }
 0x502   :  { %v2993_v38 = vperm.slane %v2896_v11, 0 }
 0x504   :  { %v3408_v45 = vpop.f32.mrf.mxu3  ;;  %v3037_v22 = vmul.f32 %v2993_v38, %v7613_v25 }
 0x505   :  { %v3409_v49 = vadd.f32 %v6801_v57, %v3408_v45 }
 0x507   :  { %3555 = vst [vmem:[#allocation13 + $0x48] sm:$0xff] %v3409_v49  ;;  %v3099_v49 = vadd.f32 %v3035_v55, %v2955_v54  ;;  %v7616_v55 = vld [vmem:[#allocation104_spill] sm:$0xff] }
 0x508   :  { %v3182_v61 = vmul.f32 %v3137_v50, %v7616_v55 }
 0x509   :  { %3450 = vmatmul.bf16.gmra.mxu3 %v3290_v4  ;;  %v3100_v4 = vadd.f32 %v3036_v3, %v2956_v10  ;;  %v3243_v34 = vadd.f32 %v3179_v40, %v3099_v49  ;;  %v7615_v10 = vld [vmem:[#allocation102_spill] sm:$0xff] }
 0x50a   :  { %v3181_v43 = vmul.f32 %v3137_v50, %v7615_v10 }
 0x50b   :  { %v3244_v30 = vadd.f32 %v3180_v32, %v3100_v4  ;;  %v7618_v32 = vld [vmem:[#allocation110_spill] sm:$0xff] }
 0x50c   :  { %v3411_v58 = vpop.f32.mrf.mxu3 }
 0x50d   :  { %v3412_v28 = vadd.f32 %v6801_v57, %v3411_v58  ;;  %v3292_v12 = vpack.c.bf16 %v3244_v30, %v3243_v34  ;;  %v3039_v34 = vmul.f32 %v2993_v38, %v7618_v32  ;;  %v3040_v30 = vmul.f32 %v2993_v38, %v7441_v1 }
 0x50f   :  { %3556 = vst [vmem:[#allocation13 + $0x50] sm:$0xff] %v3412_v28  ;;  %v2913_v28 = vperm.slane %v2887_v8, 0 }
 0x511   :  { %v2957_v29 = vmul.f32 %v2913_v28, %v7611_v42  ;;  %v2958_v17 = vmul.f32 %v2913_v28, %v7612_v60  ;;  %v2959_v40 = vmul.f32 %v2913_v28, %v7617_v2  ;;  %v2960_v63 = vmul.f32 %v2913_v28, %v7440_v15  ;;  %v7620_v42 = vld [vmem:[#allocation158_spill] sm:$0xff] }
 0x512   :  { %v2964_v32 = vmul.f32 %v2913_v28, %v5302_v26  ;;  %v2897_v26 = vrot.slane %v6731_v59, 5 }
 0x513   :  { %v3101_v54 = vadd.f32 %v3037_v22, %v2957_v29  ;;  %v3184_v29 = vmul.f32 %v3137_v50, %v7620_v42  ;;  %v7628_v42 = vld [vmem:[#allocation162_spill] sm:$0xff] }
 0x514   :  { %v3413_v62 = vpop.f32.mrf.mxu3 }
 0x515   :  { %v3414_v9 = vadd.f32 %v6801_v57, %v3413_v62  ;;  %v3038_v62 = vmul.f32 %v2993_v38, %v7614_v56  ;;  %v3245_v3 = vadd.f32 %v3181_v43, %v3101_v54  ;;  %v7621_v56 = vld [vmem:[#allocation117_spill] sm:$0xff] }
 0x516   :  { %v2961_v1 = vmul.f32 %v2913_v28, %v7621_v56 }
 0x517   :  { %3557 = vst [vmem:[#allocation13 + $0x58] sm:$0xff] %v3414_v9  ;;  %v3102_v48 = vadd.f32 %v3038_v62, %v2958_v17  ;;  %v2962_v62 = vmul.f32 %v2913_v28, %v5227_v51 }
 0x519   :  { %3455 = vmatmul.bf16.gmra.mxu3 %v3291_v46 }
 0x51c   :  { %v3416_v5 = vpop.f32.mrf.mxu3 }
 0x51d   :  { %v3417_v45 = vadd.f32 %v6801_v57, %v3416_v5  ;;  %v3246_v5 = vadd.f32 %v3182_v61, %v3102_v48  ;;  %v7623_v61 = vld [vmem:[#allocation111_spill] sm:$0xff] }
 0x51f   :  { %3558 = vst [vmem:[#allocation13 + $0x60] sm:$0xff] %v3417_v45  ;;  %v3293_v4 = vpack.c.bf16 %v3246_v5, %v3245_v3  ;;  %v3185_v3 = vmul.f32 %v3137_v50, %v7623_v61  ;;  %v7624_v5 = vld [vmem:[#allocation112_spill] sm:$0xff] }
 0x524   :  { %v3418_v44 = vpop.f32.mrf.mxu3 }
 0x525   :  { %v3419_v58 = vadd.f32 %v6801_v57, %v3418_v44  ;;  %v3103_v44 = vadd.f32 %v3039_v34, %v2959_v40  ;;  %v7626_v34 = vld [vmem:[#allocation125_spill] sm:$0xff] }
 0x527   :  { %3559 = vst [vmem:[#allocation13 + $0x68] sm:$0xff] %v3419_v58  ;;  %v3104_v58 = vadd.f32 %v3040_v30, %v2960_v63  ;;  %v3043_v30 = vmul.f32 %v2993_v38, %v7626_v34 }
 0x529   :  { %3460 = vmatmul.bf16.gmra.mxu3 %v3292_v12  ;;  %v7619_v12 = vld [vmem:[#allocation107_spill] sm:$0xff]  ;;  %v3248_v17 = vadd.f32 %v3184_v29, %v3104_v58  ;;  %v3187_v29 = vmul.f32 %v3137_v50, %v7628_v42 }
 0x52a   :  { %v3183_v21 = vmul.f32 %v3137_v50, %v7619_v12 }
 0x52c   :  { %v3421_v9 = vpop.f32.mrf.mxu3  ;;  %v3247_v60 = vadd.f32 %v3183_v21, %v3103_v44 }
 0x52d   :  { %v3422_v46 = vadd.f32 %v6801_v57, %v3421_v9  ;;  %v3041_v9 = vmul.f32 %v2993_v38, %v5187_v19  ;;  %v7625_v19 = vld [vmem:[#allocation124_spill] sm:$0xff] }
 0x52e   :  { %v3294_v15 = vpack.c.bf16 %v3248_v17, %v3247_v60  ;;  %v2963_v63 = vmul.f32 %v2913_v28, %v7625_v19  ;;  %v3188_v60 = vmul.f32 %v3137_v50, %v6031_v6 }
 0x52f   :  { %3560 = vst [vmem:[#allocation13 + $0x70] sm:$0xff] %v3422_v46  ;;  %v7622_v46 = vld [vmem:[#allocation121_spill] sm:$0xff]  ;;  %v3105_v43 = vadd.f32 %v3041_v9, %v2961_v1  ;;  %v2994_v1 = vperm.slane %v2897_v26, 0  ;;  %v7629_v9 = vld [vmem:[#allocation168_spill] sm:$0xff] }
 0x530   :  { %v3042_v54 = vmul.f32 %v2993_v38, %v7622_v46  ;;  %v3107_v12 = vadd.f32 %v3043_v30, %v2963_v63  ;;  %v7635_v30 = vld [vmem:[#allocation169_spill] sm:$0xff] }
 0x531   :  { %v7639_v26 = vld [vmem:[#allocation133_spill] sm:$0xff] }
 0x532   :  { %v3106_v55 = vadd.f32 %v3042_v54, %v2962_v62  ;;  %v3251_v17 = vadd.f32 %v3187_v29, %v3107_v12  ;;  %v2906_v62 = vrot.slane %v6733_v52, 5  ;;  %v7630_v54 = vld [vmem:[#allocation131_spill] sm:$0xff] }
 0x533   :  { %v7637_v12 = vld [vmem:[#allocation135_spill] sm:$0xff] }
 0x534   :  { %v3423_v45 = vpop.f32.mrf.mxu3 }
 0x535   :  { %v3424_v49 = vadd.f32 %v6801_v57, %v3423_v45  ;;  %v3186_v45 = vmul.f32 %v3137_v50, %v7624_v5  ;;  %v7631_v50 = vld [vmem:[#allocation171_spill] sm:$0xff] }
 0x537   :  { %3561 = vst [vmem:[#allocation13 + $0x78] sm:$0xff] %v3424_v49  ;;  %v3249_v49 = vadd.f32 %v3185_v3, %v3105_v43  ;;  %v3138_v3 = vperm.slane %v2906_v62, 0 }
 0x539   :  { %3465 = vmatmul.bf16.gmra.mxu3 %v3293_v4  ;;  %v3250_v4 = vadd.f32 %v3186_v45, %v3106_v55 }
 0x53b   :  { %v3295_v51 = vpack.c.bf16 %v3250_v4, %v3249_v49  ;;  %v7633_v49 = vld [vmem:[#allocation170_spill] sm:$0xff] }
 0x53c   :  { %v3426_v8 = vpop.f32.mrf.mxu3  ;;  %v3189_v4 = vmul.f32 %v3138_v3, %v7633_v49  ;;  %v3193_v49 = vmul.f32 %v3138_v3, %v6192_v0 }
 0x53d   :  { %v3427_v11 = vadd.f32 %v6801_v57, %v3426_v8  ;;  %v7627_v8 = vld [vmem:[#allocation126_spill] sm:$0xff] }
 0x53f   :  { %3562 = vst [vmem:[#allocation13 + $0x80] sm:$0xff] %v3427_v11  ;;  %v3044_v11 = vmul.f32 %v2993_v38, %v7627_v8 }
 0x541   :  { %v3108_v21 = vadd.f32 %v3044_v11, %v2964_v32 }
 0x544   :  { %v3428_v25 = vpop.f32.mrf.mxu3 }
 0x545   :  { %v3429_v22 = vadd.f32 %v6801_v57, %v3428_v25  ;;  %v3252_v25 = vadd.f32 %v3188_v60, %v3108_v21  ;;  %v3048_v21 = vmul.f32 %v2994_v1, %v7637_v12  ;;  %v3195_v12 = vmul.f32 %v3138_v3, %v6228_v7 }
 0x547   :  { %3563 = vst [vmem:[#allocation13 + $0x88] sm:$0xff] %v3429_v22  ;;  %v2888_v22 = vrot.slane %v6729_v13, 5  ;;  %v3296_v38 = vpack.c.bf16 %v3252_v25, %v3251_v17  ;;  %v7638_v25 = vld [vmem:[#allocation173_spill] sm:$0xff] }
 0x549   :  { %3470 = vmatmul.bf16.gmra.mxu3 %v3294_v15  ;;  %v2914_v56 = vperm.slane %v2888_v22, 0  ;;  %v3191_v22 = vmul.f32 %v3138_v3, %v7638_v25 }
 0x54b   :  { %v2965_v46 = vmul.f32 %v2914_v56, %v7629_v9  ;;  %v2966_v6 = vmul.f32 %v2914_v56, %v7630_v54  ;;  %v2967_v8 = vmul.f32 %v2914_v56, %v7635_v30  ;;  %v2968_v11 = vmul.f32 %v2914_v56, %v7461_v36  ;;  %v7644_v30 = vld [vmem:[#allocation145_spill] sm:$0xff] }
 0x54c   :  { %v3431_v48 = vpop.f32.mrf.mxu3 }
 0x54d   :  { %v3432_v10 = vadd.f32 %v6801_v57, %v3431_v48  ;;  %v3045_v48 = vmul.f32 %v2994_v1, %v7631_v50  ;;  %v3112_v17 = vadd.f32 %v3048_v21, %v2968_v11  ;;  %v3052_v11 = vmul.f32 %v2994_v1, %v7480_v31 }
 0x54e   :  { %v3196_v21 = vmul.f32 %v3138_v3, %v6258_v24 }
 0x54f   :  { %3564 = vst [vmem:[#allocation13 + $0x90] sm:$0xff] %v3432_v10  ;;  %v7632_v10 = vld [vmem:[#allocation166_spill] sm:$0xff]  ;;  %v3109_v5 = vadd.f32 %v3045_v48, %v2965_v46  ;;  %v7642_v48 = vld [vmem:[#allocation139_spill] sm:$0xff] }
 0x550   :  { %v3046_v43 = vmul.f32 %v2994_v1, %v7632_v10  ;;  %v7640_v46 = vld [vmem:[#allocation138_spill] sm:$0xff]  ;;  %v3049_v10 = vmul.f32 %v2994_v1, %v7642_v48 }
 0x551   :  { %v2969_v54 = vmul.f32 %v2914_v56, %v7640_v46 }
 0x552   :  { %v3110_v45 = vadd.f32 %v3046_v43, %v2966_v6  ;;  %v7641_v6 = vld [vmem:[#allocation141_spill] sm:$0xff]  ;;  %v3050_v43 = vmul.f32 %v2994_v1, %v7470_v27 }
 0x553   :  { %v2970_v50 = vmul.f32 %v2914_v56, %v7641_v6 }
 0x554   :  { %v3433_v2 = vpop.f32.mrf.mxu3 }
 0x555   :  { %v3434_v40 = vadd.f32 %v6801_v57, %v3433_v2  ;;  %v7634_v2 = vld [vmem:[#allocation165_spill] sm:$0xff] }
 0x557   :  { %3565 = vst [vmem:[#allocation13 + $0x98] sm:$0xff] %v3434_v40  ;;  %v3190_v40 = vmul.f32 %v3138_v3, %v7634_v2 }
 0x559   :  { %3475 = vmatmul.bf16.gmra.mxu3 %v3295_v51  ;;  %v3253_v51 = vadd.f32 %v3189_v4, %v3109_v5  ;;  %v3254_v19 = vadd.f32 %v3190_v40, %v3110_v45  ;;  %v3113_v5 = vadd.f32 %v3049_v10, %v2969_v54  ;;  %v3114_v45 = vadd.f32 %v3050_v43, %v2970_v50  ;;  %v7649_v50 = vld [vmem:[#allocation142_spill] sm:$0xff]  ;;  %v7650_v10 = vld [vmem:[#allocation140_spill] sm:$0xff] }
 0x55a   :  { %v3194_v4 = vmul.f32 %v3138_v3, %v6220_v41 }
 0x55b   :  { %v3297_v34 = vpack.c.bf16 %v3254_v19, %v3253_v51  ;;  %v3257_v2 = vadd.f32 %v3193_v49, %v3113_v5 }
 0x55c   :  { %v3436_v44 = vpop.f32.mrf.mxu3  ;;  %v3258_v40 = vadd.f32 %v3194_v4, %v3114_v45  ;;  %v7651_v4 = vld [vmem:[#allocation157_spill] sm:$0xff] }
 0x55d   :  { %v3437_v58 = vadd.f32 %v6801_v57, %v3436_v44  ;;  %v7636_v44 = vld [vmem:[#allocation132_spill] sm:$0xff] }
 0x55f   :  { %3566 = vst [vmem:[#allocation13 + $0xa0] sm:$0xff] %v3437_v58  ;;  %v3047_v58 = vmul.f32 %v2994_v1, %v7636_v44 }
 0x561   :  { %v3111_v60 = vadd.f32 %v3047_v58, %v2967_v8  ;;  %v3051_v8 = vmul.f32 %v2994_v1, %v7644_v30 }
 0x564   :  { %v3438_v28 = vpop.f32.mrf.mxu3 }
 0x565   :  { %v3439_v15 = vadd.f32 %v6801_v57, %v3438_v28  ;;  %v3192_v28 = vmul.f32 %v3138_v3, %v7639_v26  ;;  %v7645_v26 = vld [vmem:[#allocation149_spill] sm:$0xff]  ;;  %v7647_v3 = vld [vmem:[#allocation151_spill] sm:$0xff] }
 0x567   :  { %3567 = vst [vmem:[#allocation13 + $0xa8] sm:$0xff] %v3439_v15  ;;  %v3255_v15 = vadd.f32 %v3191_v22, %v3111_v60  ;;  %v2889_v60 = vrot.slane %v6729_v13, 6  ;;  %v2907_v22 = vrot.slane %v6733_v52, 6 }
 0x569   :  { %3480 = vmatmul.bf16.gmra.mxu3 %v3296_v38  ;;  %v3256_v38 = vadd.f32 %v3192_v28, %v3112_v17  ;;  %v2915_v1 = vperm.slane %v2889_v60, 0  ;;  %v7646_v28 = vld [vmem:[#allocation152_spill] sm:$0xff]  ;;  %v3139_v46 = vperm.slane %v2907_v22, 0 }
 0x56a   :  { %v7659_v22 = vld [vmem:[#allocation164_spill] sm:$0xff] }
 0x56b   :  { %v3298_v36 = vpack.c.bf16 %v3256_v38, %v3255_v15  ;;  %v2973_v7 = vmul.f32 %v2915_v1, %v7645_v26  ;;  %v2974_v24 = vmul.f32 %v2915_v1, %v7646_v28  ;;  %v7648_v38 = vld [vmem:[#allocation155_spill] sm:$0xff]  ;;  %v3197_v48 = vmul.f32 %v3139_v46, %v7649_v50 }
 0x56c   :  { %v3441_v55 = vpop.f32.mrf.mxu3  ;;  %v3198_v43 = vmul.f32 %v3139_v46, %v7650_v10 }
 0x56d   :  { %v3442_v61 = vadd.f32 %v6801_v57, %v3441_v55 }
 0x56f   :  { %3568 = vst [vmem:[#allocation13 + $0xb0] sm:$0xff] %v3442_v61 }
 0x574   :  { %v3443_v63 = vpop.f32.mrf.mxu3 }
 0x575   :  { %v3444_v32 = vadd.f32 %v6801_v57, %v3443_v63  ;;  %v3299_v63 = vpack.c.bf16 %v3258_v40, %v3257_v2  ;;  %v2975_v2 = vmul.f32 %v2915_v1, %v7651_v4  ;;  %v7652_v40 = vld [vmem:[#allocation113_spill] sm:$0xff] }
 0x577   :  { %3569 = vst [vmem:[#allocation13 + $0xb8] sm:$0xff] %v3444_v32  ;;  %v7643_v32 = vld [vmem:[#allocation144_spill] sm:$0xff] }
 0x578   :  { %v2971_v27 = vmul.f32 %v2914_v56, %v7643_v32  ;;  %v7654_v32 = vld [vmem:[#allocation161_spill] sm:$0xff] }
 0x579   :  { %3485 = vmatmul.bf16.gmra.mxu3 %v3297_v34  ;;  %v2972_v34 = vmul.f32 %v2914_v56, %v7478_v20  ;;  %v2898_v20 = vrot.slane %v6731_v59, 6 }
 0x57a   :  { %v3115_v41 = vadd.f32 %v3051_v8, %v2971_v27 }
 0x57b   :  { %v3116_v58 = vadd.f32 %v3052_v11, %v2972_v34  ;;  %v2995_v25 = vperm.slane %v2898_v20, 0  ;;  %v7657_v20 = vld [vmem:[#allocation163_spill] sm:$0xff] }
 0x57c   :  { %v3446_v42 = vpop.f32.mrf.mxu3 }
 0x57d   :  { %v3447_v29 = vadd.f32 %v6801_v57, %v3446_v42  ;;  %v3259_v42 = vadd.f32 %v3195_v12, %v3115_v41  ;;  %v3053_v15 = vmul.f32 %v2995_v25, %v7647_v3  ;;  %v3056_v27 = vmul.f32 %v2995_v25, %v7654_v32  ;;  %v7656_v41 = vld [vmem:[#allocation146_spill] sm:$0xff] }
 0x57e   :  { %v3057_v26 = vmul.f32 %v2995_v25, %v7659_v22 }
 0x57f   :  { %3570 = vst [vmem:[#allocation13 + $0xc0] sm:$0xff] %v3447_v29  ;;  %v3260_v29 = vadd.f32 %v3196_v21, %v3116_v58  ;;  %v3117_v54 = vadd.f32 %v3053_v15, %v2973_v7  ;;  %v3200_v58 = vmul.f32 %v3139_v46, %v7656_v41  ;;  %v7660_v7 = vld [vmem:[#allocation172_spill] sm:$0xff] }
 0x580   :  { %v3058_v28 = vmul.f32 %v2995_v25, %v7660_v7 }
 0x581   :  { %v3300_v31 = vpack.c.bf16 %v3260_v29, %v3259_v42 }
 0x584   :  { %v3448_v62 = vpop.f32.mrf.mxu3 }
 0x585   :  { %v3449_v9 = vadd.f32 %v6801_v57, %v3448_v62  ;;  %v3054_v62 = vmul.f32 %v2995_v25, %v7648_v38 }
 0x587   :  { %3571 = vst [vmem:[#allocation13 + $0xc8] sm:$0xff] %v3449_v9  ;;  %v3118_v6 = vadd.f32 %v3054_v62, %v2974_v24  ;;  %v7661_v62 = vld [vmem:[#allocation147_spill] sm:$0xff] }
 0x589   :  { %3490 = vmatmul.bf16.gmra.mxu3 %v3298_v36 }
 0x58c   :  { %v3451_v55 = vpop.f32.mrf.mxu3 }
 0x58d   :  { %v3452_v61 = vadd.f32 %v6801_v57, %v3451_v55  ;;  %v3261_v55 = vadd.f32 %v3197_v48, %v3117_v54 }
 0x58f   :  { %3572 = vst [vmem:[#allocation13 + $0xd0] sm:$0xff] %v3452_v61  ;;  %v3262_v61 = vadd.f32 %v3198_v43, %v3118_v6 }
 0x591   :  { %v3301_v49 = vpack.c.bf16 %v3262_v61, %v3261_v55  ;;  %v7663_v55 = vld [vmem:[#allocation134_spill] sm:$0xff] }
 0x592   :  { %v2979_v61 = vmul.f32 %v2915_v1, %v7663_v55  ;;  %v7677_v55 = vld [vmem:[#allocation185_spill] sm:$0xff] }
 0x594   :  { %v3453_v51 = vpop.f32.mrf.mxu3 }
 0x595   :  { %v3454_v19 = vadd.f32 %v6801_v57, %v3453_v51  ;;  %v2976_v51 = vmul.f32 %v2915_v1, %v7652_v40 }
 0x597   :  { %3573 = vst [vmem:[#allocation13 + $0xd8] sm:$0xff] %v3454_v19  ;;  %v7653_v19 = vld [vmem:[#allocation160_spill] sm:$0xff]  ;;  %v3120_v11 = vadd.f32 %v3056_v27, %v2976_v51  ;;  %v7667_v27 = vld [vmem:[#allocation174_spill] sm:$0xff] }
 0x599   :  { %3495 = vmatmul.bf16.gmra.mxu3 %v3299_v63  ;;  %v3055_v63 = vmul.f32 %v2995_v25, %v7653_v19  ;;  %v3264_v21 = vadd.f32 %v3200_v58, %v3120_v11 }
 0x59b   :  { %v3119_v8 = vadd.f32 %v3055_v63, %v2975_v2  ;;  %v7666_v2 = vld [vmem:[#allocation176_spill] sm:$0xff] }
 0x59c   :  { %v3456_v44 = vpop.f32.mrf.mxu3  ;;  %v3060_v40 = vmul.f32 %v2995_v25, %v7666_v2  ;;  %v7678_v2 = vld [vmem:[#allocation181_spill] sm:$0xff] }
 0x59d   :  { %v3457_v0 = vadd.f32 %v6801_v57, %v3456_v44  ;;  %v7655_v44 = vld [vmem:[#allocation143_spill] sm:$0xff] }
 0x59f   :  { %3574 = vst [vmem:[#allocation13 + $0xe0] sm:$0xff] %v3457_v0  ;;  %v3199_v0 = vmul.f32 %v3139_v46, %v7655_v44 }
 0x5a1   :  { %v3263_v12 = vadd.f32 %v3199_v0, %v3119_v8  ;;  %v2890_v0 = vrot.slane %v6729_v13, 7 }
 0x5a3   :  { %v3302_v60 = vpack.c.bf16 %v3264_v21, %v3263_v12  ;;  %v2916_v12 = vperm.slane %v2890_v0, 0 }
 0x5a4   :  { %v3458_v56 = vpop.f32.mrf.mxu3 }
 0x5a5   :  { %v3459_v17 = vadd.f32 %v6801_v57, %v3458_v56  ;;  %v2977_v56 = vmul.f32 %v2915_v1, %v7657_v20  ;;  %v7670_v20 = vld [vmem:[#allocation178_spill] sm:$0xff] }
 0x5a7   :  { %3575 = vst [vmem:[#allocation13 + $0xe8] sm:$0xff] %v3459_v17  ;;  %v7658_v17 = vld [vmem:[#allocation167_spill] sm:$0xff]  ;;  %v3121_v15 = vadd.f32 %v3057_v26, %v2977_v56 }
 0x5a8   :  { %v7671_v56 = vld [vmem:[#allocation179_spill] sm:$0xff] }
 0x5a9   :  { %3500 = vmatmul.bf16.gmra.mxu3 %v3300_v31  ;;  %v2978_v31 = vmul.f32 %v2915_v1, %v7658_v17 }
 0x5ab   :  { %v3122_v38 = vadd.f32 %v3058_v28, %v2978_v31  ;;  %v7672_v31 = vld [vmem:[#allocation180_spill] sm:$0xff] }
 0x5ac   :  { %v3461_v9 = vpop.f32.mrf.mxu3 }
 0x5ad   :  { %v3462_v36 = vadd.f32 %v6801_v57, %v3461_v9  ;;  %v3201_v9 = vmul.f32 %v3139_v46, %v7661_v62 }
 0x5af   :  { %3576 = vst [vmem:[#allocation13 + $0xf0] sm:$0xff] %v3462_v36  ;;  %v7662_v36 = vld [vmem:[#allocation148_spill] sm:$0xff]  ;;  %v3265_v6 = vadd.f32 %v3201_v9, %v3121_v15  ;;  %v7674_v15 = vld [vmem:[#allocation159_spill] sm:$0xff] }
 0x5b0   :  { %v3202_v54 = vmul.f32 %v3139_v46, %v7662_v36 }
 0x5b2   :  { %v3266_v50 = vadd.f32 %v3202_v54, %v3122_v38 }
 0x5b4   :  { %v3463_v5 = vpop.f32.mrf.mxu3  ;;  %v3303_v43 = vpack.c.bf16 %v3266_v50, %v3265_v6  ;;  %v2983_v6 = vmul.f32 %v2916_v12, %v6513_v33  ;;  %v7675_v50 = vld [vmem:[#allocation184_spill] sm:$0xff] }
 0x5b5   :  { %v3464_v45 = vadd.f32 %v6801_v57, %v3463_v5  ;;  %v7664_v5 = vld [vmem:[#allocation175_spill] sm:$0xff] }
 0x5b7   :  { %3577 = vst [vmem:[#allocation13 + $0xf8] sm:$0xff] %v3464_v45  ;;  %v2980_v45 = vmul.f32 %v2915_v1, %v7664_v5  ;;  %v2899_v1 = vrot.slane %v6731_v59, 7 }
 0x5b9   :  { %3505 = vmatmul.bf16.gmra.mxu3 %v3301_v49  ;;  %v7665_v49 = vld [vmem:[#allocation136_spill] sm:$0xff]  ;;  %v3124_v32 = vadd.f32 %v3060_v40, %v2980_v45  ;;  %v2996_v21 = vperm.slane %v2899_v1, 0 }
 0x5ba   :  { %v3059_v4 = vmul.f32 %v2995_v25, %v7665_v49 }
 0x5bb   :  { %v3061_v17 = vmul.f32 %v2996_v21, %v7671_v56  ;;  %v3062_v13 = vmul.f32 %v2996_v21, %v7672_v31  ;;  %v3066_v0 = vmul.f32 %v2996_v21, %v6626_v16  ;;  %v2988_v16 = vmul.f32 %v2916_v12, %v6675_v23 }
 0x5bc   :  { %v3466_v34 = vpop.f32.mrf.mxu3  ;;  %v3123_v63 = vadd.f32 %v3059_v4, %v2979_v61  ;;  %v3064_v61 = vmul.f32 %v2996_v21, %v7677_v55  ;;  %v3067_v31 = vmul.f32 %v2996_v21, %v6670_v47 }
 0x5bd   :  { %v3467_v30 = vadd.f32 %v6801_v57, %v3466_v34  ;;  %v3203_v34 = vmul.f32 %v3139_v46, %v7667_v27 }
 0x5bf   :  { %3578 = vst [vmem:[#allocation13 + $0x100] sm:$0xff] %v3467_v30  ;;  %v7668_v30 = vld [vmem:[#allocation177_spill] sm:$0xff]  ;;  %v3267_v11 = vadd.f32 %v3203_v34, %v3123_v63 }
 0x5c0   :  { %v3204_v8 = vmul.f32 %v3139_v46, %v7668_v30  ;;  %v2982_v46 = vmul.f32 %v2916_v12, %v7670_v20  ;;  %v7680_v30 = vld [vmem:[#allocation187_spill] sm:$0xff] }
 0x5c2   :  { %v3268_v44 = vadd.f32 %v3204_v8, %v3124_v32  ;;  %v3126_v28 = vadd.f32 %v3062_v13, %v2982_v46  ;;  %v2985_v8 = vmul.f32 %v2916_v12, %v7680_v30  ;;  %v3068_v13 = vmul.f32 %v2996_v21, %v6679_v14 }
 0x5c4   :  { %v3468_v42 = vpop.f32.mrf.mxu3  ;;  %v3304_v25 = vpack.c.bf16 %v3268_v44, %v3267_v11  ;;  %v2986_v11 = vmul.f32 %v2916_v12, %v6618_v53  ;;  %v3065_v44 = vmul.f32 %v2996_v21, %v6602_v37  ;;  %v2987_v37 = vmul.f32 %v2916_v12, %v6648_v35 }
 0x5c5   :  { %v3469_v29 = vadd.f32 %v6801_v57, %v3468_v42  ;;  %v2908_v42 = vrot.slane %v6733_v52, 7 }
 0x5c7   :  { %3579 = vst [vmem:[#allocation13 + $0x108] sm:$0xff] %v3469_v29  ;;  %v7669_v29 = vld [vmem:[#allocation154_spill] sm:$0xff]  ;;  %v3140_v26 = vperm.slane %v2908_v42, 0 }
 0x5c8   :  { %v7681_v42 = vld [vmem:[#allocation186_spill] sm:$0xff] }
 0x5c9   :  { %3510 = vmatmul.bf16.gmra.mxu3 %v3302_v60  ;;  %v2981_v60 = vmul.f32 %v2916_v12, %v7669_v29  ;;  %v3206_v38 = vmul.f32 %v3140_v26, %v7674_v15  ;;  %v3207_v40 = vmul.f32 %v3140_v26, %v7678_v2  ;;  %v3209_v29 = vmul.f32 %v3140_v26, %v7681_v42 }
 0x5cb   :  { %v3125_v7 = vadd.f32 %v3061_v17, %v2981_v60  ;;  %v3270_v62 = vadd.f32 %v3206_v38, %v3126_v28  ;;  %v3210_v60 = vmul.f32 %v3140_v26, %v6607_v18  ;;  %v3131_v18 = vadd.f32 %v3067_v31, %v2987_v37  ;;  %v7682_v28 = vld [vmem:[#allocation188_spill] sm:$0xff] }
 0x5cc   :  { %v3471_v24 = vpop.f32.mrf.mxu3 }
 0x5cd   :  { %v3472_v3 = vadd.f32 %v6801_v57, %v3471_v24  ;;  %v7673_v24 = vld [vmem:[#allocation156_spill] sm:$0xff] }
 0x5cf   :  { %3580 = vst [vmem:[#allocation13 + $0x110] sm:$0xff] %v3472_v3  ;;  %v3205_v3 = vmul.f32 %v3140_v26, %v7673_v24  ;;  %v3211_v24 = vmul.f32 %v3140_v26, %v7682_v28 }
 0x5d1   :  { %v3269_v52 = vadd.f32 %v3205_v3, %v3125_v7  ;;  %v3132_v7 = vadd.f32 %v3068_v13, %v2988_v16  ;;  %v3212_v3 = vmul.f32 %v3140_v26, %v6682_v39  ;;  %v3275_v15 = vadd.f32 %v3211_v24, %v3131_v18 }
 0x5d3   :  { %v3305_v54 = vpack.c.bf16 %v3270_v62, %v3269_v52  ;;  %v3276_v38 = vadd.f32 %v3212_v3, %v3132_v7 }
 0x5d4   :  { %v3473_v48 = vpop.f32.mrf.mxu3 }
 0x5d5   :  { %v3474_v10 = vadd.f32 %v6801_v57, %v3473_v48  ;;  %v2984_v48 = vmul.f32 %v2916_v12, %v7675_v50  ;;  %v3308_v23 = vpack.c.bf16 %v3276_v38, %v3275_v15 }
 0x5d7   :  { %3581 = vst [vmem:[#allocation13 + $0x118] sm:$0xff] %v3474_v10  ;;  %v7676_v10 = vld [vmem:[#allocation182_spill] sm:$0xff]  ;;  %v3128_v4 = vadd.f32 %v3064_v61, %v2984_v48 }
 0x5d9   :  { %3515 = vmatmul.bf16.gmra.mxu3 %v3303_v43  ;;  %v3063_v43 = vmul.f32 %v2996_v21, %v7676_v10 }
 0x5db   :  { %v3127_v49 = vadd.f32 %v3063_v43, %v2983_v6 }
 0x5dc   :  { %v3476_v51 = vpop.f32.mrf.mxu3 }
 0x5dd   :  { %v3477_v19 = vadd.f32 %v6801_v57, %v3476_v51  ;;  %v7679_v51 = vld [vmem:[#allocation183_spill] sm:$0xff]  ;;  %v3271_v63 = vadd.f32 %v3207_v40, %v3127_v49 }
 0x5df   :  { %3582 = vst [vmem:[#allocation13 + $0x120] sm:$0xff] %v3477_v19  ;;  %v3208_v19 = vmul.f32 %v3140_v26, %v7679_v51 }
 0x5e1   :  { %v3272_v32 = vadd.f32 %v3208_v19, %v3128_v4 }
 0x5e3   :  { %v3306_v34 = vpack.c.bf16 %v3272_v32, %v3271_v63 }
 0x5e4   :  { %v3478_v41 = vpop.f32.mrf.mxu3 }
 0x5e5   :  { %v3479_v58 = vadd.f32 %v6801_v57, %v3478_v41 }
 0x5e7   :  { %3583 = vst [vmem:[#allocation13 + $0x128] sm:$0xff] %v3479_v58  ;;  %v3129_v58 = vadd.f32 %v3065_v44, %v2985_v8 }
 0x5e9   :  { %3520 = vmatmul.bf16.gmra.mxu3 %v3304_v25  ;;  %v3130_v25 = vadd.f32 %v3066_v0, %v2986_v11  ;;  %v3273_v20 = vadd.f32 %v3209_v29, %v3129_v58 }
 0x5eb   :  { %v3274_v46 = vadd.f32 %v3210_v60, %v3130_v25 }
 0x5ec   :  { %v3481_v22 = vpop.f32.mrf.mxu3 }
 0x5ed   :  { %v3482_v59 = vadd.f32 %v6801_v57, %v3481_v22  ;;  %v3307_v53 = vpack.c.bf16 %v3274_v46, %v3273_v20 }
 0x5ef   :  { %3584 = vst [vmem:[#allocation13 + $0x130] sm:$0xff] %v3482_v59 }
 0x5f4   :  { %v3483_v9 = vpop.f32.mrf.mxu3 }
 0x5f5   :  { %v3484_v36 = vadd.f32 %v6801_v57, %v3483_v9 }
 0x5f7   :  { %3585 = vst [vmem:[#allocation13 + $0x138] sm:$0xff] %v3484_v36 }
 0x5f9   :  { %3525 = vmatmul.bf16.gmra.mxu3 %v3305_v54 }
 0x5fc   :  { %v3486_v5 = vpop.f32.mrf.mxu3 }
 0x5fd   :  { %v3487_v45 = vadd.f32 %v6801_v57, %v3486_v5 }
 0x5ff   :  { %3586 = vst [vmem:[#allocation13 + $0x140] sm:$0xff] %v3487_v45 }
 0x604   :  { %v3488_v27 = vpop.f32.mrf.mxu3 }
 0x605   :  { %v3489_v33 = vadd.f32 %v6801_v57, %v3488_v27 }
 0x607   :  { %3587 = vst [vmem:[#allocation13 + $0x148] sm:$0xff] %v3489_v33 }
 0x609   :  { %3530 = vmatmul.bf16.gmra.mxu3 %v3306_v34 }
 0x60c   :  { %v3491_v1 = vpop.f32.mrf.mxu3 }
 0x60d   :  { %v3492_v41 = vadd.f32 %v6801_v57, %v3491_v1 }
 0x60f   :  { %3588 = vst [vmem:[#allocation13 + $0x150] sm:$0xff] %v3492_v41 }
 0x614   :  { %v3493_v56 = vpop.f32.mrf.mxu3 }
 0x615   :  { %v3494_v17 = vadd.f32 %v6801_v57, %v3493_v56 }
 0x617   :  { %3589 = vst [vmem:[#allocation13 + $0x158] sm:$0xff] %v3494_v17 }
 0x619   :  { %3535 = vmatmul.bf16.gmra.mxu3 %v3307_v53 }
 0x61c   :  { %v3496_v22 = vpop.f32.mrf.mxu3 }
 0x61d   :  { %v3497_v59 = vadd.f32 %v6801_v57, %v3496_v22 }
 0x61f   :  { %3590 = vst [vmem:[#allocation13 + $0x160] sm:$0xff] %v3497_v59 }
 0x624   :  { %v3498_v52 = vpop.f32.mrf.mxu3 }
 0x625   :  { %v3499_v35 = vadd.f32 %v6801_v57, %v3498_v52 }
 0x627   :  { %3591 = vst [vmem:[#allocation13 + $0x168] sm:$0xff] %v3499_v35 }
 0x629   :  { %3540 = vmatmul.bf16.gmra.mxu3 %v3308_v23 }
 0x62c   :  { %v3501_v47 = vpop.f32.mrf.mxu3 }
 0x62d   :  { %v3502_v14 = vadd.f32 %v6801_v57, %v3501_v47 }
 0x62f   :  { %3592 = vst [vmem:[#allocation13 + $0x170] sm:$0xff] %v3502_v14 }
 0x634   :  { %v3503_v12 = vpop.f32.mrf.mxu3 }
 0x635   :  { %v3504_v21 = vadd.f32 %v6801_v57, %v3503_v12 }
 0x637   :  { %3593 = vst [vmem:[#allocation13 + $0x178] sm:$0xff] %v3504_v21 }
 0x63c   :  { %v3506_v62 = vpop.f32.mrf.mxu3 }
 0x63d   :  { %v3507_v9 = vadd.f32 %v6801_v57, %v3506_v62 }
 0x63f   :  { %3594 = vst [vmem:[#allocation13 + $0x180] sm:$0xff] %v3507_v9 }
 0x644   :  { %v3508_v39 = vpop.f32.mrf.mxu3 }
 0x645   :  { %v3509_v26 = vadd.f32 %v6801_v57, %v3508_v39 }
 0x647   :  { %3595 = vst [vmem:[#allocation13 + $0x188] sm:$0xff] %v3509_v26 }
 0x64c   :  { %v3511_v36 = vpop.f32.mrf.mxu3 }
 0x64d   :  { %v3512_v54 = vadd.f32 %v6801_v57, %v3511_v36 }
 0x64f   :  { %3596 = vst [vmem:[#allocation13 + $0x190] sm:$0xff] %v3512_v54 }
 0x654   :  { %v3513_v6 = vpop.f32.mrf.mxu3 }
 0x655   :  { %v3514_v50 = vadd.f32 %v6801_v57, %v3513_v6 }
 0x657   :  { %3597 = vst [vmem:[#allocation13 + $0x198] sm:$0xff] %v3514_v50 }
 0x65c   :  { %v3516_v48 = vpop.f32.mrf.mxu3 }
 0x65d   :  { %v3517_v10 = vadd.f32 %v6801_v57, %v3516_v48 }
 0x65f   :  { %3598 = vst [vmem:[#allocation13 + $0x1a0] sm:$0xff] %v3517_v10 }
 0x664   :  { %v3518_v43 = vpop.f32.mrf.mxu3 }
 0x665   :  { %v3519_v55 = vadd.f32 %v6801_v57, %v3518_v43 }
 0x667   :  { %3599 = vst [vmem:[#allocation13 + $0x1a8] sm:$0xff] %v3519_v55 }
 0x66c   :  { %v3521_v61 = vpop.f32.mrf.mxu3 }
 0x66d   :  { %v3522_v5 = vadd.f32 %v6801_v57, %v3521_v61 }
 0x66f   :  { %3600 = vst [vmem:[#allocation13 + $0x1b0] sm:$0xff] %v3522_v5 }
 0x674   :  { %v3523_v45 = vpop.f32.mrf.mxu3 }
 0x675   :  { %v3524_v49 = vadd.f32 %v6801_v57, %v3523_v45 }
 0x677   :  { %3601 = vst [vmem:[#allocation13 + $0x1b8] sm:$0xff] %v3524_v49 }
 0x67c   :  { %v3526_v4 = vpop.f32.mrf.mxu3 }
 0x67d   :  { %v3527_v2 = vadd.f32 %v6801_v57, %v3526_v4 }
 0x67f   :  { %3602 = vst [vmem:[#allocation13 + $0x1c0] sm:$0xff] %v3527_v2 }
 0x684   :  { %v3528_v40 = vpop.f32.mrf.mxu3 }
 0x685   :  { %v3529_v51 = vadd.f32 %v6801_v57, %v3528_v40 }
 0x687   :  { %3603 = vst [vmem:[#allocation13 + $0x1c8] sm:$0xff] %v3529_v51 }
 0x68c   :  { %v3531_v19 = vpop.f32.mrf.mxu3 }
 0x68d   :  { %v3532_v63 = vadd.f32 %v6801_v57, %v3531_v19 }
 0x68f   :  { %3604 = vst [vmem:[#allocation13 + $0x1d0] sm:$0xff] %v3532_v63 }
 0x694   :  { %v3533_v32 = vpop.f32.mrf.mxu3 }
 0x695   :  { %v3534_v27 = vadd.f32 %v6801_v57, %v3533_v32 }
 0x697   :  { %3605 = vst [vmem:[#allocation13 + $0x1d8] sm:$0xff] %v3534_v27 }
 0x69c   :  { %v3536_v33 = vpop.f32.mrf.mxu3 }
 0x69d   :  { %v3537_v34 = vadd.f32 %v6801_v57, %v3536_v33 }
 0x69f   :  { %3606 = vst [vmem:[#allocation13 + $0x1e0] sm:$0xff] %v3537_v34 }
 0x6a4   :  { %v3538_v30 = vpop.f32.mrf.mxu3 }
 0x6a5   :  { %v3539_v8 = vadd.f32 %v6801_v57, %v3538_v30 }
 0x6a7   :  { %3607 = vst [vmem:[#allocation13 + $0x1e8] sm:$0xff] %v3539_v8 }
 0x6ac   :  { %v3541_v11 = vpop.f32.mrf.mxu3 }
 0x6ad   :  { %v3542_v44 = vadd.f32 %v6801_v57, %v3541_v11 }
 0x6af   :  { %3608 = vst [vmem:[#allocation13 + $0x1f0] sm:$0xff] %v3542_v44 }
 0x6b4   :  { %v3543_v0 = vpop.f32.mrf.mxu3 }
 0x6b5   :  { %v3544_v1 = vadd.f32 %v6801_v57, %v3543_v0 }
 0x6b7   :  { %3609 = vst [vmem:[#allocation13 + $0x1f8] sm:$0xff] %v3544_v1 }
 0x6b8   :  { %3622 = dma.vmem_to_hbm [thread:$0]  %s3615_s9, 8192, %s3617_s1, [#allocation4], %s4164_s21, %s4164_s21, %s4165_s22  }
 0x6b9   :  { %4155 = dma.done.wait [#allocation4], 8192  }
 0x6ba   :  { %4156 = vsyncadd [#allocation4], 4294959104 }
 0x6bb   :  { %3627 = vsyncpa [#allocation3], 1 }
 0x6bc   :  { %3628 = vsyncpa [#allocation6], 1 }
 0x6bd   :  { %3629 = vsyncpa [#allocation9], 1 }
 0x6be   :  { %3630 = vsyncpa [#allocation12], 1 }
 0x6bf   :  { %3631 = vsyncpa [#allocation4], 1 }

</bundles_post_ra>
